<compile_context>
chip_gen: v5e
topology: v5e:2x2
jax: 0.10.0
libtpu: 0.0.40
codegen_flags: <defaults>
</compile_context>

<pallas_src>
from functools import partial
from math import pi

import jax
import jax.numpy as jnp
from jax.experimental import pallas as pl
from jax.experimental.pallas import tpu as pltpu

_LANE = 128


def _round_up(x, m):
    return ((x + m - 1) // m) * m


# ----------------------------------------------------------------------------
# Pallas kernel
# ----------------------------------------------------------------------------
def _sph_gabor_kernel(pts_ref, const_ref, o_ref, *, approx_recip):
    # Point columns, (tm, 1) each (lane-broadcast against (1, F) rows below).
    px = pts_ref[:, 0:1]
    py = pts_ref[:, 1:2]
    pz = pts_ref[:, 2:3]

    # Rotated x / z components for all F features at once: VPU MACs (K=3 is
    # far too small for the MXU to pay off without a measured VALU bottleneck).
    x = px * const_ref[0:1, :] + py * const_ref[1:2, :] + pz * const_ref[2:3, :]
    z = px * const_ref[3:4, :] + py * const_ref[4:5, :] + pz * const_ref[5:6, :]

    c1 = const_ref[6:7, :]         # 2 * omega * exp(dilate)
    neg_c2 = const_ref[7:8, :]     # -4 * sigma^2 * exp(2*dilate)  (sign folded)

    # Same association as the reference: (1e-6 + 1) + z.
    denom = 1e-06 + 1.0 + z
    if approx_recip:
        inv_denom = pl.reciprocal(denom, approx=True)   # EUP slot, ~free
    else:
        inv_denom = 1.0 / denom                          # exact escape hatch

    freq_term = jnp.cos(c1 * (x * inv_denom))
    gauss_term = jnp.exp(neg_c2 * ((1.0 - z) * inv_denom))
    o_ref[...] = (freq_term * gauss_term).astype(o_ref.dtype)


# ----------------------------------------------------------------------------
# Wrapper: per-generation VMEM budget, tiling, lane padding
# ----------------------------------------------------------------------------
def _vmem_budget_bytes():
    """(budget, vmem_limit) per TPU generation; conservative fallback = v7x."""
    vmem = None
    try:
        info = pltpu.get_tpu_info()
        vmem = getattr(info, "vmem_capacity_bytes", None)
    except Exception:
        vmem = None
    if vmem is not None and vmem >= (100 << 20):     # v5e / v6e: 128 MiB
        return 56 << 20, 64 << 20
    return 24 << 20, 32 << 20                        # v7x: 64 MiB / TensorCore


def _vmem_estimate_bytes(tm, f_pad, out_itemsize):
    out_b = tm * f_pad * out_itemsize
    pts_b = tm * _LANE * 4          # (tm, 3) minor dim pads to one 128-lane tile
    const_b = 8 * f_pad * 4
    return 2 * (out_b + pts_b + const_b)   # double-buffered in/out


def _pick_even_grid_tm(m, tm, n_tiles):
    """Try for an even count of near-equal tiles (megacore on v7x)."""
    if n_tiles % 2 == 0 or m <= 8:
        return tm
    cand = _round_up(pl.cdiv(m, n_tiles + 1), 8)
    while cand >= 8:
        g = pl.cdiv(m, cand)
        if g > n_tiles + 3:          # don't explode the grid-step count
            break
        if g % 2 == 0:
            return cand
        cand -= 8
    return tm


def spherical_gabor_pallas(points_flat, const_rows, *, tile_m=8192,
                           out_dtype=jnp.float32, approx_recip=True):
    """points_flat: (M, 3) f32; const_rows: (8, F) f32 (see build_constant_rows)."""
    M = points_flat.shape[0]
    F = const_rows.shape[1]

    # Lane-dense feature dim: pad constants to a multiple of 128 so output
    # stores are full-width vst instead of masked partial stores.
    Fp = _round_up(F, _LANE)
    if Fp != F:
        # Zero rotation / zero constants -> cos(0)*exp(0) = 1, finite; sliced off.
        const_rows = jnp.pad(const_rows, ((0, 0), (0, Fp - F)))

    budget, vmem_limit = _vmem_budget_bytes()
    out_itemsize = jnp.dtype(out_dtype).itemsize

    # Largest tile that (a) doesn't exceed the problem size and (b) fits VMEM.
    tm = _round_up(max(8, min(tile_m, _round_up(M, 8))), 8)
    while _vmem_estimate_bytes(tm, Fp, out_itemsize) > budget and tm > 8:
        tm = _round_up(max(8, tm // 2), 8)

    n_tiles = pl.cdiv(M, tm)
    tm = _pick_even_grid_tm(M, tm, n_tiles)      # even grid for v7x megacore
    n_tiles = pl.cdiv(M, tm)

    kernel = partial(_sph_gabor_kernel, approx_recip=approx_recip)

    # No M padding: Pallas clips the ragged last block (reads padded, writes
    # masked), so there is no wasted compute and no out[:M] epilogue copy.
    out = pl.pallas_call(
        kernel,
        out_shape=jax.ShapeDtypeStruct((M, Fp), out_dtype),
        grid_spec=pltpu.PrefetchScalarGridSpec(
            num_scalar_prefetch=0,
            grid=(n_tiles,),
            in_specs=[
                pl.BlockSpec((tm, 3), lambda i: (i, 0)),    # points tile
                pl.BlockSpec((8, Fp), lambda i: (0, 0)),    # fused rotation + constants
            ],
            out_specs=pl.BlockSpec((tm, Fp), lambda i: (i, 0)),
        ),
        compiler_params=pltpu.CompilerParams(
            dimension_semantics=("parallel",),              # megacore sharding on v7x
            vmem_limit_bytes=vmem_limit,
        ),
    )(points_flat, const_rows)

    return out[:, :F] if Fp != F else out


# ----------------------------------------------------------------------------
# Parameter glue: rotation rows + folded constants (tiny, stays in plain JAX).
# ----------------------------------------------------------------------------
def _build_rotations(u, v, w):
    """(F, 3, 3) rotation matrices R = Rz(gamma) Rx(beta) Rz(alpha)."""
    F = u.shape[0]
    zeros = jnp.zeros((F,), jnp.float32)
    ones = jnp.ones((F,), jnp.float32)

    alpha = 2.0 * pi * u
    beta = jnp.arccos(jnp.clip(2.0 * v - 1.0, -1.0 + 1e-06, 1.0 - 1e-06))
    gamma = 2.0 * pi * w

    ca, cb, cg = jnp.cos(alpha), jnp.cos(beta), jnp.cos(gamma)
    sa, sb, sg = jnp.sin(alpha), jnp.sin(beta), jnp.sin(gamma)

    Rz_alpha = jnp.stack([
        jnp.stack([ca, -sa, zeros], 1),
        jnp.stack([sa, ca, zeros], 1),
        jnp.stack([zeros, zeros, ones], 1),
    ], 1)
    Rx_beta = jnp.stack([
        jnp.stack([ones, zeros, zeros], 1),
        jnp.stack([zeros, cb, -sb], 1),
        jnp.stack([zeros, sb, cb], 1),
    ], 1)
    Rz_gamma = jnp.stack([
        jnp.stack([cg, -sg, zeros], 1),
        jnp.stack([sg, cg, zeros], 1),
        jnp.stack([zeros, zeros, ones], 1),
    ], 1)

    return jnp.einsum("fij,fjk->fik",
                      jnp.einsum("fij,fjk->fik", Rz_gamma, Rx_beta), Rz_alpha)


def build_constant_rows(u, v, w, dilate, omega, sigma):
    """(8, F): rows 0-2 = R[:,0,:]^T, rows 3-5 = R[:,2,:]^T, row 6 = c1, row 7 = -c2."""
    R = _build_rotations(u, v, w)
    rxT = jnp.transpose(R[:, 0, :])                    # (3, F)
    rzT = jnp.transpose(R[:, 2, :])                    # (3, F)
    d = jnp.exp(dilate.astype(jnp.float32))            # (1, F)
    c1 = 2.0 * omega * d                               # (1, F)
    neg_c2 = -4.0 * (sigma * sigma) * d * d            # (1, F)  sign folded
    return jnp.concatenate([rxT, rzT, c1, neg_c2], axis=0).astype(jnp.float32)


def spherical_gabor_forward(inp, params, *, omega, sigma, tile_m=8192,
                            out_dtype=jnp.float32, approx_recip=True):
    """inp: (..., >=3).  Returns (..., out_features)."""
    const_rows = build_constant_rows(params["u"], params["v"], params["w"],
                                     params["dilate"], omega, sigma)
    F = const_rows.shape[1]
    points = inp[..., 0:3].astype(jnp.float32)
    batch_shape = points.shape[:-1]
    points_flat = points.reshape(-1, 3)
    out_flat = spherical_gabor_pallas(points_flat, const_rows, tile_m=tile_m,
                                      out_dtype=out_dtype,
                                      approx_recip=approx_recip)
    return out_flat.reshape(*batch_shape, F)


def spherical_gabor_reference(inp, params, *, omega, sigma):
    """Pure-JAX reference matching the PyTorch forward exactly (exact divide)."""
    R = _build_rotations(params["u"], params["v"], params["w"])
    points = inp[..., 0:3].astype(jnp.float32)
    rot = jnp.einsum("fij,...j->...fi", R, points)     # (..., F, 3)
    x, z = rot[..., 0], rot[..., 2]
    d = jnp.exp(params["dilate"])                      # (1, F) broadcasts over (..., F)
    freq_arg = 2.0 * d * x / (1e-06 + 1.0 + z)
    gauss_arg = 4.0 * d * d * (1.0 - z) / (1e-06 + 1.0 + z)
    return jnp.cos(omega * freq_arg) * jnp.exp(-sigma * sigma * gauss_arg)


if __name__ == "__main__":
    key = jax.random.PRNGKey(0)
    k_in, k_d, k_u, k_v, k_w, k_in2, k_d2, k_u2, k_v2, k_w2 = jax.random.split(key, 10)

    omega, sigma = 30.0, 10.0

    # --- main case: F = 128 (lane-dense), M = 402 (ragged last block) -------
    B, N, F = 2, 201, 128
    params = {
        "dilate": jax.random.normal(k_d, (1, F), jnp.float32),
        "u": jax.random.uniform(k_u, (F,), jnp.float32),
        "v": jax.random.uniform(k_v, (F,), jnp.float32),
        "w": jax.random.uniform(k_w, (F,), jnp.float32),
    }
    inp = jax.random.normal(k_in, (B, N, 3), jnp.float32)
    inp = inp / (jnp.linalg.norm(inp, axis=-1, keepdims=True) + 1e-6)

    out = jax.block_until_ready(
        spherical_gabor_forward(inp, params, omega=omega, sigma=sigma))
    out_multi = jax.block_until_ready(
        spherical_gabor_forward(inp, params, omega=omega, sigma=sigma, tile_m=128))
    out_exact = jax.block_until_ready(
        spherical_gabor_forward(inp, params, omega=omega, sigma=sigma,
                                approx_recip=False))
    ref = spherical_gabor_reference(inp, params, omega=omega, sigma=sigma)

    assert out.shape == (B, N, F)
    assert out_multi.shape == (B, N, F)
    err = float(jnp.max(jnp.abs(out - ref)))
    err_multi = float(jnp.max(jnp.abs(out_multi - ref)))
    err_exact = float(jnp.max(jnp.abs(out_exact - ref)))
    # Output is bounded in [-1, 1]; approx reciprocal + MAC-order differences
    # stay well under this absolute tolerance; exact path is much tighter.
    assert err < 5e-3 and err_multi < 5e-3, (err, err_multi)
    assert err_exact < 2e-4, err_exact

    # --- secondary case: F = 80 (exercises lane padding / F-slice epilogue) --
    F2, N2 = 80, 33
    params2 = {
        "dilate": jax.random.normal(k_d2, (1, F2), jnp.float32),
        "u": jax.random.uniform(k_u2, (F2,), jnp.float32),
        "v": jax.random.uniform(k_v2, (F2,), jnp.float32),
        "w": jax.random.uniform(k_w2, (F2,), jnp.float32),
    }
    inp2 = jax.random.normal(k_in2, (B, N2, 3), jnp.float32)
    inp2 = inp2 / (jnp.linalg.norm(inp2, axis=-1, keepdims=True) + 1e-6)

    out2 = jax.block_until_ready(
        spherical_gabor_forward(inp2, params2, omega=omega, sigma=sigma))
    ref2 = spherical_gabor_reference(inp2, params2, omega=omega, sigma=sigma)
    assert out2.shape == (B, N2, F2)
    err2 = float(jnp.max(jnp.abs(out2 - ref2)))
    assert err2 < 5e-3, err2

    print("KERNEL_OK")
</pallas_src>

<mosaic_0001>
module attributes {stable_mosaic.version = 11 : i64} {
  func.func @_sph_gabor_kernel(%arg0: i32, %arg1: memref<208x3xf32, #tpu.memory_space<vmem>>, %arg2: memref<8x128xf32, #tpu.memory_space<vmem>>, %arg3: memref<208x128xf32, #tpu.memory_space<vmem>>) attributes {dimension_semantics = [#tpu.dimension_semantics<parallel>], iteration_bounds = array<i64: 2>, scalar_prefetch = 0 : i64, scratch_operands = 0 : i64, tpu.core_type = #tpu.core_type<tc>, window_params = [{transform_indices = @transform_0, window_bounds = array<i64: 208, 3>}, {pipeline_mode = #tpu.pipeline_mode<synchronous>, transform_indices = @transform_1, window_bounds = array<i64: 8, 128>}, {transform_indices = @transform_2, window_bounds = array<i64: 208, 128>}]} {
    %c0 = arith.constant 0 : index
    %c0_0 = arith.constant 0 : index
    %0 = vector.load %arg1[%c0, %c0_0] : memref<208x3xf32, #tpu.memory_space<vmem>>, vector<208x1xf32>
    %c0_1 = arith.constant 0 : index
    %c1 = arith.constant 1 : index
    %1 = vector.load %arg1[%c0_1, %c1] : memref<208x3xf32, #tpu.memory_space<vmem>>, vector<208x1xf32>
    %c0_2 = arith.constant 0 : index
    %c2 = arith.constant 2 : index
    %2 = vector.load %arg1[%c0_2, %c2] : memref<208x3xf32, #tpu.memory_space<vmem>>, vector<208x1xf32>
    %c0_3 = arith.constant 0 : index
    %c0_4 = arith.constant 0 : index
    %3 = vector.load %arg2[%c0_3, %c0_4] : memref<8x128xf32, #tpu.memory_space<vmem>>, vector<1x128xf32>
    %4 = vector.broadcast %0 : vector<208x1xf32> to vector<208x128xf32>
    %5 = vector.broadcast %3 : vector<1x128xf32> to vector<208x128xf32>
    %6 = arith.mulf %4, %5 : vector<208x128xf32>
    %c1_5 = arith.constant 1 : index
    %c0_6 = arith.constant 0 : index
    %7 = vector.load %arg2[%c1_5, %c0_6] : memref<8x128xf32, #tpu.memory_space<vmem>>, vector<1x128xf32>
    %8 = vector.broadcast %1 : vector<208x1xf32> to vector<208x128xf32>
    %9 = vector.broadcast %7 : vector<1x128xf32> to vector<208x128xf32>
    %10 = arith.mulf %8, %9 : vector<208x128xf32>
    %11 = arith.addf %6, %10 : vector<208x128xf32>
    %c2_7 = arith.constant 2 : index
    %c0_8 = arith.constant 0 : index
    %12 = vector.load %arg2[%c2_7, %c0_8] : memref<8x128xf32, #tpu.memory_space<vmem>>, vector<1x128xf32>
    %13 = vector.broadcast %2 : vector<208x1xf32> to vector<208x128xf32>
    %14 = vector.broadcast %12 : vector<1x128xf32> to vector<208x128xf32>
    %15 = arith.mulf %13, %14 : vector<208x128xf32>
    %16 = arith.addf %11, %15 : vector<208x128xf32>
    %c3 = arith.constant 3 : index
    %c0_9 = arith.constant 0 : index
    %17 = vector.load %arg2[%c3, %c0_9] : memref<8x128xf32, #tpu.memory_space<vmem>>, vector<1x128xf32>
    %18 = vector.broadcast %0 : vector<208x1xf32> to vector<208x128xf32>
    %19 = vector.broadcast %17 : vector<1x128xf32> to vector<208x128xf32>
    %20 = arith.mulf %18, %19 : vector<208x128xf32>
    %c4 = arith.constant 4 : index
    %c0_10 = arith.constant 0 : index
    %21 = vector.load %arg2[%c4, %c0_10] : memref<8x128xf32, #tpu.memory_space<vmem>>, vector<1x128xf32>
    %22 = vector.broadcast %1 : vector<208x1xf32> to vector<208x128xf32>
    %23 = vector.broadcast %21 : vector<1x128xf32> to vector<208x128xf32>
    %24 = arith.mulf %22, %23 : vector<208x128xf32>
    %25 = arith.addf %20, %24 : vector<208x128xf32>
    %c5 = arith.constant 5 : index
    %c0_11 = arith.constant 0 : index
    %26 = vector.load %arg2[%c5, %c0_11] : memref<8x128xf32, #tpu.memory_space<vmem>>, vector<1x128xf32>
    %27 = vector.broadcast %2 : vector<208x1xf32> to vector<208x128xf32>
    %28 = vector.broadcast %26 : vector<1x128xf32> to vector<208x128xf32>
    %29 = arith.mulf %27, %28 : vector<208x128xf32>
    %30 = arith.addf %25, %29 : vector<208x128xf32>
    %c6 = arith.constant 6 : index
    %c0_12 = arith.constant 0 : index
    %31 = vector.load %arg2[%c6, %c0_12] : memref<8x128xf32, #tpu.memory_space<vmem>>, vector<1x128xf32>
    %c7 = arith.constant 7 : index
    %c0_13 = arith.constant 0 : index
    %32 = vector.load %arg2[%c7, %c0_13] : memref<8x128xf32, #tpu.memory_space<vmem>>, vector<1x128xf32>
    %cst = arith.constant 1.00000095 : f32
    %33 = vector.broadcast %cst : f32 to vector<208x128xf32>
    %34 = arith.addf %33, %30 : vector<208x128xf32>
    %35 = tpu.reciprocal %34 {approx = true} : vector<208x128xf32> -> vector<208x128xf32>
    %36 = arith.mulf %16, %35 : vector<208x128xf32>
    %37 = vector.broadcast %31 : vector<1x128xf32> to vector<208x128xf32>
    %38 = arith.mulf %37, %36 : vector<208x128xf32>
    %39 = math.cos %38 : vector<208x128xf32>
    %cst_14 = arith.constant 1.000000e+00 : f32
    %40 = vector.broadcast %cst_14 : f32 to vector<208x128xf32>
    %41 = arith.subf %40, %30 : vector<208x128xf32>
    %42 = arith.mulf %41, %35 : vector<208x128xf32>
    %43 = vector.broadcast %32 : vector<1x128xf32> to vector<208x128xf32>
    %44 = arith.mulf %43, %42 : vector<208x128xf32>
    %45 = math.exp %44 : vector<208x128xf32>
    %46 = arith.mulf %39, %45 : vector<208x128xf32>
    %c0_15 = arith.constant 0 : index
    %c0_16 = arith.constant 0 : index
    %47 = vector.load %arg3[%c0_15, %c0_16] : memref<208x128xf32, #tpu.memory_space<vmem>>, vector<208x128xf32>
    tpu.vector_store %arg3[%c0_15, %c0_16], %46 {strides = array<i32>} : memref<208x128xf32, #tpu.memory_space<vmem>>, vector<208x128xf32>,
    return
  }
  func.func @transform_0(%arg0: i32) -> (i32, i32) {
    %c0_i32 = arith.constant 0 : i32
    %c0_i32_0 = arith.constant 0 : i32
    return %arg0, %c0_i32 : i32, i32
  }
  func.func @transform_1(%arg0: i32) -> (i32, i32) {
    %c0_i32 = arith.constant 0 : i32
    %c0_i32_0 = arith.constant 0 : i32
    %c0_i32_1 = arith.constant 0 : i32
    return %c0_i32, %c0_i32_0 : i32, i32
  }
  func.func @transform_2(%arg0: i32) -> (i32, i32) {
    %c0_i32 = arith.constant 0 : i32
    %c0_i32_0 = arith.constant 0 : i32
    return %arg0, %c0_i32 : i32, i32
  }
}

</mosaic_0001>

<bundles_post_ra>
// kernel: tpu_custom_call.1
= control target key start
LH: loop header
LB: loop body
LE: loop exit
PB: predicated region body
PF: predicated region fallthrough
CT: control target
= control target key end

     0   :  { %7 = vsyncpa [#allocation3], 0  ;;  %s9372_s0 = inlined_call_operand.vmem [shape: f32[402,3], index: 0, kind: input, shape index: {}]   ;;  %s9373_s1 = inlined_call_operand.vmem [shape: f32[8,128], index: 1, kind: input, shape index: {}]   ;;  %s9374_s2 = inlined_call_operand.hbm [shape: f32[402,128], index: 2, kind: output, shape index: {}]  }
   0x1   :  { %9 = vsyncpa [#allocation3 + $0x1], 0  ;;  %s5577_s9 = smov 0   ;;  %s5579_s10 = smov 0  }
   0x2   :  { %s5581_s11 = smov 0   ;;  %s5583_s12 = smov 0  }
   0x3 LB: > { %s5598_s13 = sadd.s32 4294967295, %s5548_s12   ;;  %s5184_s14 = sadd.s32 4294967294, %s5548_s12   ;;  %s5548_s12 = sphi %s5583_s12, %s9532_s12   ;;  %s5544_s11 = sphi %s5581_s11, %s9531_s11   ;;  %s5540_s10 = sphi %s5579_s10, %s9530_s10   ;;  %s5536_s9 = sphi %s5577_s9, %s9529_s9  }
   0x4   : > { %s5602_s15 = sadd.s32 1, %s5548_s12   ;;  %s69_s16 = sadd.s32 1, %s5544_s11 }
   0x5   : > { %s66_s17 = ssub.s32 %s5548_s12, %s5602_s15  ;;  %p79_p0 = scmp.ne.s32.totalorder %s5544_s11, %s5540_s10 }
   0x6   : > { %p67_p1 = scmp.eq.s32.totalorder %s66_s17, 0  ;;  %p80_p2 = scmp.eq.s32.totalorder %s5598_s13, 1 }
   0x7   : > { %p85_p3 = scmp.ne.s32.totalorder %s5540_s10, %s5536_s9  ;;  %p86_p4 = scmp.eq.s32.totalorder %s5184_s14, 1 }
   0x8   : > { %s5613_s18 = scalar_select %p67_p1, %s5544_s11, %s69_s16  }
   0x9   : > { %p5615_p5 = por %p80_p2, %p79_p0  ;;  %p5619_p6 = por %p86_p4, %p85_p3 }
   0xa   : > { %p5187_p7 = scmp.ge.s32.totalorder %s5548_s12, 1  ;;  %p124_p8 = scmp.lt.s32.totalorder %s5548_s12, 3 }
   0xc   : > { %p125_p9 = pnand %p5187_p7, %p124_p8 }
   0xe   : > { %128 = sbr.rel (%p125_p9) target bundleno = 1414 (0x586), region = 28 }
  0x13   : > { %s5626_s21 = smul.u32 26, %s5598_s13  ;;  %v9375_v0 = vmov 0   ;;  %v5551_v27 = vmov 1   ;;  %v5552_v40 = vmov 2   ;;  %v5828_v53 = vld [vmem:[%s9373_s1] ss:$0 sm:$0xff] }
  0x14   : > { %5327 = vset.pattern.permute.xlu2 %v9375_v0  ;;  %5326 = vset.pattern.permute.xlu1 %v9375_v0  ;;  %v5836_v55 = vld [vmem:[%s9373_s1 + $0x3] ss:$0 sm:$0xff]  ;;  %v5841_v56 = vld [vmem:[%s9373_s1 + $0x1] ss:$0 sm:$0xff]  ;;  %v5846_v57 = vld [vmem:[%s9373_s1 + $0x4] ss:$0 sm:$0xff] }
  0x15   : > { %5325 = vset.pattern.permute.xlu0 %v9375_v0  ;;  %p155_p10 = scmp.lt.s32.totalorder %s5626_s21, 50  ;;  %s147_s7 = sand.u32 1, %s5540_s10  }
  0x16   : > { %s9311_s17 = scalar_lea.sflag [#allocation3], %s147_s7 }
  0x17   : > { %s156_s22 = scalar_select %p155_p10, %s5626_s21, 50 }
  0x19   : > { %s5188_s23 = sshll.u32 %s156_s22, 3  ;;  %s5108_s22 = ssub.s32 (%p5615_p5), 51, %s5626_s21 }
  0x1a   : > { %s5636_s26 = scalar_lea.vmem %s9372_s0, %s5188_s23  ;;  %p5109_p11 = scmp.lt.s32.totalorder (%p5615_p5), %s5108_s22, 26 }
  0x1b   : > { %v5639_v1 = vld [vmem:[%s5636_s26 + $0x20] sm:$0xff]  ;;  %v5642_v2 = vld [vmem:[%s5636_s26 + $0x10] sm:$0xff]  ;;  %v5651_v4 = vld [vmem:[%s5636_s26 + $0x28] sm:$0xff] }
  0x1c   : > { %v5645_v3 = vld [vmem:[%s5636_s26] sm:$0xff]  ;;  %218 = vperm.xlu2 %5327, %v5639_v1   ;;  %208 = vperm.xlu1 %5326, %v5642_v2   ;;  %v5654_v5 = vld [vmem:[%s5636_s26 + $0x18] sm:$0xff]  ;;  %v5657_v6 = vld [vmem:[%s5636_s26 + $0x8] sm:$0xff] }
  0x1d   : > { %198 = vperm.xlu0 %5325, %v5645_v3   ;;  %v5663_v7 = vld [vmem:[%s5636_s26 + $0x40] sm:$0xff]  ;;  %v5666_v8 = vld [vmem:[%s5636_s26 + $0x38] sm:$0xff]  ;;  %v5669_v9 = vld [vmem:[%s5636_s26 + $0x30] sm:$0xff] }
  0x1e   : > { %v5675_v10 = vld [vmem:[%s5636_s26 + $0x58] sm:$0xff]  ;;  %v5678_v11 = vld [vmem:[%s5636_s26 + $0x50] sm:$0xff]  ;;  %v5681_v12 = vld [vmem:[%s5636_s26 + $0x48] sm:$0xff] }
  0x1f   : > { %v5687_v13 = vld [vmem:[%s5636_s26 + $0x70] sm:$0xff]  ;;  %v5690_v14 = vld [vmem:[%s5636_s26 + $0x68] sm:$0xff]  ;;  %v5693_v15 = vld [vmem:[%s5636_s26 + $0x60] sm:$0xff] }
  0x20   : > { %v5699_v16 = vld [vmem:[%s5636_s26 + $0x88] sm:$0xff]  ;;  %v5702_v17 = vld [vmem:[%s5636_s26 + $0x80] sm:$0xff]  ;;  %v5705_v18 = vld [vmem:[%s5636_s26 + $0x78] sm:$0xff] }
  0x21   : > { %v5711_v19 = vld [vmem:[%s5636_s26 + $0xa0] sm:$0xff]  ;;  %v5714_v20 = vld [vmem:[%s5636_s26 + $0x98] sm:$0xff]  ;;  %v5717_v21 = vld [vmem:[%s5636_s26 + $0x90] sm:$0xff] }
  0x22   : > { %v5723_v22 = vld [vmem:[%s5636_s26 + $0xb8] sm:$0xff]  ;;  %v5726_v23 = vld [vmem:[%s5636_s26 + $0xb0] sm:$0xff]  ;;  %v5729_v24 = vld [vmem:[%s5636_s26 + $0xa8] sm:$0xff] }
  0x23   : > { %v5735_v25 = vld [vmem:[%s5636_s26 + $0xc8] sm:$0xff]  ;;  %v5738_v26 = vld [vmem:[%s5636_s26 + $0xc0] sm:$0xff]  ;;  %s5275_s26 = smul.u32 208, %s147_s7 }
  0x24   : > { %223 = vperm.xlu2 %5327, %v5651_v4   ;;  %213 = vperm.xlu1 %5326, %v5654_v5  }
  0x25   : > { %203 = vperm.xlu0 %5325, %v5657_v6   ;;  %s6423_s27 = scalar_lea.vmem [#allocation2], %s5275_s26 }
  0x2c   : > { %238 = vperm.xlu2 %5327, %v5663_v7   ;;  %233 = vperm.xlu1 %5326, %v5666_v8  }
  0x2d   : > { %228 = vperm.xlu0 %5325, %v5669_v9  }
  0x34   : > { %253 = vperm.xlu2 %5327, %v5675_v10   ;;  %248 = vperm.xlu1 %5326, %v5678_v11  }
  0x35   : > { %243 = vperm.xlu0 %5325, %v5681_v12  }
  0x3c   : > { %268 = vperm.xlu2 %5327, %v5687_v13   ;;  %263 = vperm.xlu1 %5326, %v5690_v14  }
  0x3d   : > { %258 = vperm.xlu0 %5325, %v5693_v15  }
  0x44   : > { %283 = vperm.xlu2 %5327, %v5699_v16   ;;  %278 = vperm.xlu1 %5326, %v5702_v17  }
  0x45   : > { %273 = vperm.xlu0 %5325, %v5705_v18  }
  0x4c   : > { %298 = vperm.xlu2 %5327, %v5711_v19   ;;  %293 = vperm.xlu1 %5326, %v5714_v20  }
  0x4d   : > { %288 = vperm.xlu0 %5325, %v5717_v21  }
  0x54   : > { %313 = vperm.xlu2 %5327, %v5723_v22   ;;  %308 = vperm.xlu1 %5326, %v5726_v23  }
  0x55   : > { %303 = vperm.xlu0 %5325, %v5729_v24  }
  0x5c   : > { %5328 = vset.pattern.permute.xlu2 %v5551_v27  ;;  %323 = vperm.xlu1 %5326, %v5735_v25  }
  0x5d   : > { %318 = vperm.xlu0 %5325, %v5738_v26   ;;  %355 = vperm.xlu2 %5328, %v5645_v3  }
  0x64   : > { %5330 = vset.pattern.permute.xlu1 %v5551_v27 }
  0x65   : > { %5329 = vset.pattern.permute.xlu0 %v5551_v27  ;;  %363 = vperm.xlu1 %5330, %v5642_v2  }
  0x66   : > { %367 = vperm.xlu2 %5328, %v5654_v5   ;;  %359 = vperm.xlu0 %5329, %v5657_v6  }
  0x6d   : > { %371 = vperm.xlu1 %5330, %v5639_v1  }
  0x6e   : > { %375 = vperm.xlu2 %5328, %v5651_v4   ;;  %379 = vperm.xlu0 %5329, %v5669_v9  }
  0x75   : > { %383 = vperm.xlu1 %5330, %v5666_v8  }
  0x76   : > { %387 = vperm.xlu2 %5328, %v5663_v7   ;;  %391 = vperm.xlu0 %5329, %v5681_v12   ;;  %v5752_v28 = vpop.permute.xlu2 %218 }
  0x7d   : > { %395 = vperm.xlu1 %5330, %v5678_v11  }
  0x7e   : > { %399 = vperm.xlu2 %5328, %v5675_v10   ;;  %403 = vperm.xlu0 %5329, %v5693_v15   ;;  %v224_v29 = vpop.permute.xlu2 %223 }
  0x7f   : > { %v332_v60 = vmul.f32 %v5828_v53, %v224_v29  ;;  %v676_v61 = vmul.f32 %v5836_v55, %v224_v29 }
  0x85   : > { %407 = vperm.xlu1 %5330, %v5690_v14  }
  0x86   : > { %411 = vperm.xlu2 %5328, %v5687_v13   ;;  %415 = vperm.xlu0 %5329, %v5705_v18   ;;  %v5760_v30 = vpop.permute.xlu2 %238 }
  0x8d   : > { %419 = vperm.xlu1 %5330, %v5702_v17  }
  0x8e   : > { %423 = vperm.xlu2 %5328, %v5699_v16   ;;  %427 = vperm.xlu0 %5329, %v5717_v21   ;;  %v5765_v31 = vpop.permute.xlu2 %253  ;;  %v5767_v32 = vpop.permute.xlu1 %208 }
  0x8f   : > { %v5769_v33 = vpop.permute.xlu0 %198 }
  0x95   : > { %431 = vperm.xlu1 %5330, %v5714_v20  }
  0x96   : > { %435 = vperm.xlu2 %5328, %v5711_v19   ;;  %439 = vperm.xlu0 %5329, %v5729_v24   ;;  %v5774_v34 = vpop.permute.xlu2 %268  ;;  %v5776_v35 = vpop.permute.xlu1 %213 }
  0x97   : > { %v5778_v36 = vpop.permute.xlu0 %203 }
  0x9d   : > { %443 = vperm.xlu1 %5330, %v5726_v23  }
  0x9e   : > { %447 = vperm.xlu2 %5328, %v5723_v22   ;;  %451 = vperm.xlu0 %5329, %v5738_v26   ;;  %v5783_v37 = vpop.permute.xlu2 %283  ;;  %v5785_v38 = vpop.permute.xlu1 %233 }
  0x9f   : > { %v5787_v39 = vpop.permute.xlu0 %228 }
  0xa5   : > { %455 = vperm.xlu1 %5330, %v5735_v25  }
  0xa6   : > { %5331 = vset.pattern.permute.xlu2 %v5552_v40  ;;  %5332 = vset.pattern.permute.xlu0 %v5552_v40  ;;  %v5790_v41 = vpop.permute.xlu2 %298  ;;  %v5792_v42 = vpop.permute.xlu1 %248 }
  0xa7   : > { %513 = vperm.xlu2 %5331, %v5645_v3   ;;  %v5795_v43 = vpop.permute.xlu0 %243  ;;  %517 = vperm.xlu0 %5332, %v5657_v6   ;;  %v335_v6 = vmul.f32 %v5828_v53, %v5760_v30 }
  0xad   : > { %5333 = vset.pattern.permute.xlu1 %v5552_v40 }
  0xae   : > { %v5798_v44 = vpop.permute.xlu2 %313  ;;  %521 = vperm.xlu1 %5333, %v5642_v2   ;;  %v5801_v45 = vpop.permute.xlu1 %263 }
  0xaf   : > { %525 = vperm.xlu2 %5331, %v5654_v5   ;;  %v5804_v46 = vpop.permute.xlu0 %258  ;;  %537 = vperm.xlu0 %5332, %v5669_v9  }
  0xb6   : > { %529 = vperm.xlu1 %5333, %v5639_v1   ;;  %v5808_v47 = vpop.permute.xlu1 %278 }
  0xb7   : > { %533 = vperm.xlu2 %5331, %v5651_v4   ;;  %v5811_v48 = vpop.permute.xlu0 %273  ;;  %v5813_v49 = vpop.permute.xlu2 %355  ;;  %549 = vperm.xlu0 %5332, %v5681_v12   ;;  %v338_v12 = vmul.f32 %v5828_v53, %v5765_v31 }
  0xbe   : > { %541 = vperm.xlu1 %5333, %v5666_v8   ;;  %v5817_v50 = vpop.permute.xlu1 %293 }
  0xbf   : > { %545 = vperm.xlu2 %5331, %v5663_v7   ;;  %v5820_v51 = vpop.permute.xlu0 %288  ;;  %561 = vperm.xlu0 %5332, %v5693_v15   ;;  %v679_v7 = vmul.f32 %v5836_v55, %v5760_v30  ;;  %v329_v15 = vmul.f32 %v5828_v53, %v5767_v32  ;;  %v328_v30 = vmul.f32 %v5828_v53, %v5778_v36 }
  0xc0   : > { %v5823_v52 = vpop.permute.xlu2 %367 }
  0xc6   : > { %553 = vperm.xlu1 %5333, %v5678_v11   ;;  %v5831_v54 = vpop.permute.xlu1 %308 }
  0xc7   : > { %557 = vperm.xlu2 %5331, %v5675_v10   ;;  %v5849_v58 = vpop.permute.xlu0 %303  ;;  %573 = vperm.xlu0 %5332, %v5705_v18   ;;  %v673_v18 = vmul.f32 %v5836_v55, %v5767_v32 }
  0xc8   : > { %v376_v59 = vpop.permute.xlu2 %375 }
  0xc9   : > { %v464_v62 = vmul.f32 %v5841_v56, %v376_v59  ;;  %v704_v63 = vmul.f32 %v5846_v57, %v376_v59 }
  0xcb   : > { %v5856_v1 = vadd.f32 %v464_v62, %v332_v60  ;;  %v5858_v2 = vadd.f32 %v704_v63, %v676_v61  ;;  %v331_v62 = vmul.f32 %v5828_v53, %v5752_v28  ;;  %v675_v63 = vmul.f32 %v5836_v55, %v5752_v28 }
  0xce   : > { %565 = vperm.xlu1 %5333, %v5690_v14   ;;  %v5861_v3 = vpop.permute.xlu1 %323 }
  0xcf   : > { %9396 = vst [vmem:[#allocation5_spill] sm:$0xff] %v5861_v3  ;;  %569 = vperm.xlu2 %5331, %v5687_v13   ;;  %v5864_v4 = vpop.permute.xlu0 %318  ;;  %585 = vperm.xlu0 %5332, %v5717_v21   ;;  %v682_v13 = vmul.f32 %v5836_v55, %v5765_v31  ;;  %v699_v3 = vmul.f32 %v5846_v57, %v5813_v49 }
  0xd0   : > { %9397 = vst [vmem:[#allocation6_spill] sm:$0xff] %v5864_v4  ;;  %v388_v5 = vpop.permute.xlu2 %387 }
  0xd1   : > { %v467_v8 = vmul.f32 %v5841_v56, %v388_v5  ;;  %v707_v9 = vmul.f32 %v5846_v57, %v388_v5  ;;  %v341_v5 = vmul.f32 %v5828_v53, %v5774_v34 }
  0xd3   : > { %v5873_v10 = vadd.f32 %v467_v8, %v335_v6  ;;  %v5875_v11 = vadd.f32 %v707_v9, %v679_v7  ;;  %v685_v6 = vmul.f32 %v5836_v55, %v5774_v34  ;;  %v333_v8 = vmul.f32 %v5828_v53, %v5787_v39 }
  0xd6   : > { %577 = vperm.xlu1 %5333, %v5702_v17  }
  0xd7   : > { %581 = vperm.xlu2 %5331, %v5699_v16   ;;  %v364_v14 = vpop.permute.xlu1 %363  ;;  %597 = vperm.xlu0 %5332, %v5729_v24  }
  0xd8   : > { %v461_v21 = vmul.f32 %v5841_v56, %v364_v14  ;;  %v701_v17 = vmul.f32 %v5846_v57, %v364_v14  ;;  %v400_v27 = vpop.permute.xlu2 %399  ;;  %v5890_v29 = vpop.permute.xlu0 %359 }
  0xd9   : > { %v470_v16 = vmul.f32 %v5841_v56, %v400_v27  ;;  %v710_v31 = vmul.f32 %v5846_v57, %v400_v27  ;;  %v460_v40 = vmul.f32 %v5841_v56, %v5890_v29 }
  0xda   : > { %v5898_v32 = vadd.f32 %v461_v21, %v329_v15  ;;  %v5900_v24 = vadd.f32 %v701_v17, %v673_v18 }
  0xdb   : > { %v5902_v59 = vadd.f32 %v470_v16, %v338_v12  ;;  %v5904_v60 = vadd.f32 %v710_v31, %v682_v13  ;;  %v5906_v61 = vadd.f32 %v460_v40, %v328_v30  ;;  %v344_v30 = vmul.f32 %v5828_v53, %v5783_v37 }
  0xdc   : > { %v688_v16 = vmul.f32 %v5836_v55, %v5783_v37  ;;  %v334_v31 = vmul.f32 %v5828_v53, %v5785_v38  ;;  %v678_v40 = vmul.f32 %v5836_v55, %v5785_v38 }
  0xde   : > { %589 = vperm.xlu1 %5333, %v5714_v20   ;;  %v677_v20 = vmul.f32 %v5836_v55, %v5787_v39 }
  0xdf   : > { %593 = vperm.xlu2 %5331, %v5711_v19   ;;  %v372_v7 = vpop.permute.xlu1 %371  ;;  %609 = vperm.xlu0 %5332, %v5738_v26  }
  0xe0   : > { %v463_v9 = vmul.f32 %v5841_v56, %v372_v7  ;;  %v703_v28 = vmul.f32 %v5846_v57, %v372_v7  ;;  %v412_v12 = vpop.permute.xlu2 %411  ;;  %v380_v13 = vpop.permute.xlu0 %379 }
  0xe1   : > { %v473_v14 = vmul.f32 %v5841_v56, %v412_v12  ;;  %v713_v34 = vmul.f32 %v5846_v57, %v412_v12  ;;  %v465_v19 = vmul.f32 %v5841_v56, %v380_v13  ;;  %v705_v15 = vmul.f32 %v5846_v57, %v380_v13 }
  0xe2   : > { %v5929_v18 = vadd.f32 %v463_v9, %v331_v62  ;;  %v5931_v21 = vadd.f32 %v703_v28, %v675_v63  ;;  %v336_v63 = vmul.f32 %v5828_v53, %v5795_v43 }
  0xe3   : > { %v5933_v39 = vadd.f32 %v473_v14, %v341_v5  ;;  %v5935_v26 = vadd.f32 %v713_v34, %v685_v6  ;;  %v5937_v17 = vadd.f32 %v465_v19, %v333_v8  ;;  %v5939_v27 = vadd.f32 %v705_v15, %v677_v20 }
  0xe4   : > { %9398 = vst [vmem:[#allocation7_spill] sm:$0xff] %v5929_v18  ;;  %v347_v34 = vmul.f32 %v5828_v53, %v5790_v41  ;;  %v691_v19 = vmul.f32 %v5836_v55, %v5790_v41  ;;  %v337_v15 = vmul.f32 %v5828_v53, %v5792_v42 }
  0xe5   : > { %9399 = vst [vmem:[#allocation8_spill] sm:$0xff] %v5931_v21 }
  0xe6   : > { %9400 = vst [vmem:[#allocation9_spill] sm:$0xff] %v5933_v39  ;;  %601 = vperm.xlu1 %5333, %v5726_v23   ;;  %v680_v23 = vmul.f32 %v5836_v55, %v5795_v43 }
  0xe7   : > { %9401 = vst [vmem:[#allocation10_spill] sm:$0xff] %v5935_v26  ;;  %605 = vperm.xlu2 %5331, %v5723_v22   ;;  %v384_v62 = vpop.permute.xlu1 %383 }
  0xe8   : > { %9402 = vst [vmem:[#allocation11_spill] sm:$0xff] %v5937_v17  ;;  %v466_v5 = vmul.f32 %v5841_v56, %v384_v62  ;;  %v706_v6 = vmul.f32 %v5846_v57, %v384_v62  ;;  %v424_v37 = vpop.permute.xlu2 %423  ;;  %v392_v7 = vpop.permute.xlu0 %391 }
  0xe9   : > { %v476_v8 = vmul.f32 %v5841_v56, %v424_v37  ;;  %v716_v20 = vmul.f32 %v5846_v57, %v424_v37  ;;  %v468_v38 = vmul.f32 %v5841_v56, %v392_v7  ;;  %v708_v22 = vmul.f32 %v5846_v57, %v392_v7 }
  0xea   : > { %v5961_v9 = vadd.f32 %v466_v5, %v334_v31  ;;  %v5963_v28 = vadd.f32 %v706_v6, %v678_v40  ;;  %v339_v31 = vmul.f32 %v5828_v53, %v5804_v46 }
  0xeb   : > { %v5965_v12 = vadd.f32 %v476_v8, %v344_v30  ;;  %v5967_v43 = vadd.f32 %v716_v20, %v688_v16  ;;  %v5969_v13 = vadd.f32 %v468_v38, %v336_v63  ;;  %v5971_v14 = vadd.f32 %v708_v22, %v680_v23 }
  0xec   : > { %9403 = vst [vmem:[#allocation12_spill] sm:$0xff] %v5961_v9  ;;  %v681_v30 = vmul.f32 %v5836_v55, %v5792_v42  ;;  %v350_v22 = vmul.f32 %v5828_v53, %v5798_v44 }
  0xed   : > { %9404 = vst [vmem:[#allocation13_spill] sm:$0xff] %v5963_v28 }
  0xee   : > { %9405 = vst [vmem:[#allocation14_spill] sm:$0xff] %v5965_v12  ;;  %613 = vperm.xlu1 %5333, %v5735_v25   ;;  %v683_v25 = vmul.f32 %v5836_v55, %v5804_v46 }
  0xef   : > { %9406 = vst [vmem:[#allocation15_spill] sm:$0xff] %v5967_v43  ;;  %v396_v16 = vpop.permute.xlu1 %395 }
  0xf0   : > { %9407 = vst [vmem:[#allocation16_spill] sm:$0xff] %v5969_v13  ;;  %v469_v40 = vmul.f32 %v5841_v56, %v396_v16  ;;  %v709_v62 = vmul.f32 %v5846_v57, %v396_v16  ;;  %v436_v63 = vpop.permute.xlu2 %435  ;;  %v404_v41 = vpop.permute.xlu0 %403  ;;  %v694_v16 = vmul.f32 %v5836_v55, %v5798_v44 }
  0xf1   : > { %9408 = vst [vmem:[#allocation17_spill] sm:$0xff] %v5971_v14  ;;  %v479_v23 = vmul.f32 %v5841_v56, %v436_v63  ;;  %v719_v5 = vmul.f32 %v5846_v57, %v436_v63  ;;  %v471_v42 = vmul.f32 %v5841_v56, %v404_v41  ;;  %v711_v6 = vmul.f32 %v5846_v57, %v404_v41 }
  0xf2   : > { %v5992_v37 = vadd.f32 %v469_v40, %v337_v15  ;;  %v5994_v7 = vadd.f32 %v709_v62, %v681_v30  ;;  %v340_v15 = vmul.f32 %v5828_v53, %v5801_v45 }
  0xf3   : > { %v5996_v8 = vadd.f32 %v479_v23, %v347_v34  ;;  %v5998_v46 = vadd.f32 %v719_v5, %v691_v19  ;;  %v6000_v20 = vadd.f32 %v471_v42, %v339_v31  ;;  %v6002_v38 = vadd.f32 %v711_v6, %v683_v25 }
  0xf4   : > { %9409 = vst [vmem:[#allocation18_spill] sm:$0xff] %v5992_v37  ;;  %v684_v34 = vmul.f32 %v5836_v55, %v5801_v45  ;;  %v342_v19 = vmul.f32 %v5828_v53, %v5811_v48  ;;  %v686_v31 = vmul.f32 %v5836_v55, %v5811_v48  ;;  %v9431_v37 = vmov 683565275  }
  0xf5   : > { %9410 = vst [vmem:[#allocation19_spill] sm:$0xff] %v5994_v7 }
  0xf6   : > { %9411 = vst [vmem:[#allocation20_spill] sm:$0xff] %v5996_v8 }
  0xf7   : > { %9412 = vst [vmem:[#allocation21_spill] sm:$0xff] %v5998_v46  ;;  %v408_v30 = vpop.permute.xlu1 %407 }
  0xf8   : > { %9413 = vst [vmem:[#allocation22_spill] sm:$0xff] %v6000_v20  ;;  %v472_v25 = vmul.f32 %v5841_v56, %v408_v30  ;;  %v712_v40 = vmul.f32 %v5846_v57, %v408_v30  ;;  %v448_v62 = vpop.permute.xlu2 %447  ;;  %v416_v63 = vpop.permute.xlu0 %415 }
  0xf9   : > { %9414 = vst [vmem:[#allocation23_spill] sm:$0xff] %v6002_v38  ;;  %v482_v44 = vmul.f32 %v5841_v56, %v448_v62  ;;  %v722_v41 = vmul.f32 %v5846_v57, %v448_v62  ;;  %v474_v23 = vmul.f32 %v5841_v56, %v416_v63  ;;  %v714_v45 = vmul.f32 %v5846_v57, %v416_v63  ;;  %v6040_v62 = vld [vmem:[%s9373_s1 + $0x5] ss:$0 sm:$0xff] }
  0xfa   : > { %v6023_v5 = vadd.f32 %v472_v25, %v340_v15  ;;  %v6025_v42 = vadd.f32 %v712_v40, %v684_v34  ;;  %v671_v15 = vmul.f32 %v5836_v55, %v5769_v33  ;;  %v345_v40 = vmul.f32 %v5828_v53, %v5820_v51 }
  0xfb   : > { %v6027_v6 = vadd.f32 %v482_v44, %v350_v22  ;;  %v6029_v48 = vadd.f32 %v722_v41, %v694_v16  ;;  %v6031_v0 = vadd.f32 %v474_v23, %v342_v19  ;;  %v6033_v30 = vadd.f32 %v714_v45, %v686_v31 }
  0xfc   : > { %9415 = vst [vmem:[#allocation24_spill] sm:$0xff] %v6023_v5  ;;  %v343_v22 = vmul.f32 %v5828_v53, %v5808_v47  ;;  %v687_v16 = vmul.f32 %v5836_v55, %v5808_v47  ;;  %v689_v63 = vmul.f32 %v5836_v55, %v5820_v51  ;;  %v725_v45 = vadd.f32 %v699_v3, %v671_v15  ;;  %v6068_v51 = vld [vmem:[%s9373_s1 + $0x2] ss:$0 sm:$0xff] }
  0xfd   : > { %9416 = vst [vmem:[#allocation25_spill] sm:$0xff] %v6025_v42  ;;  %v702_v3 = vmul.f32 %v5846_v57, %v5823_v52 }
  0xfe   : > { %9417 = vst [vmem:[#allocation26_spill] sm:$0xff] %v6027_v6 }
  0xff   : > { %9418 = vst [vmem:[#allocation27_spill] sm:$0xff] %v6029_v48  ;;  %v420_v34 = vpop.permute.xlu1 %419 }
 0x100   : > { %9419 = vst [vmem:[#allocation28_spill] sm:$0xff] %v6031_v0  ;;  %v475_v19 = vmul.f32 %v5841_v56, %v420_v34  ;;  %v715_v31 = vmul.f32 %v5846_v57, %v420_v34  ;;  %v428_v25 = vpop.permute.xlu0 %427 }
 0x101   : > { %9420 = vst [vmem:[#allocation29_spill] sm:$0xff] %v6033_v30  ;;  %v477_v44 = vmul.f32 %v5841_v56, %v428_v25  ;;  %v717_v41 = vmul.f32 %v5846_v57, %v428_v25  ;;  %v514_v23 = vpop.permute.xlu2 %513  ;;  %v327_v25 = vmul.f32 %v5828_v53, %v5769_v33  ;;  %v348_v33 = vmul.f32 %v5828_v53, %v5849_v58 }
 0x102   : > { %v6056_v4 = vadd.f32 %v475_v19, %v343_v22  ;;  %v6058_v47 = vadd.f32 %v715_v31, %v687_v16  ;;  %v753_v6 = vmul.f32 %v6040_v62, %v514_v23  ;;  %v674_v22 = vmul.f32 %v5836_v55, %v5776_v35 }
 0x103   : > { %v6061_v34 = vadd.f32 %v477_v44, %v345_v40  ;;  %v6063_v5 = vadd.f32 %v717_v41, %v689_v63  ;;  %v459_v16 = vmul.f32 %v5841_v56, %v5813_v49  ;;  %v690_v19 = vmul.f32 %v5836_v55, %v5817_v50 }
 0x104   : > { %9421 = vst [vmem:[#allocation30_spill] sm:$0xff] %v6056_v4  ;;  %v779_v48 = vadd.f32 %v753_v6, %v725_v45  ;;  %v346_v6 = vmul.f32 %v5828_v53, %v5817_v50  ;;  %v692_v41 = vmul.f32 %v5836_v55, %v5849_v58  ;;  %v617_v49 = vmul.f32 %v6068_v51, %v514_v23  ;;  %v6103_v23 = vld [vmem:[%s9373_s1 + $0x6] ss:$0 sm:$0xff] }
 0x105   : > { %9422 = vst [vmem:[#allocation31_spill] sm:$0xff] %v6058_v47  ;;  %v485_v42 = vadd.f32 %v459_v16, %v327_v25  ;;  %v349_v25 = vmul.f32 %v5828_v53, %v5831_v54 }
 0x106   : > { %9423 = vst [vmem:[#allocation32_spill] sm:$0xff] %v6061_v34  ;;  %v807_v15 = vadd.f32 1.000001, %v779_v48  ;;  %v728_v34 = vadd.f32 %v702_v3, %v674_v22  ;;  %v4916_v30 = vsub.f32 1.0, %v779_v48  ;;  %v330_v48 = vmul.f32 %v5828_v53, %v5776_v35 }
 0x107   : > { %9424 = vst [vmem:[#allocation33_spill] sm:$0xff] %v6063_v5  ;;  %v432_v31 = vpop.permute.xlu1 %431 }
 0x108   : > { %5342 = vrcp.f32 %v807_v15  ;;  %v478_v40 = vmul.f32 %v5841_v56, %v432_v31  ;;  %v718_v63 = vmul.f32 %v5846_v57, %v432_v31  ;;  %v440_v44 = vpop.permute.xlu0 %439 }
 0x109   : > { %v480_v45 = vmul.f32 %v5841_v56, %v440_v44  ;;  %v720_v4 = vmul.f32 %v5846_v57, %v440_v44  ;;  %v526_v50 = vpop.permute.xlu2 %525  ;;  %v643_v44 = vadd.f32 %v617_v49, %v485_v42 }
 0x10a   : > { %v6091_v47 = vadd.f32 %v478_v40, %v346_v6  ;;  %v6093_v5 = vadd.f32 %v718_v63, %v690_v19  ;;  %v756_v15 = vmul.f32 %v6040_v62, %v526_v50  ;;  %v462_v6 = vmul.f32 %v5841_v56, %v5823_v52 }
 0x10b   : > { %v6096_v31 = vadd.f32 %v480_v45, %v348_v33  ;;  %v6098_v0 = vadd.f32 %v720_v4, %v692_v41  ;;  %v620_v40 = vmul.f32 %v6068_v51, %v526_v50 }
 0x10c   : > { %9425 = vst [vmem:[#allocation34_spill] sm:$0xff] %v6091_v47  ;;  %v782_v58 = vadd.f32 %v756_v15, %v728_v34  ;;  %v693_v34 = vmul.f32 %v5836_v55, %v5831_v54  ;;  %v488_v49 = vadd.f32 %v462_v6, %v330_v48  ;;  %v9391_v47 = vmov 1326507024  }
 0x10d   : > { %9426 = vst [vmem:[#allocation35_spill] sm:$0xff] %v6093_v5 }
 0x10e   : > { %9427 = vst [vmem:[#allocation36_spill] sm:$0xff] %v6096_v31  ;;  %v5343_v3 = vpop.eup %5342  ;;  %v810_v22 = vadd.f32 1.000001, %v782_v58  ;;  %v646_v53 = vadd.f32 %v620_v40, %v488_v49 }
 0x10f   : > { %9428 = vst [vmem:[#allocation37_spill] sm:$0xff] %v6098_v0  ;;  %v859_v16 = vmul.f32 %v5343_v3, %v643_v44  ;;  %v6109_v19 = vmul.f32 %v5343_v3, %v4916_v30  ;;  %v444_v4 = vpop.permute.xlu1 %443  ;;  %v4919_v44 = vsub.f32 1.0, %v782_v58 }
 0x110   : > { %5344 = vrcp.f32 %v810_v22  ;;  %v481_v33 = vmul.f32 %v5841_v56, %v444_v4  ;;  %v721_v42 = vmul.f32 %v5846_v57, %v444_v4 }
 0x111   : > { %v6118_v52 = vmul.f32 %v6103_v23, %v859_v16  ;;  %v534_v63 = vpop.permute.xlu2 %533 }
 0x112   : > { %v6121_v30 = vadd.f32 %v481_v33, %v349_v25  ;;  %v6123_v41 = vadd.f32 %v721_v42, %v693_v34  ;;  %v758_v54 = vmul.f32 %v6040_v62, %v534_v63  ;;  %v622_v33 = vmul.f32 %v6068_v51, %v534_v63 }
 0x113   : > { %v9379_v56 = vand.u32 2147483647, %v6118_v52  ;;  %v915_v45 = vand.u32 2139095040, %v6118_v52 }
 0x114   : > { %9429 = vst [vmem:[#allocation38_spill] sm:$0xff] %v6121_v30  ;;  %v6131_v50 = vadd.f32 %v758_v54, %v5858_v2  ;;  %v648_v49 = vadd.f32 %v622_v33, %v5856_v1 }
 0x115   : > { %9430 = vst [vmem:[#allocation39_spill] sm:$0xff] %v6123_v41  ;;  %v916_v15 = vshrl.u32 %v915_v45, 23  ;;  %v919_v35 = vand.u32 8388607, %v9379_v56  ;;  %v9387_v56 = vmov 2102212464  }
 0x116   : > { %v5345_v3 = vpop.eup %5344  ;;  %v812_v42 = vadd.f32 1.000001, %v6131_v50 }
 0x117   : > { %v5189_v22 = vadd.s32 4294967169, %v916_v15  ;;  %v920_v25 = vor.u32 8388608, %v919_v35  ;;  %v862_v16 = vmul.f32 %v5345_v3, %v646_v53  ;;  %v6133_v4 = vmul.f32 %v5345_v3, %v4919_v44 }
 0x118   : > { %5346 = vrcp.f32 %v812_v42  ;;  %v9380_v44 = vmov 683565275  }
 0x119   : > { %v922_v6 = vadd.s32 1, %v5189_v22  ;;  %v6136_v34 = vmul.f32 %v6103_v23, %v862_v16  ;;  %v6140_v48 = vshll.u32 %v920_v25, 8  ;;  %v9383_v22 = vmov 2475754826  }
 0x11b   : > { %vm923_vm0 = vcmp.gt.s32.totalorder %v922_v6, 0  ;;  %v9382_v2 = vand.u32 2147483647, %v6136_v34  ;;  %v1377_v40 = vand.u32 2139095040, %v6136_v34  ;;  %v961_v15 = vand.u32 65535, %v6140_v48 }
 0x11c   : > { %v924_v58 = vsel %vm923_vm0, %v922_v6, 0  ;;  %v962_v35 = vshrl.u32 %v6140_v48, 16  ;;  %v9385_v6 = vmov 2131351028  }
 0x11d   : > { %v926_v54 = vand.u32 31, %v924_v58  ;;  %v1378_v63 = vshrl.u32 %v1377_v40, 23  ;;  %v925_v53 = vshrl.u32 %v924_v58, 5  ;;  %v6151_v16 = vand.u32 8388607, %v9382_v2 }
 0x11e   : > { %v6161_v8 = vpop.eup %5346 }
 0x11f   : > { %v927_v45 = vsub.s32 32, %v926_v54  ;;  %v929_v3 = vshll.u32 %v9380_v44, %v926_v54  ;;  %v932_v25 = vshll.u32 %v9383_v22, %v926_v54  ;;  %v935_v42 = vshll.u32 %v9385_v6, %v926_v54 }
 0x120   : > { %v938_v40 = vshll.u32 %v9387_v56, %v926_v54  ;;  %v9389_v44 = vmov 920167782   ;;  %v5198_v0 = vadd.s32 4294967169, %v1378_v63  ;;  %vm944_vm1 = vcmp.lt.s32.totalorder %v925_v53, 1 }
 0x121   : > { %v930_v1 = vshrl.u32 %v9383_v22, %v927_v45  ;;  %v933_v33 = vshrl.u32 %v9385_v6, %v927_v45  ;;  %v936_v58 = vshrl.u32 %v9387_v56, %v927_v45  ;;  %v939_v30 = vshrl.u32 %v9389_v44, %v927_v45 }
 0x122   : > { %v941_v41 = vshll.u32 %v9389_v44, %v926_v54  ;;  %v942_v2 = vshrl.u32 %v9391_v47, %v927_v45  ;;  %vm947_vm2 = vcmp.lt.s32.totalorder %v925_v53, 4  ;;  %v928_v56 = vshrl.u32 %v9431_v37, %v927_v45 }
 0x123   : > { %v931_v31 = vor.u32 %v930_v1, %v929_v3  ;;  %v934_v22 = vor.u32 %v933_v33, %v932_v25  ;;  %v937_v5 = vor.u32 %v936_v58, %v935_v42  ;;  %v940_v6 = vor.u32 %v939_v30, %v938_v40 }
 0x124   : > { %v943_v46 = vor.u32 %v942_v2, %v941_v41  ;;  %vm946_vm3 = vcmp.lt.s32.totalorder %v925_v53, 3  ;;  %v1384_v12 = vadd.s32 1, %v5198_v0  ;;  %vm945_vm4 = vcmp.lt.s32.totalorder %v925_v53, 2 }
 0x125   : > { %v949_v7 = vsel %vm947_vm2, %v937_v5, 2102212464  ;;  %v952_v20 = vsel %vm944_vm1, %v931_v31, %v934_v22  ;;  %v956_v38 = vsel %vm944_vm1, %v934_v22, %v937_v5  ;;  %v953_v54 = vsel %vm947_vm2, %v940_v6, 920167782 }
 0x126   : > { %v957_v44 = vsel %vm947_vm2, %v943_v46, 1326507024  ;;  %v948_v3 = vsel %vm944_vm1, %v928_v56, %v931_v31  ;;  %v954_v25 = vsel %vm946_vm3, %v937_v5, %v953_v54  ;;  %v950_v63 = vsel %vm946_vm3, %v934_v22, %v949_v7 }
 0x127   : > { %v958_v1 = vsel %vm946_vm3, %v940_v6, %v957_v44  ;;  %v955_v33 = vsel %vm945_vm4, %v952_v20, %v954_v25  ;;  %vm1385_vm5 = vcmp.gt.s32.totalorder %v1384_v12, 0  ;;  %v1382_v45 = vor.u32 8388608, %v6151_v16 }
 0x128   : > { %v959_v42 = vsel %vm945_vm4, %v956_v38, %v958_v1  ;;  %v985_v2 = vand.u32 65535, %v955_v33  ;;  %v986_v58 = vshrl.u32 %v955_v33, 16  ;;  %v6166_v40 = vmul.f32 %v6161_v8, %v648_v49 }
 0x129   : > { %v963_v30 = vand.u32 65535, %v959_v42  ;;  %v964_v41 = vshrl.u32 %v959_v42, 16  ;;  %v6168_v47 = vsel %vm945_vm4, %v948_v3, %v950_v63  ;;  %v1386_v31 = vsel %vm1385_vm5, %v1384_v12, 0 }
 0x12a   : > { %v988_v7 = vmul.u32 %v986_v58, %v961_v15  ;;  %v989_v20 = vmul.u32 %v985_v2, %v962_v35  ;;  %v987_v44 = vmul.u32 %v985_v2, %v961_v15  ;;  %v990_v22 = vmul.u32 %v986_v58, %v962_v35 }
 0x12b   : > { %v966_v0 = vmul.u32 %v964_v41, %v961_v15  ;;  %v967_v46 = vmul.u32 %v963_v30, %v962_v35  ;;  %v965_v5 = vmul.u32 %v963_v30, %v961_v15  ;;  %v968_v56 = vmul.u32 %v964_v41, %v962_v35 }
 0x12c   : > { %v991_v25 = vshll.u32 %v988_v7, 16  ;;  %v992_v16 = vshrl.u32 %v988_v7, 16  ;;  %v993_v1 = vshll.u32 %v989_v20, 16  ;;  %v1388_v3 = vand.u32 31, %v1386_v31 }
 0x12d   : > { %v969_v38 = vshll.u32 %v966_v0, 16  ;;  %v970_v53 = vshrl.u32 %v966_v0, 16  ;;  %v971_v6 = vshll.u32 %v967_v46, 16  ;;  %v972_v54 = vshrl.u32 %v967_v46, 16 }
 0x12e   : > { %v9432_v63 = vmov 0   ;;  %v994_v42 = vshrl.u32 %v989_v20, 16  ;;  %vm995_vm7 = vc.u32 %v987_v44, %v991_v25  ;;  %v997_v12 = vadd.s32 %v991_v25, %v987_v44 }
 0x12f   : > { %vm973_vm6 = vc.u32 %v965_v5, %v969_v38  ;;  %v975_v49 = vadd.s32 %v969_v38, %v965_v5  ;;  %v996_v41 = vsel %vm995_vm7, 1, %v9432_v63  ;;  %v6172_v0 = vsub.s32 32, %v1388_v3 }
 0x130   : > { %v974_v33 = vsel %vm973_vm6, 1, %v9432_v63  ;;  %v998_v35 = vadd.s32 %v996_v41, %v990_v22  ;;  %vm999_vm9 = vc.u32 %v997_v12, %v993_v1  ;;  %v6175_v2 = vshrl.u32 %v1386_v31, 5 }
 0x131   : > { %v976_v30 = vadd.s32 %v974_v33, %v968_v56  ;;  %vm977_vm8 = vc.u32 %v975_v49, %v971_v6  ;;  %v1000_v46 = vsel %vm999_vm9, 1, %v9432_v63  ;;  %v6178_v5 = vadd.s32 %v997_v12, %v993_v1 }
 0x132   : > { %v978_v15 = vsel %vm977_vm8, 1, %v9432_v63  ;;  %v1391_v7 = vshll.u32 %v9431_v37, %v1388_v3  ;;  %v1002_v20 = vadd.s32 %v1000_v46, %v998_v35  ;;  %v9433_v56 = vmov 2475754826  }
 0x133   : > { %v980_v58 = vadd.s32 %v978_v15, %v976_v30  ;;  %v1392_v38 = vshrl.u32 %v9433_v56, %v6172_v0  ;;  %v1394_v44 = vshll.u32 %v9433_v56, %v1388_v3  ;;  %v9434_v6 = vmov 2131351028  }
 0x134   : > { %v1395_v25 = vshrl.u32 %v9434_v6, %v6172_v0  ;;  %v1397_v31 = vshll.u32 %v9434_v6, %v1388_v3  ;;  %v9435_v49 = vmov 2102212464   ;;  %v1003_v12 = vadd.s32 %v1002_v20, %v992_v16 }
 0x135   : > { %v981_v22 = vadd.s32 %v980_v58, %v970_v53  ;;  %v1398_v33 = vshrl.u32 %v9435_v49, %v6172_v0  ;;  %v1400_v1 = vshll.u32 %v9435_v49, %v1388_v3  ;;  %v6190_v30 = vor.u32 %v1392_v38, %v1391_v7 }
 0x136   : > { %v6192_v41 = vor.u32 %v1395_v25, %v1394_v44  ;;  %v9436_v15 = vmov 920167782   ;;  %v9437_v58 = vmov 1326507024   ;;  %v1004_v28 = vadd.s32 %v1003_v12, %v994_v42 }
 0x137   : > { %v1401_v35 = vshrl.u32 %v9436_v15, %v6172_v0  ;;  %v6196_v46 = vadd.s32 %v981_v22, %v972_v54  ;;  %v1399_v9 = vor.u32 %v1398_v33, %v1397_v31  ;;  %v1403_v53 = vshll.u32 %v9436_v15, %v1388_v3 }
 0x138   : > { %v1404_v43 = vshrl.u32 %v9437_v58, %v6172_v0  ;;  %vm1406_vm11 = vcmp.lt.s32.totalorder %v6175_v2, 1  ;;  %v6204_v7 = vshll.u32 %v1382_v45, 8  ;;  %v1005_v54 = vmul.u32 %v6140_v48, %v6168_v47 }
 0x139   : > { %v1402_v13 = vor.u32 %v1401_v35, %v1400_v1  ;;  %vm1007_vm10 = vc.u32 %v6196_v46, %v6178_v5  ;;  %v1008_v20 = vadd.s32 1, %v1004_v28  ;;  %vm1409_vm12 = vcmp.lt.s32.totalorder %v6175_v2, 4 }
 0x13a   : > { %v1405_v16 = vor.u32 %v1404_v43, %v1403_v53  ;;  %v1414_v3 = vsel %vm1406_vm11, %v6190_v30, %v6192_v41  ;;  %vm1408_vm13 = vcmp.lt.s32.totalorder %v6175_v2, 3  ;;  %v1418_v45 = vsel %vm1406_vm11, %v6192_v41, %v1399_v9 }
 0x13b   : > { %v1415_v43 = vsel %vm1409_vm12, %v1402_v13, 920167782  ;;  %v1009_v48 = vsel %vm1007_vm10, %v1008_v20, %v1004_v28  ;;  %vm1407_vm14 = vcmp.lt.s32.totalorder %v6175_v2, 2  ;;  %v1423_v31 = vand.u32 65535, %v6204_v7 }
 0x13c   : > { %v1419_v47 = vsel %vm1409_vm12, %v1405_v16, 1326507024  ;;  %v1416_v42 = vsel %vm1408_vm13, %v1399_v9, %v1415_v43  ;;  %v1010_v44 = vadd.s32 %v1009_v48, %v1005_v54  ;;  %v1424_v33 = vshrl.u32 %v6204_v7, 16 }
 0x13d   : > { %v1420_v38 = vsel %vm1408_vm13, %v1402_v13, %v1419_v47  ;;  %v1417_v25 = vsel %vm1407_vm14, %v1414_v3, %v1416_v42  ;;  %v700_v2 = vmul.f32 %v5846_v57, %v5890_v29  ;;  %vm914_vm7 = vcmp.lt.s32.totalorder %v6118_v52, 0 }
 0x13e   : > { %v1421_v22 = vsel %vm1407_vm14, %v1418_v45, %v1420_v38  ;;  %v1448_v12 = vshrl.u32 %v1417_v25, 16  ;;  %v1011_v35 = vadd.s32 536870912, %v1010_v44  ;;  %v1447_v53 = vand.u32 65535, %v1417_v25 }
 0x13f   : > { %v1425_v28 = vand.u32 65535, %v1421_v22  ;;  %v1426_v1 = vshrl.u32 %v1421_v22, 16  ;;  %v6238_v25 = vmul.f32 %v6103_v23, %v6166_v40  ;;  %v1411_v40 = vsel %vm1409_vm12, %v1399_v9, 2102212464 }
 0x140   : > { %v6232_v43 = vshrl.u32 %v1011_v35, 30  ;;  %v1450_v13 = vmul.u32 %v1448_v12, %v1423_v31  ;;  %v1449_v45 = vmul.u32 %v1447_v53, %v1423_v31  ;;  %v1451_v14 = vmul.u32 %v1447_v53, %v1424_v33 }
 0x141   : > { %v1428_v16 = vmul.u32 %v1426_v1, %v1423_v31  ;;  %v1429_v20 = vmul.u32 %v1425_v28, %v1424_v33  ;;  %v1427_v54 = vmul.u32 %v1425_v28, %v1423_v31  ;;  %v1430_v48 = vmul.u32 %v1426_v1, %v1424_v33 }
 0x142   : > { %v1013_v3 = vshll.u32 %v6232_v43, 30  ;;  %v1453_v42 = vshll.u32 %v1450_v13, 16  ;;  %v1452_v1 = vmul.u32 %v1448_v12, %v1424_v33  ;;  %v1455_v21 = vshll.u32 %v1451_v14, 16 }
 0x143   : > { %v1431_v47 = vshll.u32 %v1428_v16, 16  ;;  %v1433_v38 = vshll.u32 %v1429_v20, 16  ;;  %v1432_v35 = vshrl.u32 %v1428_v16, 16  ;;  %v1412_v9 = vsel %vm1408_vm13, %v6192_v41, %v1411_v40 }
 0x144   : > { %v1014_v22 = vsub.s32 %v1010_v44, %v1013_v3  ;;  %vm1457_vm1 = vc.u32 %v1449_v45, %v1453_v42  ;;  %v1459_v44 = vadd.s32 %v1453_v42, %v1449_v45  ;;  %v1434_v3 = vshrl.u32 %v1429_v20, 16 }
 0x145   : > { %vm1435_vm15 = vc.u32 %v1427_v54, %v1431_v47  ;;  %v1437_v39 = vadd.s32 %v1431_v47, %v1427_v54  ;;  %v1458_v53 = vsel %vm1457_vm1, 1, %v9432_v63  ;;  %v1390_v47 = vshrl.u32 %v9431_v37, %v6172_v0 }
 0x146   : > { %v1436_v26 = vsel %vm1435_vm15, 1, %v9432_v63  ;;  %vm1015_vm2 = vcmp.lt.s32.totalorder %v1014_v22, 0  ;;  %v1016_v28 = vsub.s32 0, %v1014_v22  ;;  %v1460_v16 = vadd.s32 %v1458_v53, %v1452_v1 }
 0x147   : > { %v1438_v18 = vadd.s32 %v1436_v26, %v1430_v48  ;;  %vm1439_vm0 = vc.u32 %v1437_v39, %v1433_v38  ;;  %vm1461_vm3 = vc.u32 %v1459_v44, %v1455_v21  ;;  %v1410_v12 = vsel %vm1406_vm11, %v1390_v47, %v6190_v30 }
 0x148   : > { %v1440_v31 = vsel %vm1439_vm0, 1, %v9432_v63  ;;  %v1017_v54 = vsel %vm1015_vm2, %v1016_v28, %v1014_v22  ;;  %v1462_v48 = vsel %vm1461_vm3, 1, %v9432_v63  ;;  %v1454_v45 = vshrl.u32 %v1450_v13, 16 }
 0x149   : > { %v1442_v17 = vadd.s32 %v1440_v31, %v1438_v18  ;;  %v1018_v26 = vclz %v1017_v54  ;;  %v1685_v18 = vand.u32 2139095040, %v6238_v25  ;;  %v1464_v42 = vadd.s32 %v1462_v48, %v1460_v16 }
 0x14a   : > { %v4921_v20 = vsub.f32 1.0, %v6131_v50  ;;  %v1006_v38 = vadd.s32 %v6178_v5, %v6196_v46  ;;  %v6259_v1 = vadd.s32 %v1459_v44, %v1455_v21  ;;  %v1413_v54 = vsel %vm1407_vm14, %v1410_v12, %v1412_v9  ;;  %v6269_v50 = vld [vmem:[%s9373_s1 + $0x7] ss:$0 sm:$0xff] }
 0x14b   : > { %v1443_v39 = vadd.s32 %v1442_v17, %v1432_v35  ;;  %v5190_v33 = vadd.s32 4294967294, %v1018_v26  ;;  %v1686_v17 = vshrl.u32 %v1685_v18, 23  ;;  %v1456_v35 = vshrl.u32 %v1451_v14, 16 }
 0x14c   : > { %v1465_v28 = vadd.s32 %v1464_v42, %v1454_v45  ;;  %v6262_v13 = vmul.f32 %v6161_v8, %v4921_v20  ;;  %v1036_v14 = vsub.s32 4, %v6232_v43  ;;  %v1467_v40 = vmul.u32 %v6204_v7, %v1413_v54 }
 0x14d   : > { %v6254_v0 = vadd.s32 %v1443_v39, %v1434_v3  ;;  %vm5191_vm4 = vcmp.lt.s32.totalorder %v5190_v33, 0  ;;  %v5204_v30 = vadd.s32 4294967169, %v1686_v17  ;;  %v9393_v26 = vand.u32 2147483647, %v6238_v25 }
 0x14e   : > { %v1021_v31 = vsel %vm5191_vm4, 0, %v5190_v33  ;;  %v1466_v47 = vadd.s32 %v1465_v28, %v1456_v35  ;;  %v672_v12 = vmul.f32 %v5836_v55, %v5778_v36  ;;  %v1037_v29 = vsel %vm914_vm7, %v1036_v14, %v6232_v43 }
 0x14f   : > { %v1022_v53 = vsub.s32 32, %v1021_v31  ;;  %v1026_v41 = vsub.s32 4294967266, %v1021_v31  ;;  %vm1469_vm5 = vc.u32 %v6254_v0, %v6259_v1  ;;  %v1692_v21 = vadd.s32 1, %v5204_v30 }
 0x150   : > { %v1023_v5 = vshll.u32 %v1014_v22, %v1021_v31  ;;  %v1470_v44 = vadd.s32 1, %v1466_v47  ;;  %v4969_v22 = vmul.f32 %v6269_v50, %v6109_v19  ;;  %v1689_v45 = vand.u32 8388607, %v9393_v26  ;;  %v6391_v26 = vpop.permute.xlu0 %451 }
 0x151   : > { %v1024_v8 = vshrl.u32 %v1006_v38, %v1022_v53  ;;  %v1027_v46 = vadd.s32 127, %v1026_v41  ;;  %vm1693_vm6 = vcmp.gt.s32.totalorder %v1692_v21, 0  ;;  %v6290_v9 = vadd.f32 %v700_v2, %v672_v12 }
 0x152   : > { %v1471_v3 = vsel %vm1469_vm5, %v1470_v44, %v1466_v47  ;;  %v1694_v48 = vsel %vm1693_vm6, %v1692_v21, 0  ;;  %v9438_v19 = vand.u32 2147483647, %v6118_v52  ;;  %v4995_v43 = vmul.f32 1.442695, %v4969_v22 }
 0x153   : > { %v1025_v39 = vor.u32 %v1024_v8, %v1023_v5  ;;  %v1028_v16 = vshll.u32 %v1027_v46, 23  ;;  %v1472_v18 = vadd.s32 %v1471_v3, %v1467_v40  ;;  %v1696_v33 = vand.u32 31, %v1694_v48 }
 0x154   : > { %vm6294_vm8 = vcmp.le.f32.partialorder %v9438_v19, 0.7853982  ;;  %v1690_v54 = vor.u32 8388608, %v1689_v45  ;;  %v6319_v2 = vshrl.u32 %v1694_v48, 5  ;;  %5348 = vpow2.f32 %v4995_v43 }
 0x155   : > { %v1029_v57 = vor.u32 4788187, %v1028_v16  ;;  %v1473_v7 = vadd.s32 536870912, %v1472_v18  ;;  %v6288_v42 = vsub.s32 32, %v1696_v33  ;;  %v1032_v55 = vcvt.s32.f32 %v1025_v39 }
 0x156   : > { %v1039_v20 = vsel %vm6294_vm8, 0, %v1037_v29  ;;  %v1699_v47 = vshll.u32 %v9431_v37, %v1696_v33  ;;  %v1702_v5 = vshll.u32 %v9433_v56, %v1696_v33  ;;  %v1705_v8 = vshll.u32 %v9434_v6, %v1696_v33 }
 0x157   : > { %v1030_v36 = vand.u32 2147483647, %v1029_v57  ;;  %v6300_v38 = vshrl.u32 %v1473_v7, 30  ;;  %v1700_v35 = vshrl.u32 %v9433_v56, %v6288_v42  ;;  %v1703_v31 = vshrl.u32 %v9434_v6, %v6288_v42 }
 0x158   : > { %v1706_v30 = vshrl.u32 %v9435_v49, %v6288_v42  ;;  %v1709_v53 = vshrl.u32 %v9436_v15, %v6288_v42  ;;  %v1712_v14 = vshrl.u32 %v9437_v58, %v6288_v42  ;;  %v1708_v46 = vshll.u32 %v9435_v49, %v1696_v33 }
 0x159   : > { %v1033_v28 = vmul.f32 %v1032_v55, %v1030_v36  ;;  %v1475_v41 = vshll.u32 %v6300_v38, 30  ;;  %v6321_v40 = vor.u32 %v1700_v35, %v1699_v47  ;;  %v1711_v39 = vshll.u32 %v9436_v15, %v1696_v33 }
 0x15a   : > { %v6326_v3 = vor.u32 %v1703_v31, %v1702_v5  ;;  %v6328_v22 = vor.u32 %v1706_v30, %v1705_v8  ;;  %v1710_v12 = vor.u32 %v1709_v53, %v1708_v46  ;;  %v6339_v29 = vand.u32 3, %v1039_v20 }
 0x15b   : > { %v1034_v21 = vxor.u32 2147483648, %v1033_v28  ;;  %v6317_v44 = vsub.s32 %v1472_v18, %v1475_v41  ;;  %v1713_v18 = vor.u32 %v1712_v14, %v1711_v39  ;;  %v6341_v7 = vshll.u32 %v1690_v54, 8 }
 0x15c   : > { %vm1714_vm10 = vcmp.lt.s32.totalorder %v6319_v2, 1  ;;  %vm1715_vm11 = vcmp.lt.s32.totalorder %v6319_v2, 2  ;;  %vm1717_vm12 = vcmp.lt.s32.totalorder %v6319_v2, 4  ;;  %vm1716_vm13 = vcmp.lt.s32.totalorder %v6319_v2, 3 }
 0x15d   : > { %v1035_v16 = vsel %vm914_vm7, %v1034_v21, %v1033_v28  ;;  %vm1477_vm9 = vcmp.lt.s32.totalorder %v6317_v44, 0  ;;  %v1478_v48 = vsub.s32 0, %v6317_v44  ;;  %v1722_v55 = vsel %vm1714_vm10, %v6321_v40, %v6326_v3  ;;  %v6372_v21 = vpop.eup %5348 }
 0x15e   : > { %v6333_v57 = vsel %vm6294_vm8, %v6118_v52, %v1035_v16  ;;  %v1723_v20 = vsel %vm1717_vm12, %v1710_v12, 920167782  ;;  %v1726_v43 = vsel %vm1714_vm10, %v6326_v3, %v6328_v22  ;;  %v1727_v35 = vsel %vm1717_vm12, %v1713_v18, 1326507024 }
 0x15f   : > { %v1040_v33 = vmul.f32 %v6333_v57, %v6333_v57  ;;  %v1479_v45 = vsel %vm1477_vm9, %v1478_v48, %v6317_v44  ;;  %v1724_v53 = vsel %vm1716_vm13, %v6328_v22, %v1723_v20  ;;  %v1468_v41 = vadd.s32 %v6259_v1, %v6254_v0 }
 0x160   : > { %v1480_v36 = vclz %v1479_v45  ;;  %v6367_v54 = vsel %vm1715_vm11, %v1722_v55, %v1724_v53  ;;  %v1728_v47 = vsel %vm1716_vm13, %v1710_v12, %v1727_v35  ;;  %v1731_v14 = vand.u32 65535, %v6341_v7 }
 0x161   : > { %v1041_v19 = vmul.f32 -0.001358992, %v1040_v33  ;;  %v1048_v17 = vmul.f32 -0.00019511016, %v1040_v33  ;;  %v1729_v46 = vsel %vm1715_vm11, %v1726_v43, %v1728_v47  ;;  %v1732_v0 = vshrl.u32 %v6341_v7, 16  ;;  %v6389_v47 = vpop.permute.xlu2 %545 }
 0x162   : > { %v5199_v30 = vadd.s32 4294967294, %v1480_v36  ;;  %v1733_v1 = vand.u32 65535, %v1729_v46  ;;  %v1734_v16 = vshrl.u32 %v1729_v46, 16  ;;  %v6379_v12 = vshrl.u32 %v9431_v37, %v6288_v42 }
 0x163   : > { %v1042_v28 = vadd.f32 0.041655596, %v1041_v19  ;;  %v1049_v31 = vadd.f32 0.008332121, %v1048_v17  ;;  %vm1058_vm15 = vcmp.eq.s32.totalorder %v6339_v29, 0  ;;  %vm1061_vm0 = vcmp.eq.s32.totalorder %v6339_v29, 2 }
 0x164   : > { %vm5200_vm14 = vcmp.lt.s32.totalorder %v5199_v30, 0  ;;  %v1736_v17 = vmul.u32 %v1734_v16, %v1731_v14  ;;  %v6383_v36 = vmul.u32 %v1733_v1, %v1732_v0  ;;  %v1755_v55 = vand.u32 65535, %v6367_v54 }
 0x165   : > { %v1043_v5 = vmul.f32 %v1042_v28, %v1040_v33  ;;  %v1050_v8 = vmul.f32 %v1049_v31, %v1040_v33  ;;  %v1483_v39 = vsel %vm5200_vm14, 0, %v5199_v30  ;;  %vm1057_vm1 = vcmp.lt.s32.totalorder %v6339_v29, 2 }
 0x166   : > { %v1484_v45 = vsub.s32 32, %v1483_v39  ;;  %v1488_v19 = vsub.s32 4294967266, %v1483_v39  ;;  %v1485_v35 = vshll.u32 %v6317_v44, %v1483_v39  ;;  %vm1055_vm2 = vweird.f32 %v6118_v52  ;;  %v518_v52 = vpop.permute.xlu0 %517 }
 0x167   : > { %v1044_v48 = vadd.f32 -0.4999988, %v1043_v5  ;;  %v1051_v18 = vadd.f32 -0.16666654, %v1050_v8  ;;  %v1735_v31 = vmul.u32 %v1733_v1, %v1731_v14  ;;  %v1738_v30 = vmul.u32 %v1734_v16, %v1732_v0 }
 0x168   : > { %v1486_v28 = vshrl.u32 %v1468_v41, %v1484_v45  ;;  %v1489_v42 = vadd.s32 127, %v1488_v19  ;;  %v1739_v53 = vshll.u32 %v1736_v17, 16  ;;  %v1756_v41 = vshrl.u32 %v6367_v54, 16 }
 0x169   : > { %v1045_v20 = vmul.f32 %v1044_v48, %v1040_v33  ;;  %v1052_v43 = vmul.f32 %v1051_v18, %v1040_v33  ;;  %v1741_v33 = vshll.u32 %v6383_v36, 16  ;;  %vm1376_vm4 = vcmp.lt.s32.totalorder %v6136_v34, 0 }
 0x16a   : > { %v1487_v46 = vor.u32 %v1486_v28, %v1485_v35  ;;  %v1490_v48 = vshll.u32 %v1489_v42, 23  ;;  %vm1743_vm3 = vc.u32 %v1735_v31, %v1739_v53  ;;  %v1745_v44 = vadd.s32 %v1739_v53, %v1735_v31 }
 0x16b   : > { %v1046_v5 = vadd.f32 1.0, %v1045_v20  ;;  %v1053_v8 = vadd.f32 1.0, %v1052_v43  ;;  %v1744_v16 = vsel %vm1743_vm3, 1, %v9432_v63  ;;  %v761_v18 = vmul.f32 %v6040_v62, %v6389_v47 }
 0x16c   : > { %v1491_v45 = vor.u32 4788187, %v1490_v48  ;;  %v1719_v19 = vsel %vm1717_vm12, %v6328_v22, 2102212464  ;;  %v1746_v20 = vadd.s32 %v1744_v16, %v1738_v30  ;;  %vm1747_vm5 = vc.u32 %v1745_v44, %v1741_v33 }
 0x16d   : > { %v1054_v39 = vmul.f32 %v1053_v8, %v6333_v57  ;;  %v1062_v1 = vxor.u32 2147483648, %v1046_v5  ;;  %v1494_v43 = vcvt.s32.f32 %v1487_v46  ;;  %v1748_v57 = vsel %vm1747_vm5, 1, %v9432_v63 }
 0x16e   : > { %v1758_v35 = vmul.u32 %v1756_v41, %v1731_v14  ;;  %v1492_v28 = vand.u32 2147483647, %v1491_v45  ;;  %v1750_v42 = vadd.s32 %v1748_v57, %v1746_v20  ;;  %v1757_v31 = vmul.u32 %v1755_v55, %v1731_v14 }
 0x16f   : > { %v1059_v54 = vxor.u32 2147483648, %v1054_v39  ;;  %v1759_v53 = vmul.u32 %v1755_v55, %v1732_v0  ;;  %v1063_v48 = vsel %vm1061_vm0, %v1062_v1, %v1054_v39  ;;  %v787_v30 = vadd.f32 %v761_v18, %v5875_v11 }
 0x170   : > { %v1761_v22 = vshll.u32 %v1758_v35, 16  ;;  %v1495_v46 = vmul.f32 %v1494_v43, %v1492_v28  ;;  %v1740_v44 = vshrl.u32 %v1736_v17, 16  ;;  %v1760_v16 = vmul.u32 %v1756_v41, %v1732_v0 }
 0x171   : > { %v1060_v8 = vsel %vm1058_vm15, %v1046_v5, %v1059_v54  ;;  %v1763_v14 = vshll.u32 %v1759_v53, 16  ;;  %v9441_v11 = vand.u32 2147483647, %v6136_v34  ;;  %v815_v0 = vadd.f32 1.000001, %v787_v30 }
 0x172   : > { %v1064_v33 = vsel %vm1057_vm1, %v1060_v8, %v1063_v48  ;;  %vm1765_vm6 = vc.u32 %v1757_v31, %v1761_v22  ;;  %v1767_v55 = vadd.s32 %v1761_v22, %v1757_v31  ;;  %v1496_v20 = vxor.u32 2147483648, %v1495_v46 }
 0x173   : > { %v1065_v45 = vsel %vm1055_vm2, nan, %v1064_v33  ;;  %v1751_v54 = vadd.s32 %v1750_v42, %v1740_v44  ;;  %v1766_v39 = vsel %vm1765_vm6, 1, %v9432_v63  ;;  %vm6419_vm7 = vcmp.le.f32.partialorder %v9441_v11, 0.7853982 }
 0x174   : > { %v5047_v5 = vmul.f32 %v6372_v21, %v1065_v45  ;;  %v1768_v17 = vadd.s32 %v1766_v39, %v1760_v16  ;;  %vm1769_vm8 = vc.u32 %v1767_v55, %v1763_v14  ;;  %v1497_v21 = vsel %vm1376_vm4, %v1496_v20, %v1495_v46 }
 0x175   : > { %v1718_v41 = vsel %vm1714_vm10, %v6379_v12, %v6321_v40  ;;  %v1742_v1 = vshrl.u32 %v6383_v36, 16  ;;  %v1770_v18 = vsel %vm1769_vm8, 1, %v9432_v63  ;;  %v1500_v43 = vsel %vm6419_vm7, %v6136_v34, %v1497_v21 }
 0x176   : > { %5073 = vst [vmem:[%s6423_s27] sm:$0xff] %v5047_v5  ;;  %v1720_v57 = vsel %vm1716_vm13, %v6326_v3, %v1719_v19  ;;  %v1762_v28 = vshrl.u32 %v1758_v35, 16  ;;  %v1772_v42 = vadd.s32 %v1770_v18, %v1768_v17  ;;  %v1502_v31 = vmul.f32 %v1500_v43, %v1500_v43 }
 0x177   : > { %v6440_v8 = vadd.s32 %v1751_v54, %v1742_v1  ;;  %5350 = vrcp.f32 %v815_v0  ;;  %v754_v40 = vmul.f32 %v6040_v62, %v518_v52  ;;  %v1498_v12 = vsub.s32 4, %v6300_v38 }
 0x178   : > { %v1764_v36 = vshrl.u32 %v1759_v53, 16  ;;  %v1773_v48 = vadd.s32 %v1772_v42, %v1762_v28  ;;  %v625_v22 = vmul.f32 %v6068_v51, %v6389_v47  ;;  %v1503_v33 = vmul.f32 -0.001358992, %v1502_v31 }
 0x179   : > { %v1510_v46 = vmul.f32 -0.00019511016, %v1502_v31  ;;  %v6446_v44 = vadd.s32 %v1767_v55, %v1763_v14  ;;  %v6449_v3 = vadd.f32 %v754_v40, %v6290_v9  ;;  %v4972_v19 = vmul.f32 %v6269_v50, %v6133_v4 }
 0x17a   : > { %v1721_v62 = vsel %vm1715_vm11, %v1718_v41, %v1720_v57  ;;  %v1774_v35 = vadd.s32 %v1773_v48, %v1764_v36  ;;  %v1504_v16 = vadd.f32 0.041655596, %v1503_v33  ;;  %v1499_v45 = vsel %vm1376_vm4, %v1498_v12, %v6300_v38 }
 0x17b   : > { %v1511_v53 = vadd.f32 0.008332121, %v1510_v46  ;;  %vm1777_vm9 = vc.u32 %v6440_v8, %v6446_v44  ;;  %v808_v47 = vadd.f32 1.000001, %v6449_v3  ;;  %v651_v14 = vadd.f32 %v625_v22, %v5873_v10 }
 0x17c   : > { %v1778_v9 = vadd.s32 1, %v1774_v35  ;;  %v4924_v55 = vsub.f32 1.0, %v787_v30  ;;  %v1505_v5 = vmul.f32 %v1504_v16, %v1502_v31  ;;  %v1775_v20 = vmul.u32 %v6341_v7, %v1721_v62 }
 0x17d   : > { %v5351_v4 = vpop.eup %5350  ;;  %v1512_v2 = vmul.f32 %v1511_v53, %v1502_v31  ;;  %5352 = vrcp.f32 %v808_v47  ;;  %v618_v17 = vmul.f32 %v6068_v51, %v518_v52  ;;  %v1501_v38 = vsel %vm6419_vm7, 0, %v1499_v45 }
 0x17e   : > { %v1779_v54 = vsel %vm1777_vm9, %v1778_v9, %v1774_v35  ;;  %v867_v39 = vmul.f32 %v5351_v4, %v651_v14  ;;  %v6463_v11 = vmul.f32 %v5351_v4, %v4924_v55  ;;  %v1506_v0 = vadd.f32 -0.4999988, %v1505_v5 }
 0x17f   : > { %v1513_v21 = vadd.f32 -0.16666654, %v1512_v2  ;;  %v1780_v41 = vadd.s32 %v1779_v54, %v1775_v20  ;;  %v5001_v10 = vmul.f32 1.442695, %v4972_v19  ;;  %v4974_v57 = vmul.f32 %v6269_v50, %v6262_v13 }
 0x180   : > { %v6469_v30 = vmul.f32 %v6103_v23, %v867_v39  ;;  %v1507_v1 = vmul.f32 %v1506_v0, %v1502_v31  ;;  %v644_v52 = vadd.f32 %v618_v17, %v5906_v61  ;;  %v1518_v12 = vand.u32 3, %v1501_v38 }
 0x181   : > { %v1514_v18 = vmul.f32 %v1513_v21, %v1502_v31  ;;  %v1781_v7 = vadd.s32 536870912, %v1780_v41  ;;  %vm1517_vm10 = vweird.f32 %v6136_v34  ;;  %5354 = vpow2.f32 %v5001_v10 }
 0x182   : > { %v2144_v28 = vand.u32 2147483647, %v6469_v30  ;;  %v2147_v51 = vand.u32 2139095040, %v6469_v30  ;;  %v1508_v29 = vadd.f32 1.0, %v1507_v1  ;;  %v9444_v46 = vand.u32 2147483647, %v6238_v25 }
 0x183   : > { %v6476_v42 = vpop.eup %5352  ;;  %v1515_v40 = vadd.f32 1.0, %v1514_v18  ;;  %v1782_v36 = vshrl.u32 %v1781_v7, 30  ;;  %vm1684_vm12 = vcmp.lt.s32.totalorder %v6238_v25, 0  ;;  %vm1519_vm13 = vcmp.lt.s32.totalorder %v1518_v12, 2 }
 0x184   : > { %v2148_v31 = vshrl.u32 %v2147_v51, 23  ;;  %v860_v48 = vmul.f32 %v6476_v42, %v644_v52  ;;  %v1524_v13 = vxor.u32 2147483648, %v1508_v29  ;;  %vm6482_vm11 = vcmp.le.f32.partialorder %v9444_v46, 0.7853982 }
 0x185   : > { %v1516_v22 = vmul.f32 %v1515_v40, %v1500_v43  ;;  %v1783_v50 = vshll.u32 %v1782_v36, 30  ;;  %v1806_v33 = vsub.s32 4, %v1782_v36  ;;  %v2151_v62 = vand.u32 8388607, %v2144_v28 }
 0x186   : > { %v5213_v19 = vadd.s32 4294967169, %v2148_v31  ;;  %v5005_v53 = vmul.f32 1.442695, %v4974_v57  ;;  %vm1520_vm14 = vcmp.eq.s32.totalorder %v1518_v12, 0  ;;  %vm1523_vm15 = vcmp.eq.s32.totalorder %v1518_v12, 2 }
 0x187   : > { %v1521_v35 = vxor.u32 2147483648, %v1516_v22  ;;  %v1784_v16 = vsub.s32 %v1780_v41, %v1783_v50  ;;  %v1807_v43 = vsel %vm1684_vm12, %v1806_v33, %v1782_v36  ;;  %v1525_v9 = vsel %vm1523_vm15, %v1524_v13, %v1516_v22  ;;  %v5355_v55 = vpop.eup %5354 }
 0x188   : > { %v2154_v47 = vadd.s32 1, %v5213_v19  ;;  %v2152_v5 = vor.u32 8388608, %v2151_v62  ;;  %v6492_v2 = vmul.f32 %v6103_v23, %v860_v48  ;;  %v1809_v39 = vsel %vm6482_vm11, 0, %v1807_v43 }
 0x189   : > { %v1522_v45 = vsel %vm1520_vm14, %v1508_v29, %v1521_v35  ;;  %vm1785_vm0 = vcmp.lt.s32.totalorder %v1784_v16, 0  ;;  %v1786_v14 = vsub.s32 0, %v1784_v16  ;;  %v1776_v41 = vadd.s32 %v6446_v44, %v6440_v8 }
 0x18a   : > { %v1526_v4 = vsel %vm1519_vm13, %v1522_v45, %v1525_v9  ;;  %vm2155_vm1 = vcmp.gt.s32.totalorder %v2154_v47, 0  ;;  %5356 = vpow2.f32 %v5005_v53  ;;  %v6501_v23 = vand.u32 3, %v1809_v39 }
 0x18b   : > { %v1527_v20 = vsel %vm1517_vm10, nan, %v1526_v4  ;;  %v1787_v54 = vsel %vm1785_vm0, %v1786_v14, %v1784_v16  ;;  %v2156_v21 = vsel %vm2155_vm1, %v2154_v47, 0  ;;  %v6503_v18 = vshll.u32 %v2152_v5, 8 }
 0x18c   : > { %v5050_v17 = vmul.f32 %v5355_v55, %v1527_v20  ;;  %v1788_v0 = vclz %v1787_v54  ;;  %v2157_v38 = vshrl.u32 %v2156_v21, 5  ;;  %v2158_v10 = vand.u32 31, %v2156_v21 }
 0x18d   : > { %v1066_v34 = vand.u32 2147483647, %v6492_v2  ;;  %v1069_v52 = vand.u32 2139095040, %v6492_v2  ;;  %vm1827_vm13 = vcmp.lt.s32.totalorder %v6501_v23, 2  ;;  %vm1828_vm14 = vcmp.eq.s32.totalorder %v6501_v23, 0 }
 0x18e   : > { %5076 = vst [vmem:[%s6423_s27 + $0x18] sm:$0xff] %v5050_v17  ;;  %v5205_v1 = vadd.s32 4294967294, %v1788_v0  ;;  %v2159_v7 = vsub.s32 32, %v2158_v10  ;;  %v2161_v57 = vshll.u32 %v9431_v37, %v2158_v10  ;;  %v2164_v51 = vshll.u32 %v9433_v56, %v2158_v10 }
 0x18f   : > { %v2167_v8 = vshll.u32 %v9434_v6, %v2158_v10  ;;  %v2170_v44 = vshll.u32 %v9435_v49, %v2158_v10  ;;  %v2173_v29 = vshll.u32 %v9436_v15, %v2158_v10  ;;  %vm2176_vm3 = vcmp.lt.s32.totalorder %v2157_v38, 1 }
 0x190   : > { %vm5206_vm2 = vcmp.lt.s32.totalorder %v5205_v1, 0  ;;  %v2162_v12 = vshrl.u32 %v9433_v56, %v2159_v7  ;;  %v2165_v36 = vshrl.u32 %v9434_v6, %v2159_v7  ;;  %v2160_v22 = vshrl.u32 %v9431_v37, %v2159_v7  ;;  %v6516_v50 = vpop.eup %5356 }
 0x191   : > { %v1791_v40 = vsel %vm5206_vm2, 0, %v5205_v1  ;;  %v2168_v13 = vshrl.u32 %v9435_v49, %v2159_v7  ;;  %v2171_v19 = vshrl.u32 %v9436_v15, %v2159_v7  ;;  %v2174_v62 = vshrl.u32 %v9437_v58, %v2159_v7 }
 0x192   : > { %v1792_v31 = vsub.s32 32, %v1791_v40  ;;  %v1796_v48 = vsub.s32 4294967266, %v1791_v40  ;;  %v2163_v33 = vor.u32 %v2162_v12, %v2161_v57  ;;  %v2166_v46 = vor.u32 %v2165_v36, %v2164_v51 }
 0x193   : > { %v1793_v35 = vshll.u32 %v1784_v16, %v1791_v40  ;;  %v2169_v47 = vor.u32 %v2168_v13, %v2167_v8  ;;  %v2172_v45 = vor.u32 %v2171_v19, %v2170_v44  ;;  %v2175_v9 = vor.u32 %v2174_v62, %v2173_v29 }
 0x194   : > { %v1794_v53 = vshrl.u32 %v1776_v41, %v1792_v31  ;;  %v1797_v43 = vadd.s32 127, %v1796_v48  ;;  %vm2178_vm4 = vcmp.lt.s32.totalorder %v2157_v38, 3  ;;  %vm2179_vm5 = vcmp.lt.s32.totalorder %v2157_v38, 4 }
 0x195   : > { %v2180_v4 = vsel %vm2176_vm3, %v2160_v22, %v2163_v33  ;;  %v2181_v5 = vsel %vm2179_vm5, %v2169_v47, 2102212464  ;;  %vm2177_vm6 = vcmp.lt.s32.totalorder %v2157_v38, 2  ;;  %v2184_v54 = vsel %vm2176_vm3, %v2163_v33, %v2166_v46 }
 0x196   : > { %v1795_v14 = vor.u32 %v1794_v53, %v1793_v35  ;;  %v1798_v55 = vshll.u32 %v1797_v43, 23  ;;  %v2182_v20 = vsel %vm2178_vm4, %v2166_v46, %v2181_v5  ;;  %v2185_v39 = vsel %vm2179_vm5, %v2172_v45, 920167782 }
 0x197   : > { %v2186_v0 = vsel %vm2178_vm4, %v2169_v47, %v2185_v39  ;;  %v2188_v21 = vsel %vm2176_vm3, %v2166_v46, %v2169_v47  ;;  %v6526_v41 = vsel %vm2177_vm6, %v2180_v4, %v2182_v20  ;;  %v2189_v1 = vsel %vm2179_vm5, %v2175_v9, 1326507024 }
 0x198   : > { %v1799_v17 = vor.u32 4788187, %v1798_v55  ;;  %v1802_v16 = vcvt.s32.f32 %v1795_v14  ;;  %v2187_v10 = vsel %vm2177_vm6, %v2184_v54, %v2186_v0  ;;  %v1070_v7 = vshrl.u32 %v1069_v52, 23 }
 0x199   : > { %v2190_v51 = vsel %vm2178_vm4, %v2172_v45, %v2189_v1  ;;  %v2217_v8 = vand.u32 65535, %v2187_v10  ;;  %v2218_v44 = vshrl.u32 %v2187_v10, 16  ;;  %v2193_v40 = vand.u32 65535, %v6503_v18 }
 0x19a   : > { %v1800_v57 = vand.u32 2147483647, %v1799_v17  ;;  %v2191_v29 = vsel %vm2177_vm6, %v2188_v21, %v2190_v51  ;;  %v2194_v12 = vshrl.u32 %v6503_v18, 16  ;;  %v5192_v36 = vadd.s32 4294967169, %v1070_v7 }
 0x19b   : > { %v2195_v48 = vand.u32 65535, %v2191_v29  ;;  %v2196_v22 = vshrl.u32 %v2191_v29, 16  ;;  %v6535_v13 = vand.u32 8388607, %v1066_v34  ;;  %v2220_v52 = vmul.u32 %v2218_v44, %v2193_v40 }
 0x19c   : > { %v1803_v31 = vmul.f32 %v1802_v16, %v1800_v57  ;;  %v2221_v33 = vmul.u32 %v2217_v8, %v2194_v12  ;;  %v2237_v46 = vmul.u32 %v6503_v18, %v6526_v41  ;;  %v4917_v38 = vsub.f32 1.0, %v6449_v3 }
 0x19d   : > { %v2198_v62 = vmul.u32 %v2196_v22, %v2193_v40  ;;  %v2199_v35 = vmul.u32 %v2195_v48, %v2194_v12  ;;  %v2219_v53 = vmul.u32 %v2217_v8, %v2193_v40  ;;  %v2197_v43 = vmul.u32 %v2195_v48, %v2193_v40 }
 0x19e   : > { %v1804_v19 = vxor.u32 2147483648, %v1803_v31  ;;  %v2222_v47 = vmul.u32 %v2218_v44, %v2194_v12  ;;  %v2223_v45 = vshll.u32 %v2220_v52, 16  ;;  %v1076_v9 = vadd.s32 1, %v5192_v36 }
 0x19f   : > { %v2200_v55 = vmul.u32 %v2196_v22, %v2194_v12  ;;  %v2201_v4 = vshll.u32 %v2198_v62, 16  ;;  %v2224_v5 = vshrl.u32 %v2220_v52, 16  ;;  %v2203_v54 = vshll.u32 %v2199_v35, 16 }
 0x1a0   : > { %v1805_v14 = vsel %vm1684_vm12, %v1804_v19, %v1803_v31  ;;  %v2225_v3 = vshll.u32 %v2221_v33, 16  ;;  %vm2227_vm7 = vc.u32 %v2219_v53, %v2223_v45  ;;  %v2229_v21 = vadd.s32 %v2223_v45, %v2219_v53 }
 0x1a1   : > { %v1808_v20 = vsel %vm6482_vm11, %v6238_v25, %v1805_v14  ;;  %vm2205_vm8 = vc.u32 %v2197_v43, %v2201_v4  ;;  %v2207_v17 = vadd.s32 %v2201_v4, %v2197_v43  ;;  %v2228_v16 = vsel %vm2227_vm7, 1, %v9432_v63 }
 0x1a2   : > { %v1810_v39 = vmul.f32 %v1808_v20, %v1808_v20  ;;  %v2206_v0 = vsel %vm2205_vm8, 1, %v9432_v63  ;;  %v2230_v10 = vadd.s32 %v2228_v16, %v2222_v47  ;;  %vm1077_vm9 = vcmp.gt.s32.totalorder %v1076_v9, 0 }
 0x1a3   : > { %v2208_v57 = vadd.s32 %v2206_v0, %v2200_v55  ;;  %vm2209_vm10 = vc.u32 %v2207_v17, %v2203_v54  ;;  %v2202_v51 = vshrl.u32 %v2198_v62, 16  ;;  %vm2231_vm11 = vc.u32 %v2229_v21, %v2225_v3 }
 0x1a4   : > { %v1811_v1 = vmul.f32 -0.001358992, %v1810_v39  ;;  %v1818_v7 = vmul.f32 -0.00019511016, %v1810_v39  ;;  %v2210_v61 = vsel %vm2209_vm10, 1, %v9432_v63  ;;  %v1078_v8 = vsel %vm1077_vm9, %v1076_v9, 0 }
 0x1a5   : > { %v2212_v40 = vadd.s32 %v2210_v61, %v2208_v57  ;;  %v2232_v12 = vsel %vm2231_vm11, 1, %v9432_v63  ;;  %v2204_v36 = vshrl.u32 %v2199_v35, 16  ;;  %v2226_v31 = vshrl.u32 %v2221_v33, 16 }
 0x1a6   : > { %v1812_v44 = vadd.f32 0.041655596, %v1811_v1  ;;  %v1819_v29 = vadd.f32 0.008332121, %v1818_v7  ;;  %v2234_v48 = vadd.s32 %v2232_v12, %v2230_v10  ;;  %v1080_v22 = vand.u32 31, %v1078_v8 }
 0x1a7   : > { %v2213_v53 = vadd.s32 %v2212_v40, %v2202_v51  ;;  %v6550_v43 = vmul.f32 %v6476_v42, %v4917_v38  ;;  %v6552_v62 = vadd.s32 %v2229_v21, %v2225_v3  ;;  %v6554_v45 = vshrl.u32 %v1078_v8, 5 }
 0x1a8   : > { %v1813_v52 = vmul.f32 %v1812_v44, %v1810_v39  ;;  %v1820_v19 = vmul.f32 %v1819_v29, %v1810_v39  ;;  %v2235_v47 = vadd.s32 %v2234_v48, %v2224_v5  ;;  %v6556_v9 = vsub.s32 32, %v1080_v22 }
 0x1a9   : > { %v6558_v4 = vadd.s32 %v2213_v53, %v2204_v36  ;;  %v1083_v33 = vshll.u32 %v9431_v37, %v1080_v22  ;;  %v1086_v42 = vshll.u32 %v9433_v56, %v1080_v22  ;;  %v1089_v17 = vshll.u32 %v9434_v6, %v1080_v22 }
 0x1aa   : > { %v1814_v14 = vadd.f32 -0.4999988, %v1813_v52  ;;  %v1821_v55 = vadd.f32 -0.16666654, %v1820_v19  ;;  %v2236_v35 = vadd.s32 %v2235_v47, %v2226_v31  ;;  %v1084_v54 = vshrl.u32 %v9433_v56, %v6556_v9 }
 0x1ab   : > { %v1087_v38 = vshrl.u32 %v9434_v6, %v6556_v9  ;;  %vm2239_vm12 = vc.u32 %v6558_v4, %v6552_v62  ;;  %v1090_v10 = vshrl.u32 %v9435_v49, %v6556_v9  ;;  %v1092_v57 = vshll.u32 %v9435_v49, %v1080_v22 }
 0x1ac   : > { %v1815_v5 = vmul.f32 %v1814_v14, %v1810_v39  ;;  %v1822_v3 = vmul.f32 %v1821_v55, %v1810_v39  ;;  %v2240_v16 = vadd.s32 1, %v2236_v35  ;;  %v6569_v0 = vor.u32 %v1084_v54, %v1083_v33 }
 0x1ad   : > { %v6571_v21 = vor.u32 %v1087_v38, %v1086_v42  ;;  %v1093_v39 = vshrl.u32 %v9436_v15, %v6556_v9  ;;  %v1091_v61 = vor.u32 %v1090_v10, %v1089_v17  ;;  %v1095_v8 = vshll.u32 %v9436_v15, %v1080_v22 }
 0x1ae   : > { %v1816_v1 = vadd.f32 1.0, %v1815_v5  ;;  %v1823_v7 = vadd.f32 1.0, %v1822_v3  ;;  %v2241_v51 = vsel %vm2239_vm12, %v2240_v16, %v2236_v35  ;;  %v1096_v44 = vshrl.u32 %v9437_v58, %v6556_v9  ;;  %v6621_v5 = vpop.permute.xlu1 %455 }
 0x1af   : > { %v2242_v12 = vadd.s32 %v2241_v51, %v2237_v46  ;;  %v1094_v36 = vor.u32 %v1093_v39, %v1092_v57  ;;  %vm1831_vm15 = vcmp.eq.s32.totalorder %v6501_v23, 2  ;;  %v1074_v31 = vor.u32 8388608, %v6535_v13 }
 0x1b0   : > { %v1824_v29 = vmul.f32 %v1823_v7, %v1808_v20  ;;  %v1832_v40 = vxor.u32 2147483648, %v1816_v1  ;;  %v1097_v52 = vor.u32 %v1096_v44, %v1095_v8  ;;  %vm1101_vm0 = vcmp.lt.s32.totalorder %v6554_v45, 4 }
 0x1b1   : > { %v2243_v22 = vadd.s32 536870912, %v2242_v12  ;;  %vm1098_vm1 = vcmp.lt.s32.totalorder %v6554_v45, 1  ;;  %vm1100_vm2 = vcmp.lt.s32.totalorder %v6554_v45, 3  ;;  %v1107_v18 = vsel %vm1101_vm0, %v1094_v36, 920167782 }
 0x1b2   : > { %v1829_v48 = vxor.u32 2147483648, %v1824_v29  ;;  %v1833_v20 = vsel %vm1831_vm15, %v1832_v40, %v1824_v29  ;;  %v1106_v13 = vsel %vm1098_vm1, %v6569_v0, %v6571_v21  ;;  %v1108_v19 = vsel %vm1100_vm2, %v1091_v61, %v1107_v18 }
 0x1b3   : > { %v6593_v46 = vshrl.u32 %v2243_v22, 30  ;;  %vm1825_vm3 = vweird.f32 %v6238_v25  ;;  %v1110_v47 = vsel %vm1098_vm1, %v6571_v21, %v1091_v61  ;;  %v6607_v14 = vshll.u32 %v1074_v31, 8 }
 0x1b4   : > { %v1830_v41 = vsel %vm1828_vm14, %v1816_v1, %v1829_v48  ;;  %vm1099_vm4 = vcmp.lt.s32.totalorder %v6554_v45, 2  ;;  %v1111_v35 = vsel %vm1101_vm0, %v1097_v52, 1326507024  ;;  %v1082_v8 = vshrl.u32 %v9431_v37, %v6556_v9 }
 0x1b5   : > { %v1834_v53 = vsel %vm1827_vm13, %v1830_v41, %v1833_v20  ;;  %v2245_v33 = vshll.u32 %v6593_v46, 30  ;;  %v1109_v25 = vsel %vm1099_vm4, %v1106_v13, %v1108_v19  ;;  %v1112_v23 = vsel %vm1100_vm2, %v1094_v36, %v1111_v35 }
 0x1b6   : > { %v1835_v55 = vsel %vm1825_vm3, nan, %v1834_v53  ;;  %v1113_v38 = vsel %vm1099_vm4, %v1110_v47, %v1112_v23  ;;  %v1115_v3 = vand.u32 65535, %v6607_v14  ;;  %v1116_v17 = vshrl.u32 %v6607_v14, 16 }
 0x1b7   : > { %v5052_v54 = vmul.f32 %v6516_v50, %v1835_v55  ;;  %v2246_v42 = vsub.s32 %v2242_v12, %v2245_v33  ;;  %v1117_v16 = vand.u32 65535, %v1113_v38  ;;  %v1118_v10 = vshrl.u32 %v1113_v38, 16 }
 0x1b8   : > { %v1139_v1 = vand.u32 65535, %v1109_v25  ;;  %v1140_v7 = vshrl.u32 %v1109_v25, 16  ;;  %v2238_v44 = vadd.s32 %v6552_v62, %v6558_v4  ;;  %v1103_v36 = vsel %vm1101_vm0, %v1091_v61, 2102212464  ;;  %v522_v25 = vpop.permute.xlu1 %521 }
 0x1b9   : > { %5078 = vst [vmem:[%s6423_s27 + $0x28] sm:$0xff] %v5052_v54  ;;  %vm2247_vm5 = vcmp.lt.s32.totalorder %v2246_v42, 0  ;;  %v2248_v50 = vsub.s32 0, %v2246_v42  ;;  %v1120_v57 = vmul.u32 %v1118_v10, %v1115_v3  ;;  %v1121_v39 = vmul.u32 %v1117_v16, %v1116_v17 }
 0x1ba   : > { %v1119_v40 = vmul.u32 %v1117_v16, %v1115_v3  ;;  %v1122_v31 = vmul.u32 %v1118_v10, %v1116_v17  ;;  %v1142_v48 = vmul.u32 %v1140_v7, %v1115_v3  ;;  %v1143_v22 = vmul.u32 %v1139_v1, %v1116_v17 }
 0x1bb   : > { %v2249_v51 = vsel %vm2247_vm5, %v2248_v50, %v2246_v42  ;;  %v1123_v12 = vshll.u32 %v1120_v57, 16  ;;  %v1125_v20 = vshll.u32 %v1121_v39, 16  ;;  %v1124_v41 = vshrl.u32 %v1120_v57, 16 }
 0x1bc   : > { %v2250_v29 = vclz %v2249_v51  ;;  %v1141_v9 = vmul.u32 %v1139_v1, %v1115_v3  ;;  %v1145_v19 = vshll.u32 %v1142_v48, 16  ;;  %v1147_v4 = vshll.u32 %v1143_v22, 16 }
 0x1bd   : > { %vm1127_vm6 = vc.u32 %v1119_v40, %v1123_v12  ;;  %v1129_v18 = vadd.s32 %v1123_v12, %v1119_v40  ;;  %v1144_v54 = vmul.u32 %v1140_v7, %v1116_v17  ;;  %v1102_v38 = vsel %vm1098_vm1, %v1082_v8, %v6569_v0 }
 0x1be   : > { %v5214_v52 = vadd.s32 4294967294, %v2250_v29  ;;  %v1128_v13 = vsel %vm1127_vm6, 1, %v9432_v63  ;;  %vm1149_vm9 = vc.u32 %v1141_v9, %v1145_v19  ;;  %v1151_v61 = vadd.s32 %v1145_v19, %v1141_v9 }
 0x1bf   : > { %v1130_v62 = vadd.s32 %v1128_v13, %v1122_v31  ;;  %vm1131_vm8 = vc.u32 %v1129_v18, %v1125_v20  ;;  %v1150_v3 = vsel %vm1149_vm9, 1, %v9432_v63  ;;  %v1104_v57 = vsel %vm1100_vm2, %v6571_v21, %v1103_v36  ;;  %v558_v31 = vpop.permute.xlu2 %557 }
 0x1c0   : > { %vm5215_vm7 = vcmp.lt.s32.totalorder %v5214_v52, 0  ;;  %v1132_v47 = vsel %vm1131_vm8, 1, %v9432_v63  ;;  %vm1153_vm10 = vc.u32 %v1151_v61, %v1147_v4  ;;  %v1152_v1 = vadd.s32 %v1150_v3, %v1144_v54 }
 0x1c1   : > { %v2253_v53 = vsel %vm5215_vm7, 0, %v5214_v52  ;;  %v1134_v35 = vadd.s32 %v1132_v47, %v1130_v62  ;;  %v1126_v51 = vshrl.u32 %v1121_v39, 16  ;;  %v1154_v17 = vsel %vm1153_vm10, 1, %v9432_v63 }
 0x1c2   : > { %v2254_v55 = vsub.s32 32, %v2253_v53  ;;  %v2258_v33 = vsub.s32 4294967266, %v2253_v53  ;;  %v2255_v23 = vshll.u32 %v2246_v42, %v2253_v53  ;;  %v6644_v42 = vld [vmem:[%s9373_s1 + $0x5] ss:$0 sm:$0xff]  ;;  %v1156_v29 = vadd.s32 %v1154_v17, %v1152_v1 }
 0x1c3   : > { %v1135_v50 = vadd.s32 %v1134_v35, %v1124_v41  ;;  %v755_v0 = vmul.f32 %v6644_v42, %v522_v25  ;;  %v1148_v39 = vshrl.u32 %v1143_v22, 16  ;;  %v1105_v52 = vsel %vm1099_vm4, %v1102_v38, %v1104_v57  ;;  %v6660_v22 = vld [vmem:[%s9373_s1 + $0x2] ss:$0 sm:$0xff] }
 0x1c4   : > { %v2256_v16 = vshrl.u32 %v2238_v44, %v2254_v55  ;;  %v2259_v10 = vadd.s32 127, %v2258_v33  ;;  %v1146_v44 = vshrl.u32 %v1142_v48, 16  ;;  %v6652_v20 = vadd.s32 %v1151_v61, %v1147_v4 }
 0x1c5   : > { %v6647_v40 = vadd.s32 %v1135_v50, %v1126_v51  ;;  %v781_v12 = vadd.f32 %v755_v0, %v5900_v24  ;;  %v764_v48 = vmul.f32 %v6644_v42, %v558_v31  ;;  %v619_v45 = vmul.f32 %v6660_v22, %v522_v25  ;;  %v6694_v51 = vld [vmem:[%s9373_s1 + $0x6] ss:$0 sm:$0xff] }
 0x1c6   : > { %v2257_v7 = vor.u32 %v2256_v16, %v2255_v23  ;;  %v2260_v8 = vshll.u32 %v2259_v10, 23  ;;  %v1157_v36 = vadd.s32 %v1156_v29, %v1146_v44  ;;  %v1159_v4 = vmul.u32 %v6607_v14, %v1105_v52  ;;  %v6687_v10 = vld [vmem:[%s9373_s1 + $0x7] ss:$0 sm:$0xff] }
 0x1c7   : > { %v809_v18 = vadd.f32 1.000001, %v781_v12  ;;  %vm1161_vm11 = vc.u32 %v6647_v40, %v6652_v20  ;;  %v6664_v62 = vadd.f32 %v764_v48, %v5904_v60  ;;  %vm2146_vm12 = vcmp.lt.s32.totalorder %v6469_v30, 0 }
 0x1c8   : > { %v2261_v21 = vor.u32 4788187, %v2260_v8  ;;  %v2264_v13 = vcvt.s32.f32 %v2257_v7  ;;  %v1158_v9 = vadd.s32 %v1157_v36, %v1148_v39  ;;  %vm6671_vm13 = vcmp.le.f32.partialorder %v2144_v28, 0.7853982 }
 0x1c9   : > { %5358 = vrcp.f32 %v809_v18  ;;  %v818_v61 = vadd.f32 1.000001, %v6664_v62  ;;  %v645_v60 = vadd.f32 %v619_v45, %v5898_v32  ;;  %v4918_v54 = vsub.f32 1.0, %v781_v12 }
 0x1ca   : > { %v2262_v41 = vand.u32 2147483647, %v2261_v21  ;;  %v1162_v19 = vadd.s32 1, %v1158_v9  ;;  %v2268_v25 = vsub.s32 4, %v6593_v46  ;;  %v4977_v32 = vmul.f32 %v6687_v10, %v6463_v11 }
 0x1cb   : > { %5360 = vrcp.f32 %v818_v61  ;;  %v628_v0 = vmul.f32 %v6660_v22, %v558_v31  ;;  %vm1068_vm14 = vcmp.lt.s32.totalorder %v6492_v2, 0  ;;  %vm2287_vm0 = vweird.f32 %v6469_v30 }
 0x1cc   : > { %v2265_v24 = vmul.f32 %v2264_v13, %v2262_v41  ;;  %v1163_v47 = vsel %vm1161_vm11, %v1162_v19, %v1158_v9  ;;  %v2269_v7 = vsel %vm2146_vm12, %v2268_v25, %v6593_v46  ;;  %v5011_v21 = vmul.f32 1.442695, %v4977_v32 }
 0x1cd   : > { %v1164_v55 = vadd.s32 %v1163_v47, %v1159_v4  ;;  %v2271_v31 = vsel %vm6671_vm13, 0, %v2269_v7  ;;  %v654_v46 = vadd.f32 %v628_v0, %v5902_v59  ;;  %vm6724_vm1 = vcmp.le.f32.partialorder %v1066_v34, 0.7853982 }
 0x1ce   : > { %v2266_v53 = vxor.u32 2147483648, %v2265_v24  ;;  %v2288_v4 = vand.u32 3, %v2271_v31  ;;  %5362 = vpow2.f32 %v5011_v21  ;;  %v1160_v7 = vadd.s32 %v6652_v20, %v6647_v40 }
 0x1cf   : > { %v5359_v14 = vpop.eup %5358  ;;  %v1165_v38 = vadd.s32 536870912, %v1164_v55 }
 0x1d0   : > { %v2267_v35 = vsel %vm2146_vm12, %v2266_v53, %v2265_v24  ;;  %v861_v28 = vmul.f32 %v5359_v14, %v645_v60  ;;  %v6682_v16 = vmul.f32 %v5359_v14, %v4918_v54  ;;  %vm2289_vm2 = vcmp.lt.s32.totalorder %v2288_v4, 2 }
 0x1d1   : > { %v2270_v23 = vsel %vm6671_vm13, %v6469_v30, %v2267_v35  ;;  %v1166_v50 = vshrl.u32 %v1165_v38, 30  ;;  %v6704_v12 = vpop.eup %5360  ;;  %vm2290_vm5 = vcmp.eq.s32.totalorder %v2288_v4, 0  ;;  %vm2293_vm6 = vcmp.eq.s32.totalorder %v2288_v4, 2 }
 0x1d2   : > { %v2272_v3 = vmul.f32 %v2270_v23, %v2270_v23  ;;  %v6697_v17 = vmul.f32 %v6694_v51, %v861_v28  ;;  %v870_v45 = vmul.f32 %v6704_v12, %v654_v46  ;;  %v4970_v28 = vmul.f32 %v6687_v10, %v6550_v43 }
 0x1d3   : > { %v1167_v8 = vshll.u32 %v1166_v50, 30  ;;  %v1190_v36 = vsub.s32 4, %v1166_v50 }
 0x1d4   : > { %v2273_v1 = vmul.f32 -0.001358992, %v2272_v3  ;;  %v2280_v57 = vmul.f32 -0.00019511016, %v2272_v3  ;;  %v1220_v29 = vand.u32 2147483647, %v6697_v17  ;;  %v6733_v32 = vmul.f32 %v6694_v51, %v870_v45 }
 0x1d5   : > { %v6706_v39 = vsub.s32 %v1164_v55, %v1167_v8  ;;  %v1223_v52 = vand.u32 2139095040, %v6697_v17  ;;  %v1191_v59 = vsel %vm1068_vm14, %v1190_v36, %v1166_v50  ;;  %v6741_v36 = vmul.f32 1.442695, %v4970_v28 }
 0x1d6   : > { %v2274_v44 = vadd.f32 0.041655596, %v2273_v1  ;;  %v2281_v11 = vadd.f32 0.008332121, %v2280_v57  ;;  %v1227_v19 = vand.u32 8388607, %v1220_v29 }
 0x1d7   : > { %vm1169_vm15 = vcmp.lt.s32.totalorder %v6706_v39, 0  ;;  %v1170_v13 = vsub.s32 0, %v6706_v39  ;;  %v1224_v9 = vshrl.u32 %v1223_v52, 23  ;;  %5364 = vpow2.f32 %v6741_v36 }
 0x1d8   : > { %v2275_v18 = vmul.f32 %v2274_v44, %v2272_v3  ;;  %v2282_v41 = vmul.f32 %v2281_v11, %v2272_v3  ;;  %v1228_v60 = vor.u32 8388608, %v1227_v19  ;;  %v5363_v11 = vpop.eup %5362 }
 0x1d9   : > { %v1171_v53 = vsel %vm1169_vm15, %v1170_v13, %v6706_v39  ;;  %v5195_v33 = vadd.s32 4294967169, %v1224_v9  ;;  %vm1209_vm15 = vweird.f32 %v6492_v2 }
 0x1da   : > { %v2276_v48 = vadd.f32 -0.4999988, %v2275_v18  ;;  %v2283_v24 = vadd.f32 -0.16666654, %v2282_v41  ;;  %v1172_v55 = vclz %v1171_v53  ;;  %v6737_v44 = vshll.u32 %v1228_v60, 8 }
 0x1db   : > { %v1230_v38 = vadd.s32 1, %v5195_v33  ;;  %v2606_v41 = vand.u32 2147483647, %v6733_v32 }
 0x1dc   : > { %v2277_v47 = vmul.f32 %v2276_v48, %v2272_v3  ;;  %v2284_v61 = vmul.f32 %v2283_v24, %v2272_v3  ;;  %v5193_v25 = vadd.s32 4294967294, %v1172_v55  ;;  %v1193_v3 = vsel %vm6724_vm1, 0, %v1191_v59 }
 0x1dd   : > { %vm1231_vm4 = vcmp.gt.s32.totalorder %v1230_v38, 0  ;;  %v6739_v21 = vand.u32 3, %v1193_v3  ;;  %v6752_v19 = vand.u32 65535, %v6737_v44 }
 0x1de   : > { %v2278_v54 = vadd.f32 1.0, %v2277_v47  ;;  %v2285_v14 = vadd.f32 1.0, %v2284_v61  ;;  %vm5194_vm3 = vcmp.lt.s32.totalorder %v5193_v25, 0  ;;  %v1232_v57 = vsel %vm1231_vm4, %v1230_v38, 0 }
 0x1df   : > { %v1175_v1 = vsel %vm5194_vm3, 0, %v5193_v25  ;;  %v6748_v48 = vshrl.u32 %v1232_v57, 5  ;;  %vm1215_vm3 = vcmp.eq.s32.totalorder %v6739_v21, 2 }
 0x1e0   : > { %v2286_v50 = vmul.f32 %v2285_v14, %v2270_v23  ;;  %v2294_v34 = vxor.u32 2147483648, %v2278_v54  ;;  %v1176_v8 = vsub.s32 32, %v1175_v1  ;;  %v1180_v43 = vsub.s32 4294967266, %v1175_v1 }
 0x1e1   : > { %v1234_v23 = vand.u32 31, %v1232_v57  ;;  %v1177_v40 = vshll.u32 %v6706_v39, %v1175_v1  ;;  %vm1252_vm7 = vcmp.lt.s32.totalorder %v6748_v48, 1  ;;  %vm1255_vm8 = vcmp.lt.s32.totalorder %v6748_v48, 4 }
 0x1e2   : > { %v2291_v0 = vxor.u32 2147483648, %v2286_v50  ;;  %v2295_v31 = vsel %vm2293_vm6, %v2294_v34, %v2286_v50  ;;  %v1178_v18 = vshrl.u32 %v1160_v7, %v1176_v8  ;;  %v1181_v20 = vadd.s32 127, %v1180_v43 }
 0x1e3   : > { %v1235_v13 = vsub.s32 32, %v1234_v23  ;;  %v1237_v24 = vshll.u32 %v9431_v37, %v1234_v23  ;;  %v1240_v47 = vshll.u32 %v9433_v56, %v1234_v23  ;;  %v1243_v61 = vshll.u32 %v9434_v6, %v1234_v23 }
 0x1e4   : > { %v2292_v52 = vsel %vm2290_vm5, %v2278_v54, %v2291_v0  ;;  %v1179_v53 = vor.u32 %v1178_v18, %v1177_v40  ;;  %v1182_v59 = vshll.u32 %v1181_v20, 23  ;;  %v1246_v60 = vshll.u32 %v9435_v49, %v1234_v23 }
 0x1e5   : > { %v2296_v46 = vsel %vm2289_vm2, %v2292_v52, %v2295_v31  ;;  %v1238_v4 = vshrl.u32 %v9433_v56, %v1235_v13  ;;  %v1241_v39 = vshrl.u32 %v9434_v6, %v1235_v13  ;;  %v1244_v30 = vshrl.u32 %v9435_v49, %v1235_v13 }
 0x1e6   : > { %v2297_v9 = vsel %vm2287_vm0, nan, %v2296_v46  ;;  %v1183_v55 = vor.u32 4788187, %v1182_v59  ;;  %v1247_v54 = vshrl.u32 %v9436_v15, %v1235_v13  ;;  %v1249_v38 = vshll.u32 %v9436_v15, %v1234_v23 }
 0x1e7   : > { %v5055_v45 = vmul.f32 %v5363_v11, %v2297_v9  ;;  %v1239_v33 = vor.u32 %v1238_v4, %v1237_v24  ;;  %v1242_v14 = vor.u32 %v1241_v39, %v1240_v47  ;;  %v1245_v25 = vor.u32 %v1244_v30, %v1243_v61 }
 0x1e8   : > { %v1250_v3 = vshrl.u32 %v9437_v58, %v1235_v13  ;;  %v1184_v28 = vand.u32 2147483647, %v1183_v55  ;;  %v1186_v50 = vcvt.s32.f32 %v1179_v53  ;;  %v1248_v34 = vor.u32 %v1247_v54, %v1246_v60 }
 0x1e9   : > { %5081 = vst [vmem:[%s6423_s27 + $0x40] sm:$0xff] %v5055_v45  ;;  %v1260_v57 = vsel %vm1252_vm7, %v1239_v33, %v1242_v14  ;;  %v2609_v0 = vand.u32 2139095040, %v6733_v32  ;;  %vm1254_vm9 = vcmp.lt.s32.totalorder %v6748_v48, 3  ;;  %v1264_v11 = vsel %vm1252_vm7, %v1242_v14, %v1245_v25 }
 0x1ea   : > { %v1251_v1 = vor.u32 %v1250_v3, %v1249_v38  ;;  %v1187_v7 = vmul.f32 %v1186_v50, %v1184_v28  ;;  %v1261_v8 = vsel %vm1255_vm8, %v1248_v34, 920167782  ;;  %vm1253_vm10 = vcmp.lt.s32.totalorder %v6748_v48, 2 }
 0x1eb   : > { %v1262_v43 = vsel %vm1254_vm9, %v1245_v25, %v1261_v8  ;;  %v1270_v52 = vshrl.u32 %v6737_v44, 16  ;;  %v1236_v18 = vshrl.u32 %v9431_v37, %v1235_v13  ;;  %v2610_v45 = vshrl.u32 %v2609_v0, 23 }
 0x1ec   : > { %v1265_v23 = vsel %vm1255_vm8, %v1251_v1, 1326507024  ;;  %v1188_v31 = vxor.u32 2147483648, %v1187_v7  ;;  %v1263_v46 = vsel %vm1253_vm10, %v1260_v57, %v1262_v43  ;;  %v1257_v59 = vsel %vm1255_vm8, %v1245_v25, 2102212464 }
 0x1ed   : > { %v1266_v40 = vsel %vm1254_vm9, %v1248_v34, %v1265_v23  ;;  %v1293_v9 = vand.u32 65535, %v1263_v46  ;;  %v1294_v24 = vshrl.u32 %v1263_v46, 16  ;;  %v6797_v61 = vand.u32 8388607, %v2606_v41 }
 0x1ee   : > { %v1267_v20 = vsel %vm1253_vm10, %v1264_v11, %v1266_v40  ;;  %v1189_v53 = vsel %vm1068_vm14, %v1188_v31, %v1187_v7  ;;  %v4927_v30 = vsub.f32 1.0, %v6664_v62  ;;  %v1256_v60 = vsel %vm1252_vm7, %v1236_v18, %v1239_v33 }
 0x1ef   : > { %v1271_v4 = vand.u32 65535, %v1267_v20  ;;  %v1272_v13 = vshrl.u32 %v1267_v20, 16  ;;  %v1192_v47 = vsel %vm6724_vm1, %v6492_v2, %v1189_v53  ;;  %v1296_v39 = vmul.u32 %v1294_v24, %v6752_v19 }
 0x1f0   : > { %v1194_v55 = vmul.f32 %v1192_v47, %v1192_v47  ;;  %v1258_v38 = vsel %vm1254_vm9, %v1242_v14, %v1257_v59  ;;  %v1297_v35 = vmul.u32 %v1293_v9, %v1270_v52  ;;  %v5222_v28 = vadd.s32 4294967169, %v2610_v45 }
 0x1f1   : > { %v1274_v54 = vmul.u32 %v1272_v13, %v6752_v19  ;;  %v1275_v25 = vmul.u32 %v1271_v4, %v1270_v52  ;;  %v1299_v3 = vshll.u32 %v1296_v39, 16  ;;  %v1273_v1 = vmul.u32 %v1271_v4, %v6752_v19 }
 0x1f2   : > { %v1195_v50 = vmul.f32 -0.001358992, %v1194_v55  ;;  %v1202_v34 = vmul.f32 -0.00019511016, %v1194_v55  ;;  %v1276_v0 = vmul.u32 %v1272_v13, %v1270_v52  ;;  %v1295_v7 = vmul.u32 %v1293_v9, %v6752_v19 }
 0x1f3   : > { %v1277_v57 = vshll.u32 %v1274_v54, 16  ;;  %v1279_v62 = vshll.u32 %v1275_v25, 16  ;;  %v1298_v8 = vmul.u32 %v1294_v24, %v1270_v52  ;;  %v1301_v14 = vshll.u32 %v1297_v35, 16 }
 0x1f4   : > { %v1196_v33 = vadd.f32 0.041655596, %v1195_v50  ;;  %v1203_v11 = vadd.f32 0.008332121, %v1202_v34  ;;  %vm1303_vm12 = vc.u32 %v1295_v7, %v1299_v3  ;;  %v1305_v31 = vadd.s32 %v1299_v3, %v1295_v7 }
 0x1f5   : > { %vm1281_vm11 = vc.u32 %v1273_v1, %v1277_v57  ;;  %v1283_v43 = vadd.s32 %v1277_v57, %v1273_v1  ;;  %v1278_v20 = vshrl.u32 %v1274_v54, 16  ;;  %v1304_v53 = vsel %vm1303_vm12, 1, %v9432_v63 }
 0x1f6   : > { %v1282_v23 = vsel %vm1281_vm11, 1, %v9432_v63  ;;  %v1197_v18 = vmul.f32 %v1196_v33, %v1194_v55  ;;  %v1204_v46 = vmul.f32 %v1203_v11, %v1194_v55  ;;  %vm1307_vm14 = vc.u32 %v1305_v31, %v1301_v14 }
 0x1f7   : > { %v1284_v40 = vadd.s32 %v1282_v23, %v1276_v0  ;;  %vm1285_vm13 = vc.u32 %v1283_v43, %v1279_v62  ;;  %v1306_v24 = vadd.s32 %v1304_v53, %v1298_v8  ;;  %v1280_v59 = vshrl.u32 %v1275_v25, 16 }
 0x1f8   : > { %v1286_v45 = vsel %vm1285_vm13, 1, %v9432_v63  ;;  %v1198_v19 = vadd.f32 -0.4999988, %v1197_v18  ;;  %v1205_v52 = vadd.f32 -0.16666654, %v1204_v46  ;;  %v1300_v4 = vshrl.u32 %v1296_v39, 16 }
 0x1f9   : > { %v1288_v9 = vadd.s32 %v1286_v45, %v1284_v40  ;;  %v1308_v13 = vsel %vm1307_vm14, 1, %v9432_v63  ;;  %v2616_v50 = vadd.s32 1, %v5222_v28  ;;  %v1259_v54 = vsel %vm1253_vm10, %v1256_v60, %v1258_v38  ;;  %v5365_v40 = vpop.eup %5364 }
 0x1fa   : > { %v1199_v3 = vmul.f32 %v1198_v19, %v1194_v55  ;;  %v1206_v34 = vmul.f32 %v1205_v52, %v1194_v55  ;;  %v1310_v57 = vadd.s32 %v1308_v13, %v1306_v24  ;;  %v1302_v0 = vshrl.u32 %v1297_v35, 16 }
 0x1fb   : > { %v1289_v1 = vadd.s32 %v1288_v9, %v1278_v20  ;;  %vm2617_vm0 = vcmp.gt.s32.totalorder %v2616_v50, 0  ;;  %v6815_v62 = vmul.f32 %v6704_v12, %v4927_v30  ;;  %vm1211_vm1 = vcmp.lt.s32.totalorder %v6739_v21, 2 }
 0x1fc   : > { %v1200_v7 = vadd.f32 1.0, %v1199_v3  ;;  %v1207_v25 = vadd.f32 1.0, %v1206_v34  ;;  %v1311_v8 = vadd.s32 %v1310_v57, %v1300_v4  ;;  %v6821_v55 = vadd.s32 %v1305_v31, %v1301_v14 }
 0x1fd   : > { %v6817_v39 = vadd.s32 %v1289_v1, %v1280_v59  ;;  %v2618_v28 = vsel %vm2617_vm0, %v2616_v50, 0  ;;  %vm1212_vm2 = vcmp.eq.s32.totalorder %v6739_v21, 0  ;;  %v1313_v12 = vmul.u32 %v6737_v44, %v1259_v54 }
 0x1fe   : > { %v1208_v33 = vmul.f32 %v1207_v25, %v1192_v47  ;;  %v1216_v48 = vxor.u32 2147483648, %v1200_v7  ;;  %v1312_v60 = vadd.s32 %v1311_v8, %v1302_v0  ;;  %v2620_v30 = vand.u32 31, %v2618_v28 }
 0x1ff   : > { %vm1315_vm4 = vc.u32 %v6817_v39, %v6821_v55  ;;  %v2614_v36 = vor.u32 8388608, %v6797_v61  ;;  %v6829_v11 = vshrl.u32 %v2618_v28, 5  ;;  %vm6912_vm0 = vcmp.le.f32.partialorder %v1220_v29, 0.7853982 }
 0x200   : > { %v1213_v38 = vxor.u32 2147483648, %v1208_v33  ;;  %v1316_v35 = vadd.s32 1, %v1312_v60  ;;  %v1217_v43 = vsel %vm1215_vm3, %v1216_v48, %v1208_v33  ;;  %v2621_v47 = vsub.s32 32, %v2620_v30 }
 0x201   : > { %v2623_v23 = vshll.u32 %v9431_v37, %v2620_v30  ;;  %v2626_v14 = vshll.u32 %v9433_v56, %v2620_v30  ;;  %v2629_v44 = vshll.u32 %v9434_v6, %v2620_v30  ;;  %v2632_v46 = vshll.u32 %v9435_v49, %v2620_v30 }
 0x202   : > { %v1214_v31 = vsel %vm1212_vm2, %v1200_v7, %v1213_v38  ;;  %v1317_v18 = vsel %vm1315_vm4, %v1316_v35, %v1312_v60  ;;  %v2624_v45 = vshrl.u32 %v9433_v56, %v2621_v47  ;;  %v2635_v53 = vshll.u32 %v9436_v15, %v2620_v30  ;;  %v6871_v35 = vpop.permute.xlu0 %537 }
 0x203   : > { %v1218_v20 = vsel %vm1211_vm1, %v1214_v31, %v1217_v43  ;;  %v1318_v61 = vadd.s32 %v1317_v18, %v1313_v12  ;;  %v2627_v52 = vshrl.u32 %v9434_v6, %v2621_v47  ;;  %v2630_v9 = vshrl.u32 %v9435_v49, %v2621_v47 }
 0x204   : > { %v1219_v19 = vsel %vm1209_vm15, nan, %v1218_v20  ;;  %v2633_v24 = vshrl.u32 %v9436_v15, %v2621_v47  ;;  %v2625_v13 = vor.u32 %v2624_v45, %v2623_v23  ;;  %v2636_v21 = vshrl.u32 %v9437_v58, %v2621_v47 }
 0x205   : > { %v5048_v59 = vmul.f32 %v5365_v40, %v1219_v19  ;;  %v1319_v4 = vadd.s32 536870912, %v1318_v61  ;;  %v2628_v50 = vor.u32 %v2627_v52, %v2626_v14  ;;  %v2631_v3 = vor.u32 %v2630_v9, %v2629_v44 }
 0x206   : > { %v2634_v34 = vor.u32 %v2633_v24, %v2632_v46  ;;  %v2637_v57 = vor.u32 %v2636_v21, %v2635_v53  ;;  %vm2638_vm5 = vcmp.lt.s32.totalorder %v6829_v11, 1  ;;  %vm2641_vm6 = vcmp.lt.s32.totalorder %v6829_v11, 4 }
 0x207   : > { %5074 = vst [vmem:[%s6423_s27 + $0x8] sm:$0xff] %v5048_v59  ;;  %v6846_v1 = vshrl.u32 %v1319_v4, 30  ;;  %v2646_v2 = vsel %vm2638_vm5, %v2625_v13, %v2628_v50  ;;  %v6852_v54 = vshll.u32 %v2614_v36, 8  ;;  %vm2640_vm7 = vcmp.lt.s32.totalorder %v6829_v11, 3 }
 0x208   : > { %v2647_v7 = vsel %vm2641_vm6, %v2634_v34, 920167782  ;;  %vm2639_vm8 = vcmp.lt.s32.totalorder %v6829_v11, 2  ;;  %v2650_v8 = vsel %vm2638_vm5, %v2628_v50, %v2631_v3  ;;  %v2651_v28 = vsel %vm2641_vm6, %v2637_v57, 1326507024 }
 0x209   : > { %v1321_v0 = vshll.u32 %v6846_v1, 30  ;;  %v2648_v25 = vsel %vm2640_vm7, %v2631_v3, %v2647_v7  ;;  %v2652_v60 = vsel %vm2640_vm7, %v2634_v34, %v2651_v28  ;;  %v2655_v12 = vand.u32 65535, %v6852_v54 }
 0x20a   : > { %v2649_v48 = vsel %vm2639_vm8, %v2646_v2, %v2648_v25  ;;  %v2656_v30 = vshrl.u32 %v6852_v54, 16  ;;  %v2653_v43 = vsel %vm2639_vm8, %v2650_v8, %v2652_v60  ;;  %v2643_v14 = vsel %vm2641_vm6, %v2631_v3, 2102212464 }
 0x20b   : > { %v1322_v33 = vsub.s32 %v1318_v61, %v1321_v0  ;;  %v2680_v38 = vshrl.u32 %v2649_v48, 16  ;;  %v2679_v23 = vand.u32 65535, %v2649_v48  ;;  %v2657_v31 = vand.u32 65535, %v2653_v43 }
 0x20c   : > { %v2658_v18 = vshrl.u32 %v2653_v43, 16  ;;  %v2622_v40 = vshrl.u32 %v9431_v37, %v2621_v47  ;;  %v759_v20 = vmul.f32 %v6644_v42, %v6871_v35  ;;  %v1314_v61 = vadd.s32 %v6821_v55, %v6817_v39 }
 0x20d   : > { %vm1323_vm9 = vcmp.lt.s32.totalorder %v1322_v33, 0  ;;  %v1324_v36 = vsub.s32 0, %v1322_v33  ;;  %v2682_v44 = vmul.u32 %v2680_v38, %v2655_v12  ;;  %v2661_v19 = vmul.u32 %v2657_v31, %v2656_v30 }
 0x20e   : > { %v2660_v53 = vmul.u32 %v2658_v18, %v2655_v12  ;;  %v2642_v52 = vsel %vm2638_vm5, %v2622_v40, %v2625_v13  ;;  %v2644_v9 = vsel %vm2640_vm7, %v2628_v50, %v2643_v14  ;;  %v2683_v24 = vmul.u32 %v2679_v23, %v2656_v30 }
 0x20f   : > { %v1325_v46 = vsel %vm1323_vm9, %v1324_v36, %v1322_v33  ;;  %v2685_v59 = vshll.u32 %v2682_v44, 16  ;;  %v2659_v21 = vmul.u32 %v2657_v31, %v2655_v12  ;;  %v2681_v3 = vmul.u32 %v2679_v23, %v2655_v12 }
 0x210   : > { %v1326_v45 = vclz %v1325_v46  ;;  %v2663_v47 = vshll.u32 %v2660_v53, 16  ;;  %v2662_v34 = vmul.u32 %v2658_v18, %v2656_v30  ;;  %v2665_v57 = vshll.u32 %v2661_v19, 16 }
 0x211   : > { %v2684_v2 = vmul.u32 %v2680_v38, %v2656_v30  ;;  %v2687_v0 = vshll.u32 %v2683_v24, 16  ;;  %vm2689_vm12 = vc.u32 %v2681_v3, %v2685_v59  ;;  %v2691_v50 = vadd.s32 %v2685_v59, %v2681_v3  ;;  %v530_v30 = vpop.permute.xlu1 %529 }
 0x212   : > { %v5196_v4 = vadd.s32 4294967294, %v1326_v45  ;;  %vm2667_vm11 = vc.u32 %v2659_v21, %v2663_v47  ;;  %v2669_v39 = vadd.s32 %v2663_v47, %v2659_v21  ;;  %v2690_v7 = vsel %vm2689_vm12, 1, %v9432_v63 }
 0x213   : > { %v2668_v13 = vsel %vm2667_vm11, 1, %v9432_v63  ;;  %v2664_v28 = vshrl.u32 %v2660_v53, 16  ;;  %v2692_v12 = vadd.s32 %v2690_v7, %v2684_v2  ;;  %vm2693_vm14 = vc.u32 %v2691_v50, %v2687_v0 }
 0x214   : > { %vm5197_vm10 = vcmp.lt.s32.totalorder %v5196_v4, 0  ;;  %v2670_v48 = vadd.s32 %v2668_v13, %v2662_v34  ;;  %vm2671_vm13 = vc.u32 %v2669_v39, %v2665_v57  ;;  %v2694_v23 = vsel %vm2693_vm14, 1, %v9432_v63  ;;  %v9451_v34 = vld [vmem:[#allocation8_spill] sm:$0xff] }
 0x215   : > { %v1329_v55 = vsel %vm5197_vm10, 0, %v5196_v4  ;;  %v2672_v43 = vsel %vm2671_vm13, 1, %v9432_v63  ;;  %v2686_v31 = vshrl.u32 %v2682_v44, 16  ;;  %v2696_v18 = vadd.s32 %v2694_v23, %v2692_v12 }
 0x216   : > { %v1330_v25 = vsub.s32 32, %v1329_v55  ;;  %v1334_v8 = vsub.s32 4294967266, %v1329_v55  ;;  %v1331_v60 = vshll.u32 %v1322_v33, %v1329_v55  ;;  %v2674_v14 = vadd.s32 %v2672_v43, %v2670_v48 }
 0x217   : > { %v785_v46 = vadd.f32 %v759_v20, %v5939_v27  ;;  %v2666_v53 = vshrl.u32 %v2661_v19, 16  ;;  %v757_v33 = vmul.f32 %v6644_v42, %v530_v30  ;;  %v2688_v4 = vshrl.u32 %v2683_v24, 16 }
 0x218   : > { %v1332_v38 = vshrl.u32 %v1314_v61, %v1330_v25  ;;  %v1335_v36 = vadd.s32 127, %v1334_v8  ;;  %v2675_v59 = vadd.s32 %v2674_v14, %v2664_v28  ;;  %v2697_v21 = vadd.s32 %v2696_v18, %v2686_v31 }
 0x219   : > { %v813_v47 = vadd.f32 1.000001, %v785_v46  ;;  %v2645_v3 = vsel %vm2639_vm8, %v2642_v52, %v2644_v9  ;;  %v6895_v57 = vadd.f32 %v757_v33, %v9451_v34  ;;  %v6899_v2 = vadd.s32 %v2691_v50, %v2687_v0  ;;  %v9452_v50 = vld [vmem:[#allocation11_spill] sm:$0xff] }
 0x21a   : > { %v1333_v40 = vor.u32 %v1332_v38, %v1331_v60  ;;  %v1336_v45 = vshll.u32 %v1335_v36, 23  ;;  %v6897_v44 = vadd.s32 %v2675_v59, %v2666_v53  ;;  %v2698_v27 = vadd.s32 %v2697_v21, %v2688_v4  ;;  %v9455_v38 = vld [vmem:[#allocation7_spill] sm:$0xff] }
 0x21b   : > { %5366 = vrcp.f32 %v813_v47  ;;  %v623_v42 = vmul.f32 %v6660_v22, %v6871_v35  ;;  %v811_v24 = vadd.f32 1.000001, %v6895_v57  ;;  %v2699_v9 = vmul.u32 %v6852_v54, %v2645_v3 }
 0x21c   : > { %v1337_v61 = vor.u32 4788187, %v1336_v45  ;;  %v1340_v19 = vcvt.s32.f32 %v1333_v40  ;;  %vm2701_vm15 = vc.u32 %v6897_v44, %v6899_v2  ;;  %v2702_v11 = vadd.s32 1, %v2698_v27 }
 0x21d   : > { %5368 = vrcp.f32 %v811_v24  ;;  %v1344_v0 = vsub.s32 4, %v6846_v1  ;;  %v621_v55 = vmul.f32 %v6660_v22, %v530_v30  ;;  %v649_v25 = vadd.f32 %v623_v42, %v9452_v50 }
 0x21e   : > { %v1338_v20 = vand.u32 2147483647, %v1337_v61  ;;  %v2703_v39 = vsel %vm2701_vm15, %v2702_v11, %v2698_v27  ;;  %v4922_v35 = vsub.f32 1.0, %v785_v46  ;;  %vm1222_vm1 = vcmp.lt.s32.totalorder %v6697_v17, 0 }
 0x21f   : > { %v2704_v7 = vadd.s32 %v2703_v39, %v2699_v9  ;;  %v1345_v22 = vsel %vm1222_vm1, %v1344_v0, %v6846_v1  ;;  %v647_v36 = vadd.f32 %v621_v55, %v9455_v38  ;;  %v4971_v31 = vmul.f32 %v6687_v10, %v6682_v16 }
 0x220   : > { %v1341_v52 = vmul.f32 %v1340_v19, %v1338_v20  ;;  %v1347_v1 = vsel %vm6912_vm0, 0, %v1345_v22  ;;  %v4980_v3 = vmul.f32 %v6687_v10, %v6815_v62  ;;  %vm2608_vm3 = vcmp.lt.s32.totalorder %v6733_v32, 0 }
 0x221   : > { %v5367_v8 = vpop.eup %5366  ;;  %v2705_v48 = vadd.s32 536870912, %v2704_v7  ;;  %v1364_v47 = vand.u32 3, %v1347_v1  ;;  %v4999_v61 = vmul.f32 1.442695, %v4971_v31  ;;  %vm6943_vm4 = vcmp.le.f32.partialorder %v2606_v41, 0.7853982 }
 0x222   : > { %v1342_v13 = vxor.u32 2147483648, %v1341_v52  ;;  %v865_v60 = vmul.f32 %v5367_v8, %v649_v25  ;;  %v6917_v12 = vmul.f32 %v5367_v8, %v4922_v35  ;;  %v6947_v0 = vmul.f32 1.442695, %v4980_v3 }
 0x223   : > { %v6924_v43 = vpop.eup %5368  ;;  %v2706_v23 = vshrl.u32 %v2705_v48, 30  ;;  %5370 = vpow2.f32 %v4999_v61  ;;  %vm1365_vm5 = vcmp.lt.s32.totalorder %v1364_v47, 2  ;;  %vm1363_vm6 = vweird.f32 %v6697_v17 }
 0x224   : > { %v1343_v54 = vsel %vm1222_vm1, %v1342_v13, %v1341_v52  ;;  %v6927_v14 = vmul.f32 %v6694_v51, %v865_v60  ;;  %v863_v18 = vmul.f32 %v6924_v43, %v647_v36  ;;  %vm1366_vm7 = vcmp.eq.s32.totalorder %v1364_v47, 0 }
 0x225   : > { %v1346_v30 = vsel %vm6912_vm0, %v6697_v17, %v1343_v54  ;;  %v2707_v45 = vshll.u32 %v2706_v23, 30  ;;  %v2730_v21 = vsub.s32 4, %v2706_v23  ;;  %vm1369_vm8 = vcmp.eq.s32.totalorder %v1364_v47, 2 }
 0x226   : > { %v1348_v29 = vmul.f32 %v1346_v30, %v1346_v30  ;;  %v1839_v53 = vand.u32 2139095040, %v6927_v14  ;;  %v1836_v19 = vand.u32 2147483647, %v6927_v14  ;;  %v2700_v8 = vadd.s32 %v6899_v2, %v6897_v44 }
 0x227   : > { %v2708_v4 = vsub.s32 %v2704_v7, %v2707_v45  ;;  %v2731_v9 = vsel %vm2608_vm3, %v2730_v21, %v2706_v23  ;;  %v4920_v54 = vsub.f32 1.0, %v6895_v57  ;;  %v6962_v44 = vmul.f32 %v6694_v51, %v863_v18 }
 0x228   : > { %v1349_v46 = vmul.f32 -0.001358992, %v1348_v29  ;;  %v1356_v40 = vmul.f32 -0.00019511016, %v1348_v29  ;;  %v1840_v16 = vshrl.u32 %v1839_v53, 23  ;;  %v2733_v50 = vsel %vm6943_vm4, 0, %v2731_v9 }
 0x229   : > { %vm2709_vm2 = vcmp.lt.s32.totalorder %v2708_v4, 0  ;;  %v2710_v20 = vsub.s32 0, %v2708_v4  ;;  %v1843_v35 = vand.u32 8388607, %v1836_v19  ;;  %v5371_v36 = vpop.eup %5370  ;;  %v6959_v31 = vand.u32 3, %v2733_v50 }
 0x22a   : > { %v1350_v33 = vadd.f32 0.041655596, %v1349_v46  ;;  %v1357_v59 = vadd.f32 0.008332121, %v1356_v40  ;;  %v5207_v42 = vadd.s32 4294967169, %v1840_v16  ;;  %5372 = vpow2.f32 %v6947_v0 }
 0x22b   : > { %v2711_v52 = vsel %vm2709_vm2, %v2710_v20, %v2708_v4  ;;  %v1844_v45 = vor.u32 8388608, %v1843_v35 }
 0x22c   : > { %v1351_v34 = vmul.f32 %v1350_v33, %v1348_v29  ;;  %v1358_v27 = vmul.f32 %v1357_v59, %v1348_v29  ;;  %v2712_v62 = vclz %v2711_v52  ;;  %v1846_v13 = vadd.s32 1, %v5207_v42 }
 0x22e   : > { %v1352_v24 = vadd.f32 -0.4999988, %v1351_v34  ;;  %v1359_v11 = vadd.f32 -0.16666654, %v1358_v27  ;;  %v5223_v7 = vadd.s32 4294967294, %v2712_v62  ;;  %vm1847_vm9 = vcmp.gt.s32.totalorder %v1846_v13, 0 }
 0x22f   : > { %v1848_v28 = vsel %vm1847_vm9, %v1846_v13, 0 }
 0x230   : > { %v1353_v39 = vmul.f32 %v1352_v24, %v1348_v29  ;;  %v1360_v55 = vmul.f32 %v1359_v11, %v1348_v29  ;;  %vm5224_vm10 = vcmp.lt.s32.totalorder %v5223_v7, 0  ;;  %v6957_v38 = vshrl.u32 %v1848_v28, 5 }
 0x231   : > { %v2715_v22 = vsel %vm5224_vm10, 0, %v5223_v7  ;;  %v1850_v1 = vand.u32 31, %v1848_v28 }
 0x232   : > { %v1354_v25 = vadd.f32 1.0, %v1353_v39  ;;  %v1361_v41 = vadd.f32 1.0, %v1360_v55  ;;  %v2716_v29 = vsub.s32 32, %v2715_v22  ;;  %v2720_v23 = vsub.s32 4294967266, %v2715_v22 }
 0x233   : > { %v2717_v40 = vshll.u32 %v2708_v4, %v2715_v22  ;;  %v1851_v33 = vsub.s32 32, %v1850_v1  ;;  %v1853_v21 = vshll.u32 %v9431_v37, %v1850_v1  ;;  %v1856_v61 = vshll.u32 %v9433_v56, %v1850_v1 }
 0x234   : > { %v1362_v48 = vmul.f32 %v1361_v41, %v1346_v30  ;;  %v1370_v60 = vxor.u32 2147483648, %v1354_v25  ;;  %v2718_v53 = vshrl.u32 %v2700_v8, %v2716_v29  ;;  %v2721_v30 = vadd.s32 127, %v2720_v23 }
 0x235   : > { %vm1868_vm11 = vcmp.lt.s32.totalorder %v6957_v38, 1  ;;  %v1859_v51 = vshll.u32 %v9434_v6, %v1850_v1  ;;  %v1854_v34 = vshrl.u32 %v9433_v56, %v1851_v33  ;;  %v1857_v27 = vshrl.u32 %v9434_v6, %v1851_v33 }
 0x236   : > { %v1367_v46 = vxor.u32 2147483648, %v1362_v48  ;;  %v1371_v2 = vsel %vm1369_vm8, %v1370_v60, %v1362_v48  ;;  %v2719_v4 = vor.u32 %v2718_v53, %v2717_v40  ;;  %v2722_v16 = vshll.u32 %v2721_v30, 23 }
 0x237   : > { %v1860_v20 = vshrl.u32 %v9435_v49, %v1851_v33  ;;  %v1862_v11 = vshll.u32 %v9435_v49, %v1850_v1  ;;  %v1863_v47 = vshrl.u32 %v9436_v15, %v1851_v33  ;;  %v1855_v9 = vor.u32 %v1854_v34, %v1853_v21 }
 0x238   : > { %v1368_v59 = vsel %vm1366_vm7, %v1354_v25, %v1367_v46  ;;  %v2723_v24 = vor.u32 4788187, %v2722_v16  ;;  %v2726_v52 = vcvt.s32.f32 %v2719_v4  ;;  %v1858_v62 = vor.u32 %v1857_v27, %v1856_v61 }
 0x239   : > { %v1372_v3 = vsel %vm1365_vm5, %v1368_v59, %v1371_v2  ;;  %v1861_v39 = vor.u32 %v1860_v20, %v1859_v51  ;;  %v1864_v17 = vor.u32 %v1863_v47, %v1862_v11  ;;  %v1865_v13 = vshll.u32 %v9436_v15, %v1850_v1 }
 0x23a   : > { %v1373_v18 = vsel %vm1363_vm6, nan, %v1372_v3  ;;  %v2724_v55 = vand.u32 2147483647, %v2723_v24  ;;  %v1866_v7 = vshrl.u32 %v9437_v58, %v1851_v33  ;;  %vm1871_vm12 = vcmp.lt.s32.totalorder %v6957_v38, 4 }
 0x23b   : > { %v5049_v42 = vmul.f32 %v5371_v36, %v1373_v18  ;;  %v1876_v50 = vsel %vm1868_vm11, %v1855_v9, %v1858_v62  ;;  %v6984_v25 = vshll.u32 %v1844_v45, 8  ;;  %v1528_v41 = vand.u32 2147483647, %v6962_v44 }
 0x23c   : > { %v2727_v35 = vmul.f32 %v2726_v52, %v2724_v55  ;;  %v1867_v8 = vor.u32 %v1866_v7, %v1865_v13  ;;  %vm1870_vm13 = vcmp.lt.s32.totalorder %v6957_v38, 3  ;;  %v1877_v28 = vsel %vm1871_vm12, %v1864_v17, 920167782 }
 0x23d   : > { %5075 = vst [vmem:[%s6423_s27 + $0x10] sm:$0xff] %v5049_v42  ;;  %v1852_v48 = vshrl.u32 %v9431_v37, %v1851_v33  ;;  %vm1869_vm14 = vcmp.lt.s32.totalorder %v6957_v38, 2  ;;  %v1878_v60 = vsel %vm1870_vm13, %v1861_v39, %v1877_v28  ;;  %v1880_v22 = vsel %vm1868_vm11, %v1858_v62, %v1861_v39 }
 0x23e   : > { %v2728_v36 = vxor.u32 2147483648, %v2727_v35  ;;  %v1873_v29 = vsel %vm1871_vm12, %v1861_v39, 2102212464  ;;  %v1879_v23 = vsel %vm1869_vm14, %v1876_v50, %v1878_v60  ;;  %v1881_v1 = vsel %vm1871_vm12, %v1867_v8, 1326507024 }
 0x23f   : > { %v1882_v46 = vsel %vm1870_vm13, %v1864_v17, %v1881_v1  ;;  %v1909_v40 = vand.u32 65535, %v1879_v23  ;;  %v1910_v45 = vshrl.u32 %v1879_v23, 16  ;;  %v1531_v2 = vand.u32 2139095040, %v6962_v44 }
 0x240   : > { %v2729_v53 = vsel %vm2608_vm3, %v2728_v36, %v2727_v35  ;;  %v1883_v30 = vsel %vm1869_vm14, %v1880_v22, %v1882_v46  ;;  %v1885_v33 = vand.u32 65535, %v6984_v25  ;;  %v1886_v59 = vshrl.u32 %v6984_v25, 16 }
 0x241   : > { %v2732_v21 = vsel %vm6943_vm4, %v6733_v32, %v2729_v53  ;;  %v1872_v61 = vsel %vm1868_vm11, %v1852_v48, %v1855_v9  ;;  %v1887_v3 = vand.u32 65535, %v1883_v30  ;;  %v1888_v4 = vshrl.u32 %v1883_v30, 16 }
 0x242   : > { %v2734_v16 = vmul.f32 %v2732_v21, %v2732_v21  ;;  %v1874_v51 = vsel %vm1870_vm13, %v1858_v62, %v1873_v29  ;;  %v1912_v18 = vmul.u32 %v1910_v45, %v1885_v33  ;;  %v1913_v34 = vmul.u32 %v1909_v40, %v1886_v59 }
 0x243   : > { %v1890_v27 = vmul.u32 %v1888_v4, %v1885_v33  ;;  %v1891_v20 = vmul.u32 %v1887_v3, %v1886_v59  ;;  %v1911_v42 = vmul.u32 %v1909_v40, %v1885_v33  ;;  %v1532_v24 = vshrl.u32 %v1531_v2, 23 }
 0x244   : > { %v2735_v11 = vmul.f32 -0.001358992, %v2734_v16  ;;  %v2742_v47 = vmul.f32 -0.00019511016, %v2734_v16  ;;  %v1914_v52 = vmul.u32 %v1910_v45, %v1886_v59  ;;  %v1915_v10 = vshll.u32 %v1912_v18, 16 }
 0x245   : > { %v1889_v39 = vmul.u32 %v1887_v3, %v1885_v33  ;;  %v1892_v55 = vmul.u32 %v1888_v4, %v1886_v59  ;;  %v1893_v17 = vshll.u32 %v1890_v27, 16  ;;  %v1916_v9 = vshrl.u32 %v1912_v18, 16 }
 0x246   : > { %v2736_v13 = vadd.f32 0.041655596, %v2735_v11  ;;  %v2743_v7 = vadd.f32 0.008332121, %v2742_v47  ;;  %v1895_v50 = vshll.u32 %v1891_v20, 16  ;;  %v1917_v35 = vshll.u32 %v1913_v34, 16 }
 0x247   : > { %vm1897_vm15 = vc.u32 %v1889_v39, %v1893_v17  ;;  %v1899_v62 = vadd.s32 %v1893_v17, %v1889_v39  ;;  %vm1919_vm0 = vc.u32 %v1911_v42, %v1915_v10  ;;  %v1921_v8 = vadd.s32 %v1915_v10, %v1911_v42 }
 0x248   : > { %v2737_v28 = vmul.f32 %v2736_v13, %v2734_v16  ;;  %v2744_v48 = vmul.f32 %v2743_v7, %v2734_v16  ;;  %v1898_v60 = vsel %vm1897_vm15, 1, %v9432_v63  ;;  %v1920_v22 = vsel %vm1919_vm0, 1, %v9432_v63 }
 0x249   : > { %v1900_v36 = vadd.s32 %v1898_v60, %v1892_v55  ;;  %vm1901_vm1 = vc.u32 %v1899_v62, %v1895_v50  ;;  %v1922_v29 = vadd.s32 %v1920_v22, %v1914_v52  ;;  %vm1923_vm2 = vc.u32 %v1921_v8, %v1917_v35 }
 0x24a   : > { %v2738_v23 = vadd.f32 -0.4999988, %v2737_v28  ;;  %v2745_v1 = vadd.f32 -0.16666654, %v2744_v48  ;;  %v1902_v46 = vsel %vm1901_vm1, 1, %v9432_v63  ;;  %v1924_v40 = vsel %vm1923_vm2, 1, %v9432_v63 }
 0x24b   : > { %v1894_v45 = vshrl.u32 %v1890_v27, 16  ;;  %v1904_v2 = vadd.s32 %v1902_v46, %v1900_v36  ;;  %v1926_v53 = vadd.s32 %v1924_v40, %v1922_v29  ;;  %v5201_v30 = vadd.s32 4294967169, %v1532_v24 }
 0x24c   : > { %v2739_v33 = vmul.f32 %v2738_v23, %v2734_v16  ;;  %v2746_v59 = vmul.f32 %v2745_v1, %v2734_v16  ;;  %v1896_v3 = vshrl.u32 %v1891_v20, 16  ;;  %v1918_v4 = vshrl.u32 %v1913_v34, 16 }
 0x24d   : > { %v1905_v18 = vadd.s32 %v1904_v2, %v1894_v45  ;;  %v1927_v42 = vadd.s32 %v1926_v53, %v1916_v9  ;;  %v1538_v11 = vadd.s32 1, %v5201_v30  ;;  %v7019_v47 = vmul.f32 %v6924_v43, %v4920_v54 }
 0x24e   : > { %v2740_v52 = vadd.f32 1.0, %v2739_v33  ;;  %v2747_v10 = vadd.f32 1.0, %v2746_v59  ;;  %v1875_v27 = vsel %vm1869_vm14, %v1872_v61, %v1874_v51  ;;  %v1535_v24 = vand.u32 8388607, %v1528_v41 }
 0x24f   : > { %v7025_v39 = vadd.s32 %v1905_v18, %v1896_v3  ;;  %v7027_v16 = vadd.s32 %v1921_v8, %v1917_v35  ;;  %v1928_v34 = vadd.s32 %v1927_v42, %v1918_v4  ;;  %vm1539_vm3 = vcmp.gt.s32.totalorder %v1538_v11, 0 }
 0x250   : > { %v2748_v20 = vmul.f32 %v2747_v10, %v2732_v21  ;;  %v2756_v55 = vxor.u32 2147483648, %v2740_v52  ;;  %v1540_v57 = vsel %vm1539_vm3, %v1538_v11, 0  ;;  %vm2749_vm4 = vweird.f32 %v6733_v32 }
 0x251   : > { %vm2751_vm5 = vcmp.lt.s32.totalorder %v6959_v31, 2  ;;  %vm1931_vm6 = vc.u32 %v7025_v39, %v7027_v16  ;;  %v1932_v43 = vadd.s32 1, %v1928_v34  ;;  %vm2752_vm7 = vcmp.eq.s32.totalorder %v6959_v31, 0 }
 0x252   : > { %v2753_v54 = vxor.u32 2147483648, %v2748_v20  ;;  %v1929_v38 = vmul.u32 %v6984_v25, %v1875_v27  ;;  %v1542_v61 = vand.u32 31, %v1540_v57  ;;  %vm2755_vm8 = vcmp.eq.s32.totalorder %v6959_v31, 2  ;;  %v5373_v25 = vpop.eup %5372 }
 0x253   : > { %v1933_v21 = vsel %vm1931_vm6, %v1932_v43, %v1928_v34  ;;  %v1536_v51 = vor.u32 8388608, %v1535_v24  ;;  %v7037_v0 = vshrl.u32 %v1540_v57, 5  ;;  %v2757_v9 = vsel %vm2755_vm8, %v2756_v55, %v2748_v20 }
 0x254   : > { %v2754_v17 = vsel %vm2752_vm7, %v2740_v52, %v2753_v54  ;;  %v1934_v13 = vadd.s32 %v1933_v21, %v1929_v38  ;;  %v1543_v7 = vsub.s32 32, %v1542_v61  ;;  %v1545_v35 = vshll.u32 %v9431_v37, %v1542_v61 }
 0x255   : > { %v2758_v50 = vsel %vm2751_vm5, %v2754_v17, %v2757_v9  ;;  %v1548_v62 = vshll.u32 %v9433_v56, %v1542_v61  ;;  %v1551_v8 = vshll.u32 %v9434_v6, %v1542_v61  ;;  %v1554_v60 = vshll.u32 %v9435_v49, %v1542_v61 }
 0x256   : > { %v2759_v31 = vsel %vm2749_vm4, nan, %v2758_v50  ;;  %v1935_v28 = vadd.s32 536870912, %v1934_v13  ;;  %v1546_v48 = vshrl.u32 %v9433_v56, %v1543_v7  ;;  %v1549_v36 = vshrl.u32 %v9434_v6, %v1543_v7 }
 0x257   : > { %v5058_v22 = vmul.f32 %v5373_v25, %v2759_v31  ;;  %v1552_v29 = vshrl.u32 %v9435_v49, %v1543_v7  ;;  %v1555_v23 = vshrl.u32 %v9436_v15, %v1543_v7  ;;  %v1557_v40 = vshll.u32 %v9436_v15, %v1542_v61 }
 0x258   : > { %v7049_v1 = vshrl.u32 %v1935_v28, 30  ;;  %v1547_v46 = vor.u32 %v1546_v48, %v1545_v35  ;;  %v1558_v32 = vshrl.u32 %v9437_v58, %v1543_v7  ;;  %v7054_v45 = vor.u32 %v1549_v36, %v1548_v62 }
 0x259   : > { %5084 = vst [vmem:[%s6423_s27 + $0x58] sm:$0xff] %v5058_v22  ;;  %v1553_v2 = vor.u32 %v1552_v29, %v1551_v8  ;;  %v1556_v53 = vor.u32 %v1555_v23, %v1554_v60  ;;  %vm1560_vm9 = vcmp.lt.s32.totalorder %v7037_v0, 1  ;;  %vm1563_vm10 = vcmp.lt.s32.totalorder %v7037_v0, 4 }
 0x25a   : > { %v1937_v30 = vshll.u32 %v7049_v1, 30  ;;  %v1559_v33 = vor.u32 %v1558_v32, %v1557_v40  ;;  %vm1562_vm11 = vcmp.lt.s32.totalorder %v7037_v0, 3  ;;  %v1568_v59 = vsel %vm1560_vm9, %v1547_v46, %v7054_v45 }
 0x25b   : > { %v1569_v3 = vsel %vm1563_vm10, %v1556_v53, 920167782  ;;  %v7065_v4 = vshll.u32 %v1536_v51, 8  ;;  %vm1561_vm12 = vcmp.lt.s32.totalorder %v7037_v0, 2  ;;  %v1572_v11 = vsel %vm1560_vm9, %v7054_v45, %v1553_v2 }
 0x25c   : > { %v1938_v18 = vsub.s32 %v1934_v13, %v1937_v30  ;;  %v1570_v42 = vsel %vm1562_vm11, %v1553_v2, %v1569_v3  ;;  %v1573_v10 = vsel %vm1563_vm10, %v1559_v33, 1326507024  ;;  %v1544_v61 = vshrl.u32 %v9431_v37, %v1543_v7 }
 0x25d   : > { %v1571_v52 = vsel %vm1561_vm12, %v1568_v59, %v1570_v42  ;;  %v1574_v24 = vsel %vm1562_vm11, %v1556_v53, %v1573_v10  ;;  %v1577_v43 = vand.u32 65535, %v7065_v4  ;;  %v1578_v54 = vshrl.u32 %v7065_v4, 16  ;;  %v570_v42 = vpop.permute.xlu2 %569 }
 0x25e   : > { %vm1939_vm13 = vcmp.lt.s32.totalorder %v1938_v18, 0  ;;  %v1940_v27 = vsub.s32 0, %v1938_v18  ;;  %v1575_v34 = vsel %vm1561_vm12, %v1572_v11, %v1574_v24  ;;  %v1601_v20 = vand.u32 65535, %v1571_v52 }
 0x25f   : > { %v1602_v55 = vshrl.u32 %v1571_v52, 16  ;;  %v1579_v21 = vand.u32 65535, %v1575_v34  ;;  %v1580_v51 = vshrl.u32 %v1575_v34, 16  ;;  %v1930_v17 = vadd.s32 %v7027_v16, %v7025_v39 }
 0x260   : > { %v1941_v57 = vsel %vm1939_vm13, %v1940_v27, %v1938_v18  ;;  %v1605_v13 = vmul.u32 %v1601_v20, %v1578_v54  ;;  %v1564_v35 = vsel %vm1560_vm9, %v1544_v61, %v1547_v46  ;;  %v1565_v25 = vsel %vm1563_vm10, %v1553_v2, 2102212464 }
 0x261   : > { %v1942_v38 = vclz %v1941_v57  ;;  %v1604_v9 = vmul.u32 %v1602_v55, %v1577_v43  ;;  %v1582_v62 = vmul.u32 %v1580_v51, %v1577_v43  ;;  %v1583_v8 = vmul.u32 %v1579_v21, %v1578_v54 }
 0x262   : > { %v1603_v31 = vmul.u32 %v1601_v20, %v1577_v43  ;;  %v1606_v28 = vmul.u32 %v1602_v55, %v1578_v54  ;;  %v1581_v7 = vmul.u32 %v1579_v21, %v1577_v43  ;;  %v1584_v60 = vmul.u32 %v1580_v51, %v1578_v54  ;;  %v7100_v43 = vld [vmem:[%s9373_s1 + $0x5] ss:$0 sm:$0xff] }
 0x263   : > { %v5208_v50 = vadd.s32 4294967294, %v1942_v38  ;;  %v1607_v48 = vshll.u32 %v1604_v9, 16  ;;  %v1585_v22 = vshll.u32 %v1582_v62, 16  ;;  %v1587_v39 = vshll.u32 %v1583_v8, 16 }
 0x264   : > { %v1609_v16 = vshll.u32 %v1605_v13, 16  ;;  %v1566_v11 = vsel %vm1562_vm11, %v7054_v45, %v1565_v25  ;;  %v1608_v52 = vshrl.u32 %v1604_v9, 16  ;;  %v1586_v20 = vshrl.u32 %v1582_v62, 16  ;;  %v9458_v9 = vld [vmem:[#allocation10_spill] sm:$0xff] }
 0x265   : > { %vm5209_vm14 = vcmp.lt.s32.totalorder %v5208_v50, 0  ;;  %vm1611_vm15 = vc.u32 %v1603_v31, %v1607_v48  ;;  %vm1589_vm0 = vc.u32 %v1581_v7, %v1585_v22  ;;  %v1591_v32 = vadd.s32 %v1585_v22, %v1581_v7 }
 0x266   : > { %v1945_v36 = vsel %vm5209_vm14, 0, %v5208_v50  ;;  %v1590_v46 = vsel %vm1589_vm0, 1, %v9432_v63  ;;  %v1612_v2 = vsel %vm1611_vm15, 1, %v9432_v63  ;;  %v1613_v53 = vadd.s32 %v1607_v48, %v1603_v31 }
 0x267   : > { %v1946_v29 = vsub.s32 32, %v1945_v36  ;;  %v1947_v23 = vshll.u32 %v1938_v18, %v1945_v36  ;;  %v1950_v40 = vsub.s32 4294967266, %v1945_v36  ;;  %v1592_v59 = vadd.s32 %v1590_v46, %v1584_v60  ;;  %v550_v18 = vpop.permute.xlu0 %549 }
 0x268   : > { %v1614_v3 = vadd.s32 %v1612_v2, %v1606_v28  ;;  %vm1593_vm1 = vc.u32 %v1591_v32, %v1587_v39  ;;  %vm1615_vm2 = vc.u32 %v1613_v53, %v1609_v16  ;;  %v767_v45 = vmul.f32 %v7100_v43, %v570_v42  ;;  %v9459_v28 = vld [vmem:[#allocation17_spill] sm:$0xff] }
 0x269   : > { %v1948_v30 = vshrl.u32 %v1930_v17, %v1946_v29  ;;  %v1951_v33 = vadd.s32 127, %v1950_v40  ;;  %v1594_v24 = vsel %vm1593_vm1, 1, %v9432_v63  ;;  %v1616_v34 = vsel %vm1615_vm2, 1, %v9432_v63 }
 0x26a   : > { %v1596_v55 = vadd.s32 %v1594_v24, %v1592_v59  ;;  %v1618_v57 = vadd.s32 %v1616_v34, %v1614_v3  ;;  %v1588_v38 = vshrl.u32 %v1583_v8, 16  ;;  %v762_v61 = vmul.f32 %v7100_v43, %v550_v18  ;;  %v9462_v59 = vld [vmem:[#allocation9_spill] sm:$0xff] }
 0x26b   : > { %v1949_v10 = vor.u32 %v1948_v30, %v1947_v23  ;;  %v1952_v27 = vshll.u32 %v1951_v33, 23  ;;  %v1610_v51 = vshrl.u32 %v1605_v13, 16  ;;  %v793_v50 = vadd.f32 %v767_v45, %v9458_v9 }
 0x26c   : > { %v1597_v21 = vadd.s32 %v1596_v55, %v1586_v20  ;;  %v1619_v17 = vadd.s32 %v1618_v57, %v1608_v52  ;;  %v1567_v31 = vsel %vm1561_vm12, %v1564_v35, %v1566_v11  ;;  %v7108_v48 = vadd.f32 %v762_v61, %v9459_v28  ;;  %v7121_v35 = vld [vmem:[%s9373_s1 + $0x2] ss:$0 sm:$0xff] }
 0x26d   : > { %v1953_v54 = vor.u32 4788187, %v1952_v27  ;;  %v1956_v62 = vcvt.s32.f32 %v1949_v10  ;;  %v7112_v60 = vadd.s32 %v1613_v53, %v1609_v16  ;;  %v821_v22 = vadd.f32 1.000001, %v793_v50  ;;  %v9463_v10 = vld [vmem:[#allocation16_spill] sm:$0xff] }
 0x26e   : > { %v7110_v7 = vadd.s32 %v1597_v21, %v1588_v38  ;;  %v1620_v8 = vadd.s32 %v1619_v17, %v1610_v51  ;;  %v816_v13 = vadd.f32 1.000001, %v7108_v48  ;;  %v1621_v0 = vmul.u32 %v7065_v4, %v1567_v31  ;;  %v7156_v51 = vld [vmem:[%s9373_s1 + $0x6] ss:$0 sm:$0xff] }
 0x26f   : > { %v1954_v25 = vand.u32 2147483647, %v1953_v54  ;;  %5374 = vrcp.f32 %v821_v22  ;;  %v631_v16 = vmul.f32 %v7121_v35, %v570_v42  ;;  %vm1838_vm4 = vcmp.lt.s32.totalorder %v6927_v14, 0 }
 0x270   : > { %vm1623_vm3 = vc.u32 %v7110_v7, %v7112_v60  ;;  %v1624_v39 = vadd.s32 1, %v1620_v8  ;;  %5376 = vrcp.f32 %v816_v13  ;;  %v1960_v23 = vsub.s32 4, %v7049_v1 }
 0x271   : > { %v1957_v36 = vmul.f32 %v1956_v62, %v1954_v25  ;;  %v626_v46 = vmul.f32 %v7121_v35, %v550_v18  ;;  %vm7129_vm5 = vcmp.le.f32.partialorder %v1836_v19, 0.7853982  ;;  %v657_v3 = vadd.f32 %v631_v16, %v9462_v59  ;;  %v7141_v19 = vld [vmem:[%s9373_s1 + $0x7] ss:$0 sm:$0xff] }
 0x272   : > { %v1625_v40 = vsel %vm1623_vm3, %v1624_v39, %v1620_v8  ;;  %v1961_v11 = vsel %vm1838_vm4, %v1960_v23, %v7049_v1  ;;  %v4975_v52 = vmul.f32 %v7141_v19, %v6917_v12  ;;  %v4930_v18 = vsub.f32 1.0, %v793_v50 }
 0x273   : > { %v1958_v29 = vxor.u32 2147483648, %v1957_v36  ;;  %v1626_v2 = vadd.s32 %v1625_v40, %v1621_v0  ;;  %v652_v27 = vadd.f32 %v626_v46, %v9463_v10  ;;  %v1963_v54 = vsel %vm7129_vm5, 0, %v1961_v11 }
 0x274   : > { %v5007_v12 = vmul.f32 1.442695, %v4975_v52  ;;  %v1980_v62 = vand.u32 3, %v1963_v54  ;;  %v4973_v31 = vmul.f32 %v7141_v19, %v7019_v47  ;;  %vm1979_vm7 = vweird.f32 %v6927_v14 }
 0x275   : > { %v1959_v4 = vsel %vm1838_vm4, %v1958_v29, %v1957_v36  ;;  %v1627_v33 = vadd.s32 536870912, %v1626_v2  ;;  %v5375_v42 = vpop.eup %5374  ;;  %vm7168_vm8 = vcmp.le.f32.partialorder %v1528_v41, 0.7853982  ;;  %vm1530_vm9 = vcmp.lt.s32.totalorder %v6962_v44, 0 }
 0x276   : > { %v1962_v53 = vsel %vm7129_vm5, %v6927_v14, %v1959_v4  ;;  %v7146_v24 = vpop.eup %5376  ;;  %v873_v57 = vmul.f32 %v5375_v42, %v657_v3  ;;  %v7148_v45 = vmul.f32 %v5375_v42, %v4930_v18  ;;  %5378 = vpow2.f32 %v5007_v12 }
 0x277   : > { %v1964_v30 = vmul.f32 %v1962_v53, %v1962_v53  ;;  %v1628_v55 = vshrl.u32 %v1627_v33, 30  ;;  %v868_v1 = vmul.f32 %v7146_v24, %v652_v27  ;;  %v5003_v46 = vmul.f32 1.442695, %v4973_v31 }
 0x278   : > { %v7159_v17 = vmul.f32 %v7156_v51, %v873_v57  ;;  %vm1981_vm10 = vcmp.lt.s32.totalorder %v1980_v62, 2  ;;  %vm1982_vm11 = vcmp.eq.s32.totalorder %v1980_v62, 0  ;;  %vm1985_vm12 = vcmp.eq.s32.totalorder %v1980_v62, 2 }
 0x279   : > { %v1965_v34 = vmul.f32 -0.001358992, %v1964_v30  ;;  %v1972_v20 = vmul.f32 -0.00019511016, %v1964_v30  ;;  %v1629_v21 = vshll.u32 %v1628_v55, 30  ;;  %v1652_v13 = vsub.s32 4, %v1628_v55 }
 0x27a   : > { %v3071_v28 = vand.u32 2139095040, %v7159_v17  ;;  %v3068_v23 = vand.u32 2147483647, %v7159_v17  ;;  %v1622_v52 = vadd.s32 %v7112_v60, %v7110_v7  ;;  %5380 = vpow2.f32 %v5003_v46 }
 0x27b   : > { %v1966_v38 = vadd.f32 0.041655596, %v1965_v34  ;;  %v1973_v61 = vadd.f32 0.008332121, %v1972_v20  ;;  %v1630_v25 = vsub.s32 %v1626_v2, %v1629_v21  ;;  %v1653_v33 = vsel %vm1530_vm9, %v1652_v13, %v1628_v55 }
 0x27c   : > { %v3072_v39 = vshrl.u32 %v3071_v28, 23  ;;  %v3075_v41 = vand.u32 8388607, %v3068_v23  ;;  %v5379_v11 = vpop.eup %5378  ;;  %v4925_v18 = vsub.f32 1.0, %v7108_v48  ;;  %v7181_v34 = vmul.f32 %v7156_v51, %v868_v1 }
 0x27d   : > { %v1967_v9 = vmul.f32 %v1966_v38, %v1964_v30  ;;  %v1974_v50 = vmul.f32 %v1973_v61, %v1964_v30  ;;  %vm1631_vm6 = vcmp.lt.s32.totalorder %v1630_v25, 0  ;;  %v1632_v36 = vsub.s32 0, %v1630_v25 }
 0x27e   : > { %v5231_v2 = vadd.s32 4294967169, %v3072_v39  ;;  %v1655_v55 = vsel %vm7168_vm8, 0, %v1653_v33  ;;  %v3076_v60 = vor.u32 8388608, %v3075_v41 }
 0x27f   : > { %v1968_v8 = vadd.f32 -0.4999988, %v1967_v9  ;;  %v1975_v22 = vadd.f32 -0.16666654, %v1974_v50  ;;  %v1633_v16 = vsel %vm1631_vm6, %v1632_v36, %v1630_v25 }
 0x280   : > { %v1634_v40 = vclz %v1633_v16  ;;  %v3078_v42 = vadd.s32 1, %v5231_v2  ;;  %v7203_v46 = vshll.u32 %v3076_v60, 8 }
 0x281   : > { %v1969_v29 = vmul.f32 %v1968_v8, %v1964_v30  ;;  %v1976_v0 = vmul.f32 %v1975_v22, %v1964_v30  ;;  %v7193_v8 = vpop.eup %5380 }
 0x282   : > { %v5202_v30 = vadd.s32 4294967294, %v1634_v40  ;;  %vm3079_vm14 = vcmp.gt.s32.totalorder %v3078_v42, 0 }
 0x283   : > { %v1970_v32 = vadd.f32 1.0, %v1969_v29  ;;  %v1977_v4 = vadd.f32 1.0, %v1976_v0  ;;  %v3080_v57 = vsel %vm3079_vm14, %v3078_v42, 0  ;;  %v7209_v42 = vand.u32 3, %v1655_v55 }
 0x284   : > { %vm5203_vm13 = vcmp.lt.s32.totalorder %v5202_v30, 0  ;;  %v3082_v38 = vand.u32 31, %v3080_v57  ;;  %v7190_v50 = vshrl.u32 %v3080_v57, 5  ;;  %v3117_v57 = vand.u32 65535, %v7203_v46 }
 0x285   : > { %v1978_v59 = vmul.f32 %v1977_v4, %v1962_v53  ;;  %v1986_v3 = vxor.u32 2147483648, %v1970_v32  ;;  %v1637_v27 = vsel %vm5203_vm13, 0, %v5202_v30  ;;  %vm1674_vm6 = vcmp.eq.s32.totalorder %v7209_v42, 0 }
 0x286   : > { %v1638_v53 = vsub.s32 32, %v1637_v27  ;;  %v1642_v20 = vsub.s32 4294967266, %v1637_v27  ;;  %v1639_v21 = vshll.u32 %v1630_v25, %v1637_v27  ;;  %v3083_v31 = vsub.s32 32, %v3082_v38 }
 0x287   : > { %v1983_v10 = vxor.u32 2147483648, %v1978_v59  ;;  %v1987_v7 = vsel %vm1985_vm12, %v1986_v3, %v1978_v59  ;;  %v3085_v28 = vshll.u32 %v9431_v37, %v3082_v38  ;;  %v3088_v62 = vshll.u32 %v9433_v56, %v3082_v38 }
 0x288   : > { %v1640_v12 = vshrl.u32 %v1622_v52, %v1638_v53  ;;  %v1643_v9 = vadd.s32 127, %v1642_v20  ;;  %v3086_v25 = vshrl.u32 %v9433_v56, %v3083_v31  ;;  %v3089_v39 = vshrl.u32 %v9434_v6, %v3083_v31 }
 0x289   : > { %v1984_v54 = vsel %vm1982_vm11, %v1970_v32, %v1983_v10  ;;  %v3091_v29 = vshll.u32 %v9434_v6, %v3082_v38  ;;  %v3092_v14 = vshrl.u32 %v9435_v49, %v3083_v31  ;;  %v3094_v16 = vshll.u32 %v9435_v49, %v3082_v38 }
 0x28a   : > { %v1988_v61 = vsel %vm1981_vm10, %v1984_v54, %v1987_v7  ;;  %v1641_v36 = vor.u32 %v1640_v12, %v1639_v21  ;;  %v1644_v13 = vshll.u32 %v1643_v9, 23  ;;  %v3095_v40 = vshrl.u32 %v9436_v15, %v3083_v31 }
 0x28b   : > { %v1989_v1 = vsel %vm1979_vm7, nan, %v1988_v61  ;;  %v3087_v4 = vor.u32 %v3086_v25, %v3085_v28  ;;  %v7205_v2 = vor.u32 %v3089_v39, %v3088_v62  ;;  %v3093_v30 = vor.u32 %v3092_v14, %v3091_v29 }
 0x28c   : > { %v5053_v22 = vmul.f32 %v5379_v11, %v1989_v1  ;;  %v1645_v0 = vor.u32 4788187, %v1644_v13  ;;  %v1648_v32 = vcvt.s32.f32 %v1641_v36  ;;  %v3096_v59 = vor.u32 %v3095_v40, %v3094_v16 }
 0x28d   : > { %v3097_v3 = vshll.u32 %v9436_v15, %v3082_v38  ;;  %v3098_v41 = vshrl.u32 %v9437_v58, %v3083_v31  ;;  %vm3100_vm15 = vcmp.lt.s32.totalorder %v7190_v50, 1  ;;  %v2298_v11 = vand.u32 2147483647, %v7181_v34 }
 0x28e   : > { %5079 = vst [vmem:[%s6423_s27 + $0x30] sm:$0xff] %v5053_v22  ;;  %v1646_v33 = vand.u32 2147483647, %v1645_v0  ;;  %v2301_v52 = vand.u32 2139095040, %v7181_v34  ;;  %vm3103_vm0 = vcmp.lt.s32.totalorder %v7190_v50, 4  ;;  %v3108_v53 = vsel %vm3100_vm15, %v3087_v4, %v7205_v2 }
 0x28f   : > { %v3099_v27 = vor.u32 %v3098_v41, %v3097_v3  ;;  %vm3102_vm1 = vcmp.lt.s32.totalorder %v7190_v50, 3  ;;  %v3109_v20 = vsel %vm3103_vm0, %v3096_v59, 920167782  ;;  %v3112_v55 = vsel %vm3100_vm15, %v7205_v2, %v3093_v30 }
 0x290   : > { %v1649_v10 = vmul.f32 %v1648_v32, %v1646_v33  ;;  %vm3101_vm2 = vcmp.lt.s32.totalorder %v7190_v50, 2  ;;  %v3110_v7 = vsel %vm3102_vm1, %v3093_v30, %v3109_v20  ;;  %v3084_v38 = vshrl.u32 %v9431_v37, %v3083_v31 }
 0x291   : > { %v3113_v60 = vsel %vm3103_vm0, %v3099_v27, 1326507024  ;;  %v3111_v61 = vsel %vm3101_vm2, %v3108_v53, %v3110_v7  ;;  %v2302_v12 = vshrl.u32 %v2301_v52, 23  ;;  %v3118_v31 = vshrl.u32 %v7203_v46, 16 }
 0x292   : > { %v1650_v54 = vxor.u32 2147483648, %v1649_v10  ;;  %v3114_v21 = vsel %vm3102_vm1, %v3096_v59, %v3113_v60  ;;  %v3141_v28 = vand.u32 65535, %v3111_v61  ;;  %v3142_v22 = vshrl.u32 %v3111_v61, 16 }
 0x293   : > { %v3115_v1 = vsel %vm3101_vm2, %v3112_v55, %v3114_v21  ;;  %v3104_v39 = vsel %vm3100_vm15, %v3084_v38, %v3087_v4  ;;  %v3105_v29 = vsel %vm3103_vm0, %v3093_v30, 2102212464  ;;  %v7253_v47 = vand.u32 8388607, %v2298_v11 }
 0x294   : > { %v1651_v9 = vsel %vm1530_vm9, %v1650_v54, %v1649_v10  ;;  %v3119_v13 = vand.u32 65535, %v3115_v1  ;;  %v3120_v62 = vshrl.u32 %v3115_v1, 16  ;;  %v3144_v14 = vmul.u32 %v3142_v22, %v3117_v57 }
 0x295   : > { %v7242_v36 = vsel %vm7168_vm8, %v6962_v44, %v1651_v9  ;;  %v3145_v40 = vmul.u32 %v3141_v28, %v3118_v31  ;;  %v5216_v3 = vadd.s32 4294967169, %v2302_v12  ;;  %v3143_v27 = vmul.u32 %v3141_v28, %v3117_v57 }
 0x296   : > { %v1656_v25 = vmul.f32 %v7242_v36, %v7242_v36  ;;  %v3122_v0 = vmul.u32 %v3120_v62, %v3117_v57  ;;  %v3123_v16 = vmul.u32 %v3119_v13, %v3118_v31  ;;  %v3147_v59 = vshll.u32 %v3144_v14, 16 }
 0x297   : > { %v3121_v41 = vmul.u32 %v3119_v13, %v3117_v57  ;;  %v3124_v52 = vmul.u32 %v3120_v62, %v3118_v31  ;;  %v3146_v30 = vmul.u32 %v3142_v22, %v3118_v31  ;;  %v3149_v54 = vshll.u32 %v3145_v40, 16 }
 0x298   : > { %v1657_v32 = vmul.f32 -0.001358992, %v1656_v25  ;;  %v1664_v33 = vmul.f32 -0.00019511016, %v1656_v25  ;;  %v3125_v10 = vshll.u32 %v3122_v0, 16  ;;  %v3127_v20 = vshll.u32 %v3123_v16, 16 }
 0x299   : > { %vm3151_vm4 = vc.u32 %v3143_v27, %v3147_v59  ;;  %v3153_v12 = vadd.s32 %v3147_v59, %v3143_v27  ;;  %v3106_v28 = vsel %vm3102_vm1, %v7205_v2, %v3105_v29  ;;  %vm1677_vm7 = vcmp.eq.s32.totalorder %v7209_v42, 2 }
 0x29a   : > { %v1658_v4 = vadd.f32 0.041655596, %v1657_v32  ;;  %v1665_v53 = vadd.f32 0.008332121, %v1664_v33  ;;  %vm3129_vm3 = vc.u32 %v3121_v41, %v3125_v10  ;;  %v3131_v55 = vadd.s32 %v3125_v10, %v3121_v41 }
 0x29b   : > { %v3130_v38 = vsel %vm3129_vm3, 1, %v9432_v63  ;;  %v3152_v61 = vsel %vm3151_vm4, 1, %v9432_v63  ;;  %v3126_v31 = vshrl.u32 %v3122_v0, 16  ;;  %vm3155_vm8 = vc.u32 %v3153_v12, %v3149_v54 }
 0x29c   : > { %v1659_v7 = vmul.f32 %v1658_v4, %v1656_v25  ;;  %v1666_v60 = vmul.f32 %v1665_v53, %v1656_v25  ;;  %v3132_v21 = vadd.s32 %v3130_v38, %v3124_v52  ;;  %vm3133_vm5 = vc.u32 %v3131_v55, %v3127_v20 }
 0x29d   : > { %v3154_v9 = vadd.s32 %v3152_v61, %v3146_v30  ;;  %v3134_v22 = vsel %vm3133_vm5, 1, %v9432_v63  ;;  %v2308_v62 = vadd.s32 1, %v5216_v3  ;;  %vm1673_vm9 = vcmp.lt.s32.totalorder %v7209_v42, 2 }
 0x29e   : > { %v1660_v1 = vadd.f32 -0.4999988, %v1659_v7  ;;  %v1667_v57 = vadd.f32 -0.16666654, %v1666_v60  ;;  %v3136_v13 = vadd.s32 %v3134_v22, %v3132_v21  ;;  %v3128_v59 = vshrl.u32 %v3123_v16, 16 }
 0x29f   : > { %v3156_v41 = vsel %vm3155_vm8, 1, %v9432_v63  ;;  %vm1671_vm10 = vweird.f32 %v6962_v44  ;;  %v3148_v29 = vshrl.u32 %v3144_v14, 16  ;;  %vm2309_vm11 = vcmp.gt.s32.totalorder %v2308_v62, 0 }
 0x2a0   : > { %v1661_v32 = vmul.f32 %v1660_v1, %v1656_v25  ;;  %v1668_v33 = vmul.f32 %v1667_v57, %v1656_v25  ;;  %v3137_v2 = vadd.s32 %v3136_v13, %v3126_v31  ;;  %v3158_v52 = vadd.s32 %v3156_v41, %v3154_v9 }
 0x2a1   : > { %v3107_v0 = vsel %vm3101_vm2, %v3104_v39, %v3106_v28  ;;  %v2310_v4 = vsel %vm2309_vm11, %v2308_v62, 0  ;;  %v3150_v25 = vshrl.u32 %v3145_v40, 16  ;;  %v3157_v55 = vadd.s32 %v3153_v12, %v3149_v54 }
 0x2a2   : > { %v1662_v10 = vadd.f32 1.0, %v1661_v32  ;;  %v1669_v27 = vadd.f32 1.0, %v1668_v33  ;;  %v7268_v3 = vadd.s32 %v3137_v2, %v3128_v59  ;;  %v3159_v53 = vadd.s32 %v3158_v52, %v3148_v29 }
 0x2a3   : > { %v2312_v20 = vand.u32 31, %v2310_v4  ;;  %v7274_v14 = vmul.f32 %v7146_v24, %v4925_v18  ;;  %v3161_v60 = vmul.u32 %v7203_v46, %v3107_v0  ;;  %v2306_v50 = vor.u32 8388608, %v7253_v47 }
 0x2a4   : > { %v1670_v16 = vmul.f32 %v1669_v27, %v7242_v36  ;;  %v1678_v30 = vxor.u32 2147483648, %v1662_v10  ;;  %v3160_v7 = vadd.s32 %v3159_v53, %v3150_v25  ;;  %vm3163_vm12 = vc.u32 %v7268_v3, %v3157_v55 }
 0x2a5   : > { %v2313_v39 = vsub.s32 32, %v2312_v20  ;;  %v7279_v40 = vshrl.u32 %v2310_v4, 5  ;;  %v2315_v36 = vshll.u32 %v9431_v37, %v2312_v20  ;;  %v2318_v48 = vshll.u32 %v9433_v56, %v2312_v20 }
 0x2a6   : > { %v1675_v38 = vxor.u32 2147483648, %v1670_v16  ;;  %v3164_v61 = vadd.s32 1, %v3160_v7  ;;  %v1679_v46 = vsel %vm1677_vm7, %v1678_v30, %v1670_v16  ;;  %v2321_v47 = vshll.u32 %v9434_v6, %v2312_v20 }
 0x2a7   : > { %v2316_v54 = vshrl.u32 %v9433_v56, %v2313_v39  ;;  %v2319_v24 = vshrl.u32 %v9434_v6, %v2313_v39  ;;  %v2322_v21 = vshrl.u32 %v9435_v49, %v2313_v39  ;;  %v2324_v31 = vshll.u32 %v9435_v49, %v2312_v20 }
 0x2a8   : > { %v1676_v18 = vsel %vm1674_vm6, %v1662_v10, %v1675_v38  ;;  %v3165_v9 = vsel %vm3163_vm12, %v3164_v61, %v3160_v7  ;;  %v2325_v13 = vshrl.u32 %v9436_v15, %v2313_v39  ;;  %v2327_v42 = vshll.u32 %v9436_v15, %v2312_v20 }
 0x2a9   : > { %v1680_v12 = vsel %vm1673_vm9, %v1676_v18, %v1679_v46  ;;  %v7293_v1 = vor.u32 %v2316_v54, %v2315_v36  ;;  %v7295_v57 = vor.u32 %v2319_v24, %v2318_v48  ;;  %v3166_v22 = vadd.s32 %v3165_v9, %v3161_v60 }
 0x2aa   : > { %v1681_v28 = vsel %vm1671_vm10, nan, %v1680_v12  ;;  %v2323_v32 = vor.u32 %v2322_v21, %v2321_v47  ;;  %v2328_v33 = vshrl.u32 %v9437_v58, %v2313_v39  ;;  %v2326_v41 = vor.u32 %v2325_v13, %v2324_v31 }
 0x2ab   : > { %v5051_v62 = vmul.f32 %v7193_v8, %v1681_v28  ;;  %v3167_v59 = vadd.s32 536870912, %v3166_v22  ;;  %vm2330_vm13 = vcmp.lt.s32.totalorder %v7279_v40, 1  ;;  %vm2333_vm14 = vcmp.lt.s32.totalorder %v7279_v40, 4 }
 0x2ac   : > { %v2329_v2 = vor.u32 %v2328_v33, %v2327_v42  ;;  %v2338_v44 = vsel %vm2330_vm13, %v7293_v1, %v7295_v57  ;;  %vm2332_vm15 = vcmp.lt.s32.totalorder %v7279_v40, 3  ;;  %v2339_v8 = vsel %vm2333_vm14, %v2326_v41, 920167782 }
 0x2ad   : > { %5077 = vst [vmem:[%s6423_s27 + $0x20] sm:$0xff] %v5051_v62  ;;  %v7311_v29 = vshrl.u32 %v3167_v59, 30  ;;  %v7316_v52 = vshll.u32 %v2306_v50, 8  ;;  %vm2331_vm0 = vcmp.lt.s32.totalorder %v7279_v40, 2  ;;  %v2340_v10 = vsel %vm2332_vm15, %v2323_v32, %v2339_v8 }
 0x2ae   : > { %v2342_v27 = vsel %vm2330_vm13, %v7295_v57, %v2323_v32  ;;  %v2343_v0 = vsel %vm2333_vm14, %v2329_v2, 1326507024  ;;  %v2341_v25 = vsel %vm2331_vm0, %v2338_v44, %v2340_v10  ;;  %v3162_v18 = vadd.s32 %v3157_v55, %v7268_v3 }
 0x2af   : > { %v3169_v4 = vshll.u32 %v7311_v29, 30  ;;  %v2344_v53 = vsel %vm2332_vm15, %v2326_v41, %v2343_v0  ;;  %v2372_v20 = vshrl.u32 %v2341_v25, 16  ;;  %v2347_v7 = vand.u32 65535, %v7316_v52 }
 0x2b0   : > { %v2345_v30 = vsel %vm2331_vm0, %v2342_v27, %v2344_v53  ;;  %v2348_v60 = vshrl.u32 %v7316_v52, 16  ;;  %v2371_v61 = vand.u32 65535, %v2341_v25  ;;  %v2314_v47 = vshrl.u32 %v9431_v37, %v2313_v39  ;;  %v542_v53 = vpop.permute.xlu1 %541 }
 0x2b1   : > { %v3170_v16 = vsub.s32 %v3166_v22, %v3169_v4  ;;  %v2349_v50 = vand.u32 65535, %v2345_v30  ;;  %v2350_v38 = vshrl.u32 %v2345_v30, 16  ;;  %v2374_v54 = vmul.u32 %v2372_v20, %v2347_v7 }
 0x2b2   : > { %v2335_v12 = vsel %vm2333_vm14, %v2323_v32, 2102212464  ;;  %v2373_v31 = vmul.u32 %v2371_v61, %v2347_v7  ;;  %v2375_v13 = vmul.u32 %v2371_v61, %v2348_v60  ;;  %v2376_v3 = vmul.u32 %v2372_v20, %v2348_v60 }
 0x2b3   : > { %vm3171_vm1 = vcmp.lt.s32.totalorder %v3170_v16, 0  ;;  %v3172_v36 = vsub.s32 0, %v3170_v16  ;;  %v2352_v48 = vmul.u32 %v2350_v38, %v2347_v7  ;;  %v2353_v24 = vmul.u32 %v2349_v50, %v2348_v60 }
 0x2b4   : > { %v2351_v9 = vmul.u32 %v2349_v50, %v2347_v7  ;;  %v2354_v22 = vmul.u32 %v2350_v38, %v2348_v60  ;;  %v2377_v62 = vshll.u32 %v2374_v54, 16  ;;  %v2379_v55 = vshll.u32 %v2375_v13, 16  ;;  %v582_v60 = vpop.permute.xlu2 %581 }
 0x2b5   : > { %v3173_v46 = vsel %vm3171_vm1, %v3172_v36, %v3170_v16  ;;  %v2355_v28 = vshll.u32 %v2352_v48, 16  ;;  %v2357_v33 = vshll.u32 %v2353_v24, 16  ;;  %v2356_v4 = vshrl.u32 %v2352_v48, 16 }
 0x2b6   : > { %v3174_v21 = vclz %v3173_v46  ;;  %vm2381_vm3 = vc.u32 %v2373_v31, %v2377_v62  ;;  %v2383_v8 = vadd.s32 %v2377_v62, %v2373_v31  ;;  %v2334_v20 = vsel %vm2330_vm13, %v2314_v47, %v7293_v1  ;;  %v9466_v47 = vld [vmem:[#allocation13_spill] sm:$0xff] }
 0x2b7   : > { %vm2359_vm2 = vc.u32 %v2351_v9, %v2355_v28  ;;  %v2361_v59 = vadd.s32 %v2355_v28, %v2351_v9  ;;  %v2382_v32 = vsel %vm2381_vm3, 1, %v9432_v63  ;;  %v2358_v7 = vshrl.u32 %v2353_v24, 16 }
 0x2b8   : > { %v5232_v42 = vadd.s32 4294967294, %v3174_v21  ;;  %v2360_v41 = vsel %vm2359_vm2, 1, %v9432_v63  ;;  %v2384_v10 = vadd.s32 %v2382_v32, %v2376_v3  ;;  %vm2385_vm6 = vc.u32 %v2383_v8, %v2379_v55 }
 0x2b9   : > { %v2362_v39 = vadd.s32 %v2360_v41, %v2354_v22  ;;  %vm2363_vm5 = vc.u32 %v2361_v59, %v2357_v33  ;;  %v2386_v61 = vsel %vm2385_vm6, 1, %v9432_v63  ;;  %v2336_v46 = vsel %vm2332_vm15, %v7295_v57, %v2335_v12  ;;  %v9467_v33 = vld [vmem:[#allocation15_spill] sm:$0xff] }
 0x2ba   : > { %vm5233_vm4 = vcmp.lt.s32.totalorder %v5232_v42, 0  ;;  %v2364_v44 = vsel %vm2363_vm5, 1, %v9432_v63  ;;  %v2378_v48 = vshrl.u32 %v2374_v54, 16  ;;  %v2388_v21 = vadd.s32 %v2386_v61, %v2384_v10 }
 0x2bb   : > { %v3177_v2 = vsel %vm5233_vm4, 0, %v5232_v42  ;;  %v2366_v25 = vadd.s32 %v2364_v44, %v2362_v39  ;;  %v770_v1 = vmul.f32 %v7100_v43, %v582_v60  ;;  %v2380_v24 = vshrl.u32 %v2375_v13, 16 }
 0x2bc   : > { %v3178_v27 = vsub.s32 32, %v3177_v2  ;;  %v3182_v0 = vsub.s32 4294967266, %v3177_v2  ;;  %v3179_v30 = vshll.u32 %v3170_v16, %v3177_v2  ;;  %v760_v16 = vmul.f32 %v7100_v43, %v542_v53 }
 0x2bd   : > { %v2367_v36 = vadd.s32 %v2366_v25, %v2356_v4  ;;  %v7354_v42 = vadd.s32 %v2383_v8, %v2379_v55  ;;  %v2337_v57 = vsel %vm2331_vm0, %v2334_v20, %v2336_v46  ;;  %v7359_v59 = vadd.f32 %v770_v1, %v9467_v33  ;;  %v9470_v25 = vld [vmem:[#allocation12_spill] sm:$0xff] }
 0x2be   : > { %v3180_v50 = vshrl.u32 %v3162_v18, %v3178_v27  ;;  %v3183_v38 = vadd.s32 127, %v3182_v0  ;;  %v2389_v18 = vadd.s32 %v2388_v21, %v2378_v48  ;;  %v786_v31 = vadd.f32 %v760_v16, %v9466_v47  ;;  %v9471_v48 = vld [vmem:[#allocation14_spill] sm:$0xff] }
 0x2bf   : > { %v7350_v22 = vadd.s32 %v2367_v36, %v2358_v7  ;;  %v824_v39 = vadd.f32 1.000001, %v7359_v59  ;;  %v2391_v55 = vmul.u32 %v7316_v52, %v2337_v57  ;;  %v624_v40 = vmul.f32 %v7121_v35, %v542_v53  ;;  %v562_v57 = vpop.permute.xlu0 %561 }
 0x2c0   : > { %v3181_v9 = vor.u32 %v3180_v50, %v3179_v30  ;;  %v3184_v28 = vshll.u32 %v3183_v38, 23  ;;  %v2390_v54 = vadd.s32 %v2389_v18, %v2380_v24  ;;  %v814_v12 = vadd.f32 1.000001, %v786_v31 }
 0x2c1   : > { %vm2393_vm7 = vc.u32 %v7350_v22, %v7354_v42  ;;  %v3192_v2 = vsub.s32 4, %v7311_v29  ;;  %vm7369_vm8 = vcmp.le.f32.partialorder %v3068_v23, 0.7853982  ;;  %vm3070_vm9 = vcmp.lt.s32.totalorder %v7159_v17, 0 }
 0x2c2   : > { %v3185_v62 = vor.u32 4788187, %v3184_v28  ;;  %v3188_v3 = vcvt.s32.f32 %v3181_v9  ;;  %v2394_v13 = vadd.s32 1, %v2390_v54  ;;  %5382 = vrcp.f32 %v814_v12 }
 0x2c3   : > { %5384 = vrcp.f32 %v824_v39  ;;  %v634_v0 = vmul.f32 %v7121_v35, %v582_v60  ;;  %v650_v53 = vadd.f32 %v624_v40, %v9470_v25  ;;  %v4923_v30 = vsub.f32 1.0, %v786_v31  ;;  %v9472_v25 = vld [vmem:[#allocation23_spill] sm:$0xff] }
 0x2c4   : > { %v3186_v41 = vand.u32 2147483647, %v3185_v62  ;;  %v2395_v44 = vsel %vm2393_vm7, %v2394_v13, %v2390_v54  ;;  %v3193_v7 = vsel %vm3070_vm9, %v3192_v2, %v7311_v29  ;;  %v4983_v23 = vmul.f32 %v7141_v19, %v7148_v45 }
 0x2c5   : > { %v2396_v10 = vadd.s32 %v2395_v44, %v2391_v55  ;;  %v660_v21 = vadd.f32 %v634_v0, %v9471_v48  ;;  %v3195_v16 = vsel %vm7369_vm8, 0, %v3193_v7  ;;  %v4978_v45 = vmul.f32 %v7141_v19, %v7274_v14 }
 0x2c6   : > { %v3189_v32 = vmul.f32 %v3188_v3, %v3186_v41  ;;  %v5023_v1 = vmul.f32 1.442695, %v4983_v23  ;;  %v3212_v54 = vand.u32 3, %v3195_v16  ;;  %vm2300_vm11 = vcmp.lt.s32.totalorder %v7181_v34, 0 }
 0x2c7   : > { %v2397_v52 = vadd.s32 536870912, %v2396_v10  ;;  %v5013_v19 = vmul.f32 1.442695, %v4978_v45  ;;  %v765_v13 = vmul.f32 %v7100_v43, %v562_v57  ;;  %v4933_v44 = vsub.f32 1.0, %v7359_v59 }
 0x2c8   : > { %v3190_v8 = vxor.u32 2147483648, %v3189_v32  ;;  %v5383_v20 = vpop.eup %5382  ;;  %5386 = vpow2.f32 %v5023_v1  ;;  %vm3214_vm12 = vcmp.eq.s32.totalorder %v3212_v54, 0  ;;  %vm3213_vm13 = vcmp.lt.s32.totalorder %v3212_v54, 2 }
 0x2c9   : > { %v7382_v36 = vshrl.u32 %v2397_v52, 30  ;;  %v866_v61 = vmul.f32 %v5383_v20, %v650_v53  ;;  %v7384_v60 = vmul.f32 %v5383_v20, %v4923_v30  ;;  %v5385_v46 = vpop.eup %5384  ;;  %vm3217_vm14 = vcmp.eq.s32.totalorder %v3212_v54, 2 }
 0x2ca   : > { %v3191_v4 = vsel %vm3070_vm9, %v3190_v8, %v3189_v32  ;;  %v7395_v18 = vmul.f32 %v5385_v46, %v660_v21  ;;  %v629_v8 = vmul.f32 %v7121_v35, %v562_v57  ;;  %vm3211_vm15 = vweird.f32 %v7159_v17 }
 0x2cb   : > { %v3194_v50 = vsel %vm7369_vm8, %v7159_v17, %v3191_v4  ;;  %v2399_v28 = vshll.u32 %v7382_v36, 30  ;;  %v7393_v24 = vmul.f32 %v7156_v51, %v866_v61  ;;  %v2422_v4 = vsub.s32 4, %v7382_v36 }
 0x2cc   : > { %v3196_v38 = vmul.f32 %v3194_v50, %v3194_v50  ;;  %v7410_v52 = vmul.f32 %v5385_v46, %v4933_v44  ;;  %v7413_v53 = vadd.f32 %v765_v13, %v9472_v25  ;;  %v2392_v23 = vadd.s32 %v7354_v42, %v7350_v22 }
 0x2cd   : > { %v7397_v62 = vsub.s32 %v2396_v10, %v2399_v28  ;;  %v1993_v12 = vand.u32 2139095040, %v7393_v24  ;;  %v1990_v40 = vand.u32 2147483647, %v7393_v24  ;;  %5388 = vpow2.f32 %v5013_v19 }
 0x2ce   : > { %v3197_v29 = vmul.f32 -0.001358992, %v3196_v38  ;;  %v3204_v9 = vmul.f32 -0.00019511016, %v3196_v38  ;;  %v5387_v7 = vpop.eup %5386  ;;  %vm7424_vm2 = vcmp.le.f32.partialorder %v2298_v11, 0.7853982  ;;  %v7432_v1 = vsel %vm2300_vm11, %v2422_v4, %v7382_v36 }
 0x2cf   : > { %vm2401_vm10 = vcmp.lt.s32.totalorder %v7397_v62, 0  ;;  %v2402_v3 = vsub.s32 0, %v7397_v62  ;;  %v1994_v14 = vshrl.u32 %v1993_v12, 23  ;;  %v1997_v35 = vand.u32 8388607, %v1990_v40 }
 0x2d0   : > { %v3198_v47 = vadd.f32 0.041655596, %v3197_v29  ;;  %v3205_v31 = vadd.f32 0.008332121, %v3204_v9  ;;  %v819_v22 = vadd.f32 1.000001, %v7413_v53 }
 0x2d1   : > { %v2403_v55 = vsel %vm2401_vm10, %v2402_v3, %v7397_v62  ;;  %v5210_v0 = vadd.s32 4294967169, %v1994_v14 }
 0x2d2   : > { %v3199_v33 = vmul.f32 %v3198_v47, %v3196_v38  ;;  %v3206_v41 = vmul.f32 %v3205_v31, %v3196_v38  ;;  %v2404_v2 = vclz %v2403_v55  ;;  %5390 = vrcp.f32 %v819_v22 }
 0x2d3   : > { %v2000_v59 = vadd.s32 1, %v5210_v0  ;;  %v7440_v19 = vpop.eup %5388 }
 0x2d4   : > { %v3200_v39 = vadd.f32 -0.4999988, %v3199_v33  ;;  %v3207_v32 = vadd.f32 -0.16666654, %v3206_v41  ;;  %v5217_v43 = vadd.s32 4294967294, %v2404_v2 }
 0x2d5   : > { %vm2001_vm1 = vcmp.gt.s32.totalorder %v2000_v59, 0 }
 0x2d6   : > { %v3201_v10 = vmul.f32 %v3200_v39, %v3196_v38  ;;  %v3208_v27 = vmul.f32 %v3207_v32, %v3196_v38  ;;  %vm5218_vm0 = vcmp.lt.s32.totalorder %v5217_v43, 0  ;;  %v9473_v38 = vld [vmem:[#allocation22_spill] sm:$0xff]  ;;  %v2002_v28 = vsel %vm2001_vm1, %v2000_v59, 0 }
 0x2d7   : > { %v7420_v61 = vadd.f32 %v629_v8, %v9473_v38  ;;  %v2407_v21 = vsel %vm5218_vm0, 0, %v5217_v43  ;;  %v2004_v45 = vand.u32 31, %v2002_v28  ;;  %v7437_v33 = vshrl.u32 %v2002_v28, 5 }
 0x2d8   : > { %v3202_v30 = vadd.f32 1.0, %v3201_v10  ;;  %v3209_v20 = vadd.f32 1.0, %v3208_v27  ;;  %v2408_v29 = vsub.s32 32, %v2407_v21  ;;  %v2412_v9 = vsub.s32 4294967266, %v2407_v21 }
 0x2d9   : > { %v2409_v11 = vshll.u32 %v7397_v62, %v2407_v21  ;;  %v2005_v41 = vsub.s32 32, %v2004_v45  ;;  %v2007_v3 = vshll.u32 %v9431_v37, %v2004_v45  ;;  %v2010_v39 = vshll.u32 %v9433_v56, %v2004_v45 }
 0x2da   : > { %v3210_v46 = vmul.f32 %v3209_v20, %v3194_v50  ;;  %v3218_v48 = vxor.u32 2147483648, %v3202_v30  ;;  %v1998_v50 = vor.u32 8388608, %v1997_v35  ;;  %v2410_v31 = vshrl.u32 %v2392_v23, %v2408_v29 }
 0x2db   : > { %v2413_v57 = vadd.s32 127, %v2412_v9  ;;  %v2008_v32 = vshrl.u32 %v9433_v56, %v2005_v41  ;;  %v2011_v55 = vshrl.u32 %v9434_v6, %v2005_v41  ;;  %v2013_v2 = vshll.u32 %v9434_v6, %v2004_v45 }
 0x2dc   : > { %v3215_v42 = vxor.u32 2147483648, %v3210_v46  ;;  %v3219_v47 = vsel %vm3217_vm14, %v3218_v48, %v3210_v46  ;;  %v2411_v14 = vor.u32 %v2410_v31, %v2409_v11  ;;  %v2014_v54 = vshrl.u32 %v9435_v49, %v2005_v41 }
 0x2dd   : > { %v2414_v13 = vshll.u32 %v2413_v57, 23  ;;  %v2009_v27 = vor.u32 %v2008_v32, %v2007_v3  ;;  %v7450_v0 = vor.u32 %v2011_v55, %v2010_v39  ;;  %v2016_v43 = vshll.u32 %v9435_v49, %v2004_v45  ;;  %v7495_v57 = vpop.eup %5390 }
 0x2de   : > { %v3216_v12 = vsel %vm3214_vm12, %v3202_v30, %v3215_v42  ;;  %v2418_v10 = vcvt.s32.f32 %v2411_v14  ;;  %v2017_v4 = vshrl.u32 %v9436_v15, %v2005_v41  ;;  %v7455_v25 = vor.u32 %v2014_v54, %v2013_v2 }
 0x2df   : > { %v3220_v36 = vsel %vm3213_vm13, %v3216_v12, %v3219_v47  ;;  %v2415_v8 = vor.u32 4788187, %v2414_v13  ;;  %v2019_v30 = vshll.u32 %v9436_v15, %v2004_v45  ;;  %v2020_v20 = vshrl.u32 %v9437_v58, %v2005_v41 }
 0x2e0   : > { %v3221_v62 = vsel %vm3211_vm15, nan, %v3220_v36  ;;  %v2425_v35 = vsel %vm7424_vm2, 0, %v7432_v1  ;;  %v2018_v59 = vor.u32 %v2017_v4, %v2016_v43  ;;  %vm2022_vm3 = vcmp.lt.s32.totalorder %v7437_v33, 1 }
 0x2e1   : > { %v5061_v44 = vmul.f32 %v5387_v7, %v3221_v62  ;;  %v2416_v17 = vand.u32 2147483647, %v2415_v8  ;;  %v7462_v7 = vshll.u32 %v1998_v50, 8  ;;  %v2021_v38 = vor.u32 %v2020_v20, %v2019_v30 }
 0x2e2   : > { %vm2025_vm4 = vcmp.lt.s32.totalorder %v7437_v33, 4  ;;  %vm2024_vm5 = vcmp.lt.s32.totalorder %v7437_v33, 3  ;;  %v2030_v46 = vsel %vm2022_vm3, %v2009_v27, %v7450_v0  ;;  %v2034_v21 = vsel %vm2022_vm3, %v7450_v0, %v7455_v25 }
 0x2e3   : > { %5087 = vst [vmem:[%s6423_s27 + $0x70] sm:$0xff] %v5061_v44  ;;  %v2419_v23 = vmul.f32 %v2418_v10, %v2416_v17  ;;  %v2031_v48 = vsel %vm2025_vm4, %v2018_v59, 920167782  ;;  %vm2023_vm6 = vcmp.lt.s32.totalorder %v7437_v33, 2  ;;  %v2035_v28 = vsel %vm2025_vm4, %v2021_v38, 1326507024 }
 0x2e4   : > { %v2032_v9 = vsel %vm2024_vm5, %v7455_v25, %v2031_v48  ;;  %v2036_v42 = vsel %vm2024_vm5, %v2018_v59, %v2035_v28  ;;  %v2039_v1 = vand.u32 65535, %v7462_v7  ;;  %v7489_v50 = vmul.f32 %v7156_v51, %v7395_v18 }
 0x2e5   : > { %v2420_v29 = vxor.u32 2147483648, %v2419_v23  ;;  %v2033_v22 = vsel %vm2023_vm6, %v2030_v46, %v2032_v9  ;;  %v2037_v47 = vsel %vm2023_vm6, %v2034_v21, %v2036_v42  ;;  %v2040_v3 = vshrl.u32 %v7462_v7, 16 }
 0x2e6   : > { %v2063_v11 = vand.u32 65535, %v2033_v22  ;;  %v2064_v31 = vshrl.u32 %v2033_v22, 16  ;;  %v2041_v36 = vand.u32 65535, %v2037_v47  ;;  %v2042_v14 = vshrl.u32 %v2037_v47, 16 }
 0x2e7   : > { %v2421_v45 = vsel %vm2300_vm11, %v2420_v29, %v2419_v23  ;;  %v7501_v18 = vand.u32 3, %v2425_v35  ;;  %v2006_v13 = vshrl.u32 %v9431_v37, %v2005_v41  ;;  %v3530_v2 = vand.u32 2147483647, %v7489_v50 }
 0x2e8   : > { %v2424_v12 = vsel %vm7424_vm2, %v7181_v34, %v2421_v45  ;;  %v2066_v39 = vmul.u32 %v2064_v31, %v2039_v1  ;;  %v2044_v62 = vmul.u32 %v2042_v14, %v2039_v1  ;;  %v2045_v32 = vmul.u32 %v2041_v36, %v2040_v3 }
 0x2e9   : > { %v2426_v51 = vmul.f32 %v2424_v12, %v2424_v12  ;;  %v2067_v55 = vmul.u32 %v2063_v11, %v2040_v3  ;;  %v2026_v16 = vsel %vm2022_vm3, %v2006_v13, %v2009_v27  ;;  %v2043_v54 = vmul.u32 %v2041_v36, %v2039_v1 }
 0x2ea   : > { %v2069_v10 = vshll.u32 %v2066_v39, 16  ;;  %v2046_v43 = vmul.u32 %v2042_v14, %v2040_v3  ;;  %v2047_v4 = vshll.u32 %v2044_v62, 16  ;;  %v2065_v17 = vmul.u32 %v2063_v11, %v2039_v1 }
 0x2eb   : > { %v2427_v44 = vmul.f32 -0.001358992, %v2426_v51  ;;  %v2434_v8 = vmul.f32 -0.00019511016, %v2426_v51  ;;  %v2049_v35 = vshll.u32 %v2045_v32, 16  ;;  %v2068_v41 = vmul.u32 %v2064_v31, %v2040_v3 }
 0x2ec   : > { %vm2051_vm7 = vc.u32 %v2043_v54, %v2047_v4  ;;  %v2053_v59 = vadd.s32 %v2047_v4, %v2043_v54  ;;  %v2071_v23 = vshll.u32 %v2067_v55, 16  ;;  %vm2073_vm8 = vc.u32 %v2065_v17, %v2069_v10 }
 0x2ed   : > { %v2428_v30 = vadd.f32 0.041655596, %v2427_v44  ;;  %v2435_v20 = vadd.f32 0.008332121, %v2434_v8  ;;  %v2052_v48 = vsel %vm2051_vm7, 1, %v9432_v63  ;;  %v2074_v21 = vsel %vm2073_vm8, 1, %v9432_v63 }
 0x2ee   : > { %v2054_v27 = vadd.s32 %v2052_v48, %v2046_v43  ;;  %vm2055_vm9 = vc.u32 %v2053_v59, %v2049_v35  ;;  %v2075_v29 = vadd.s32 %v2069_v10, %v2065_v17  ;;  %v2076_v9 = vadd.s32 %v2074_v21, %v2068_v41 }
 0x2ef   : > { %v2429_v38 = vmul.f32 %v2428_v30, %v2426_v51  ;;  %v2436_v46 = vmul.f32 %v2435_v20, %v2426_v51  ;;  %v2056_v42 = vsel %vm2055_vm9, 1, %v9432_v63  ;;  %v3533_v1 = vand.u32 2139095040, %v7489_v50 }
 0x2f0   : > { %v2027_v45 = vsel %vm2025_vm4, %v7455_v25, 2102212464  ;;  %v2048_v47 = vshrl.u32 %v2044_v62, 16  ;;  %v2058_v11 = vadd.s32 %v2056_v42, %v2054_v27  ;;  %vm2077_vm10 = vc.u32 %v2075_v29, %v2071_v23 }
 0x2f1   : > { %v2430_v28 = vadd.f32 -0.4999988, %v2429_v38  ;;  %v2437_v22 = vadd.f32 -0.16666654, %v2436_v46  ;;  %v2078_v36 = vsel %vm2077_vm10, 1, %v9432_v63  ;;  %v3534_v14 = vshrl.u32 %v3533_v1, 23 }
 0x2f2   : > { %v2050_v13 = vshrl.u32 %v2045_v32, 16  ;;  %v2059_v44 = vadd.s32 %v2058_v11, %v2048_v47  ;;  %v2070_v8 = vshrl.u32 %v2066_v39, 16  ;;  %v2080_v10 = vadd.s32 %v2078_v36, %v2076_v9 }
 0x2f3   : > { %v2431_v31 = vmul.f32 %v2430_v28, %v2426_v51  ;;  %v2438_v3 = vmul.f32 %v2437_v22, %v2426_v51  ;;  %v2028_v4 = vsel %vm2024_vm5, %v7450_v0, %v2027_v45  ;;  %v5240_v17 = vadd.s32 4294967169, %v3534_v14 }
 0x2f4   : > { %v2060_v25 = vadd.s32 %v2059_v44, %v2050_v13  ;;  %v2072_v62 = vshrl.u32 %v2067_v55, 16  ;;  %v2081_v30 = vadd.s32 %v2080_v10, %v2070_v8  ;;  %v871_v51 = vmul.f32 %v7495_v57, %v7420_v61 }
 0x2f5   : > { %v2432_v54 = vadd.f32 1.0, %v2431_v31  ;;  %v2439_v43 = vadd.f32 1.0, %v2438_v3  ;;  %v2079_v41 = vadd.s32 %v2075_v29, %v2071_v23  ;;  %v3540_v32 = vadd.s32 1, %v5240_v17 }
 0x2f6   : > { %vm2443_vm11 = vcmp.lt.s32.totalorder %v7501_v18, 2  ;;  %v2029_v39 = vsel %vm2023_vm6, %v2026_v16, %v2028_v4  ;;  %v2082_v59 = vadd.s32 %v2081_v30, %v2072_v62  ;;  %v3537_v0 = vand.u32 8388607, %v3530_v2 }
 0x2f7   : > { %v2440_v20 = vmul.f32 %v2439_v43, %v2424_v12  ;;  %v2448_v35 = vxor.u32 2147483648, %v2432_v54  ;;  %vm2085_vm12 = vc.u32 %v2060_v25, %v2079_v41  ;;  %vm3541_vm13 = vcmp.gt.s32.totalorder %v3540_v32, 0 }
 0x2f8   : > { %vm2444_vm14 = vcmp.eq.s32.totalorder %v7501_v18, 0  ;;  %vm2447_vm15 = vcmp.eq.s32.totalorder %v7501_v18, 2  ;;  %v2086_v61 = vadd.s32 1, %v2082_v59  ;;  %v3542_v12 = vsel %vm3541_vm13, %v3540_v32, 0 }
 0x2f9   : > { %v2445_v38 = vxor.u32 2147483648, %v2440_v20  ;;  %v2449_v23 = vsel %vm2447_vm15, %v2448_v35, %v2440_v20  ;;  %v2083_v46 = vmul.u32 %v7462_v7, %v2029_v39  ;;  %v3544_v48 = vand.u32 31, %v3542_v12  ;;  %v7563_v20 = vld [vmem:[%s9373_s1 + $0x6] ss:$0 sm:$0xff]  ;;  %v7571_v39 = vld [vmem:[%s9373_s1 + $0x7] ss:$0 sm:$0xff] }
 0x2fa   : > { %vm2441_vm0 = vweird.f32 %v7181_v34  ;;  %v2087_v16 = vsel %vm2085_vm12, %v2086_v61, %v2082_v59  ;;  %v3538_v29 = vor.u32 8388608, %v3537_v0  ;;  %v7532_v22 = vshrl.u32 %v3542_v12, 5 }
 0x2fb   : > { %v2446_v55 = vsel %vm2444_vm14, %v2432_v54, %v2445_v38  ;;  %v2088_v27 = vadd.s32 %v2087_v16, %v2083_v46  ;;  %v3545_v9 = vsub.s32 32, %v3544_v48  ;;  %v3547_v42 = vshll.u32 %v9431_v37, %v3544_v48 }
 0x2fc   : > { %v2450_v33 = vsel %vm2443_vm11, %v2446_v55, %v2449_v23  ;;  %v3550_v7 = vshll.u32 %v9433_v56, %v3544_v48  ;;  %v3553_v18 = vshll.u32 %v9434_v6, %v3544_v48  ;;  %v3556_v11 = vshll.u32 %v9435_v49, %v3544_v48 }
 0x2fd   : > { %v2451_v21 = vsel %vm2441_vm0, nan, %v2450_v33  ;;  %v2089_v1 = vadd.s32 536870912, %v2088_v27  ;;  %v3548_v45 = vshrl.u32 %v9433_v56, %v3545_v9  ;;  %v3551_v34 = vshrl.u32 %v9434_v6, %v3545_v9 }
 0x2fe   : > { %v5056_v28 = vmul.f32 %v7440_v19, %v2451_v21  ;;  %v3554_v47 = vshrl.u32 %v9435_v49, %v3545_v9  ;;  %v3557_v19 = vshrl.u32 %v9436_v15, %v3545_v9  ;;  %v3560_v31 = vshrl.u32 %v9437_v58, %v3545_v9 }
 0x2ff   : > { %v7544_v3 = vshrl.u32 %v2089_v1, 30  ;;  %v3549_v36 = vor.u32 %v3548_v45, %v3547_v42  ;;  %v3552_v14 = vor.u32 %v3551_v34, %v3550_v7  ;;  %v3559_v13 = vshll.u32 %v9436_v15, %v3544_v48 }
 0x300   : > { %5082 = vst [vmem:[%s6423_s27 + $0x48] sm:$0xff] %v5056_v28  ;;  %v3555_v44 = vor.u32 %v3554_v47, %v3553_v18  ;;  %v3558_v8 = vor.u32 %v3557_v19, %v3556_v11  ;;  %vm3562_vm1 = vcmp.lt.s32.totalorder %v7532_v22, 1  ;;  %vm3565_vm2 = vcmp.lt.s32.totalorder %v7532_v22, 4 }
 0x301   : > { %v2091_v10 = vshll.u32 %v7544_v3, 30  ;;  %v3561_v54 = vor.u32 %v3560_v31, %v3559_v13  ;;  %vm3564_vm3 = vcmp.lt.s32.totalorder %v7532_v22, 3  ;;  %v3570_v43 = vsel %vm3562_vm1, %v3549_v36, %v3552_v14 }
 0x302   : > { %v3571_v4 = vsel %vm3565_vm2, %v3558_v8, 920167782  ;;  %v7555_v17 = vshll.u32 %v3538_v29, 8  ;;  %vm3563_vm4 = vcmp.lt.s32.totalorder %v7532_v22, 2  ;;  %v7566_v35 = vmul.f32 %v7563_v20, %v871_v51 }
 0x303   : > { %v2092_v62 = vsub.s32 %v2088_v27, %v2091_v10  ;;  %v3572_v30 = vsel %vm3564_vm3, %v3555_v44, %v3571_v4  ;;  %v2084_v32 = vadd.s32 %v2079_v41, %v2060_v25  ;;  %v7575_v59 = vmul.f32 %v7571_v39, %v7384_v60 }
 0x304   : > { %v3573_v38 = vsel %vm3563_vm4, %v3570_v43, %v3572_v30  ;;  %v3574_v61 = vsel %vm3562_vm1, %v3552_v14, %v3555_v44  ;;  %v3575_v25 = vsel %vm3565_vm2, %v3561_v54, 1326507024  ;;  %v3579_v41 = vand.u32 65535, %v7555_v17 }
 0x305   : > { %vm2093_vm5 = vcmp.lt.s32.totalorder %v2092_v62, 0  ;;  %v2094_v0 = vsub.s32 0, %v2092_v62  ;;  %v3576_v51 = vsel %vm3564_vm3, %v3558_v8, %v3575_v25  ;;  %v3603_v12 = vand.u32 65535, %v3573_v38 }
 0x306   : > { %v3604_v55 = vshrl.u32 %v3573_v38, 16  ;;  %v3580_v23 = vshrl.u32 %v7555_v17, 16  ;;  %v2760_v46 = vand.u32 2147483647, %v7566_v35  ;;  %v4928_v48 = vsub.f32 1.0, %v7413_v53 }
 0x307   : > { %v2095_v60 = vsel %vm2093_vm5, %v2094_v0, %v2092_v62  ;;  %v3567_v16 = vsel %vm3565_vm2, %v3555_v44, 2102212464  ;;  %v3577_v21 = vsel %vm3563_vm4, %v3574_v61, %v3576_v51  ;;  %v3546_v29 = vshrl.u32 %v9431_v37, %v3545_v9 }
 0x308   : > { %v2096_v33 = vclz %v2095_v60  ;;  %v3606_v27 = vmul.u32 %v3604_v55, %v3579_v41  ;;  %v3581_v28 = vand.u32 65535, %v3577_v21  ;;  %v3582_v42 = vshrl.u32 %v3577_v21, 16 }
 0x309   : > { %v3607_v7 = vmul.u32 %v3603_v12, %v3580_v23  ;;  %v2114_v45 = vsub.s32 4, %v7544_v3  ;;  %v3605_v34 = vmul.u32 %v3603_v12, %v3579_v41  ;;  %v3566_v53 = vsel %vm3562_vm1, %v3546_v29, %v3549_v36 }
 0x30a   : > { %v5211_v1 = vadd.s32 4294967294, %v2096_v33  ;;  %v3609_v18 = vshll.u32 %v3606_v27, 16  ;;  %v3568_v47 = vsel %vm3564_vm3, %v3552_v14, %v3567_v16  ;;  %v3584_v11 = vmul.u32 %v3582_v42, %v3579_v41 }
 0x30b   : > { %v3585_v19 = vmul.u32 %v3581_v28, %v3580_v23  ;;  %v3583_v31 = vmul.u32 %v3581_v28, %v3579_v41  ;;  %v3608_v13 = vmul.u32 %v3604_v55, %v3580_v23  ;;  %v3586_v44 = vmul.u32 %v3582_v42, %v3580_v23 }
 0x30c   : > { %vm5212_vm6 = vcmp.lt.s32.totalorder %v5211_v1, 0  ;;  %vm3613_vm7 = vc.u32 %v3605_v34, %v3609_v18  ;;  %v3587_v8 = vshll.u32 %v3584_v11, 16  ;;  %v3611_v10 = vshll.u32 %v3607_v7, 16 }
 0x30d   : > { %v2099_v9 = vsel %vm5212_vm6, 0, %v5211_v1  ;;  %v3589_v30 = vshll.u32 %v3585_v19, 16  ;;  %v3614_v36 = vsel %vm3613_vm7, 1, %v9432_v63  ;;  %v3615_v0 = vadd.s32 %v3609_v18, %v3605_v34 }
 0x30e   : > { %v2100_v54 = vsub.s32 32, %v2099_v9  ;;  %v2101_v43 = vshll.u32 %v2092_v62, %v2099_v9  ;;  %v2104_v4 = vsub.s32 4294967266, %v2099_v9  ;;  %vm3591_vm8 = vc.u32 %v3583_v31, %v3587_v8 }
 0x30f   : > { %v3593_v38 = vadd.s32 %v3587_v8, %v3583_v31  ;;  %v3592_v25 = vsel %vm3591_vm8, 1, %v9432_v63  ;;  %v3616_v51 = vadd.s32 %v3614_v36, %v3608_v13  ;;  %v3610_v12 = vshrl.u32 %v3606_v27, 16  ;;  %v7632_v36 = vld [vmem:[%s9373_s1 + $0x2] ss:$0 sm:$0xff] }
 0x310   : > { %v2102_v14 = vshrl.u32 %v2084_v32, %v2100_v54  ;;  %v2105_v61 = vadd.s32 127, %v2104_v4  ;;  %v3594_v41 = vadd.s32 %v3592_v25, %v3586_v44  ;;  %vm3617_vm10 = vc.u32 %v3615_v0, %v3611_v10  ;;  %v554_v44 = vpop.permute.xlu1 %553 }
 0x311   : > { %vm3595_vm9 = vc.u32 %v3593_v38, %v3589_v30  ;;  %v3618_v23 = vsel %vm3617_vm10, 1, %v9432_v63  ;;  %v3588_v33 = vshrl.u32 %v3584_v11, 16  ;;  %v2763_v29 = vand.u32 2139095040, %v7566_v35  ;;  %v7618_v38 = vld [vmem:[%s9373_s1 + $0x5] ss:$0 sm:$0xff] }
 0x312   : > { %v2103_v55 = vor.u32 %v2102_v14, %v2101_v43  ;;  %v2106_v60 = vshll.u32 %v2105_v61, 23  ;;  %v3596_v62 = vsel %vm3595_vm9, 1, %v9432_v63  ;;  %v3620_v21 = vadd.s32 %v3618_v23, %v3616_v51 }
 0x313   : > { %v3598_v16 = vadd.s32 %v3596_v62, %v3594_v41  ;;  %v3612_v28 = vshrl.u32 %v3607_v7, 16  ;;  %v2767_v42 = vand.u32 8388607, %v2760_v46  ;;  %v7607_v1 = vmul.f32 %v7495_v57, %v4928_v48  ;;  %v9478_v41 = vld [vmem:[#allocation19_spill] sm:$0xff]  ;;  %v7651_v62 = vpop.permute.xlu2 %593 }
 0x314   : > { %v2107_v32 = vor.u32 4788187, %v2106_v60  ;;  %v3590_v27 = vshrl.u32 %v3585_v19, 16  ;;  %v3621_v18 = vadd.s32 %v3620_v21, %v3610_v12  ;;  %v2764_v31 = vshrl.u32 %v2763_v29, 23 }
 0x315   : > { %v3599_v34 = vadd.s32 %v3598_v16, %v3588_v33  ;;  %vm1992_vm11 = vcmp.lt.s32.totalorder %v7393_v24, 0  ;;  %v2110_v11 = vcvt.s32.f32 %v2103_v55  ;;  %v3569_v9 = vsel %vm3563_vm4, %v3566_v53, %v3568_v47  ;;  %v9479_v16 = vld [vmem:[#allocation18_spill] sm:$0xff] }
 0x316   : > { %v2108_v13 = vand.u32 2147483647, %v2107_v32  ;;  %v3619_v7 = vadd.s32 %v3615_v0, %v3611_v10  ;;  %v3622_v54 = vadd.s32 %v3621_v18, %v3612_v28  ;;  %v5225_v43 = vadd.s32 4294967169, %v2764_v31 }
 0x317   : > { %v3600_v8 = vadd.s32 %v3599_v34, %v3590_v27  ;;  %v2115_v57 = vsel %vm1992_vm11, %v2114_v45, %v7544_v3  ;;  %v2768_v48 = vor.u32 8388608, %v2767_v42  ;;  %v763_v22 = vmul.f32 %v7618_v38, %v554_v44 }
 0x318   : > { %v2111_v4 = vmul.f32 %v2110_v11, %v2108_v13  ;;  %v3626_v19 = vadd.s32 1, %v3622_v54  ;;  %v2770_v30 = vadd.s32 1, %v5225_v43  ;;  %vm7623_vm13 = vcmp.le.f32.partialorder %v1990_v40, 0.7853982 }
 0x319   : > { %vm3625_vm12 = vc.u32 %v3600_v8, %v3619_v7  ;;  %v3623_v3 = vmul.u32 %v7555_v17, %v3569_v9  ;;  %v5009_v45 = vmul.f32 1.442695, %v7575_v59  ;;  %v627_v0 = vmul.f32 %v7632_v36, %v554_v44 }
 0x31a   : > { %v2112_v47 = vxor.u32 2147483648, %v2111_v4  ;;  %v3627_v10 = vsel %vm3625_vm12, %v3626_v19, %v3622_v54  ;;  %vm2771_vm14 = vcmp.gt.s32.totalorder %v2770_v30, 0  ;;  %v2117_v14 = vsel %vm7623_vm13, 0, %v2115_v57 }
 0x31b   : > { %v3628_v61 = vadd.s32 %v3627_v10, %v3623_v3  ;;  %v2772_v25 = vsel %vm2771_vm14, %v2770_v30, 0  ;;  %v7644_v51 = vshll.u32 %v2768_v48, 8  ;;  %v7647_v12 = vadd.f32 %v763_v22, %v9478_v41 }
 0x31c   : > { %v2113_v40 = vsel %vm1992_vm11, %v2112_v47, %v2111_v4  ;;  %v2774_v59 = vand.u32 31, %v2772_v25  ;;  %v7653_v23 = vand.u32 3, %v2117_v14  ;;  %5392 = vpow2.f32 %v5009_v45 }
 0x31d   : > { %v7642_v17 = vsel %vm7623_vm13, %v7393_v24, %v2113_v40  ;;  %v3629_v60 = vadd.s32 536870912, %v3628_v61  ;;  %v7656_v21 = vadd.f32 %v627_v0, %v9479_v16  ;;  %v7658_v28 = vadd.s32 %v3619_v7, %v3600_v8 }
 0x31e   : > { %v2118_v55 = vmul.f32 %v7642_v17, %v7642_v17  ;;  %v2775_v33 = vsub.s32 32, %v2774_v59  ;;  %v7663_v27 = vand.u32 65535, %v7644_v51  ;;  %v7666_v34 = vshrl.u32 %v7644_v51, 16 }
 0x31f   : > { %v7660_v42 = vshrl.u32 %v3629_v60, 30  ;;  %v817_v18 = vadd.f32 1.000001, %v7647_v12  ;;  %v7671_v31 = vmul.f32 %v7618_v38, %v7651_v62  ;;  %v7674_v44 = vshrl.u32 %v2772_v25, 5 }
 0x320   : > { %v2119_v29 = vmul.f32 -0.001358992, %v2118_v55  ;;  %v2126_v32 = vmul.f32 -0.00019511016, %v2118_v55  ;;  %v2777_v8 = vshll.u32 %v9431_v37, %v2774_v59  ;;  %v2778_v7 = vshrl.u32 %v9433_v56, %v2775_v33 }
 0x321   : > { %v3631_v9 = vshll.u32 %v7660_v42, 30  ;;  %v2781_v54 = vshrl.u32 %v9434_v6, %v2775_v33  ;;  %v2787_v43 = vshrl.u32 %v9436_v15, %v2775_v33  ;;  %v2784_v19 = vshrl.u32 %v9435_v49, %v2775_v33 }
 0x322   : > { %v2120_v13 = vadd.f32 0.041655596, %v2119_v29  ;;  %v2127_v11 = vadd.f32 0.008332121, %v2126_v32  ;;  %v5393_v30 = vpop.eup %5392  ;;  %vm2139_vm15 = vcmp.eq.s32.totalorder %v7653_v23, 2  ;;  %v2780_v22 = vshll.u32 %v9433_v56, %v2774_v59 }
 0x323   : > { %v7680_v48 = vsub.s32 %v3628_v61, %v3631_v9  ;;  %v2783_v53 = vshll.u32 %v9434_v6, %v2774_v59  ;;  %v2786_v47 = vshll.u32 %v9435_v49, %v2774_v59  ;;  %v2790_v3 = vshrl.u32 %v9437_v58, %v2775_v33 }
 0x324   : > { %v2121_v4 = vmul.f32 %v2120_v13, %v2118_v55  ;;  %v2128_v57 = vmul.f32 %v2127_v11, %v2118_v55  ;;  %vm2136_vm1 = vcmp.eq.s32.totalorder %v7653_v23, 0  ;;  %v2779_v40 = vor.u32 %v2778_v7, %v2777_v8 }
 0x325   : > { %vm3633_vm0 = vcmp.lt.s32.totalorder %v7680_v48, 0  ;;  %v3634_v0 = vsub.s32 0, %v7680_v48  ;;  %v7691_v14 = vor.u32 %v2781_v54, %v2780_v22  ;;  %v2788_v61 = vor.u32 %v2787_v43, %v2786_v47 }
 0x326   : > { %v2122_v45 = vadd.f32 -0.4999988, %v2121_v4  ;;  %v2129_v10 = vadd.f32 -0.16666654, %v2128_v57  ;;  %v2789_v25 = vshll.u32 %v9436_v15, %v2774_v59  ;;  %vm2135_vm2 = vcmp.lt.s32.totalorder %v7653_v23, 2 }
 0x327   : > { %v3635_v16 = vsel %vm3633_vm0, %v3634_v0, %v7680_v48  ;;  %v2785_v29 = vor.u32 %v2784_v19, %v2783_v53  ;;  %vm2133_vm3 = vweird.f32 %v7393_v24  ;;  %5394 = vrcp.f32 %v817_v18 }
 0x328   : > { %v2123_v41 = vmul.f32 %v2122_v45, %v2118_v55  ;;  %v2130_v60 = vmul.f32 %v2129_v10, %v2118_v55  ;;  %v3636_v32 = vclz %v3635_v16  ;;  %v2791_v13 = vor.u32 %v2790_v3, %v2789_v25 }
 0x329   : > { %v4926_v11 = vsub.f32 1.0, %v7647_v12  ;;  %vm2792_vm4 = vcmp.lt.s32.totalorder %v7674_v44, 1  ;;  %vm2795_vm5 = vcmp.lt.s32.totalorder %v7674_v44, 4  ;;  %vm2794_vm6 = vcmp.lt.s32.totalorder %v7674_v44, 3 }
 0x32a   : > { %v2124_v9 = vadd.f32 1.0, %v2123_v41  ;;  %v2131_v8 = vadd.f32 1.0, %v2130_v60  ;;  %v5241_v59 = vadd.s32 4294967294, %v3636_v32  ;;  %v2800_v55 = vsel %vm2792_vm4, %v2779_v40, %v7691_v14 }
 0x32b   : > { %v2801_v7 = vsel %vm2795_vm5, %v2788_v61, 920167782  ;;  %vm2793_vm7 = vcmp.lt.s32.totalorder %v7674_v44, 2  ;;  %v2776_v4 = vshrl.u32 %v9431_v37, %v2775_v33  ;;  %v2804_v19 = vsel %vm2792_vm4, %v7691_v14, %v2785_v29 }
 0x32c   : > { %v2132_v18 = vmul.f32 %v2131_v8, %v7642_v17  ;;  %v2140_v54 = vxor.u32 2147483648, %v2124_v9  ;;  %v2802_v43 = vsel %vm2794_vm6, %v2785_v29, %v2801_v7  ;;  %vm5242_vm8 = vcmp.lt.s32.totalorder %v5241_v59, 0 }
 0x32d   : > { %v2803_v57 = vsel %vm2793_vm7, %v2800_v55, %v2802_v43  ;;  %v3639_v53 = vsel %vm5242_vm8, 0, %v5241_v59  ;;  %v2805_v47 = vsel %vm2795_vm5, %v2791_v13, 1326507024  ;;  %v5395_v3 = vpop.eup %5394  ;;  %v3654_v23 = vsub.s32 4, %v7660_v42 }
 0x32e   : > { %v2137_v22 = vxor.u32 2147483648, %v2132_v18  ;;  %v2141_v17 = vsel %vm2139_vm15, %v2140_v54, %v2132_v18  ;;  %v3640_v45 = vsub.s32 32, %v3639_v53  ;;  %v3641_v10 = vshll.u32 %v7680_v48, %v3639_v53 }
 0x32f   : > { %v3644_v33 = vsub.s32 4294967266, %v3639_v53  ;;  %v2806_v0 = vsel %vm2794_vm6, %v2788_v61, %v2805_v47  ;;  %v2833_v60 = vand.u32 65535, %v2803_v57  ;;  %v2834_v16 = vshrl.u32 %v2803_v57, 16 }
 0x330   : > { %v2138_v25 = vsel %vm2136_vm1, %v2124_v9, %v2137_v22  ;;  %v2807_v41 = vsel %vm2793_vm7, %v2804_v19, %v2806_v0  ;;  %v3642_v13 = vshrl.u32 %v7658_v28, %v3640_v45  ;;  %v2797_v61 = vsel %vm2795_vm5, %v2785_v29, 2102212464 }
 0x331   : > { %v2142_v32 = vsel %vm2135_vm2, %v2138_v25, %v2141_v17  ;;  %v3645_v8 = vadd.s32 127, %v3644_v33  ;;  %v2811_v48 = vand.u32 65535, %v2807_v41  ;;  %v2812_v9 = vshrl.u32 %v2807_v41, 16 }
 0x332   : > { %v2143_v59 = vsel %vm2133_vm3, nan, %v2142_v32  ;;  %v2836_v55 = vmul.u32 %v2834_v16, %v7663_v27  ;;  %v3643_v18 = vor.u32 %v3642_v13, %v3641_v10  ;;  %vm3532_vm9 = vcmp.lt.s32.totalorder %v7489_v50, 0 }
 0x333   : > { %v5054_v7 = vmul.f32 %v5393_v30, %v2143_v59  ;;  %v3646_v54 = vshll.u32 %v3645_v8, 23  ;;  %v2796_v28 = vsel %vm2792_vm4, %v2776_v4, %v2779_v40  ;;  %v2814_v43 = vmul.u32 %v2812_v9, %v7663_v27  ;;  %v9483_v30 = vld [vmem:[#allocation20_spill] sm:$0xff] }
 0x334   : > { %v2815_v24 = vmul.u32 %v2811_v48, %v7666_v34  ;;  %v2837_v57 = vmul.u32 %v2833_v60, %v7666_v34  ;;  %vm7745_vm10 = vcmp.le.f32.partialorder %v3530_v2, 0.7853982  ;;  %v2798_v19 = vsel %vm2794_vm6, %v7691_v14, %v2797_v61 }
 0x335   : > { %5080 = vst [vmem:[%s6423_s27 + $0x38] sm:$0xff] %v5054_v7  ;;  %v3647_v29 = vor.u32 4788187, %v3646_v54  ;;  %v2835_v40 = vmul.u32 %v2833_v60, %v7663_v27  ;;  %v2839_v4 = vshll.u32 %v2836_v55, 16  ;;  %v3650_v22 = vcvt.s32.f32 %v3643_v18 }
 0x336   : > { %v2813_v17 = vmul.u32 %v2811_v48, %v7663_v27  ;;  %v2816_v53 = vmul.u32 %v2812_v9, %v7666_v34  ;;  %v2817_v47 = vshll.u32 %v2814_v43, 16  ;;  %v2819_v10 = vshll.u32 %v2815_v24, 16 }
 0x337   : > { %v3648_v45 = vand.u32 2147483647, %v3647_v29  ;;  %v2838_v2 = vmul.u32 %v2834_v16, %v7666_v34  ;;  %v2841_v33 = vshll.u32 %v2837_v57, 16  ;;  %vm2843_vm12 = vc.u32 %v2835_v40, %v2839_v4  ;;  %v9482_v29 = vld [vmem:[#allocation21_spill] sm:$0xff] }
 0x338   : > { %vm2821_vm11 = vc.u32 %v2813_v17, %v2817_v47  ;;  %v2823_v0 = vadd.s32 %v2817_v47, %v2813_v17  ;;  %v2845_v25 = vadd.s32 %v2839_v4, %v2835_v40  ;;  %v2818_v14 = vshrl.u32 %v2814_v43, 16 }
 0x339   : > { %v3651_v41 = vmul.f32 %v3650_v22, %v3648_v45  ;;  %v2822_v60 = vsel %vm2821_vm11, 1, %v9432_v63  ;;  %v2844_v32 = vsel %vm2843_vm12, 1, %v9432_v63  ;;  %v2840_v59 = vshrl.u32 %v2836_v55, 16 }
 0x33a   : > { %v2824_v13 = vadd.s32 %v2822_v60, %v2816_v53  ;;  %vm2825_vm13 = vc.u32 %v2823_v0, %v2819_v10  ;;  %v2846_v27 = vadd.s32 %v2844_v32, %v2838_v2  ;;  %vm2847_vm14 = vc.u32 %v2845_v25, %v2841_v33 }
 0x33b   : > { %v3652_v8 = vxor.u32 2147483648, %v3651_v41  ;;  %v2826_v48 = vsel %vm2825_vm13, 1, %v9432_v63  ;;  %v2848_v34 = vsel %vm2847_vm14, 1, %v9432_v63  ;;  %v869_v9 = vmul.f32 %v5395_v3, %v7656_v21 }
 0x33c   : > { %v2828_v16 = vadd.s32 %v2826_v48, %v2824_v13  ;;  %v2850_v61 = vadd.s32 %v2848_v34, %v2846_v27  ;;  %v7763_v7 = vmul.f32 %v5395_v3, %v4926_v11  ;;  %v2820_v54 = vshrl.u32 %v2815_v24, 16 }
 0x33d   : > { %v3653_v18 = vsel %vm3532_vm9, %v3652_v8, %v3651_v41  ;;  %v2842_v43 = vshrl.u32 %v2837_v57, 16  ;;  %v7769_v40 = vadd.f32 %v7671_v31, %v9482_v29  ;;  %v7775_v21 = vmul.f32 %v7563_v20, %v869_v9 }
 0x33e   : > { %v3656_v55 = vsel %vm7745_vm10, %v7489_v50, %v3653_v18  ;;  %v2829_v4 = vadd.s32 %v2828_v16, %v2818_v14  ;;  %v2851_v22 = vadd.s32 %v2850_v61, %v2840_v59  ;;  %v2799_v11 = vsel %vm2793_vm7, %v2796_v28, %v2798_v19 }
 0x33f   : > { %v3658_v12 = vmul.f32 %v3656_v55, %v3656_v55  ;;  %v827_v3 = vadd.f32 1.000001, %v7769_v40  ;;  %v2849_v57 = vadd.s32 %v2845_v25, %v2841_v33  ;;  %v2452_v31 = vand.u32 2147483647, %v7775_v21 }
 0x340   : > { %v2830_v24 = vadd.s32 %v2829_v4, %v2820_v54  ;;  %v2852_v17 = vadd.s32 %v2851_v22, %v2842_v43  ;;  %v3655_v53 = vsel %vm3532_vm9, %v3654_v23, %v7660_v42  ;;  %v2455_v10 = vand.u32 2139095040, %v7775_v21 }
 0x341   : > { %v3659_v47 = vmul.f32 -0.001358992, %v3658_v12  ;;  %v3666_v45 = vmul.f32 -0.00019511016, %v3658_v12  ;;  %v4986_v2 = vmul.f32 %v7571_v39, %v7410_v52  ;;  %v2853_v44 = vmul.u32 %v7644_v51, %v2799_v11 }
 0x342   : > { %vm2855_vm15 = vc.u32 %v2830_v24, %v2849_v57  ;;  %v2856_v28 = vadd.s32 1, %v2852_v17  ;;  %v2456_v0 = vshrl.u32 %v2455_v10, 23  ;;  %5396 = vrcp.f32 %v827_v3 }
 0x343   : > { %v3660_v19 = vadd.f32 0.041655596, %v3659_v47  ;;  %v3667_v33 = vadd.f32 0.008332121, %v3666_v45  ;;  %v3657_v25 = vsel %vm7745_vm10, 0, %v3655_v53  ;;  %v637_v23 = vmul.f32 %v7632_v36, %v7651_v62  ;;  %v574_v62 = vpop.permute.xlu0 %573 }
 0x344   : > { %v2857_v41 = vsel %vm2855_vm15, %v2856_v28, %v2852_v17  ;;  %v2459_v42 = vand.u32 8388607, %v2452_v31  ;;  %v5219_v51 = vadd.s32 4294967169, %v2456_v0  ;;  %v5029_v32 = vmul.f32 1.442695, %v4986_v2 }
 0x345   : > { %v3661_v14 = vmul.f32 %v3660_v19, %v3658_v12  ;;  %v3668_v52 = vmul.f32 %v3667_v33, %v3658_v12  ;;  %v2858_v60 = vadd.s32 %v2857_v41, %v2853_v44  ;;  %v3674_v59 = vand.u32 3, %v3657_v25 }
 0x346   : > { %v2462_v48 = vadd.s32 1, %v5219_v51  ;;  %v2460_v34 = vor.u32 8388608, %v2459_v42  ;;  %v663_v16 = vadd.f32 %v637_v23, %v9483_v30  ;;  %vm3673_vm1 = vweird.f32 %v7489_v50 }
 0x347   : > { %v3662_v13 = vadd.f32 -0.4999988, %v3661_v14  ;;  %v3669_v27 = vadd.f32 -0.16666654, %v3668_v52  ;;  %v2859_v8 = vadd.s32 536870912, %v2858_v60  ;;  %5398 = vpow2.f32 %v5029_v32 }
 0x348   : > { %v7795_v61 = vpop.eup %5396  ;;  %vm2463_vm0 = vcmp.gt.s32.totalorder %v2462_v48, 0  ;;  %v7804_v3 = vmul.f32 %v7571_v39, %v7607_v1  ;;  %v768_v53 = vmul.f32 %v7618_v38, %v574_v62  ;;  %vm3675_vm2 = vcmp.lt.s32.totalorder %v3674_v59, 2 }
 0x349   : > { %v3663_v9 = vmul.f32 %v3662_v13, %v3658_v12  ;;  %v3670_v18 = vmul.f32 %v3669_v27, %v3658_v12  ;;  %v7797_v54 = vshrl.u32 %v2859_v8, 30  ;;  %v2464_v43 = vsel %vm2463_vm0, %v2462_v48, 0 }
 0x34a   : > { %v879_v29 = vmul.f32 %v7795_v61, %v663_v16  ;;  %v2466_v17 = vand.u32 31, %v2464_v43  ;;  %v7806_v12 = vshll.u32 %v2460_v34, 8  ;;  %vm3676_vm3 = vcmp.eq.s32.totalorder %v3674_v59, 0 }
 0x34b   : > { %v3664_v4 = vadd.f32 1.0, %v3663_v9  ;;  %v3671_v22 = vadd.f32 1.0, %v3670_v18  ;;  %v2861_v11 = vshll.u32 %v7797_v54, 30  ;;  %vm3679_vm4 = vcmp.eq.s32.totalorder %v3674_v59, 2 }
 0x34c   : > { %v2854_v2 = vadd.s32 %v2849_v57, %v2830_v24  ;;  %v2467_v44 = vsub.s32 32, %v2466_v17  ;;  %v7810_v33 = vmul.f32 %v7632_v36, %v574_v62  ;;  %v7815_v38 = vand.u32 65535, %v7806_v12 }
 0x34d   : > { %v3672_v47 = vmul.f32 %v3671_v22, %v3656_v55  ;;  %v3680_v45 = vxor.u32 2147483648, %v3664_v4  ;;  %v2862_v10 = vsub.s32 %v2858_v60, %v2861_v11  ;;  %v9484_v55 = vld [vmem:[#allocation29_spill] sm:$0xff]  ;;  %v5399_v41 = vpop.eup %5398  ;;  %v2469_v23 = vshll.u32 %v9431_v37, %v2466_v17 }
 0x34e   : > { %v2470_v1 = vshrl.u32 %v9433_v56, %v2467_v44  ;;  %v2473_v0 = vshrl.u32 %v9434_v6, %v2467_v44  ;;  %v7818_v25 = vadd.f32 %v768_v53, %v9484_v55  ;;  %vm2762_vm6 = vcmp.lt.s32.totalorder %v7566_v35, 0 }
 0x34f   : > { %v3677_v28 = vxor.u32 2147483648, %v3672_v47  ;;  %vm2863_vm5 = vcmp.lt.s32.totalorder %v2862_v10, 0  ;;  %v2864_v19 = vsub.s32 0, %v2862_v10  ;;  %v3681_v24 = vsel %vm3679_vm4, %v3680_v45, %v3672_v47 }
 0x350   : > { %v2472_v52 = vshll.u32 %v9433_v56, %v2466_v17  ;;  %v2476_v60 = vshrl.u32 %v9435_v49, %v2467_v44  ;;  %v7827_v32 = vshrl.u32 %v2464_v43, 5  ;;  %v2475_v13 = vshll.u32 %v9434_v6, %v2466_v17 }
 0x351   : > { %v3678_v42 = vsel %vm3676_vm3, %v3664_v4, %v3677_v28  ;;  %v2865_v57 = vsel %vm2863_vm5, %v2864_v19, %v2862_v10  ;;  %v2502_v27 = vshrl.u32 %v7806_v12, 16  ;;  %v2471_v59 = vor.u32 %v2470_v1, %v2469_v23 }
 0x352   : > { %v3682_v14 = vsel %vm3675_vm2, %v3678_v42, %v3681_v24  ;;  %v2866_v36 = vclz %v2865_v57  ;;  %v2474_v34 = vor.u32 %v2473_v0, %v2472_v52  ;;  %vm7833_vm7 = vcmp.le.f32.partialorder %v2760_v46, 0.7853982 }
 0x353   : > { %v3683_v51 = vsel %vm3673_vm1, nan, %v3682_v14  ;;  %v2478_v16 = vshll.u32 %v9435_v49, %v2466_v17  ;;  %v2479_v50 = vshrl.u32 %v9436_v15, %v2467_v44  ;;  %v2481_v9 = vshll.u32 %v9436_v15, %v2466_v17 }
 0x354   : > { %v5064_v8 = vmul.f32 %v5399_v41, %v3683_v51  ;;  %v5226_v48 = vadd.s32 4294967294, %v2866_v36  ;;  %v2482_v18 = vshrl.u32 %v9437_v58, %v2467_v44  ;;  %v2884_v62 = vsub.s32 4, %v7797_v54 }
 0x355   : > { %v2477_v43 = vor.u32 %v2476_v60, %v2475_v13  ;;  %v7844_v4 = vmul.f32 %v7563_v20, %v879_v29  ;;  %v2480_v22 = vor.u32 %v2479_v50, %v2478_v16  ;;  %vm2484_vm9 = vcmp.lt.s32.totalorder %v7827_v32, 1 }
 0x356   : > { %5090 = vst [vmem:[%s6423_s27 + $0x88] sm:$0xff] %v5064_v8  ;;  %vm5227_vm8 = vcmp.lt.s32.totalorder %v5226_v48, 0  ;;  %v2483_v11 = vor.u32 %v2482_v18, %v2481_v9  ;;  %vm2485_vm10 = vcmp.lt.s32.totalorder %v7827_v32, 2  ;;  %vm2487_vm11 = vcmp.lt.s32.totalorder %v7827_v32, 4 }
 0x357   : > { %v2869_v46 = vsel %vm5227_vm8, 0, %v5226_v48  ;;  %vm2486_vm12 = vcmp.lt.s32.totalorder %v7827_v32, 3  ;;  %v2492_v45 = vsel %vm2484_vm9, %v2471_v59, %v2474_v34  ;;  %v2493_v28 = vsel %vm2487_vm11, %v2480_v22, 920167782 }
 0x358   : > { %v2870_v53 = vsub.s32 32, %v2869_v46  ;;  %v2874_v47 = vsub.s32 4294967266, %v2869_v46  ;;  %v2871_v17 = vshll.u32 %v2862_v10, %v2869_v46  ;;  %v2494_v19 = vsel %vm2486_vm12, %v2477_v43, %v2493_v28 }
 0x359   : > { %v2496_v1 = vsel %vm2484_vm9, %v2474_v34, %v2477_v43  ;;  %v7859_v0 = vsel %vm2762_vm6, %v2884_v62, %v7797_v54  ;;  %v2489_v10 = vsel %vm2487_vm11, %v2477_v43, 2102212464  ;;  %v2495_v55 = vsel %vm2485_vm10, %v2492_v45, %v2494_v19 }
 0x35a   : > { %v2872_v20 = vshrl.u32 %v2854_v2, %v2870_v53  ;;  %v2875_v29 = vadd.s32 127, %v2874_v47  ;;  %v2497_v41 = vsel %vm2487_vm11, %v2483_v11, 1326507024  ;;  %v2525_v57 = vand.u32 65535, %v2495_v55 }
 0x35b   : > { %v2498_v2 = vsel %vm2486_vm12, %v2480_v22, %v2497_v41  ;;  %v2468_v23 = vshrl.u32 %v9431_v37, %v2467_v44  ;;  %v2526_v36 = vshrl.u32 %v2495_v55, 16  ;;  %v4936_v54 = vsub.f32 1.0, %v7769_v40 }
 0x35c   : > { %v2873_v42 = vor.u32 %v2872_v20, %v2871_v17  ;;  %v2876_v24 = vshll.u32 %v2875_v29, 23  ;;  %v2499_v14 = vsel %vm2485_vm10, %v2496_v1, %v2498_v2  ;;  %v2887_v60 = vsel %vm7833_vm7, 0, %v7859_v0 }
 0x35d   : > { %v2503_v51 = vand.u32 65535, %v2499_v14  ;;  %v2504_v13 = vshrl.u32 %v2499_v14, 16  ;;  %v2488_v8 = vsel %vm2484_vm9, %v2468_v23, %v2471_v59  ;;  %v2490_v48 = vsel %vm2486_vm12, %v2474_v34, %v2489_v10 }
 0x35e   : > { %v2877_v52 = vor.u32 4788187, %v2876_v24  ;;  %v2528_v44 = vmul.u32 %v2526_v36, %v7815_v38  ;;  %v2529_v16 = vmul.u32 %v2525_v57, %v2502_v27  ;;  %v2880_v9 = vcvt.s32.f32 %v2873_v42 }
 0x35f   : > { %v2506_v40 = vmul.u32 %v2504_v13, %v7815_v38  ;;  %v2507_v18 = vmul.u32 %v2503_v51, %v2502_v27  ;;  %v2527_v62 = vmul.u32 %v2525_v57, %v7815_v38  ;;  %v2530_v43 = vmul.u32 %v2526_v36, %v2502_v27 }
 0x360   : > { %v2878_v50 = vand.u32 2147483647, %v2877_v52  ;;  %v2531_v46 = vshll.u32 %v2528_v44, 16  ;;  %v3992_v22 = vand.u32 2147483647, %v7844_v4  ;;  %v2505_v59 = vmul.u32 %v2503_v51, %v7815_v38 }
 0x361   : > { %v2508_v53 = vmul.u32 %v2504_v13, %v2502_v27  ;;  %v2509_v47 = vshll.u32 %v2506_v40, 16  ;;  %v2511_v34 = vshll.u32 %v2507_v18, 16  ;;  %v2533_v17 = vshll.u32 %v2529_v16, 16 }
 0x362   : > { %v2881_v11 = vmul.f32 %v2880_v9, %v2878_v50  ;;  %vm2535_vm13 = vc.u32 %v2527_v62, %v2531_v46  ;;  %v2537_v45 = vadd.s32 %v2531_v46, %v2527_v62  ;;  %v2532_v1 = vshrl.u32 %v2528_v44, 16 }
 0x363   : > { %vm2513_vm14 = vc.u32 %v2505_v59, %v2509_v47  ;;  %v2515_v20 = vadd.s32 %v2509_v47, %v2505_v59  ;;  %v2536_v29 = vsel %vm2535_vm13, 1, %v9432_v63  ;;  %v3995_v2 = vand.u32 2139095040, %v7844_v4 }
 0x364   : > { %v2882_v28 = vxor.u32 2147483648, %v2881_v11  ;;  %v2514_v19 = vsel %vm2513_vm14, 1, %v9432_v63  ;;  %v2538_v10 = vadd.s32 %v2536_v29, %v2530_v43  ;;  %vm2539_vm15 = vc.u32 %v2537_v45, %v2533_v17 }
 0x365   : > { %v2516_v38 = vadd.s32 %v2514_v19, %v2508_v53  ;;  %vm2517_vm0 = vc.u32 %v2515_v20, %v2511_v34  ;;  %v2540_v27 = vsel %vm2539_vm15, 1, %v9432_v63  ;;  %v2510_v23 = vshrl.u32 %v2506_v40, 16 }
 0x366   : > { %v2883_v55 = vsel %vm2762_vm6, %v2882_v28, %v2881_v11  ;;  %v2518_v42 = vsel %vm2517_vm0, 1, %v9432_v63  ;;  %v2542_v24 = vadd.s32 %v2540_v27, %v2538_v10  ;;  %v2534_v36 = vshrl.u32 %v2529_v16, 16 }
 0x367   : > { %v2886_v41 = vsel %vm7833_vm7, %v7566_v35, %v2883_v55  ;;  %v2520_v14 = vadd.s32 %v2518_v42, %v2516_v38  ;;  %v3996_v51 = vshrl.u32 %v3995_v2, 23  ;;  %v7892_v13 = vmul.f32 %v7795_v61, %v4936_v54 }
 0x368   : > { %v2888_v57 = vmul.f32 %v2886_v41, %v2886_v41  ;;  %v2543_v52 = vadd.s32 %v2542_v24, %v2532_v1  ;;  %v822_v44 = vadd.f32 1.000001, %v7818_v25  ;;  %v2512_v62 = vshrl.u32 %v2507_v18, 16 }
 0x369   : > { %v2521_v43 = vadd.s32 %v2520_v14, %v2510_v23  ;;  %v2491_v46 = vsel %vm2485_vm10, %v2488_v8, %v2490_v48  ;;  %v5249_v59 = vadd.s32 4294967169, %v3996_v51  ;;  %v7899_v47 = vadd.s32 %v2537_v45, %v2533_v17 }
 0x36a   : > { %v2889_v50 = vmul.f32 -0.001358992, %v2888_v57  ;;  %v2896_v9 = vmul.f32 -0.00019511016, %v2888_v57  ;;  %v2544_v11 = vadd.s32 %v2543_v52, %v2534_v36  ;;  %5400 = vrcp.f32 %v822_v44 }
 0x36b   : > { %v7897_v16 = vadd.s32 %v2521_v43, %v2512_v62  ;;  %v5019_v61 = vmul.f32 1.442695, %v7804_v3  ;;  %v3999_v34 = vand.u32 8388607, %v3992_v22  ;;  %v4002_v18 = vadd.s32 1, %v5249_v59  ;;  %v9487_v3 = vld [vmem:[#allocation28_spill] sm:$0xff] }
 0x36c   : > { %v2890_v40 = vadd.f32 0.041655596, %v2889_v50  ;;  %v2897_v53 = vadd.f32 0.008332121, %v2896_v9  ;;  %v2548_v54 = vadd.s32 1, %v2544_v11  ;;  %v2545_v32 = vmul.u32 %v7806_v12, %v2491_v46 }
 0x36d   : > { %vm2547_vm1 = vc.u32 %v7897_v16, %v7899_v47  ;;  %v2904_v8 = vand.u32 3, %v2887_v60  ;;  %vm4003_vm2 = vcmp.gt.s32.totalorder %v4002_v18, 0  ;;  %v658_v17 = vadd.f32 %v7810_v33, %v9487_v3 }
 0x36e   : > { %v2891_v28 = vmul.f32 %v2890_v40, %v2888_v57  ;;  %v2898_v20 = vmul.f32 %v2897_v53, %v2888_v57  ;;  %v2549_v48 = vsel %vm2547_vm1, %v2548_v54, %v2544_v11  ;;  %v4004_v1 = vsel %vm4003_vm2, %v4002_v18, 0 }
 0x36f   : > { %v2550_v19 = vadd.s32 %v2549_v48, %v2545_v32  ;;  %v4000_v12 = vor.u32 8388608, %v3999_v34  ;;  %v4006_v55 = vand.u32 31, %v4004_v1  ;;  %vm2905_vm3 = vcmp.lt.s32.totalorder %v2904_v8, 2 }
 0x370   : > { %v2892_v45 = vadd.f32 -0.4999988, %v2891_v28  ;;  %v2899_v29 = vadd.f32 -0.16666654, %v2898_v20  ;;  %v7913_v10 = vpop.eup %5400  ;;  %5402 = vpow2.f32 %v5019_v61  ;;  %vm2906_vm4 = vcmp.eq.s32.totalorder %v2904_v8, 0 }
 0x371   : > { %v2551_v42 = vadd.s32 536870912, %v2550_v19  ;;  %v7916_v30 = vmul.f32 %v7913_v10, %v658_v17  ;;  %v7918_v0 = vsub.s32 32, %v4006_v55  ;;  %vm2909_vm5 = vcmp.eq.s32.totalorder %v2904_v8, 2 }
 0x372   : > { %v2893_v38 = vmul.f32 %v2892_v45, %v2888_v57  ;;  %v2900_v27 = vmul.f32 %v2899_v29, %v2888_v57  ;;  %v7926_v23 = vshll.u32 %v4000_v12, 8  ;;  %v7929_v51 = vshrl.u32 %v4004_v1, 5 }
 0x373   : > { %v7920_v24 = vshrl.u32 %v2551_v42, 30  ;;  %v4010_v2 = vshrl.u32 %v9433_v56, %v7918_v0  ;;  %v4013_v57 = vshrl.u32 %v9434_v6, %v7918_v0  ;;  %v4009_v44 = vshll.u32 %v9431_v37, %v4006_v55 }
 0x374   : > { %v2894_v60 = vadd.f32 1.0, %v2893_v38  ;;  %v2901_v33 = vadd.f32 1.0, %v2900_v27  ;;  %v4012_v50 = vshll.u32 %v9433_v56, %v4006_v55  ;;  %v4016_v9 = vshrl.u32 %v9435_v49, %v7918_v0 }
 0x375   : > { %v2553_v52 = vshll.u32 %v7920_v24, 30  ;;  %v4019_v62 = vshrl.u32 %v9436_v15, %v7918_v0  ;;  %v4015_v11 = vshll.u32 %v9434_v6, %v4006_v55  ;;  %v4011_v53 = vor.u32 %v4010_v2, %v4009_v44 }
 0x376   : > { %v2902_v14 = vmul.f32 %v2901_v33, %v2886_v41  ;;  %v2910_v36 = vxor.u32 2147483648, %v2894_v60  ;;  %v4018_v41 = vshll.u32 %v9435_v49, %v4006_v55  ;;  %v5403_v59 = vpop.eup %5402  ;;  %v7940_v61 = vor.u32 %v4013_v57, %v4012_v50 }
 0x377   : > { %v2554_v46 = vsub.s32 %v2550_v19, %v2553_v52  ;;  %v4022_v54 = vshrl.u32 %v9437_v58, %v7918_v0  ;;  %v4021_v28 = vshll.u32 %v9436_v15, %v4006_v55  ;;  %vm2903_vm7 = vweird.f32 %v7566_v35 }
 0x378   : > { %v2907_v43 = vxor.u32 2147483648, %v2902_v14  ;;  %v2911_v40 = vsel %vm2909_vm5, %v2910_v36, %v2902_v14  ;;  %v4017_v32 = vor.u32 %v4016_v9, %v4015_v11  ;;  %v4020_v48 = vor.u32 %v4019_v62, %v4018_v41 }
 0x379   : > { %vm2555_vm6 = vcmp.lt.s32.totalorder %v2554_v46, 0  ;;  %v2556_v18 = vsub.s32 0, %v2554_v46  ;;  %v7950_v45 = vmul.f32 %v7571_v39, %v7763_v7  ;;  %v4023_v29 = vor.u32 %v4022_v54, %v4021_v28 }
 0x37a   : > { %v2908_v34 = vsel %vm2906_vm4, %v2894_v60, %v2907_v43  ;;  %v2546_v1 = vadd.s32 %v7899_v47, %v7897_v16  ;;  %vm4024_vm8 = vcmp.lt.s32.totalorder %v7929_v51, 1  ;;  %vm4027_vm9 = vcmp.lt.s32.totalorder %v7929_v51, 4 }
 0x37b   : > { %v2912_v20 = vsel %vm2905_vm3, %v2908_v34, %v2911_v40  ;;  %v2557_v17 = vsel %vm2555_vm6, %v2556_v18, %v2554_v46  ;;  %v4032_v35 = vsel %vm4024_vm8, %v4011_v53, %v7940_v61  ;;  %v4041_v8 = vand.u32 65535, %v7926_v23 }
 0x37c   : > { %v2913_v3 = vsel %vm2903_vm7, nan, %v2912_v20  ;;  %v2558_v12 = vclz %v2557_v17  ;;  %v4931_v55 = vsub.f32 1.0, %v7818_v25  ;;  %vm4026_vm10 = vcmp.lt.s32.totalorder %v7929_v51, 3 }
 0x37d   : > { %v5059_v19 = vmul.f32 %v5403_v59, %v2913_v3  ;;  %v4033_v7 = vsel %vm4027_vm9, %v4020_v48, 920167782  ;;  %v4036_v16 = vsel %vm4024_vm8, %v7940_v61, %v4017_v32  ;;  %vm4025_vm11 = vcmp.lt.s32.totalorder %v7929_v51, 2 }
 0x37e   : > { %v5220_v39 = vadd.s32 4294967294, %v2558_v12  ;;  %v4034_v47 = vsel %vm4026_vm10, %v4017_v32, %v4033_v7  ;;  %v4037_v38 = vsel %vm4027_vm9, %v4023_v29, 1326507024  ;;  %v7974_v25 = vmul.f32 %v7913_v10, %v4931_v55 }
 0x37f   : > { %5085 = vst [vmem:[%s6423_s27 + $0x60] sm:$0xff] %v5059_v19  ;;  %v4035_v27 = vsel %vm4025_vm11, %v4032_v35, %v4034_v47  ;;  %v4038_v42 = vsel %vm4026_vm10, %v4020_v48, %v4037_v38  ;;  %v4042_v60 = vshrl.u32 %v7926_v23, 16  ;;  %v4008_v10 = vshrl.u32 %v9431_v37, %v7918_v0 }
 0x380   : > { %vm5221_vm12 = vcmp.lt.s32.totalorder %v5220_v39, 0  ;;  %v4039_v2 = vsel %vm4025_vm11, %v4036_v16, %v4038_v42  ;;  %v4065_v57 = vand.u32 65535, %v4035_v27  ;;  %v4066_v14 = vshrl.u32 %v4035_v27, 16 }
 0x381   : > { %v2561_v33 = vsel %vm5221_vm12, 0, %v5220_v39  ;;  %v4043_v44 = vand.u32 65535, %v4039_v2  ;;  %v2576_v9 = vsub.s32 4, %v7920_v24  ;;  %v4044_v62 = vshrl.u32 %v4039_v2, 16 }
 0x382   : > { %v2562_v36 = vsub.s32 32, %v2561_v33  ;;  %v2566_v52 = vsub.s32 4294967266, %v2561_v33  ;;  %v2563_v50 = vshll.u32 %v2554_v46, %v2561_v33  ;;  %v4068_v43 = vmul.u32 %v4066_v14, %v4041_v8  ;;  %v7993_v46 = vld [vmem:[%s9373_s1 + $0x6] ss:$0 sm:$0xff] }
 0x383   : > { %v4047_v59 = vmul.u32 %v4043_v44, %v4042_v60  ;;  %v4069_v40 = vmul.u32 %v4065_v57, %v4042_v60  ;;  %v4028_v54 = vsel %vm4024_vm8, %v4008_v10, %v4011_v53  ;;  %v4029_v34 = vsel %vm4027_vm9, %v4017_v32, 2102212464 }
 0x384   : > { %v2564_v11 = vshrl.u32 %v2546_v1, %v2562_v36  ;;  %v2567_v41 = vadd.s32 127, %v2566_v52  ;;  %v4046_v18 = vmul.u32 %v4044_v62, %v4041_v8  ;;  %v4071_v28 = vshll.u32 %v4068_v43, 16 }
 0x385   : > { %v4067_v48 = vmul.u32 %v4065_v57, %v4041_v8  ;;  %v7997_v3 = vmul.f32 %v7993_v46, %v7916_v30  ;;  %vm2454_vm13 = vcmp.lt.s32.totalorder %v7775_v21, 0  ;;  %v4045_v53 = vmul.u32 %v4043_v44, %v4041_v8 }
 0x386   : > { %v2565_v20 = vor.u32 %v2564_v11, %v2563_v50  ;;  %v2568_v0 = vshll.u32 %v2567_v41, 23  ;;  %v4048_v17 = vmul.u32 %v4044_v62, %v4042_v60  ;;  %v4049_v29 = vshll.u32 %v4046_v18, 16 }
 0x387   : > { %v4070_v32 = vmul.u32 %v4066_v14, %v4042_v60  ;;  %v4051_v1 = vshll.u32 %v4047_v59, 16  ;;  %v4073_v12 = vshll.u32 %v4069_v40, 16  ;;  %vm4075_vm14 = vc.u32 %v4067_v48, %v4071_v28 }
 0x388   : > { %v2569_v19 = vor.u32 4788187, %v2568_v0  ;;  %vm4053_vm15 = vc.u32 %v4045_v53, %v4049_v29  ;;  %v4055_v35 = vadd.s32 %v4049_v29, %v4045_v53  ;;  %v4076_v55 = vsel %vm4075_vm14, 1, %v9432_v63 }
 0x389   : > { %v4077_v39 = vadd.s32 %v4071_v28, %v4067_v48  ;;  %v2572_v16 = vcvt.s32.f32 %v2565_v20  ;;  %v4054_v30 = vsel %vm4053_vm15, 1, %v9432_v63  ;;  %v4078_v47 = vadd.s32 %v4076_v55, %v4070_v32 }
 0x38a   : > { %v2570_v7 = vand.u32 2147483647, %v2569_v19  ;;  %v4030_v8 = vsel %vm4026_vm10, %v7940_v61, %v4029_v34  ;;  %v4056_v38 = vadd.s32 %v4054_v30, %v4048_v17  ;;  %vm4057_vm0 = vc.u32 %v4055_v35, %v4051_v1 }
 0x38b   : > { %vm4079_vm1 = vc.u32 %v4077_v39, %v4073_v12  ;;  %v4050_v42 = vshrl.u32 %v4046_v18, 16  ;;  %v4058_v60 = vsel %vm4057_vm0, 1, %v9432_v63  ;;  %v4072_v57 = vshrl.u32 %v4068_v43, 16 }
 0x38c   : > { %v2573_v27 = vmul.f32 %v2572_v16, %v2570_v7  ;;  %v4080_v33 = vsel %vm4079_vm1, 1, %v9432_v63  ;;  %v4060_v2 = vadd.s32 %v4058_v60, %v4056_v38  ;;  %v3225_v36 = vand.u32 2139095040, %v7997_v3 }
 0x38d   : > { %v4082_v14 = vadd.s32 %v4080_v33, %v4078_v47  ;;  %vm8010_vm2 = vcmp.le.f32.partialorder %v2452_v31, 0.7853982  ;;  %v4052_v10 = vshrl.u32 %v4047_v59, 16  ;;  %v4074_v44 = vshrl.u32 %v4069_v40, 16 }
 0x38e   : > { %v2574_v61 = vxor.u32 2147483648, %v2573_v27  ;;  %v4061_v50 = vadd.s32 %v4060_v2, %v4050_v42  ;;  %v3222_v11 = vand.u32 2147483647, %v7997_v3  ;;  %v3226_v41 = vshrl.u32 %v3225_v36, 23  ;;  %v8047_v2 = vld [vmem:[%s9373_s1 + $0x5] ss:$0 sm:$0xff] }
 0x38f   : > { %v4083_v62 = vadd.s32 %v4082_v14, %v4072_v57  ;;  %v2577_v34 = vsel %vm2454_vm13, %v2576_v9, %v7920_v24  ;;  %v4031_v31 = vsel %vm4025_vm11, %v4028_v54, %v4030_v8  ;;  %v8022_v18 = vadd.s32 %v4077_v39, %v4073_v12  ;;  %v566_v8 = vpop.permute.xlu1 %565 }
 0x390   : > { %v2575_v43 = vsel %vm2454_vm13, %v2574_v61, %v2573_v27  ;;  %v4062_v40 = vadd.s32 %v4061_v50, %v4052_v10  ;;  %v5234_v20 = vadd.s32 4294967169, %v3226_v41  ;;  %v3229_v53 = vand.u32 8388607, %v3222_v11 }
 0x391   : > { %v2578_v59 = vsel %vm8010_vm2, %v7775_v21, %v2575_v43  ;;  %v4084_v28 = vadd.s32 %v4083_v62, %v4074_v44  ;;  %v2579_v51 = vsel %vm8010_vm2, 0, %v2577_v34  ;;  %v4085_v17 = vmul.u32 %v7926_v23, %v4031_v31 }
 0x392   : > { %v2580_v0 = vmul.f32 %v2578_v59, %v2578_v59  ;;  %vm4087_vm3 = vc.u32 %v4062_v40, %v8022_v18  ;;  %v3232_v24 = vadd.s32 1, %v5234_v20  ;;  %v5015_v29 = vmul.f32 1.442695, %v7950_v45 }
 0x393   : > { %v4088_v48 = vadd.s32 1, %v4084_v28  ;;  %v2596_v55 = vand.u32 3, %v2579_v51  ;;  %v3230_v39 = vor.u32 8388608, %v3229_v53  ;;  %v766_v57 = vmul.f32 %v8047_v2, %v566_v8 }
 0x394   : > { %v2581_v9 = vmul.f32 -0.001358992, %v2580_v0  ;;  %v2588_v54 = vmul.f32 -0.00019511016, %v2580_v0  ;;  %vm3233_vm4 = vcmp.gt.s32.totalorder %v3232_v24, 0  ;;  %5404 = vpow2.f32 %v5015_v29 }
 0x395   : > { %v4089_v32 = vsel %vm4087_vm3, %v4088_v48, %v4084_v28  ;;  %v3234_v35 = vsel %vm3233_vm4, %v3232_v24, 0  ;;  %vm2598_vm5 = vcmp.eq.s32.totalorder %v2596_v55, 0  ;;  %vm2601_vm6 = vcmp.eq.s32.totalorder %v2596_v55, 2 }
 0x396   : > { %v2582_v19 = vadd.f32 0.041655596, %v2581_v9  ;;  %v2589_v1 = vadd.f32 0.008332121, %v2588_v54  ;;  %v4090_v12 = vadd.s32 %v4089_v32, %v4085_v17  ;;  %v3236_v7 = vand.u32 31, %v3234_v35 }
 0x397   : > { %v8042_v33 = vshll.u32 %v3230_v39, 8  ;;  %vm2597_vm7 = vcmp.lt.s32.totalorder %v2596_v55, 2  ;;  %v8051_v61 = vshrl.u32 %v3234_v35, 5  ;;  %vm2595_vm8 = vweird.f32 %v7775_v21  ;;  %v8077_v32 = vld [vmem:[%s9373_s1 + $0x2] ss:$0 sm:$0xff] }
 0x398   : > { %v2583_v16 = vmul.f32 %v2582_v19, %v2580_v0  ;;  %v2590_v30 = vmul.f32 %v2589_v1, %v2580_v0  ;;  %v4091_v47 = vadd.s32 536870912, %v4090_v12  ;;  %v8034_v38 = vsub.s32 32, %v3236_v7 }
 0x399   : > { %v3239_v10 = vshll.u32 %v9431_v37, %v3236_v7  ;;  %v3242_v44 = vshll.u32 %v9433_v56, %v3236_v7  ;;  %v3245_v50 = vshll.u32 %v9434_v6, %v3236_v7  ;;  %v4086_v54 = vadd.s32 %v8022_v18, %v4062_v40  ;;  %v9490_v18 = vld [vmem:[#allocation25_spill] sm:$0xff] }
 0x39a   : > { %v2584_v27 = vadd.f32 -0.4999988, %v2583_v16  ;;  %v2591_v42 = vadd.f32 -0.16666654, %v2590_v30  ;;  %v8036_v23 = vshrl.u32 %v4091_v47, 30  ;;  %v3240_v45 = vshrl.u32 %v9433_v56, %v8034_v38  ;;  %v5405_v53 = vpop.eup %5404 }
 0x39b   : > { %v3243_v60 = vshrl.u32 %v9434_v6, %v8034_v38  ;;  %v3249_v62 = vshrl.u32 %v9436_v15, %v8034_v38  ;;  %v3246_v31 = vshrl.u32 %v9435_v49, %v8034_v38  ;;  %v3252_v48 = vshrl.u32 %v9437_v58, %v8034_v38 }
 0x39c   : > { %v2585_v14 = vmul.f32 %v2584_v27, %v2580_v0  ;;  %v2592_v36 = vmul.f32 %v2591_v42, %v2580_v0  ;;  %v4093_v52 = vshll.u32 %v8036_v23, 30  ;;  %v8063_v28 = vor.u32 %v3240_v45, %v3239_v10 }
 0x39d   : > { %v8065_v20 = vor.u32 %v3243_v60, %v3242_v44  ;;  %v3248_v0 = vshll.u32 %v9435_v49, %v3236_v7  ;;  %v3251_v29 = vshll.u32 %v9436_v15, %v3236_v7  ;;  %v8080_v19 = vmul.f32 %v8077_v32, %v566_v8 }
 0x39e   : > { %v2586_v41 = vadd.f32 1.0, %v2585_v14  ;;  %v2593_v43 = vadd.f32 1.0, %v2592_v36  ;;  %v8059_v34 = vsub.s32 %v4090_v12, %v4093_v52  ;;  %v3247_v12 = vor.u32 %v3246_v31, %v3245_v50  ;;  %v8116_v31 = vpop.permute.xlu2 %605 }
 0x39f   : > { %v3250_v17 = vor.u32 %v3249_v62, %v3248_v0  ;;  %v3271_v35 = vand.u32 65535, %v8042_v33  ;;  %v3253_v16 = vor.u32 %v3252_v48, %v3251_v29  ;;  %vm3254_vm10 = vcmp.lt.s32.totalorder %v8051_v61, 1 }
 0x3a0   : > { %v2594_v24 = vmul.f32 %v2593_v43, %v2578_v59  ;;  %v2602_v51 = vxor.u32 2147483648, %v2586_v41  ;;  %vm4095_vm9 = vcmp.lt.s32.totalorder %v8059_v34, 0  ;;  %v4096_v9 = vsub.s32 0, %v8059_v34 }
 0x3a1   : > { %v8086_v40 = vadd.f32 %v766_v57, %v9490_v18  ;;  %vm3257_vm11 = vcmp.lt.s32.totalorder %v8051_v61, 4  ;;  %v3262_v47 = vsel %vm3254_vm10, %v8063_v28, %v8065_v20  ;;  %vm3256_vm12 = vcmp.lt.s32.totalorder %v8051_v61, 3 }
 0x3a2   : > { %v2599_v1 = vxor.u32 2147483648, %v2594_v24  ;;  %v4097_v59 = vsel %vm4095_vm9, %v4096_v9, %v8059_v34  ;;  %v2603_v30 = vsel %vm2601_vm6, %v2602_v51, %v2594_v24  ;;  %v3263_v42 = vsel %vm3257_vm11, %v3250_v17, 920167782 }
 0x3a3   : > { %v4098_v39 = vclz %v4097_v59  ;;  %vm3255_vm13 = vcmp.lt.s32.totalorder %v8051_v61, 2  ;;  %v3264_v60 = vsel %vm3256_vm12, %v3247_v12, %v3263_v42  ;;  %v3272_v57 = vshrl.u32 %v8042_v33, 16 }
 0x3a4   : > { %v2600_v7 = vsel %vm2598_vm5, %v2586_v41, %v2599_v1  ;;  %v3265_v55 = vsel %vm3255_vm13, %v3262_v47, %v3264_v60  ;;  %v3266_v36 = vsel %vm3254_vm10, %v8065_v20, %v3247_v12  ;;  %v3267_v21 = vsel %vm3257_vm11, %v3253_v16, 1326507024 }
 0x3a5   : > { %v2604_v8 = vsel %vm2597_vm7, %v2600_v7, %v2603_v30  ;;  %v5250_v27 = vadd.s32 4294967294, %v4098_v39  ;;  %v3295_v10 = vand.u32 65535, %v3265_v55  ;;  %v3296_v44 = vshrl.u32 %v3265_v55, 16 }
 0x3a6   : > { %v2605_v45 = vsel %vm2595_vm8, nan, %v2604_v8  ;;  %v3268_v41 = vsel %vm3256_vm12, %v3250_v17, %v3267_v21  ;;  %v820_v43 = vadd.f32 1.000001, %v8086_v40  ;;  %v3238_v59 = vshrl.u32 %v9431_v37, %v8034_v38 }
 0x3a7   : > { %v5057_v14 = vmul.f32 %v5405_v53, %v2605_v45  ;;  %vm5251_vm14 = vcmp.lt.s32.totalorder %v5250_v27, 0  ;;  %v3269_v48 = vsel %vm3255_vm13, %v3266_v36, %v3268_v41  ;;  %v3298_v53 = vmul.u32 %v3296_v44, %v3271_v35 }
 0x3a8   : > { %v4101_v52 = vsel %vm5251_vm14, 0, %v5250_v27  ;;  %v3299_v24 = vmul.u32 %v3295_v10, %v3272_v57  ;;  %v3273_v29 = vand.u32 65535, %v3269_v48  ;;  %v3274_v1 = vshrl.u32 %v3269_v48, 16 }
 0x3a9   : > { %5083 = vst [vmem:[%s6423_s27 + $0x50] sm:$0xff] %v5057_v14  ;;  %v4102_v50 = vsub.s32 32, %v4101_v52  ;;  %v4106_v62 = vsub.s32 4294967266, %v4101_v52  ;;  %v4103_v0 = vshll.u32 %v8059_v34, %v4101_v52  ;;  %v3297_v39 = vmul.u32 %v3295_v10, %v3271_v35 }
 0x3aa   : > { %v3301_v17 = vshll.u32 %v3298_v53, 16  ;;  %v776_v16 = vmul.f32 %v8047_v2, %v8116_v31  ;;  %v3259_v34 = vsel %vm3257_vm11, %v3247_v12, 2102212464  ;;  %v3276_v30 = vmul.u32 %v3274_v1, %v3271_v35 }
 0x3ab   : > { %v4104_v51 = vshrl.u32 %v4086_v54, %v4102_v50  ;;  %v4107_v9 = vadd.s32 127, %v4106_v62  ;;  %v3277_v47 = vmul.u32 %v3273_v29, %v3272_v57  ;;  %v3300_v8 = vmul.u32 %v3296_v44, %v3272_v57 }
 0x3ac   : > { %v3303_v54 = vshll.u32 %v3299_v24, 16  ;;  %vm3305_vm15 = vc.u32 %v3297_v39, %v3301_v17  ;;  %v3275_v42 = vmul.u32 %v3273_v29, %v3271_v35  ;;  %v3278_v45 = vmul.u32 %v3274_v1, %v3272_v57  ;;  %v9491_v29 = vld [vmem:[#allocation27_spill] sm:$0xff] }
 0x3ad   : > { %v4105_v18 = vor.u32 %v4104_v51, %v4103_v0  ;;  %v4108_v7 = vshll.u32 %v4107_v9, 23  ;;  %v3279_v60 = vshll.u32 %v3276_v30, 16  ;;  %v3281_v14 = vshll.u32 %v3277_v47, 16 }
 0x3ae   : > { %v3306_v55 = vsel %vm3305_vm15, 1, %v9432_v63  ;;  %v3307_v36 = vadd.s32 %v3301_v17, %v3297_v39  ;;  %v3258_v12 = vsel %vm3254_vm10, %v3238_v59, %v8063_v28  ;;  %v3260_v44 = vsel %vm3256_vm12, %v8065_v20, %v3259_v34  ;;  %v9494_v34 = vld [vmem:[#allocation24_spill] sm:$0xff] }
 0x3af   : > { %v4109_v27 = vor.u32 4788187, %v4108_v7  ;;  %v4112_v38 = vcvt.s32.f32 %v4105_v18  ;;  %vm3283_vm0 = vc.u32 %v3275_v42, %v3279_v60  ;;  %v3285_v21 = vadd.s32 %v3279_v60, %v3275_v42 }
 0x3b0   : > { %v3308_v10 = vadd.s32 %v3306_v55, %v3300_v8  ;;  %v3284_v35 = vsel %vm3283_vm0, 1, %v9432_v63  ;;  %vm3309_vm1 = vc.u32 %v3307_v36, %v3303_v54  ;;  %v3302_v0 = vshrl.u32 %v3298_v53, 16 }
 0x3b1   : > { %v4110_v52 = vand.u32 2147483647, %v4109_v27  ;;  %v3286_v50 = vadd.s32 %v3284_v35, %v3278_v45  ;;  %vm3287_vm2 = vc.u32 %v3285_v21, %v3281_v14  ;;  %v3310_v62 = vsel %vm3309_vm1, 1, %v9432_v63 }
 0x3b2   : > { %v3288_v41 = vsel %vm3287_vm2, 1, %v9432_v63  ;;  %v3312_v48 = vadd.s32 %v3310_v62, %v3308_v10  ;;  %5406 = vrcp.f32 %v820_v43  ;;  %v3280_v9 = vshrl.u32 %v3276_v30, 16  ;;  %v9495_v62 = vld [vmem:[#allocation26_spill] sm:$0xff] }
 0x3b3   : > { %v4113_v57 = vmul.f32 %v4112_v38, %v4110_v52  ;;  %v3290_v28 = vadd.s32 %v3288_v41, %v3286_v50  ;;  %v8138_v1 = vadd.f32 %v776_v16, %v9491_v29  ;;  %vm8142_vm3 = vcmp.le.f32.partialorder %v3992_v22, 0.7853982 }
 0x3b4   : > { %vm3994_vm4 = vcmp.lt.s32.totalorder %v7844_v4, 0  ;;  %v3304_v59 = vshrl.u32 %v3299_v24, 16  ;;  %v3313_v39 = vadd.s32 %v3312_v48, %v3302_v0  ;;  %v3282_v43 = vshrl.u32 %v3277_v47, 16 }
 0x3b5   : > { %v4114_v51 = vxor.u32 2147483648, %v4113_v57  ;;  %v3291_v17 = vadd.s32 %v3290_v28, %v3280_v9  ;;  %v830_v18 = vadd.f32 1.000001, %v8138_v1  ;;  %v3261_v22 = vsel %vm3255_vm13, %v3258_v12, %v3260_v44 }
 0x3b6   : > { %v3314_v7 = vadd.s32 %v3313_v39, %v3304_v59  ;;  %v656_v30 = vadd.f32 %v8080_v19, %v9494_v34  ;;  %v8159_v27 = vadd.s32 %v3307_v36, %v3303_v54  ;;  %v4116_v42 = vsub.s32 4, %v8036_v23 }
 0x3b7   : > { %v4115_v53 = vsel %vm3994_vm4, %v4114_v51, %v4113_v57  ;;  %v8157_v8 = vadd.s32 %v3291_v17, %v3282_v43  ;;  %5408 = vrcp.f32 %v830_v18  ;;  %v4929_v60 = vsub.f32 1.0, %v8086_v40 }
 0x3b8   : > { %v4118_v16 = vsel %vm8142_vm3, %v7844_v4, %v4115_v53  ;;  %v5407_v47 = vpop.eup %5406  ;;  %v3318_v45 = vadd.s32 1, %v3314_v7  ;;  %v640_v61 = vmul.f32 %v8077_v32, %v8116_v31  ;;  %v3315_v55 = vmul.u32 %v8042_v33, %v3261_v22  ;;  %v8176_v31 = vld [vmem:[%s9373_s1 + $0x7] ss:$0 sm:$0xff] }
 0x3b9   : > { %v4120_v24 = vmul.f32 %v4118_v16, %v4118_v16  ;;  %vm3317_vm5 = vc.u32 %v8157_v8, %v8159_v27  ;;  %v872_v54 = vmul.f32 %v5407_v47, %v656_v30  ;;  %v8168_v36 = vmul.f32 %v5407_v47, %v4929_v60 }
 0x3ba   : > { %v3319_v19 = vsel %vm3317_vm5, %v3318_v45, %v3314_v7  ;;  %v4117_v40 = vsel %vm3994_vm4, %v4116_v42, %v8036_v23  ;;  %v4989_v33 = vmul.f32 %v8176_v31, %v7892_v13  ;;  %v666_v41 = vadd.f32 %v640_v61, %v9495_v62 }
 0x3bb   : > { %v4121_v38 = vmul.f32 -0.001358992, %v4120_v24  ;;  %v4128_v14 = vmul.f32 -0.00019511016, %v4120_v24  ;;  %v3320_v10 = vadd.s32 %v3319_v19, %v3315_v55  ;;  %v8181_v12 = vmul.f32 %v7993_v46, %v872_v54 }
 0x3bc   : > { %v4119_v13 = vsel %vm8142_vm3, 0, %v4117_v40  ;;  %v5035_v29 = vmul.f32 1.442695, %v4989_v33  ;;  %v4984_v17 = vmul.f32 %v8176_v31, %v7974_v25  ;;  %vm4135_vm6 = vweird.f32 %v7844_v4 }
 0x3bd   : > { %v4122_v52 = vadd.f32 0.041655596, %v4121_v38  ;;  %v4129_v21 = vadd.f32 0.008332121, %v4128_v14  ;;  %v8183_v44 = vpop.eup %5408  ;;  %v3321_v50 = vadd.s32 536870912, %v3320_v10  ;;  %v2917_v0 = vand.u32 2139095040, %v8181_v12 }
 0x3be   : > { %v2914_v23 = vand.u32 2147483647, %v8181_v12  ;;  %v882_v28 = vmul.f32 %v8183_v44, %v666_v41  ;;  %v4136_v30 = vand.u32 3, %v4119_v13  ;;  %5410 = vpow2.f32 %v5035_v29 }
 0x3bf   : > { %v4123_v35 = vmul.f32 %v4122_v52, %v4120_v24  ;;  %v4130_v57 = vmul.f32 %v4129_v21, %v4120_v24  ;;  %v3322_v9 = vshrl.u32 %v3321_v50, 30  ;;  %v2918_v59 = vshrl.u32 %v2917_v0, 23 }
 0x3c0   : > { %v2921_v22 = vand.u32 8388607, %v2914_v23  ;;  %vm3224_vm7 = vcmp.lt.s32.totalorder %v7997_v3, 0  ;;  %v8197_v25 = vmul.f32 1.442695, %v4984_v17  ;;  %vm4137_vm10 = vcmp.lt.s32.totalorder %v4136_v30, 2 }
 0x3c1   : > { %v4124_v48 = vadd.f32 -0.4999988, %v4123_v35  ;;  %v4131_v51 = vadd.f32 -0.16666654, %v4130_v57  ;;  %v3323_v43 = vshll.u32 %v3322_v9, 30  ;;  %v5228_v18 = vadd.s32 4294967169, %v2918_v59 }
 0x3c2   : > { %v3346_v60 = vsub.s32 4, %v3322_v9  ;;  %v2922_v61 = vor.u32 8388608, %v2921_v22  ;;  %vm4138_vm11 = vcmp.eq.s32.totalorder %v4136_v30, 0  ;;  %vm4141_vm12 = vcmp.eq.s32.totalorder %v4136_v30, 2 }
 0x3c3   : > { %v4125_v39 = vmul.f32 %v4124_v48, %v4120_v24  ;;  %v4132_v53 = vmul.f32 %v4131_v51, %v4120_v24  ;;  %v3324_v47 = vsub.s32 %v3320_v10, %v3323_v43  ;;  %v2924_v20 = vadd.s32 1, %v5228_v18 }
 0x3c4   : > { %vm8201_vm13 = vcmp.le.f32.partialorder %v3222_v11, 0.7853982  ;;  %v8208_v40 = vmul.f32 %v7993_v46, %v882_v28  ;;  %v5411_v33 = vpop.eup %5410  ;;  %v3347_v11 = vsel %vm3224_vm7, %v3346_v60, %v3322_v9  ;;  %v8212_v50 = vshll.u32 %v2922_v61, 8 }
 0x3c5   : > { %v4126_v7 = vadd.f32 1.0, %v4125_v39  ;;  %v4133_v34 = vadd.f32 1.0, %v4132_v53  ;;  %vm3325_vm8 = vcmp.lt.s32.totalorder %v3324_v47, 0  ;;  %v3326_v45 = vsub.s32 0, %v3324_v47 }
 0x3c6   : > { %vm2925_vm9 = vcmp.gt.s32.totalorder %v2924_v20, 0  ;;  %5412 = vpow2.f32 %v8197_v25 }
 0x3c7   : > { %v4134_v42 = vmul.f32 %v4133_v34, %v4118_v16  ;;  %v4142_v24 = vxor.u32 2147483648, %v4126_v7  ;;  %v3327_v14 = vsel %vm3325_vm8, %v3326_v45, %v3324_v47  ;;  %v2926_v55 = vsel %vm2925_vm9, %v2924_v20, 0 }
 0x3c8   : > { %v3316_v16 = vadd.s32 %v8159_v27, %v8157_v8  ;;  %v3328_v54 = vclz %v3327_v14  ;;  %v2928_v10 = vand.u32 31, %v2926_v55  ;;  %v8216_v8 = vshrl.u32 %v2926_v55, 5 }
 0x3c9   : > { %v4139_v38 = vxor.u32 2147483648, %v4134_v42  ;;  %v4143_v21 = vsel %vm4141_vm12, %v4142_v24, %v4134_v42  ;;  %v3349_v20 = vsel %vm8201_vm13, 0, %v3347_v11  ;;  %v2963_v14 = vand.u32 65535, %v8212_v50 }
 0x3ca   : > { %v5235_v57 = vadd.s32 4294967294, %v3328_v54  ;;  %v2929_v27 = vsub.s32 32, %v2928_v10  ;;  %v2931_v41 = vshll.u32 %v9431_v37, %v2928_v10  ;;  %v2934_v46 = vshll.u32 %v9433_v56, %v2928_v10 }
 0x3cb   : > { %v4140_v52 = vsel %vm4138_vm11, %v4126_v7, %v4139_v38  ;;  %v2937_v48 = vshll.u32 %v9434_v6, %v2928_v10  ;;  %v2940_v13 = vshll.u32 %v9435_v49, %v2928_v10  ;;  %v2943_v18 = vshll.u32 %v9436_v15, %v2928_v10 }
 0x3cc   : > { %v4144_v35 = vsel %vm4137_vm10, %v4140_v52, %v4143_v21  ;;  %vm5236_vm14 = vcmp.lt.s32.totalorder %v5235_v57, 0  ;;  %v2932_v28 = vshrl.u32 %v9433_v56, %v2929_v27  ;;  %v2935_v9 = vshrl.u32 %v9434_v6, %v2929_v27 }
 0x3cd   : > { %v4145_v62 = vsel %vm4135_vm6, nan, %v4144_v35  ;;  %v3331_v51 = vsel %vm5236_vm14, 0, %v5235_v57  ;;  %v2938_v39 = vshrl.u32 %v9435_v49, %v2929_v27  ;;  %v2941_v17 = vshrl.u32 %v9436_v15, %v2929_v27 }
 0x3ce   : > { %v5067_v0 = vmul.f32 %v5411_v33, %v4145_v62  ;;  %v3332_v4 = vsub.s32 32, %v3331_v51  ;;  %v3333_v29 = vshll.u32 %v3324_v47, %v3331_v51  ;;  %v3336_v59 = vsub.s32 4294967266, %v3331_v51 }
 0x3cf   : > { %v2933_v53 = vor.u32 %v2932_v28, %v2931_v41  ;;  %v2936_v43 = vor.u32 %v2935_v9, %v2934_v46  ;;  %v2939_v34 = vor.u32 %v2938_v39, %v2937_v48  ;;  %v2944_v30 = vshrl.u32 %v9437_v58, %v2929_v27 }
 0x3d0   : > { %5093 = vst [vmem:[%s6423_s27 + $0xa0] sm:$0xff] %v5067_v0  ;;  %v3334_v22 = vshrl.u32 %v3316_v16, %v3332_v4  ;;  %v3337_v7 = vadd.s32 127, %v3336_v59  ;;  %v2942_v42 = vor.u32 %v2941_v17, %v2940_v13  ;;  %vm2946_vm15 = vcmp.lt.s32.totalorder %v8216_v8, 1 }
 0x3d1   : > { %v4939_v47 = vsub.f32 1.0, %v8138_v1  ;;  %v2945_v60 = vor.u32 %v2944_v30, %v2943_v18  ;;  %vm2949_vm0 = vcmp.lt.s32.totalorder %v8216_v8, 4  ;;  %vm2948_vm1 = vcmp.lt.s32.totalorder %v8216_v8, 3 }
 0x3d2   : > { %v3335_v24 = vor.u32 %v3334_v22, %v3333_v29  ;;  %v3338_v45 = vshll.u32 %v3337_v7, 23  ;;  %v2954_v61 = vsel %vm2946_vm15, %v2933_v53, %v2936_v43  ;;  %v2955_v38 = vsel %vm2949_vm0, %v2942_v42, 920167782 }
 0x3d3   : > { %vm2947_vm2 = vcmp.lt.s32.totalorder %v8216_v8, 2  ;;  %v2956_v16 = vsel %vm2948_vm1, %v2939_v34, %v2955_v38  ;;  %v4457_v54 = vand.u32 2139095040, %v8208_v40  ;;  %v2958_v21 = vsel %vm2946_vm15, %v2936_v43, %v2939_v34 }
 0x3d4   : > { %v3339_v55 = vor.u32 4788187, %v3338_v45  ;;  %v2957_v52 = vsel %vm2947_vm2, %v2954_v61, %v2956_v16  ;;  %v2959_v10 = vsel %vm2949_vm0, %v2945_v60, 1326507024  ;;  %v2964_v33 = vshrl.u32 %v8212_v50, 16 }
 0x3d5   : > { %v3342_v57 = vcvt.s32.f32 %v3335_v24  ;;  %v2960_v11 = vsel %vm2948_vm1, %v2942_v42, %v2959_v10  ;;  %v2988_v62 = vshrl.u32 %v2957_v52, 16  ;;  %v2930_v41 = vshrl.u32 %v9431_v37, %v2929_v27 }
 0x3d6   : > { %v3340_v35 = vand.u32 2147483647, %v3339_v55  ;;  %v2951_v0 = vsel %vm2949_vm0, %v2939_v34, 2102212464  ;;  %v2961_v46 = vsel %vm2947_vm2, %v2958_v21, %v2960_v11  ;;  %v2987_v48 = vand.u32 65535, %v2957_v52 }
 0x3d7   : > { %v2965_v28 = vand.u32 65535, %v2961_v46  ;;  %v2966_v9 = vshrl.u32 %v2961_v46, 16  ;;  %v4458_v13 = vshrl.u32 %v4457_v54, 23  ;;  %v8258_v4 = vand.u32 3, %v3349_v20 }
 0x3d8   : > { %v3343_v51 = vmul.f32 %v3342_v57, %v3340_v35  ;;  %v2950_v29 = vsel %vm2946_vm15, %v2930_v41, %v2933_v53  ;;  %v2990_v59 = vmul.u32 %v2988_v62, %v2963_v14  ;;  %v4454_v39 = vand.u32 2147483647, %v8208_v40 }
 0x3d9   : > { %v2952_v17 = vsel %vm2948_vm1, %v2936_v43, %v2951_v0  ;;  %v2968_v18 = vmul.u32 %v2966_v9, %v2963_v14  ;;  %v2969_v22 = vmul.u32 %v2965_v28, %v2964_v33  ;;  %v2989_v7 = vmul.u32 %v2987_v48, %v2963_v14 }
 0x3da   : > { %v3344_v27 = vxor.u32 2147483648, %v3343_v51  ;;  %v2991_v34 = vmul.u32 %v2987_v48, %v2964_v33  ;;  %v2992_v30 = vmul.u32 %v2988_v62, %v2964_v33  ;;  %v2993_v42 = vshll.u32 %v2990_v59, 16 }
 0x3db   : > { %v2967_v24 = vmul.u32 %v2965_v28, %v2963_v14  ;;  %v2971_v45 = vshll.u32 %v2968_v18, 16  ;;  %v5258_v60 = vadd.s32 4294967169, %v4458_v13  ;;  %v2970_v61 = vmul.u32 %v2966_v9, %v2964_v33 }
 0x3dc   : > { %v3345_v20 = vsel %vm3224_vm7, %v3344_v27, %v3343_v51  ;;  %v2973_v38 = vshll.u32 %v2969_v22, 16  ;;  %vm2997_vm3 = vc.u32 %v2989_v7, %v2993_v42  ;;  %v2995_v52 = vshll.u32 %v2991_v34, 16 }
 0x3dd   : > { %v3348_v53 = vsel %vm8201_vm13, %v7997_v3, %v3345_v20  ;;  %vm2975_vm4 = vc.u32 %v2967_v24, %v2971_v45  ;;  %v2977_v55 = vadd.s32 %v2971_v45, %v2967_v24  ;;  %v2998_v16 = vsel %vm2997_vm3, 1, %v9432_v63 }
 0x3de   : > { %v3350_v43 = vmul.f32 %v3348_v53, %v3348_v53  ;;  %v2976_v54 = vsel %vm2975_vm4, 1, %v9432_v63  ;;  %v2999_v21 = vadd.s32 %v2993_v42, %v2989_v7  ;;  %v3000_v10 = vadd.s32 %v2998_v16, %v2992_v30 }
 0x3df   : > { %v2978_v57 = vadd.s32 %v2976_v54, %v2970_v61  ;;  %vm2979_vm5 = vc.u32 %v2977_v55, %v2973_v38  ;;  %v2972_v11 = vshrl.u32 %v2968_v18, 16  ;;  %v2994_v33 = vshrl.u32 %v2990_v59, 16 }
 0x3e0   : > { %v3351_v14 = vmul.f32 -0.001358992, %v3350_v43  ;;  %v3358_v35 = vmul.f32 -0.00019511016, %v3350_v43  ;;  %v2980_v19 = vsel %vm2979_vm5, 1, %v9432_v63  ;;  %vm3001_vm6 = vc.u32 %v2999_v21, %v2995_v52 }
 0x3e1   : > { %v2982_v0 = vadd.s32 %v2980_v19, %v2978_v57  ;;  %v3002_v46 = vsel %vm3001_vm6, 1, %v9432_v63  ;;  %v2974_v48 = vshrl.u32 %v2969_v22, 16  ;;  %v2996_v51 = vshrl.u32 %v2991_v34, 16 }
 0x3e2   : > { %v3352_v62 = vadd.f32 0.041655596, %v3351_v14  ;;  %v3359_v41 = vadd.f32 0.008332121, %v3358_v35  ;;  %v3004_v28 = vadd.s32 %v3002_v46, %v3000_v10  ;;  %v4464_v9 = vadd.s32 1, %v5258_v60  ;;  %v5413_v35 = vpop.eup %5412 }
 0x3e3   : > { %v2983_v7 = vadd.s32 %v2982_v0, %v2972_v11  ;;  %v8277_v18 = vmul.f32 %v8183_v44, %v4939_v47  ;;  %v8279_v30 = vadd.s32 %v2999_v21, %v2995_v52  ;;  %v4461_v42 = vand.u32 8388607, %v4454_v39 }
 0x3e4   : > { %v3353_v13 = vmul.f32 %v3352_v62, %v3350_v43  ;;  %v3360_v27 = vmul.f32 %v3359_v41, %v3350_v43  ;;  %v3005_v59 = vadd.s32 %v3004_v28, %v2994_v33  ;;  %vm4465_vm7 = vcmp.gt.s32.totalorder %v4464_v9, 0 }
 0x3e5   : > { %v8283_v34 = vadd.s32 %v2983_v7, %v2974_v48  ;;  %v4466_v24 = vsel %vm4465_vm7, %v4464_v9, 0  ;;  %v2953_v1 = vsel %vm2947_vm2, %v2950_v29, %v2952_v17  ;;  %vm3367_vm8 = vcmp.lt.s32.totalorder %v8258_v4, 2 }
 0x3e6   : > { %v3354_v20 = vadd.f32 -0.4999988, %v3353_v13  ;;  %v3361_v22 = vadd.f32 -0.16666654, %v3360_v27  ;;  %v3006_v45 = vadd.s32 %v3005_v59, %v2996_v51  ;;  %v4468_v44 = vand.u32 31, %v4466_v24 }
 0x3e7   : > { %vm3009_vm9 = vc.u32 %v8283_v34, %v8279_v30  ;;  %vm3368_vm10 = vcmp.eq.s32.totalorder %v8258_v4, 0  ;;  %vm3371_vm11 = vcmp.eq.s32.totalorder %v8258_v4, 2  ;;  %v3007_v8 = vmul.u32 %v8212_v50, %v2953_v1 }
 0x3e8   : > { %v3355_v47 = vmul.f32 %v3354_v20, %v3350_v43  ;;  %v3362_v60 = vmul.f32 %v3361_v22, %v3350_v43  ;;  %v3010_v61 = vadd.s32 1, %v3006_v45  ;;  %v4469_v38 = vsub.s32 32, %v4468_v44 }
 0x3e9   : > { %v4462_v29 = vor.u32 8388608, %v4461_v42  ;;  %v4471_v16 = vshll.u32 %v9431_v37, %v4468_v44  ;;  %v8298_v57 = vshrl.u32 %v4466_v24, 5  ;;  %v4474_v11 = vshll.u32 %v9433_v56, %v4468_v44 }
 0x3ea   : > { %v3356_v55 = vadd.f32 1.0, %v3355_v47  ;;  %v3363_v25 = vadd.f32 1.0, %v3362_v60  ;;  %v3011_v17 = vsel %vm3009_vm9, %v3010_v61, %v3006_v45  ;;  %v4472_v43 = vshrl.u32 %v9433_v56, %v4469_v38 }
 0x3eb   : > { %v4475_v54 = vshrl.u32 %v9434_v6, %v4469_v38  ;;  %v3012_v10 = vadd.s32 %v3011_v17, %v3007_v8  ;;  %v4478_v14 = vshrl.u32 %v9435_v49, %v4469_v38  ;;  %v4480_v50 = vshll.u32 %v9435_v49, %v4468_v44 }
 0x3ec   : > { %v3364_v52 = vmul.f32 %v3363_v25, %v3348_v53  ;;  %v3372_v21 = vxor.u32 2147483648, %v3356_v55  ;;  %v4481_v19 = vshrl.u32 %v9436_v15, %v4469_v38  ;;  %v4473_v41 = vor.u32 %v4472_v43, %v4471_v16 }
 0x3ed   : > { %v3013_v62 = vadd.s32 536870912, %v3012_v10  ;;  %v4477_v0 = vshll.u32 %v9434_v6, %v4468_v44  ;;  %v8304_v46 = vor.u32 %v4475_v54, %v4474_v11  ;;  %v4483_v48 = vshll.u32 %v9436_v15, %v4468_v44 }
 0x3ee   : > { %v3369_v33 = vxor.u32 2147483648, %v3364_v52  ;;  %v4482_v53 = vor.u32 %v4481_v19, %v4480_v50  ;;  %v4484_v51 = vshrl.u32 %v9437_v58, %v4469_v38  ;;  %v3373_v9 = vsel %vm3371_vm11, %v3372_v21, %v3364_v52 }
 0x3ef   : > { %v8312_v13 = vshrl.u32 %v3013_v62, 30  ;;  %v4479_v27 = vor.u32 %v4478_v14, %v4477_v0  ;;  %vm3365_vm12 = vweird.f32 %v7997_v3  ;;  %v8317_v42 = vshll.u32 %v4462_v29, 8 }
 0x3f0   : > { %v3370_v28 = vsel %vm3368_vm10, %v3356_v55, %v3369_v33  ;;  %v4485_v59 = vor.u32 %v4484_v51, %v4483_v48  ;;  %vm4486_vm13 = vcmp.lt.s32.totalorder %v8298_v57, 1  ;;  %vm4489_vm14 = vcmp.lt.s32.totalorder %v8298_v57, 4 }
 0x3f1   : > { %v3374_v7 = vsel %vm3367_vm8, %v3370_v28, %v3373_v9  ;;  %v3015_v22 = vshll.u32 %v8312_v13, 30  ;;  %vm4488_vm15 = vcmp.lt.s32.totalorder %v8298_v57, 3  ;;  %v4494_v3 = vsel %vm4486_vm13, %v4473_v41, %v8304_v46 }
 0x3f2   : > { %v3375_v20 = vsel %vm3365_vm12, nan, %v3374_v7  ;;  %v4495_v4 = vsel %vm4489_vm14, %v4482_v53, 920167782  ;;  %vm4487_vm0 = vcmp.lt.s32.totalorder %v8298_v57, 2  ;;  %v4498_v44 = vsel %vm4486_vm13, %v8304_v46, %v4479_v27 }
 0x3f3   : > { %v5062_v24 = vmul.f32 %v5413_v35, %v3375_v20  ;;  %v3016_v1 = vsub.s32 %v3012_v10, %v3015_v22  ;;  %v4496_v45 = vsel %vm4488_vm15, %v4479_v27, %v4495_v4  ;;  %v4499_v60 = vsel %vm4489_vm14, %v4485_v59, 1326507024 }
 0x3f4   : > { %v4497_v47 = vsel %vm4487_vm0, %v4494_v3, %v4496_v45  ;;  %v4500_v55 = vsel %vm4488_vm15, %v4482_v53, %v4499_v60  ;;  %v4503_v16 = vand.u32 65535, %v8317_v42  ;;  %v4504_v43 = vshrl.u32 %v8317_v42, 16  ;;  %v586_v60 = vpop.permute.xlu0 %585 }
 0x3f5   : > { %5088 = vst [vmem:[%s6423_s27 + $0x78] sm:$0xff] %v5062_v24  ;;  %vm3017_vm1 = vcmp.lt.s32.totalorder %v3016_v1, 0  ;;  %v3018_v61 = vsub.s32 0, %v3016_v1  ;;  %v4501_v25 = vsel %vm4487_vm0, %v4498_v44, %v4500_v55  ;;  %v4527_v8 = vand.u32 65535, %v4497_v47 }
 0x3f6   : > { %v4528_v29 = vshrl.u32 %v4497_v47, 16  ;;  %v4470_v52 = vshrl.u32 %v9431_v37, %v4469_v38  ;;  %v4505_v21 = vand.u32 65535, %v4501_v25  ;;  %v4506_v10 = vshrl.u32 %v4501_v25, 16 }
 0x3f7   : > { %v3019_v17 = vsel %vm3017_vm1, %v3018_v61, %v3016_v1  ;;  %v3008_v14 = vadd.s32 %v8279_v30, %v8283_v34  ;;  %v4531_v11 = vmul.u32 %v4527_v8, %v4504_v43  ;;  %v4491_v0 = vsel %vm4489_vm14, %v4479_v27, 2102212464 }
 0x3f8   : > { %v3020_v54 = vclz %v3019_v17  ;;  %v4530_v35 = vmul.u32 %v4528_v29, %v4503_v16  ;;  %v4490_v19 = vsel %vm4486_vm13, %v4470_v52, %v4473_v41  ;;  %v4508_v33 = vmul.u32 %v4506_v10, %v4503_v16 }
 0x3f9   : > { %v4509_v62 = vmul.u32 %v4505_v21, %v4504_v43  ;;  %v4529_v53 = vmul.u32 %v4527_v8, %v4503_v16  ;;  %v4532_v48 = vmul.u32 %v4528_v29, %v4504_v43  ;;  %v4507_v38 = vmul.u32 %v4505_v21, %v4503_v16 }
 0x3fa   : > { %v5229_v50 = vadd.s32 4294967294, %v3020_v54  ;;  %v4533_v51 = vshll.u32 %v4530_v35, 16  ;;  %v4510_v28 = vmul.u32 %v4506_v10, %v4504_v43  ;;  %v4511_v9 = vshll.u32 %v4508_v33, 16 }
 0x3fb   : > { %v4513_v30 = vshll.u32 %v4509_v62, 16  ;;  %v4535_v34 = vshll.u32 %v4531_v11, 16  ;;  %v4492_v61 = vsel %vm4488_vm15, %v8304_v46, %v4491_v0  ;;  %v4534_v55 = vshrl.u32 %v4530_v35, 16  ;;  %v9498_v0 = vld [vmem:[#allocation33_spill] sm:$0xff] }
 0x3fc   : > { %vm5230_vm2 = vcmp.lt.s32.totalorder %v5229_v50, 0  ;;  %vm4537_vm3 = vc.u32 %v4529_v53, %v4533_v51  ;;  %vm4515_vm4 = vc.u32 %v4507_v38, %v4511_v9  ;;  %v4517_v24 = vadd.s32 %v4511_v9, %v4507_v38 }
 0x3fd   : > { %v3023_v7 = vsel %vm5230_vm2, 0, %v5229_v50  ;;  %v4516_v41 = vsel %vm4515_vm4, 1, %v9432_v63  ;;  %v4538_v27 = vsel %vm4537_vm3, 1, %v9432_v63  ;;  %v4539_v3 = vadd.s32 %v4533_v51, %v4529_v53 }
 0x3fe   : > { %v3024_v59 = vsub.s32 32, %v3023_v7  ;;  %v3025_v20 = vshll.u32 %v3016_v1, %v3023_v7  ;;  %v3028_v22 = vsub.s32 4294967266, %v3023_v7  ;;  %v4518_v44 = vadd.s32 %v4516_v41, %v4510_v28  ;;  %v578_v1 = vpop.permute.xlu1 %577  ;;  %v9499_v28 = vld [vmem:[#allocation31_spill] sm:$0xff] }
 0x3ff   : > { %v4540_v47 = vadd.s32 %v4538_v27, %v4532_v48  ;;  %vm4519_vm5 = vc.u32 %v4517_v24, %v4513_v30  ;;  %vm4541_vm6 = vc.u32 %v4539_v3, %v4535_v34  ;;  %v4512_v16 = vshrl.u32 %v4508_v33, 16 }
 0x400   : > { %v3026_v4 = vshrl.u32 %v3008_v14, %v3024_v59  ;;  %v3029_v45 = vadd.s32 127, %v3028_v22  ;;  %v4520_v29 = vsel %vm4519_vm5, 1, %v9432_v63  ;;  %v4542_v17 = vsel %vm4541_vm6, 1, %v9432_v63 }
 0x401   : > { %v4522_v43 = vadd.s32 %v4520_v29, %v4518_v44  ;;  %v4544_v54 = vadd.s32 %v4542_v17, %v4540_v47  ;;  %v771_v52 = vmul.f32 %v8047_v2, %v586_v60  ;;  %v4514_v10 = vshrl.u32 %v4509_v62, 16  ;;  %v9502_v44 = vld [vmem:[#allocation32_spill] sm:$0xff] }
 0x402   : > { %v3027_v25 = vor.u32 %v3026_v4, %v3025_v20  ;;  %v3030_v8 = vshll.u32 %v3029_v45, 23  ;;  %v769_v14 = vmul.f32 %v8047_v2, %v578_v1  ;;  %v4536_v50 = vshrl.u32 %v4531_v11, 16 }
 0x403   : > { %v4523_v46 = vadd.s32 %v4522_v43, %v4512_v16  ;;  %v4545_v35 = vadd.s32 %v4544_v54, %v4534_v55  ;;  %v797_v53 = vadd.f32 %v771_v52, %v9498_v0  ;;  %v4493_v38 = vsel %vm4487_vm0, %v4490_v19, %v4492_v61  ;;  %v9503_v55 = vld [vmem:[#allocation30_spill] sm:$0xff] }
 0x404   : > { %v3031_v21 = vor.u32 4788187, %v3030_v8  ;;  %v3034_v51 = vcvt.s32.f32 %v3027_v25  ;;  %v8365_v33 = vadd.f32 %v769_v14, %v9499_v28  ;;  %v8369_v7 = vadd.s32 %v4539_v3, %v4535_v34  ;;  %v8403_v14 = vld [vmem:[%s9373_s1 + $0x6] ss:$0 sm:$0xff] }
 0x405   : > { %v8367_v9 = vadd.s32 %v4523_v46, %v4514_v10  ;;  %v4546_v62 = vadd.s32 %v4545_v35, %v4536_v50  ;;  %v825_v30 = vadd.f32 1.000001, %v797_v53  ;;  %v4547_v57 = vmul.u32 %v8317_v42, %v4493_v38 }
 0x406   : > { %v3032_v48 = vand.u32 2147483647, %v3031_v21  ;;  %v823_v11 = vadd.f32 1.000001, %v8365_v33  ;;  %v635_v19 = vmul.f32 %v8077_v32, %v586_v60  ;;  %vm2916_vm8 = vcmp.lt.s32.totalorder %v8181_v12, 0 }
 0x407   : > { %vm4549_vm7 = vc.u32 %v8367_v9, %v8369_v7  ;;  %v4550_v59 = vadd.s32 1, %v4546_v62  ;;  %5414 = vrcp.f32 %v825_v30  ;;  %v3038_v34 = vsub.s32 4, %v8312_v13 }
 0x408   : > { %v3035_v2 = vmul.f32 %v3034_v51, %v3032_v48  ;;  %5416 = vrcp.f32 %v823_v11  ;;  %v633_v41 = vmul.f32 %v8077_v32, %v578_v1  ;;  %vm8381_vm9 = vcmp.le.f32.partialorder %v2914_v23, 0.7853982 }
 0x409   : > { %v4551_v22 = vsel %vm4549_vm7, %v4550_v59, %v4546_v62  ;;  %v661_v47 = vadd.f32 %v635_v19, %v9502_v44  ;;  %v3039_v61 = vsel %vm2916_vm8, %v3038_v34, %v8312_v13  ;;  %v4982_v32 = vmul.f32 %v8176_v31, %v8168_v36 }
 0x40a   : > { %v3036_v20 = vxor.u32 2147483648, %v3035_v2  ;;  %v4552_v3 = vadd.s32 %v4551_v22, %v4547_v57  ;;  %v4934_v23 = vsub.f32 1.0, %v797_v53  ;;  %v659_v1 = vadd.f32 %v633_v41, %v9503_v55 }
 0x40b   : > { %v3041_v52 = vsel %vm8381_vm9, 0, %v3039_v61  ;;  %v5021_v36 = vmul.f32 1.442695, %v4982_v32  ;;  %v4992_v48 = vmul.f32 %v8176_v31, %v8277_v18  ;;  %vm3057_vm11 = vweird.f32 %v8181_v12 }
 0x40c   : > { %v3037_v27 = vsel %vm2916_vm8, %v3036_v20, %v3035_v2  ;;  %v4553_v45 = vadd.s32 536870912, %v4552_v3  ;;  %v3058_v53 = vand.u32 3, %v3041_v52  ;;  %vm8415_vm12 = vcmp.le.f32.partialorder %v4454_v39, 0.7853982 }
 0x40d   : > { %v3040_v42 = vsel %vm8381_vm9, %v8181_v12, %v3037_v27  ;;  %v5415_v60 = vpop.eup %5414  ;;  %5418 = vpow2.f32 %v5021_v36  ;;  %vm4456_vm13 = vcmp.lt.s32.totalorder %v8208_v40, 0  ;;  %v5041_v19 = vmul.f32 1.442695, %v4992_v48 }
 0x40e   : > { %v3042_v4 = vmul.f32 %v3040_v42, %v3040_v42  ;;  %v8393_v25 = vpop.eup %5416  ;;  %v4554_v17 = vshrl.u32 %v4553_v45, 30  ;;  %v877_v16 = vmul.f32 %v5415_v60, %v661_v47  ;;  %v8395_v43 = vmul.f32 %v5415_v60, %v4934_v23 }
 0x40f   : > { %v875_v54 = vmul.f32 %v8393_v25, %v659_v1  ;;  %vm3059_vm14 = vcmp.lt.s32.totalorder %v3058_v53, 2  ;;  %vm3060_vm15 = vcmp.eq.s32.totalorder %v3058_v53, 0  ;;  %vm3063_vm0 = vcmp.eq.s32.totalorder %v3058_v53, 2 }
 0x410   : > { %v3043_v8 = vmul.f32 -0.001358992, %v3042_v4  ;;  %v3050_v29 = vmul.f32 -0.00019511016, %v3042_v4  ;;  %v4555_v10 = vshll.u32 %v4554_v17, 30  ;;  %v8406_v46 = vmul.f32 %v8403_v14, %v877_v16 }
 0x411   : > { %v4578_v30 = vsub.s32 4, %v4554_v17  ;;  %v4548_v47 = vadd.s32 %v8369_v7, %v8367_v9  ;;  %5420 = vpow2.f32 %v5041_v19  ;;  %v4932_v60 = vsub.f32 1.0, %v8365_v33 }
 0x412   : > { %v3044_v13 = vadd.f32 0.041655596, %v3043_v8  ;;  %v3051_v21 = vadd.f32 0.008332121, %v3050_v29  ;;  %v4556_v0 = vsub.s32 %v4552_v3, %v4555_v10  ;;  %v3687_v51 = vand.u32 2139095040, %v8406_v46 }
 0x413   : > { %v3684_v57 = vand.u32 2147483647, %v8406_v46  ;;  %v4579_v27 = vsel %vm4456_vm13, %v4578_v30, %v4554_v17  ;;  %v5419_v44 = vpop.eup %5418  ;;  %v8428_v23 = vmul.f32 %v8403_v14, %v875_v54 }
 0x414   : > { %v3045_v50 = vmul.f32 %v3044_v13, %v3042_v4  ;;  %v3052_v35 = vmul.f32 %v3051_v21, %v3042_v4  ;;  %vm4557_vm10 = vcmp.lt.s32.totalorder %v4556_v0, 0  ;;  %v4558_v62 = vsub.s32 0, %v4556_v0 }
 0x415   : > { %v3688_v2 = vshrl.u32 %v3687_v51, 23  ;;  %v3691_v39 = vand.u32 8388607, %v3684_v57  ;;  %v4581_v1 = vsel %vm8415_vm12, 0, %v4579_v27 }
 0x416   : > { %v3046_v38 = vadd.f32 -0.4999988, %v3045_v50  ;;  %v3053_v28 = vadd.f32 -0.16666654, %v3052_v35  ;;  %v4559_v20 = vsel %vm4557_vm10, %v4558_v62, %v4556_v0 }
 0x417   : > { %v4560_v18 = vclz %v4559_v20  ;;  %v5243_v41 = vadd.s32 4294967169, %v3688_v2  ;;  %v3692_v7 = vor.u32 8388608, %v3691_v39  ;;  %v8440_v35 = vpop.eup %5420  ;;  %v3379_v39 = vand.u32 2139095040, %v8428_v23 }
 0x418   : > { %v3047_v11 = vmul.f32 %v3046_v38, %v3042_v4  ;;  %v3054_v59 = vmul.f32 %v3053_v28, %v3042_v4 }
 0x419   : > { %v5259_v24 = vadd.s32 4294967294, %v4560_v18  ;;  %v3694_v45 = vadd.s32 1, %v5243_v41 }
 0x41a   : > { %v3048_v34 = vadd.f32 1.0, %v3047_v11  ;;  %v3055_v22 = vadd.f32 1.0, %v3054_v59  ;;  %v8450_v59 = vshll.u32 %v3692_v7, 8 }
 0x41b   : > { %vm5260_vm1 = vcmp.lt.s32.totalorder %v5259_v24, 0  ;;  %vm3695_vm2 = vcmp.gt.s32.totalorder %v3694_v45, 0 }
 0x41c   : > { %v3056_v3 = vmul.f32 %v3055_v22, %v3040_v42  ;;  %v3064_v4 = vxor.u32 2147483648, %v3048_v34  ;;  %v4563_v32 = vsel %vm5260_vm1, 0, %v5259_v24  ;;  %v3696_v8 = vsel %vm3695_vm2, %v3694_v45, 0 }
 0x41d   : > { %v4564_v42 = vsub.s32 32, %v4563_v32  ;;  %v4568_v55 = vsub.s32 4294967266, %v4563_v32  ;;  %v3698_v17 = vand.u32 31, %v3696_v8  ;;  %v4565_v52 = vshll.u32 %v4556_v0, %v4563_v32 }
 0x41e   : > { %v3061_v61 = vxor.u32 2147483648, %v3056_v3  ;;  %v3065_v9 = vsel %vm3063_vm0, %v3064_v4, %v3056_v3  ;;  %v8437_v10 = vshrl.u32 %v3696_v8, 5  ;;  %v8456_v3 = vand.u32 3, %v4581_v1 }
 0x41f   : > { %v4566_v13 = vshrl.u32 %v4548_v47, %v4564_v42  ;;  %v4569_v21 = vadd.s32 127, %v4568_v55  ;;  %v3699_v36 = vsub.s32 32, %v3698_v17  ;;  %v3701_v50 = vshll.u32 %v9431_v37, %v3698_v17 }
 0x420   : > { %v3062_v29 = vsel %vm3060_vm15, %v3048_v34, %v3061_v61  ;;  %v3704_v53 = vshll.u32 %v9433_v56, %v3698_v17  ;;  %v3707_v62 = vshll.u32 %v9434_v6, %v3698_v17  ;;  %v3710_v2 = vshll.u32 %v9435_v49, %v3698_v17 }
 0x421   : > { %v3066_v16 = vsel %vm3059_vm14, %v3062_v29, %v3065_v9  ;;  %v4567_v51 = vor.u32 %v4566_v13, %v4565_v52  ;;  %v4570_v38 = vshll.u32 %v4569_v21, 23  ;;  %v3702_v0 = vshrl.u32 %v9433_v56, %v3699_v36 }
 0x422   : > { %v3067_v54 = vsel %vm3057_vm11, nan, %v3066_v16  ;;  %v3705_v28 = vshrl.u32 %v9434_v6, %v3699_v36  ;;  %v3708_v12 = vshrl.u32 %v9435_v49, %v3699_v36  ;;  %v3711_v11 = vshrl.u32 %v9436_v15, %v3699_v36 }
 0x423   : > { %v5060_v48 = vmul.f32 %v5419_v44, %v3067_v54  ;;  %v4571_v30 = vor.u32 4788187, %v4570_v38  ;;  %v4574_v20 = vcvt.s32.f32 %v4567_v51  ;;  %v3703_v18 = vor.u32 %v3702_v0, %v3701_v50 }
 0x424   : > { %v8452_v19 = vor.u32 %v3705_v28, %v3704_v53  ;;  %v3709_v34 = vor.u32 %v3708_v12, %v3707_v62  ;;  %v3712_v41 = vor.u32 %v3711_v11, %v3710_v2  ;;  %v3713_v24 = vshll.u32 %v9436_v15, %v3698_v17 }
 0x425   : > { %5086 = vst [vmem:[%s6423_s27 + $0x68] sm:$0xff] %v5060_v48  ;;  %v4572_v22 = vand.u32 2147483647, %v4571_v30  ;;  %v3714_v27 = vshrl.u32 %v9437_v58, %v3699_v36  ;;  %vm3716_vm3 = vcmp.lt.s32.totalorder %v8437_v10, 1  ;;  %v3376_v4 = vand.u32 2147483647, %v8428_v23 }
 0x426   : > { %vm3719_vm4 = vcmp.lt.s32.totalorder %v8437_v10, 4  ;;  %v3724_v47 = vsel %vm3716_vm3, %v3703_v18, %v8452_v19  ;;  %vm3718_vm5 = vcmp.lt.s32.totalorder %v8437_v10, 3  ;;  %v3728_v32 = vsel %vm3716_vm3, %v8452_v19, %v3709_v34 }
 0x427   : > { %v4575_v45 = vmul.f32 %v4574_v20, %v4572_v22  ;;  %v3715_v44 = vor.u32 %v3714_v27, %v3713_v24  ;;  %v3725_v61 = vsel %vm3719_vm4, %v3712_v41, 920167782  ;;  %v3733_v42 = vand.u32 65535, %v8450_v59 }
 0x428   : > { %vm3717_vm6 = vcmp.lt.s32.totalorder %v8437_v10, 2  ;;  %v3726_v1 = vsel %vm3718_vm5, %v3709_v34, %v3725_v61  ;;  %v3700_v29 = vshrl.u32 %v9431_v37, %v3699_v36  ;;  %v3380_v17 = vshrl.u32 %v3379_v39, 23 }
 0x429   : > { %v4576_v55 = vxor.u32 2147483648, %v4575_v45  ;;  %v3729_v8 = vsel %vm3719_vm4, %v3715_v44, 1326507024  ;;  %v3727_v9 = vsel %vm3717_vm6, %v3724_v47, %v3726_v1  ;;  %v3734_v36 = vshrl.u32 %v8450_v59, 16 }
 0x42a   : > { %v3730_v7 = vsel %vm3718_vm5, %v3712_v41, %v3729_v8  ;;  %v3757_v13 = vand.u32 65535, %v3727_v9  ;;  %v3758_v21 = vshrl.u32 %v3727_v9, 16  ;;  %v3720_v38 = vsel %vm3716_vm3, %v3700_v29, %v3703_v18 }
 0x42b   : > { %v4577_v16 = vsel %vm4456_vm13, %v4576_v55, %v4575_v45  ;;  %v3731_v52 = vsel %vm3717_vm6, %v3728_v32, %v3730_v7  ;;  %v3721_v53 = vsel %vm3719_vm4, %v3709_v34, 2102212464  ;;  %v8500_v31 = vand.u32 8388607, %v3376_v4 }
 0x42c   : > { %v8489_v54 = vsel %vm8415_vm12, %v8208_v40, %v4577_v16  ;;  %v3735_v50 = vand.u32 65535, %v3731_v52  ;;  %v3736_v48 = vshrl.u32 %v3731_v52, 16  ;;  %v3760_v0 = vmul.u32 %v3758_v21, %v3733_v42 }
 0x42d   : > { %v4582_v51 = vmul.f32 %v8489_v54, %v8489_v54  ;;  %v3761_v12 = vmul.u32 %v3757_v13, %v3734_v36  ;;  %v5237_v20 = vadd.s32 4294967169, %v3380_v17  ;;  %v3759_v27 = vmul.u32 %v3757_v13, %v3733_v42 }
 0x42e   : > { %v3738_v28 = vmul.u32 %v3736_v48, %v3733_v42  ;;  %v3739_v62 = vmul.u32 %v3735_v50, %v3734_v36  ;;  %v3763_v11 = vshll.u32 %v3760_v0, 16  ;;  %v3737_v22 = vmul.u32 %v3735_v50, %v3733_v42 }
 0x42f   : > { %v4583_v30 = vmul.f32 -0.001358992, %v4582_v51  ;;  %v4590_v2 = vmul.f32 -0.00019511016, %v4582_v51  ;;  %v3740_v41 = vmul.u32 %v3736_v48, %v3734_v36  ;;  %v3762_v34 = vmul.u32 %v3758_v21, %v3734_v36 }
 0x430   : > { %v3741_v24 = vshll.u32 %v3738_v28, 16  ;;  %v3743_v45 = vshll.u32 %v3739_v62, 16  ;;  %v3765_v47 = vshll.u32 %v3761_v12, 16  ;;  %vm3767_vm8 = vc.u32 %v3759_v27, %v3763_v11 }
 0x431   : > { %v4584_v18 = vadd.f32 0.041655596, %v4583_v30  ;;  %v4591_v39 = vadd.f32 0.008332121, %v4590_v2  ;;  %v3768_v1 = vsel %vm3767_vm8, 1, %v9432_v63  ;;  %v3769_v29 = vadd.s32 %v3763_v11, %v3759_v27 }
 0x432   : > { %vm3745_vm7 = vc.u32 %v3737_v22, %v3741_v24  ;;  %v3747_v44 = vadd.s32 %v3741_v24, %v3737_v22  ;;  %v3770_v9 = vadd.s32 %v3768_v1, %v3762_v34  ;;  %v3722_v17 = vsel %vm3718_vm5, %v8452_v19, %v3721_v53 }
 0x433   : > { %v4585_v61 = vmul.f32 %v4584_v18, %v4582_v51  ;;  %v4592_v32 = vmul.f32 %v4591_v39, %v4582_v51  ;;  %v3746_v55 = vsel %vm3745_vm7, 1, %v9432_v63  ;;  %vm4600_vm10 = vcmp.eq.s32.totalorder %v8456_v3, 0 }
 0x434   : > { %v3748_v8 = vadd.s32 %v3746_v55, %v3740_v41  ;;  %vm3749_vm9 = vc.u32 %v3747_v44, %v3743_v45  ;;  %vm4603_vm11 = vcmp.eq.s32.totalorder %v8456_v3, 2  ;;  %v3742_v52 = vshrl.u32 %v3738_v28, 16 }
 0x435   : > { %v4586_v7 = vadd.f32 -0.4999988, %v4585_v61  ;;  %v4593_v42 = vadd.f32 -0.16666654, %v4592_v32  ;;  %v3750_v16 = vsel %vm3749_vm9, 1, %v9432_v63  ;;  %vm3771_vm12 = vc.u32 %v3769_v29, %v3765_v47 }
 0x436   : > { %v3752_v13 = vadd.s32 %v3750_v16, %v3748_v8  ;;  %v3386_v21 = vadd.s32 1, %v5237_v20  ;;  %vm4599_vm13 = vcmp.lt.s32.totalorder %v8456_v3, 2  ;;  %v3744_v48 = vshrl.u32 %v3739_v62, 16 }
 0x437   : > { %v4587_v36 = vmul.f32 %v4586_v7, %v4582_v51  ;;  %v4594_v50 = vmul.f32 %v4593_v42, %v4582_v51  ;;  %v3772_v30 = vsel %vm3771_vm12, 1, %v9432_v63  ;;  %vm4597_vm14 = vweird.f32 %v8208_v40 }
 0x438   : > { %v3753_v19 = vadd.s32 %v3752_v13, %v3742_v52  ;;  %v3764_v53 = vshrl.u32 %v3760_v0, 16  ;;  %v3774_v2 = vadd.s32 %v3772_v30, %v3770_v9  ;;  %vm3387_vm15 = vcmp.gt.s32.totalorder %v3386_v21, 0 }
 0x439   : > { %v4588_v11 = vadd.f32 1.0, %v4587_v36  ;;  %v4595_v22 = vadd.f32 1.0, %v4594_v50  ;;  %v3723_v28 = vsel %vm3717_vm6, %v3720_v38, %v3722_v17  ;;  %v3388_v41 = vsel %vm3387_vm15, %v3386_v21, 0 }
 0x43a   : > { %v8515_v20 = vadd.s32 %v3753_v19, %v3744_v48  ;;  %v3766_v51 = vshrl.u32 %v3761_v12, 16  ;;  %v3775_v24 = vadd.s32 %v3774_v2, %v3764_v53  ;;  %v3390_v27 = vand.u32 31, %v3388_v41 }
 0x43b   : > { %v4596_v62 = vmul.f32 %v4595_v22, %v8489_v54  ;;  %v4604_v18 = vxor.u32 2147483648, %v4588_v11  ;;  %v3773_v39 = vadd.s32 %v3769_v29, %v3765_v47  ;;  %v8521_v0 = vmul.f32 %v8393_v25, %v4932_v60 }
 0x43c   : > { %v3776_v45 = vadd.s32 %v3775_v24, %v3766_v51  ;;  %v3777_v34 = vmul.u32 %v8450_v59, %v3723_v28  ;;  %v3384_v10 = vor.u32 8388608, %v8500_v31  ;;  %v3391_v38 = vsub.s32 32, %v3390_v27 }
 0x43d   : > { %v4601_v44 = vxor.u32 2147483648, %v4596_v62  ;;  %vm3779_vm0 = vc.u32 %v8515_v20, %v3773_v39  ;;  %v8526_v12 = vshrl.u32 %v3388_v41, 5  ;;  %v3393_v54 = vshll.u32 %v9431_v37, %v3390_v27 }
 0x43e   : > { %v3780_v61 = vadd.s32 1, %v3776_v45  ;;  %v3394_v47 = vshrl.u32 %v9433_v56, %v3391_v38  ;;  %v3396_v33 = vshll.u32 %v9433_v56, %v3390_v27  ;;  %v3397_v25 = vshrl.u32 %v9434_v6, %v3391_v38 }
 0x43f   : > { %v4602_v60 = vsel %vm4600_vm10, %v4588_v11, %v4601_v44  ;;  %v4605_v59 = vsel %vm4603_vm11, %v4604_v18, %v4596_v62  ;;  %v3399_v31 = vshll.u32 %v9434_v6, %v3390_v27  ;;  %v3400_v32 = vshrl.u32 %v9435_v49, %v3391_v38 }
 0x440   : > { %v4606_v55 = vsel %vm4599_vm13, %v4602_v60, %v4605_v59  ;;  %v3781_v1 = vsel %vm3779_vm0, %v3780_v61, %v3776_v45  ;;  %v8540_v8 = vor.u32 %v3394_v47, %v3393_v54  ;;  %v8542_v29 = vor.u32 %v3397_v25, %v3396_v33 }
 0x441   : > { %v4607_v9 = vsel %vm4597_vm14, nan, %v4606_v55  ;;  %v3782_v7 = vadd.s32 %v3781_v1, %v3777_v34  ;;  %v3402_v42 = vshll.u32 %v9435_v49, %v3390_v27  ;;  %v3403_v17 = vshrl.u32 %v9436_v15, %v3391_v38 }
 0x442   : > { %v5070_v16 = vmul.f32 %v8440_v35, %v4607_v9  ;;  %v3401_v52 = vor.u32 %v3400_v32, %v3399_v31  ;;  %v3405_v3 = vshll.u32 %v9436_v15, %v3390_v27  ;;  %v3406_v13 = vshrl.u32 %v9437_v58, %v3391_v38 }
 0x443   : > { %v3783_v21 = vadd.s32 536870912, %v3782_v7  ;;  %v3404_v36 = vor.u32 %v3403_v17, %v3402_v42  ;;  %vm3408_vm1 = vcmp.lt.s32.totalorder %v8526_v12, 1  ;;  %vm3411_vm2 = vcmp.lt.s32.totalorder %v8526_v12, 4 }
 0x444   : > { %5096 = vst [vmem:[%s6423_s27 + $0xb8] sm:$0xff] %v5070_v16  ;;  %v3407_v50 = vor.u32 %v3406_v13, %v3405_v3  ;;  %v3416_v40 = vsel %vm3408_vm1, %v8540_v8, %v8542_v29  ;;  %vm3410_vm3 = vcmp.lt.s32.totalorder %v8526_v12, 3  ;;  %v8563_v30 = vshll.u32 %v3384_v10, 8 }
 0x445   : > { %v8558_v48 = vshrl.u32 %v3783_v21, 30  ;;  %v3417_v35 = vsel %vm3411_vm2, %v3404_v36, 920167782  ;;  %vm3409_vm4 = vcmp.lt.s32.totalorder %v8526_v12, 2  ;;  %v3420_v53 = vsel %vm3408_vm1, %v8542_v29, %v3401_v52  ;;  %v8620_v12 = vld [vmem:[%s9373_s1 + $0x2] ss:$0 sm:$0xff] }
 0x446   : > { %v3418_v19 = vsel %vm3410_vm3, %v3401_v52, %v3417_v35  ;;  %v3421_v2 = vsel %vm3411_vm2, %v3407_v50, 1326507024  ;;  %v3425_v27 = vand.u32 65535, %v8563_v30  ;;  %v3426_v62 = vshrl.u32 %v8563_v30, 16 }
 0x447   : > { %v3785_v11 = vshll.u32 %v8558_v48, 30  ;;  %v3419_v22 = vsel %vm3409_vm4, %v3416_v40, %v3418_v19  ;;  %v3422_v28 = vsel %vm3410_vm3, %v3404_v36, %v3421_v2  ;;  %v3778_v47 = vadd.s32 %v3773_v39, %v8515_v20  ;;  %v598_v2 = vpop.permute.xlu0 %597 }
 0x448   : > { %v3450_v41 = vshrl.u32 %v3419_v22, 16  ;;  %v3423_v24 = vsel %vm3409_vm4, %v3420_v53, %v3422_v28  ;;  %v3449_v10 = vand.u32 65535, %v3419_v22  ;;  %v3392_v25 = vshrl.u32 %v9431_v37, %v3391_v38 }
 0x449   : > { %v3786_v51 = vsub.s32 %v3782_v7, %v3785_v11  ;;  %v3427_v18 = vand.u32 65535, %v3423_v24  ;;  %v3428_v45 = vshrl.u32 %v3423_v24, 16  ;;  %v3413_v59 = vsel %vm3411_vm2, %v3401_v52, 2102212464 }
 0x44a   : > { %v3452_v44 = vmul.u32 %v3450_v41, %v3425_v27  ;;  %v3451_v1 = vmul.u32 %v3449_v10, %v3425_v27  ;;  %v3453_v9 = vmul.u32 %v3449_v10, %v3426_v62  ;;  %v3454_v20 = vmul.u32 %v3450_v41, %v3426_v62  ;;  %v590_v41 = vpop.permute.xlu1 %589 }
 0x44b   : > { %vm3787_vm5 = vcmp.lt.s32.totalorder %v3786_v51, 0  ;;  %v3788_v34 = vsub.s32 0, %v3786_v51  ;;  %v3430_v54 = vmul.u32 %v3428_v45, %v3425_v27  ;;  %v3431_v61 = vmul.u32 %v3427_v18, %v3426_v62 }
 0x44c   : > { %v3429_v31 = vmul.u32 %v3427_v18, %v3425_v27  ;;  %v3432_v55 = vmul.u32 %v3428_v45, %v3426_v62  ;;  %v3455_v7 = vshll.u32 %v3452_v44, 16  ;;  %v3457_v39 = vshll.u32 %v3453_v9, 16 }
 0x44d   : > { %v3789_v33 = vsel %vm3787_vm5, %v3788_v34, %v3786_v51  ;;  %v3433_v32 = vshll.u32 %v3430_v54, 16  ;;  %v3435_v17 = vshll.u32 %v3431_v61, 16  ;;  %v3434_v19 = vshrl.u32 %v3430_v54, 16 }
 0x44e   : > { %v3790_v60 = vclz %v3789_v33  ;;  %vm3459_vm7 = vc.u32 %v3451_v1, %v3455_v7  ;;  %v3461_v36 = vadd.s32 %v3455_v7, %v3451_v1  ;;  %v3412_v22 = vsel %vm3408_vm1, %v3392_v25, %v8540_v8  ;;  %v9507_v7 = vld [vmem:[#allocation35_spill] sm:$0xff] }
 0x44f   : > { %vm3437_vm6 = vc.u32 %v3429_v31, %v3433_v32  ;;  %v3439_v16 = vadd.s32 %v3433_v32, %v3429_v31  ;;  %v3460_v52 = vsel %vm3459_vm7, 1, %v9432_v63  ;;  %v3436_v28 = vshrl.u32 %v3431_v61, 16  ;;  %v9506_v31 = vld [vmem:[#allocation37_spill] sm:$0xff] }
 0x450   : > { %v5244_v42 = vadd.s32 4294967294, %v3790_v60  ;;  %v3438_v3 = vsel %vm3437_vm6, 1, %v9432_v63  ;;  %v3462_v50 = vadd.s32 %v3460_v52, %v3454_v20  ;;  %vm3463_vm10 = vc.u32 %v3461_v36, %v3457_v39 }
 0x451   : > { %v3440_v38 = vadd.s32 %v3438_v3, %v3432_v55  ;;  %vm3441_vm9 = vc.u32 %v3439_v16, %v3435_v17  ;;  %v3464_v18 = vsel %vm3463_vm10, 1, %v9432_v63  ;;  %v3414_v45 = vsel %vm3410_vm3, %v8542_v29, %v3413_v59 }
 0x452   : > { %vm5245_vm8 = vcmp.lt.s32.totalorder %v5244_v42, 0  ;;  %v3442_v21 = vsel %vm3441_vm9, 1, %v9432_v63  ;;  %v3456_v34 = vshrl.u32 %v3452_v44, 16  ;;  %v3466_v10 = vadd.s32 %v3464_v18, %v3462_v50 }
 0x453   : > { %v3793_v13 = vsel %vm5245_vm8, 0, %v5244_v42  ;;  %v3444_v53 = vadd.s32 %v3442_v21, %v3440_v38  ;;  %v3458_v25 = vshrl.u32 %v3453_v9, 16  ;;  %v8606_v44 = vadd.s32 %v3461_v36, %v3457_v39 }
 0x454   : > { %v3794_v40 = vsub.s32 32, %v3793_v13  ;;  %v3798_v35 = vsub.s32 4294967266, %v3793_v13  ;;  %v3795_v11 = vshll.u32 %v3786_v51, %v3793_v13  ;;  %v8599_v51 = vld [vmem:[%s9373_s1 + $0x5] ss:$0 sm:$0xff]  ;;  %v3467_v60 = vadd.s32 %v3466_v10, %v3456_v34  ;;  %v8652_v34 = vld [vmem:[%s9373_s1] ss:$0 sm:$0xff] }
 0x455   : > { %v3445_v62 = vadd.s32 %v3444_v53, %v3434_v19  ;;  %v774_v8 = vmul.f32 %v8599_v51, %v598_v2  ;;  %v772_v33 = vmul.f32 %v8599_v51, %v590_v41  ;;  %v3415_v59 = vsel %vm3409_vm4, %v3412_v22, %v3414_v45  ;;  %v9510_v19 = vld [vmem:[#allocation36_spill] sm:$0xff]  ;;  %v5465_v22 = vld [vmem:[%s9373_s1 + $0x1] ss:$0 sm:$0xff] }
 0x456   : > { %v3796_v24 = vshrl.u32 %v3778_v47, %v3794_v40  ;;  %v3799_v27 = vadd.s32 127, %v3798_v35  ;;  %v3468_v55 = vadd.s32 %v3467_v60, %v3458_v25  ;;  %v3469_v39 = vmul.u32 %v8563_v30, %v3415_v59 }
 0x457   : > { %v8602_v47 = vadd.s32 %v3445_v62, %v3436_v28  ;;  %v800_v32 = vadd.f32 %v774_v8, %v9506_v31  ;;  %v8611_v42 = vadd.f32 %v772_v33, %v9507_v7  ;;  %v638_v38 = vmul.f32 %v8620_v12, %v598_v2  ;;  %v8659_v8 = vld [vmem:[%s9373_s1 + $0x7] ss:$0 sm:$0xff] }
 0x458   : > { %v3797_v54 = vor.u32 %v3796_v24, %v3795_v11  ;;  %v3800_v61 = vshll.u32 %v3799_v27, 23  ;;  %v3472_v9 = vadd.s32 1, %v3468_v55  ;;  %v3808_v52 = vsub.s32 4, %v8558_v48 }
 0x459   : > { %v828_v1 = vadd.f32 1.000001, %v800_v32  ;;  %vm3471_vm11 = vc.u32 %v8602_v47, %v8606_v44  ;;  %v826_v3 = vadd.f32 1.000001, %v8611_v42  ;;  %vm8626_vm12 = vcmp.le.f32.partialorder %v3684_v57, 0.7853982 }
 0x45a   : > { %v3801_v29 = vor.u32 4788187, %v3800_v61  ;;  %v3804_v16 = vcvt.s32.f32 %v3797_v54  ;;  %v3473_v13 = vsel %vm3471_vm11, %v3472_v9, %v3468_v55  ;;  %vm3686_vm13 = vcmp.lt.s32.totalorder %v8406_v46, 0  ;;  %v9512_v61 = vld [vmem:[#allocation34_spill] sm:$0xff] }
 0x45b   : > { %5422 = vrcp.f32 %v828_v1  ;;  %v3474_v36 = vadd.s32 %v3473_v13, %v3469_v39  ;;  %v636_v30 = vmul.f32 %v8620_v12, %v590_v41  ;;  %v664_v53 = vadd.f32 %v638_v38, %v9510_v19 }
 0x45c   : > { %v3802_v17 = vand.u32 2147483647, %v3801_v29  ;;  %5424 = vrcp.f32 %v826_v3  ;;  %v4937_v2 = vsub.f32 1.0, %v800_v32  ;;  %v483_v28 = vmul.f32 %v5465_v22, %v6391_v26  ;;  %v8670_v29 = vld [vmem:[%s9373_s1 + $0x3] ss:$0 sm:$0xff] }
 0x45d   : > { %v3475_v35 = vadd.s32 536870912, %v3474_v36  ;;  %v3809_v57 = vsel %vm3686_vm13, %v3808_v52, %v8558_v48  ;;  %v9511_v48 = vld [vmem:[#allocation6_spill] sm:$0xff]  ;;  %v4987_v54 = vmul.f32 %v8659_v8, %v8395_v43  ;;  %v662_v33 = vadd.f32 %v636_v30, %v9512_v61  ;;  %v8677_v43 = vld [vmem:[%s9373_s1 + $0x4] ss:$0 sm:$0xff] }
 0x45e   : > { %v3805_v20 = vmul.f32 %v3804_v16, %v3802_v17  ;;  %v351_v10 = vmul.f32 %v8652_v34, %v9511_v48  ;;  %v3811_v25 = vsel %vm8626_vm12, 0, %v3809_v57  ;;  %v695_v59 = vmul.f32 %v8670_v29, %v9511_v48 }
 0x45f   : > { %v8645_v27 = vshrl.u32 %v3475_v35, 30  ;;  %v723_v55 = vmul.f32 %v8677_v43, %v6391_v26  ;;  %v3828_v39 = vand.u32 3, %v3811_v25  ;;  %v5031_v38 = vmul.f32 1.442695, %v4987_v54 }
 0x460   : > { %v3806_v21 = vxor.u32 2147483648, %v3805_v20  ;;  %v8686_v17 = vadd.f32 %v483_v28, %v351_v10  ;;  %v4985_v52 = vmul.f32 %v8659_v8, %v8521_v0  ;;  %vm3378_vm15 = vcmp.lt.s32.totalorder %v8428_v23, 0 }
 0x461   : > { %v5423_v11 = vpop.eup %5422  ;;  %v3477_v32 = vshll.u32 %v8645_v27, 30  ;;  %v749_v30 = vadd.f32 %v723_v55, %v695_v59  ;;  %5426 = vpow2.f32 %v5031_v38  ;;  %v4935_v22 = vsub.f32 1.0, %v8611_v42 }
 0x462   : > { %v3807_v40 = vsel %vm3686_vm13, %v3806_v21, %v3805_v20  ;;  %v880_v62 = vmul.f32 %v5423_v11, %v664_v53  ;;  %v8647_v18 = vmul.f32 %v5423_v11, %v4937_v2  ;;  %v5425_v45 = vpop.eup %5424  ;;  %v610_v20 = vpop.permute.xlu0 %609  ;;  %v8699_v11 = vmul.f32 1.442695, %v4985_v52 }
 0x463   : > { %v8641_v24 = vsel %vm8626_vm12, %v8406_v46, %v3807_v40  ;;  %v8684_v7 = vmul.f32 %v5425_v45, %v662_v33  ;;  %v8688_v3 = vsub.s32 %v3474_v36, %v3477_v32  ;;  %v777_v36 = vmul.f32 %v8599_v51, %v610_v20 }
 0x464   : > { %v3812_v41 = vmul.f32 %v8641_v24, %v8641_v24  ;;  %v8682_v1 = vmul.f32 %v8403_v14, %v880_v62  ;;  %vm3829_vm0 = vcmp.lt.s32.totalorder %v3828_v39, 2  ;;  %vm3830_vm1 = vcmp.eq.s32.totalorder %v3828_v39, 0 }
 0x465   : > { %vm3479_vm14 = vcmp.lt.s32.totalorder %v8688_v3, 0  ;;  %v3480_v50 = vsub.s32 0, %v8688_v3  ;;  %vm3827_vm2 = vweird.f32 %v8406_v46  ;;  %v3500_v10 = vsub.s32 4, %v8645_v27 }
 0x466   : > { %v3813_v60 = vmul.f32 -0.001358992, %v3812_v41  ;;  %v3820_v31 = vmul.f32 -0.00019511016, %v3812_v41  ;;  %v4149_v13 = vand.u32 2139095040, %v8682_v1  ;;  %v8704_v54 = vmul.f32 %v5425_v45, %v4935_v22 }
 0x467   : > { %v3481_v53 = vsel %vm3479_vm14, %v3480_v50, %v8688_v3  ;;  %v4146_v0 = vand.u32 2147483647, %v8682_v1  ;;  %v8706_v61 = vadd.f32 %v777_v36, %v749_v30  ;;  %vm3833_vm3 = vcmp.eq.s32.totalorder %v3828_v39, 2  ;;  %v5427_v55 = vpop.eup %5426 }
 0x468   : > { %v3814_v16 = vadd.f32 0.041655596, %v3813_v60  ;;  %v3821_v9 = vadd.f32 0.008332121, %v3820_v31  ;;  %v4150_v40 = vshrl.u32 %v4149_v13, 23  ;;  %v3482_v2 = vclz %v3481_v53 }
 0x469   : > { %v4153_v60 = vand.u32 8388607, %v4146_v0  ;;  %v8713_v31 = vmul.f32 %v8620_v12, %v610_v20  ;;  %vm8718_vm6 = vcmp.le.f32.partialorder %v3376_v4, 0.7853982 }
 0x46a   : > { %v3815_v26 = vmul.f32 %v3814_v16, %v3812_v41  ;;  %v3822_v21 = vmul.f32 %v3821_v9, %v3812_v41  ;;  %v5252_v62 = vadd.s32 4294967169, %v4150_v40  ;;  %v5238_v48 = vadd.s32 4294967294, %v3482_v2 }
 0x46b   : > { %v4154_v20 = vor.u32 8388608, %v4153_v60 }
 0x46c   : > { %v3816_v35 = vadd.f32 -0.4999988, %v3815_v26  ;;  %v3823_v19 = vadd.f32 -0.16666654, %v3822_v21  ;;  %v4156_v42 = vadd.s32 1, %v5252_v62  ;;  %vm5239_vm4 = vcmp.lt.s32.totalorder %v5238_v48, 0 }
 0x46d   : > { %v3485_v59 = vsel %vm5239_vm4, 0, %v5238_v48  ;;  %vm3519_vm4 = vweird.f32 %v8428_v23 }
 0x46e   : > { %v3817_v28 = vmul.f32 %v3816_v35, %v3812_v41  ;;  %v3824_v57 = vmul.f32 %v3823_v19, %v3812_v41  ;;  %v3470_v41 = vadd.s32 %v8606_v44, %v8602_v47  ;;  %vm4157_vm5 = vcmp.gt.s32.totalorder %v4156_v42, 0 }
 0x46f   : > { %v3486_v9 = vsub.s32 32, %v3485_v59  ;;  %v3490_v38 = vsub.s32 4294967266, %v3485_v59  ;;  %v4158_v52 = vsel %vm4157_vm5, %v4156_v42, 0  ;;  %v831_v47 = vadd.f32 1.000001, %v8706_v61 }
 0x470   : > { %v3818_v33 = vadd.f32 1.0, %v3817_v28  ;;  %v3825_v25 = vadd.f32 1.0, %v3824_v57  ;;  %v4160_v13 = vand.u32 31, %v4158_v52  ;;  %v3487_v21 = vshll.u32 %v8688_v3, %v3485_v59 }
 0x471   : > { %v3488_v4 = vshrl.u32 %v3470_v41, %v3486_v9  ;;  %v3491_v50 = vadd.s32 127, %v3490_v38  ;;  %v8729_v40 = vshrl.u32 %v4158_v52, 5  ;;  %v8751_v9 = vshll.u32 %v4154_v20, 8 }
 0x472   : > { %v3826_v32 = vmul.f32 %v3825_v25, %v8641_v24  ;;  %v3834_v45 = vxor.u32 2147483648, %v3818_v33  ;;  %v3501_v24 = vsel %vm3378_vm15, %v3500_v10, %v8645_v27  ;;  %v4161_v36 = vsub.s32 32, %v4160_v13 }
 0x473   : > { %v4163_v35 = vshll.u32 %v9431_v37, %v4160_v13  ;;  %v3489_v53 = vor.u32 %v3488_v4, %v3487_v21  ;;  %v3492_v27 = vshll.u32 %v3491_v50, 23  ;;  %v4166_v2 = vshll.u32 %v9433_v56, %v4160_v13 }
 0x474   : > { %v3831_v44 = vxor.u32 2147483648, %v3826_v32  ;;  %v3835_v26 = vsel %vm3833_vm3, %v3834_v45, %v3826_v32  ;;  %v4164_v3 = vshrl.u32 %v9433_v56, %v4161_v36  ;;  %v4167_v28 = vshrl.u32 %v9434_v6, %v4161_v36 }
 0x475   : > { %v4169_v57 = vshll.u32 %v9434_v6, %v4160_v13  ;;  %v3493_v48 = vor.u32 4788187, %v3492_v27  ;;  %v3496_v10 = vcvt.s32.f32 %v3489_v53  ;;  %v4170_v39 = vshrl.u32 %v9435_v49, %v4161_v36 }
 0x476   : > { %v3832_v30 = vsel %vm3830_vm1, %v3818_v33, %v3831_v44  ;;  %v4165_v33 = vor.u32 %v4164_v3, %v4163_v35  ;;  %v8740_v25 = vor.u32 %v4167_v28, %v4166_v2  ;;  %v4172_v60 = vshll.u32 %v9435_v49, %v4160_v13 }
 0x477   : > { %v3836_v19 = vsel %vm3829_vm0, %v3832_v30, %v3835_v26  ;;  %v4173_v42 = vshrl.u32 %v9436_v15, %v4161_v36  ;;  %v3494_v46 = vand.u32 2147483647, %v3493_v48  ;;  %v8745_v41 = vor.u32 %v4170_v39, %v4169_v57 }
 0x478   : > { %v3837_v22 = vsel %vm3827_vm2, nan, %v3836_v19  ;;  %v4175_v32 = vshll.u32 %v9436_v15, %v4160_v13  ;;  %v4176_v45 = vshrl.u32 %v9437_v58, %v4161_v36  ;;  %v3503_v59 = vsel %vm8718_vm6, 0, %v3501_v24 }
 0x479   : > { %v5065_v62 = vmul.f32 %v5427_v55, %v3837_v22  ;;  %v4174_v55 = vor.u32 %v4173_v42, %v4172_v60  ;;  %5428 = vrcp.f32 %v831_v47  ;;  %v3497_v38 = vmul.f32 %v3496_v10, %v3494_v46 }
 0x47a   : > { %v4177_v52 = vor.u32 %v4176_v45, %v4175_v32  ;;  %vm4178_vm7 = vcmp.lt.s32.totalorder %v8729_v40, 1  ;;  %vm4181_vm8 = vcmp.lt.s32.totalorder %v8729_v40, 4  ;;  %vm4180_vm9 = vcmp.lt.s32.totalorder %v8729_v40, 3 }
 0x47b   : > { %5091 = vst [vmem:[%s6423_s27 + $0x90] sm:$0xff] %v5065_v62  ;;  %v4186_v44 = vsel %vm4178_vm7, %v4165_v33, %v8740_v25  ;;  %v4187_v13 = vsel %vm4181_vm8, %v4174_v55, 920167782  ;;  %v4190_v47 = vsel %vm4178_vm7, %v8740_v25, %v8745_v41  ;;  %v3498_v24 = vxor.u32 2147483648, %v3497_v38 }
 0x47c   : > { %vm4179_vm10 = vcmp.lt.s32.totalorder %v8729_v40, 2  ;;  %v4188_v20 = vsel %vm4180_vm9, %v8745_v41, %v4187_v13  ;;  %v4191_v26 = vsel %vm4181_vm8, %v4177_v52, 1326507024  ;;  %v4195_v50 = vand.u32 65535, %v8751_v9 }
 0x47d   : > { %v4189_v21 = vsel %vm4179_vm10, %v4186_v44, %v4188_v20  ;;  %v4192_v4 = vsel %vm4180_vm9, %v4174_v55, %v4191_v26  ;;  %v8778_v30 = vmul.f32 %v8403_v14, %v8684_v7  ;;  %v3499_v35 = vsel %vm3378_vm15, %v3498_v24, %v3497_v38 }
 0x47e   : > { %v4193_v19 = vsel %vm4179_vm10, %v4190_v47, %v4192_v4  ;;  %v4219_v53 = vand.u32 65535, %v4189_v21  ;;  %v4220_v27 = vshrl.u32 %v4189_v21, 16  ;;  %v3502_v22 = vsel %vm8718_vm6, %v8428_v23, %v3499_v35 }
 0x47f   : > { %v8784_v2 = vpop.eup %5428  ;;  %v4196_v3 = vshrl.u32 %v8751_v9, 16  ;;  %v4197_v28 = vand.u32 65535, %v4193_v19  ;;  %v4198_v57 = vshrl.u32 %v4193_v19, 16  ;;  %v3504_v14 = vmul.f32 %v3502_v22, %v3502_v22 }
 0x480   : > { %v8790_v7 = vand.u32 3, %v3503_v59  ;;  %v4162_v62 = vshrl.u32 %v9431_v37, %v4161_v36  ;;  %v4222_v48 = vmul.u32 %v4220_v27, %v4195_v50  ;;  %v3838_v42 = vand.u32 2147483647, %v8778_v30 }
 0x481   : > { %v4200_v10 = vmul.u32 %v4198_v57, %v4195_v50  ;;  %v4201_v39 = vmul.u32 %v4197_v28, %v4196_v3  ;;  %v4223_v60 = vmul.u32 %v4219_v53, %v4196_v3  ;;  %v3505_v46 = vmul.f32 -0.001358992, %v3504_v14 }
 0x482   : > { %v3512_v32 = vmul.f32 -0.00019511016, %v3504_v14  ;;  %v4182_v16 = vsel %vm4178_vm7, %v4162_v62, %v4165_v33  ;;  %v4225_v45 = vshll.u32 %v4222_v48, 16  ;;  %v4199_v55 = vmul.u32 %v4197_v28, %v4195_v50 }
 0x483   : > { %v4202_v38 = vmul.u32 %v4198_v57, %v4196_v3  ;;  %v4203_v52 = vshll.u32 %v4200_v10, 16  ;;  %v4221_v44 = vmul.u32 %v4219_v53, %v4195_v50  ;;  %v3506_v59 = vadd.f32 0.041655596, %v3505_v46 }
 0x484   : > { %v3513_v13 = vadd.f32 0.008332121, %v3512_v32  ;;  %v4205_v47 = vshll.u32 %v4201_v39, 16  ;;  %v4224_v36 = vmul.u32 %v4220_v27, %v4196_v3  ;;  %v4227_v20 = vshll.u32 %v4223_v60, 16 }
 0x485   : > { %vm4207_vm11 = vc.u32 %v4199_v55, %v4203_v52  ;;  %v4209_v24 = vadd.s32 %v4203_v52, %v4199_v55  ;;  %vm4229_vm12 = vc.u32 %v4221_v44, %v4225_v45  ;;  %v3507_v26 = vmul.f32 %v3506_v59, %v3504_v14 }
 0x486   : > { %v3514_v21 = vmul.f32 %v3513_v13, %v3504_v14  ;;  %v4208_v4 = vsel %vm4207_vm11, 1, %v9432_v63  ;;  %v4230_v35 = vsel %vm4229_vm12, 1, %v9432_v63  ;;  %v4231_v19 = vadd.s32 %v4225_v45, %v4221_v44 }
 0x487   : > { %v4210_v33 = vadd.s32 %v4208_v4, %v4202_v38  ;;  %vm4211_vm13 = vc.u32 %v4209_v24, %v4205_v47  ;;  %v4232_v28 = vadd.s32 %v4230_v35, %v4224_v36  ;;  %v3508_v57 = vadd.f32 -0.4999988, %v3507_v26 }
 0x488   : > { %v3515_v50 = vadd.f32 -0.16666654, %v3514_v21  ;;  %v4212_v53 = vsel %vm4211_vm13, 1, %v9432_v63  ;;  %v3841_v27 = vand.u32 2139095040, %v8778_v30  ;;  %v4183_v3 = vsel %vm4181_vm8, %v8745_v41, 2102212464 }
 0x489   : > { %v4204_v62 = vshrl.u32 %v4200_v10, 16  ;;  %v4214_v46 = vadd.s32 %v4212_v53, %v4210_v33  ;;  %vm4233_vm14 = vc.u32 %v4231_v19, %v4227_v20  ;;  %v3509_v32 = vmul.f32 %v3508_v57, %v3504_v14 }
 0x48a   : > { %v3516_v55 = vmul.f32 %v3515_v50, %v3504_v14  ;;  %v4234_v38 = vsel %vm4233_vm14, 1, %v9432_v63  ;;  %v3842_v52 = vshrl.u32 %v3841_v27, 23  ;;  %v4206_v45 = vshrl.u32 %v4201_v39, 16 }
 0x48b   : > { %v4215_v44 = vadd.s32 %v4214_v46, %v4204_v62  ;;  %v4226_v59 = vshrl.u32 %v4222_v48, 16  ;;  %v4236_v13 = vadd.s32 %v4234_v38, %v4232_v28  ;;  %v3510_v47 = vadd.f32 1.0, %v3509_v32 }
 0x48c   : > { %v3517_v36 = vadd.f32 1.0, %v3516_v55  ;;  %v4184_v24 = vsel %vm4180_vm9, %v8740_v25, %v4183_v3  ;;  %v5246_v26 = vadd.s32 4294967169, %v3842_v52  ;;  %5430 = vpow2.f32 %v8699_v11 }
 0x48d   : > { %v8808_v41 = vadd.s32 %v4215_v44, %v4206_v45  ;;  %v4228_v10 = vshrl.u32 %v4223_v60, 16  ;;  %v4237_v14 = vadd.s32 %v4236_v13, %v4226_v59  ;;  %v3526_v4 = vxor.u32 2147483648, %v3510_v47 }
 0x48e   : > { %v3518_v21 = vmul.f32 %v3517_v36, %v3502_v22  ;;  %v4235_v35 = vadd.s32 %v4231_v19, %v4227_v20  ;;  %v3848_v39 = vadd.s32 1, %v5246_v26  ;;  %v4185_v48 = vsel %vm4179_vm10, %v4182_v16, %v4184_v24 }
 0x48f   : > { %v4238_v33 = vadd.s32 %v4237_v14, %v4228_v10  ;;  %v3845_v28 = vand.u32 8388607, %v3838_v42  ;;  %v667_v25 = vadd.f32 %v8713_v31, %v8686_v17  ;;  %vm3521_vm15 = vcmp.lt.s32.totalorder %v8790_v7, 2 }
 0x490   : > { %v3523_v11 = vxor.u32 2147483648, %v3518_v21  ;;  %vm4241_vm0 = vc.u32 %v8808_v41, %v4235_v35  ;;  %vm3849_vm1 = vcmp.gt.s32.totalorder %v3848_v39, 0  ;;  %vm3522_vm2 = vcmp.eq.s32.totalorder %v8790_v7, 0 }
 0x491   : > { %vm3525_vm3 = vcmp.eq.s32.totalorder %v8790_v7, 2  ;;  %v4242_v22 = vadd.s32 1, %v4238_v33  ;;  %v3850_v40 = vsel %vm3849_vm1, %v3848_v39, 0  ;;  %v4239_v20 = vmul.u32 %v8751_v9, %v4185_v48 }
 0x492   : > { %v3524_v60 = vsel %vm3522_vm2, %v3510_v47, %v3523_v11  ;;  %v3527_v16 = vsel %vm3525_vm3, %v3526_v4, %v3518_v21  ;;  %v3852_v19 = vand.u32 31, %v3850_v40  ;;  %v5431_v57 = vpop.eup %5430  ;;  %v3846_v50 = vor.u32 8388608, %v3845_v28  ;;  %v8854_v11 = vld [vmem:[%s9373_s1 + $0x6] ss:$0 sm:$0xff] }
 0x493   : > { %v3528_v17 = vsel %vm3521_vm15, %v3524_v60, %v3527_v16  ;;  %v4243_v31 = vsel %vm4241_vm0, %v4242_v22, %v4238_v33  ;;  %v883_v62 = vmul.f32 %v8784_v2, %v667_v25  ;;  %v8823_v46 = vshrl.u32 %v3850_v40, 5 }
 0x494   : > { %v3529_v53 = vsel %vm3519_vm4, nan, %v3528_v17  ;;  %v4244_v27 = vadd.s32 %v4243_v31, %v4239_v20  ;;  %v3853_v3 = vsub.s32 32, %v3852_v19  ;;  %v3855_v32 = vshll.u32 %v9431_v37, %v3852_v19 }
 0x495   : > { %v5063_v7 = vmul.f32 %v5431_v57, %v3529_v53  ;;  %v3858_v9 = vshll.u32 %v9433_v56, %v3852_v19  ;;  %v3861_v52 = vshll.u32 %v9434_v6, %v3852_v19  ;;  %v3864_v44 = vshll.u32 %v9435_v49, %v3852_v19 }
 0x496   : > { %v4245_v55 = vadd.s32 536870912, %v4244_v27  ;;  %v3856_v38 = vshrl.u32 %v9433_v56, %v3853_v3  ;;  %v3859_v23 = vshrl.u32 %v9434_v6, %v3853_v3  ;;  %v3862_v45 = vshrl.u32 %v9435_v49, %v3853_v3 }
 0x497   : > { %5089 = vst [vmem:[%s6423_s27 + $0x80] sm:$0xff] %v5063_v7  ;;  %v3865_v59 = vshrl.u32 %v9436_v15, %v3853_v3  ;;  %v3868_v13 = vshrl.u32 %v9437_v58, %v3853_v3  ;;  %v3867_v26 = vshll.u32 %v9436_v15, %v3852_v19  ;;  %vm3870_vm5 = vcmp.lt.s32.totalorder %v8823_v46, 1 }
 0x498   : > { %v8835_v47 = vshrl.u32 %v4245_v55, 30  ;;  %v3857_v36 = vor.u32 %v3856_v38, %v3855_v32  ;;  %v3860_v24 = vor.u32 %v3859_v23, %v3858_v9  ;;  %v3863_v10 = vor.u32 %v3862_v45, %v3861_v52 }
 0x499   : > { %v3866_v14 = vor.u32 %v3865_v59, %v3864_v44  ;;  %v3869_v4 = vor.u32 %v3868_v13, %v3867_v26  ;;  %vm3873_vm6 = vcmp.lt.s32.totalorder %v8823_v46, 4  ;;  %vm3872_vm7 = vcmp.lt.s32.totalorder %v8823_v46, 3 }
 0x49a   : > { %v4247_v21 = vshll.u32 %v8835_v47, 30  ;;  %v3878_v39 = vsel %vm3870_vm5, %v3857_v36, %v3860_v24  ;;  %v8846_v33 = vshll.u32 %v3846_v50, 8  ;;  %vm3871_vm8 = vcmp.lt.s32.totalorder %v8823_v46, 2 }
 0x49b   : > { %v3879_v48 = vsel %vm3873_vm6, %v3866_v14, 920167782  ;;  %v8857_v22 = vmul.f32 %v8854_v11, %v883_v62  ;;  %v4240_v40 = vadd.s32 %v4235_v35, %v8808_v41  ;;  %v8862_v60 = vmul.f32 %v8659_v8, %v8647_v18 }
 0x49c   : > { %v4248_v28 = vsub.s32 %v4244_v27, %v4247_v21  ;;  %v3880_v25 = vsel %vm3872_vm7, %v3863_v10, %v3879_v48  ;;  %v3882_v19 = vsel %vm3870_vm5, %v3860_v24, %v3863_v10  ;;  %v3883_v57 = vsel %vm3873_vm6, %v3869_v4, 1326507024 }
 0x49d   : > { %v3881_v16 = vsel %vm3871_vm8, %v3878_v39, %v3880_v25  ;;  %v3884_v17 = vsel %vm3872_vm7, %v3866_v14, %v3883_v57  ;;  %v3887_v41 = vand.u32 65535, %v8846_v33  ;;  %v3888_v50 = vshrl.u32 %v8846_v33, 16 }
 0x49e   : > { %vm4249_vm9 = vcmp.lt.s32.totalorder %v4248_v28, 0  ;;  %v4250_v20 = vsub.s32 0, %v4248_v28  ;;  %v3911_v35 = vand.u32 65535, %v3881_v16  ;;  %v3912_v31 = vshrl.u32 %v3881_v16, 16 }
 0x49f   : > { %v4608_v53 = vand.u32 2147483647, %v8857_v22  ;;  %v4940_v27 = vsub.f32 1.0, %v8706_v61  ;;  %v3875_v7 = vsel %vm3873_vm6, %v3863_v10, 2102212464  ;;  %v3885_v32 = vsel %vm3871_vm8, %v3882_v19, %v3884_v17 }
 0x4a0   : > { %v4251_v18 = vsel %vm4249_vm9, %v4250_v20, %v4248_v28  ;;  %v3914_v9 = vmul.u32 %v3912_v31, %v3887_v41  ;;  %v3854_v55 = vshrl.u32 %v9431_v37, %v3853_v3  ;;  %v3889_v38 = vand.u32 65535, %v3885_v32 }
 0x4a1   : > { %v4252_v62 = vclz %v4251_v18  ;;  %v3890_v23 = vshrl.u32 %v3885_v32, 16  ;;  %v3915_v52 = vmul.u32 %v3911_v35, %v3888_v50  ;;  %v4270_v44 = vsub.s32 4, %v8835_v47 }
 0x4a2   : > { %v3913_v59 = vmul.u32 %v3911_v35, %v3887_v41  ;;  %v3917_v13 = vshll.u32 %v3914_v9, 16  ;;  %v3874_v61 = vsel %vm3870_vm5, %v3854_v55, %v3857_v36  ;;  %v3876_v26 = vsel %vm3872_vm7, %v3860_v24, %v3875_v7 }
 0x4a3   : > { %v5253_v45 = vadd.s32 4294967294, %v4252_v62  ;;  %v3892_v10 = vmul.u32 %v3890_v23, %v3887_v41  ;;  %v3893_v14 = vmul.u32 %v3889_v38, %v3888_v50  ;;  %v3891_v21 = vmul.u32 %v3889_v38, %v3887_v41 }
 0x4a4   : > { %v3916_v4 = vmul.u32 %v3912_v31, %v3888_v50  ;;  %vm3921_vm11 = vc.u32 %v3913_v59, %v3917_v13  ;;  %v3894_v39 = vmul.u32 %v3890_v23, %v3888_v50  ;;  %v3919_v25 = vshll.u32 %v3915_v52, 16 }
 0x4a5   : > { %vm5254_vm10 = vcmp.lt.s32.totalorder %v5253_v45, 0  ;;  %v3895_v48 = vshll.u32 %v3892_v10, 16  ;;  %v3897_v57 = vshll.u32 %v3893_v14, 16  ;;  %v3922_v36 = vsel %vm3921_vm11, 1, %v9432_v63 }
 0x4a6   : > { %v4255_v3 = vsel %vm5254_vm10, 0, %v5253_v45  ;;  %v3923_v35 = vadd.s32 %v3917_v13, %v3913_v59  ;;  %v3924_v41 = vadd.s32 %v3922_v36, %v3916_v4  ;;  %v3918_v7 = vshrl.u32 %v3914_v9, 16 }
 0x4a7   : > { %v4256_v16 = vsub.s32 32, %v4255_v3  ;;  %v4257_v20 = vshll.u32 %v4248_v28, %v4255_v3  ;;  %v4260_v19 = vsub.s32 4294967266, %v4255_v3  ;;  %vm3899_vm12 = vc.u32 %v3891_v21, %v3895_v48 }
 0x4a8   : > { %v3901_v17 = vadd.s32 %v3895_v48, %v3891_v21  ;;  %v3900_v62 = vsel %vm3899_vm12, 1, %v9432_v63  ;;  %vm3925_vm14 = vc.u32 %v3923_v35, %v3919_v25  ;;  %v3896_v38 = vshrl.u32 %v3892_v10, 16 }
 0x4a9   : > { %v4258_v24 = vshrl.u32 %v4240_v40, %v4256_v16  ;;  %v4261_v18 = vadd.s32 127, %v4260_v19  ;;  %v3902_v31 = vadd.s32 %v3900_v62, %v3894_v39  ;;  %v3926_v55 = vsel %vm3925_vm14, 1, %v9432_v63  ;;  %v602_v19 = vpop.permute.xlu1 %601 }
 0x4aa   : > { %vm3903_vm13 = vc.u32 %v3901_v17, %v3897_v57  ;;  %v3928_v45 = vadd.s32 %v3926_v55, %v3924_v41  ;;  %v4611_v59 = vand.u32 2139095040, %v8857_v22  ;;  %v3920_v13 = vshrl.u32 %v3915_v52, 16 }
 0x4ab   : > { %v4259_v50 = vor.u32 %v4258_v24, %v4257_v20  ;;  %v4262_v32 = vshll.u32 %v4261_v18, 23  ;;  %v3904_v28 = vsel %vm3903_vm13, 1, %v9432_v63  ;;  %v4615_v21 = vand.u32 8388607, %v4608_v53 }
 0x4ac   : > { %v3906_v23 = vadd.s32 %v3904_v28, %v3902_v31  ;;  %v8894_v4 = vmul.f32 %v8784_v2, %v4940_v27  ;;  %v3898_v9 = vshrl.u32 %v3893_v14, 16  ;;  %v3929_v39 = vadd.s32 %v3928_v45, %v3918_v7 }
 0x4ad   : > { %v4263_v40 = vor.u32 4788187, %v4262_v32  ;;  %v4612_v48 = vshrl.u32 %v4611_v59, 23  ;;  %vm4148_vm15 = vcmp.lt.s32.totalorder %v8682_v1, 0  ;;  %v4266_v10 = vcvt.s32.f32 %v4259_v50  ;;  %v9517_v50 = vld [vmem:[#allocation39_spill] sm:$0xff] }
 0x4ae   : > { %v3907_v3 = vadd.s32 %v3906_v23, %v3896_v38  ;;  %v3877_v20 = vsel %vm3871_vm8, %v3874_v61, %v3876_v26  ;;  %v3927_v52 = vadd.s32 %v3923_v35, %v3919_v25  ;;  %v3930_v17 = vadd.s32 %v3929_v39, %v3920_v13  ;;  %v9518_v13 = vld [vmem:[#allocation38_spill] sm:$0xff] }
 0x4af   : > { %v4264_v16 = vand.u32 2147483647, %v4263_v40  ;;  %v5261_v36 = vadd.s32 4294967169, %v4612_v48  ;;  %v4271_v2 = vsel %vm4148_vm15, %v4270_v44, %v8835_v47  ;;  %v4616_v27 = vor.u32 8388608, %v4615_v21 }
 0x4b0   : > { %v3908_v57 = vadd.s32 %v3907_v3, %v3898_v9  ;;  %v3934_v14 = vadd.s32 1, %v3930_v17  ;;  %v775_v62 = vmul.f32 %v8599_v51, %v602_v19  ;;  %vm8905_vm1 = vcmp.le.f32.partialorder %v4146_v0, 0.7853982 }
 0x4b1   : > { %v4267_v24 = vmul.f32 %v4266_v10, %v4264_v16  ;;  %v4618_v18 = vadd.s32 1, %v5261_v36  ;;  %v3931_v26 = vmul.u32 %v8846_v33, %v3877_v20  ;;  %v4273_v25 = vsel %vm8905_vm1, 0, %v4271_v2 }
 0x4b2   : > { %vm3933_vm0 = vc.u32 %v3908_v57, %v3927_v52  ;;  %v5037_v47 = vmul.f32 1.442695, %v8862_v60  ;;  %v639_v0 = vmul.f32 %v8620_v12, %v602_v19  ;;  %v8919_v33 = vshll.u32 %v4616_v27, 8 }
 0x4b3   : > { %v4268_v61 = vxor.u32 2147483648, %v4267_v24  ;;  %v3935_v44 = vsel %vm3933_vm0, %v3934_v14, %v3930_v17  ;;  %vm4619_vm2 = vcmp.gt.s32.totalorder %v4618_v18, 0  ;;  %v8922_v32 = vadd.f32 %v775_v62, %v9517_v50 }
 0x4b4   : > { %v3936_v51 = vadd.s32 %v3935_v44, %v3931_v26  ;;  %v4620_v41 = vsel %vm4619_vm2, %v4618_v18, 0  ;;  %5432 = vpow2.f32 %v5037_v47  ;;  %v8926_v45 = vand.u32 3, %v4273_v25 }
 0x4b5   : > { %v4269_v35 = vsel %vm4148_vm15, %v4268_v61, %v4267_v24  ;;  %v4622_v7 = vand.u32 31, %v4620_v41  ;;  %v8930_v59 = vadd.s32 %v3927_v52, %v3908_v57  ;;  %v8933_v40 = vand.u32 65535, %v8919_v33 }
 0x4b6   : > { %v4272_v31 = vsel %vm8905_vm1, %v8682_v1, %v4269_v35  ;;  %v3937_v28 = vadd.s32 536870912, %v3936_v51  ;;  %v8936_v21 = vadd.f32 %v639_v0, %v9518_v13  ;;  %v829_v9 = vadd.f32 1.000001, %v8922_v32 }
 0x4b7   : > { %v4274_v60 = vmul.f32 %v4272_v31, %v4272_v31  ;;  %v8924_v55 = vsub.s32 32, %v4622_v7  ;;  %v8940_v16 = vshrl.u32 %v4620_v41, 5  ;;  %v4625_v10 = vshll.u32 %v9431_v37, %v4622_v7 }
 0x4b8   : > { %v8928_v12 = vshrl.u32 %v3937_v28, 30  ;;  %vm4295_vm3 = vcmp.eq.s32.totalorder %v8926_v45, 2  ;;  %v4628_v27 = vshll.u32 %v9433_v56, %v4622_v7  ;;  %v4631_v14 = vshll.u32 %v9434_v6, %v4622_v7 }
 0x4b9   : > { %v4275_v38 = vmul.f32 -0.001358992, %v4274_v60  ;;  %v4282_v23 = vmul.f32 -0.00019511016, %v4274_v60  ;;  %v4626_v20 = vshrl.u32 %v9433_v56, %v8924_v55  ;;  %v4629_v19 = vshrl.u32 %v9434_v6, %v8924_v55 }
 0x4ba   : > { %v3939_v48 = vshll.u32 %v8928_v12, 30  ;;  %v4635_v57 = vshrl.u32 %v9436_v15, %v8924_v55  ;;  %v4632_v24 = vshrl.u32 %v9435_v49, %v8924_v55  ;;  %v5433_v2 = vpop.eup %5432  ;;  %v4634_v18 = vshll.u32 %v9435_v49, %v4622_v7 }
 0x4bb   : > { %v4276_v3 = vadd.f32 0.041655596, %v4275_v38  ;;  %v4283_v39 = vadd.f32 0.008332121, %v4282_v23  ;;  %v4638_v62 = vshrl.u32 %v9437_v58, %v8924_v55  ;;  %vm4292_vm5 = vcmp.eq.s32.totalorder %v8926_v45, 0 }
 0x4bc   : > { %v8949_v36 = vsub.s32 %v3936_v51, %v3939_v48  ;;  %v4627_v25 = vor.u32 %v4626_v20, %v4625_v10  ;;  %v8962_v47 = vor.u32 %v4629_v19, %v4628_v27  ;;  %v4636_v44 = vor.u32 %v4635_v57, %v4634_v18 }
 0x4bd   : > { %v4277_v52 = vmul.f32 %v4276_v3, %v4274_v60  ;;  %v4284_v17 = vmul.f32 %v4283_v39, %v4274_v60  ;;  %v4637_v35 = vshll.u32 %v9436_v15, %v4622_v7  ;;  %vm4291_vm6 = vcmp.lt.s32.totalorder %v8926_v45, 2 }
 0x4be   : > { %vm3941_vm4 = vcmp.lt.s32.totalorder %v8949_v36, 0  ;;  %v3942_v26 = vsub.s32 0, %v8949_v36  ;;  %v4633_v50 = vor.u32 %v4632_v24, %v4631_v14  ;;  %vm4289_vm7 = vweird.f32 %v8682_v1 }
 0x4bf   : > { %v4278_v46 = vadd.f32 -0.4999988, %v4277_v52  ;;  %v4285_v61 = vadd.f32 -0.16666654, %v4284_v17  ;;  %v4639_v38 = vor.u32 %v4638_v62, %v4637_v35  ;;  %v4658_v23 = vshrl.u32 %v8919_v33, 16 }
 0x4c0   : > { %v3943_v0 = vsel %vm3941_vm4, %v3942_v26, %v8949_v36  ;;  %5434 = vrcp.f32 %v829_v9  ;;  %vm4640_vm8 = vcmp.lt.s32.totalorder %v8940_v16, 1  ;;  %vm4643_vm9 = vcmp.lt.s32.totalorder %v8940_v16, 4 }
 0x4c1   : > { %v4279_v51 = vmul.f32 %v4278_v46, %v4274_v60  ;;  %v4286_v41 = vmul.f32 %v4285_v61, %v4274_v60  ;;  %v3944_v28 = vclz %v3943_v0  ;;  %vm4642_vm10 = vcmp.lt.s32.totalorder %v8940_v16, 3 }
 0x4c2   : > { %v4648_v60 = vsel %vm4640_vm8, %v4627_v25, %v8962_v47  ;;  %v4649_v39 = vsel %vm4643_vm9, %v4636_v44, 920167782  ;;  %vm4641_vm11 = vcmp.lt.s32.totalorder %v8940_v16, 2  ;;  %v4652_v19 = vsel %vm4640_vm8, %v8962_v47, %v4633_v50 }
 0x4c3   : > { %v4280_v13 = vadd.f32 1.0, %v4279_v51  ;;  %v4287_v3 = vadd.f32 1.0, %v4286_v41  ;;  %v5247_v7 = vadd.s32 4294967294, %v3944_v28  ;;  %v4650_v9 = vsel %vm4642_vm10, %v4633_v50, %v4649_v39 }
 0x4c4   : > { %v4651_v20 = vsel %vm4641_vm11, %v4648_v60, %v4650_v9  ;;  %v4938_v57 = vsub.f32 1.0, %v8922_v32  ;;  %v4653_v24 = vsel %vm4643_vm9, %v4639_v38, 1326507024  ;;  %v3962_v45 = vsub.s32 4, %v8928_v12 }
 0x4c5   : > { %v4288_v48 = vmul.f32 %v4287_v3, %v4272_v31  ;;  %v4296_v10 = vxor.u32 2147483648, %v4280_v13  ;;  %vm5248_vm12 = vcmp.lt.s32.totalorder %v5247_v7, 0  ;;  %v4654_v46 = vsel %vm4642_vm10, %v4636_v44, %v4653_v24 }
 0x4c6   : > { %v3947_v17 = vsel %vm5248_vm12, 0, %v5247_v7  ;;  %v5435_v27 = vpop.eup %5434  ;;  %v4655_v26 = vsel %vm4641_vm11, %v4652_v19, %v4654_v46  ;;  %v4681_v35 = vand.u32 65535, %v4651_v20  ;;  %v4682_v51 = vshrl.u32 %v4651_v20, 16 }
 0x4c7   : > { %v4293_v52 = vxor.u32 2147483648, %v4288_v48  ;;  %v4297_v31 = vsel %vm4295_vm3, %v4296_v10, %v4288_v48  ;;  %v3948_v14 = vsub.s32 32, %v3947_v17  ;;  %v3949_v18 = vshll.u32 %v8949_v36, %v3947_v17 }
 0x4c8   : > { %v3952_v62 = vsub.s32 4294967266, %v3947_v17  ;;  %v4659_v36 = vand.u32 65535, %v4655_v26  ;;  %v4624_v44 = vshrl.u32 %v9431_v37, %v8924_v55  ;;  %v4684_v3 = vmul.u32 %v4682_v51, %v8933_v40  ;;  %v5471_v55 = vld [vmem:[%s9373_s1 + $0x1] ss:$0 sm:$0xff] }
 0x4c9   : > { %v4294_v61 = vsel %vm4292_vm5, %v4280_v13, %v4293_v52  ;;  %v3950_v0 = vshrl.u32 %v8930_v59, %v3948_v14  ;;  %v4660_v13 = vshrl.u32 %v4655_v26, 16  ;;  %vm3840_vm13 = vcmp.lt.s32.totalorder %v8778_v30, 0 }
 0x4ca   : > { %v4298_v41 = vsel %vm4291_vm6, %v4294_v61, %v4297_v31  ;;  %v3953_v28 = vadd.s32 127, %v3952_v62  ;;  %v4644_v59 = vsel %vm4640_vm8, %v4624_v44, %v4627_v25  ;;  %v4663_v1 = vmul.u32 %v4659_v36, %v4658_v23 }
 0x4cb   : > { %v4299_v38 = vsel %vm4289_vm7, nan, %v4298_v41  ;;  %v3951_v60 = vor.u32 %v3950_v0, %v3949_v18  ;;  %v4662_v48 = vmul.u32 %v4660_v13, %v8933_v40  ;;  %v4685_v10 = vmul.u32 %v4681_v35, %v4658_v23 }
 0x4cc   : > { %v5068_v7 = vmul.f32 %v5433_v2, %v4299_v38  ;;  %v3954_v39 = vshll.u32 %v3953_v28, 23  ;;  %vm9013_vm14 = vcmp.le.f32.partialorder %v3838_v42, 0.7853982  ;;  %v4645_v9 = vsel %vm4643_vm9, %v4633_v50, 2102212464 }
 0x4cd   : > { %v4683_v20 = vmul.u32 %v4681_v35, %v8933_v40  ;;  %v4687_v19 = vshll.u32 %v4684_v3, 16  ;;  %v3958_v52 = vcvt.s32.f32 %v3951_v60  ;;  %v4661_v25 = vmul.u32 %v4659_v36, %v8933_v40 }
 0x4ce   : > { %5094 = vst [vmem:[%s6423_s27 + $0xa8] sm:$0xff] %v5068_v7  ;;  %v3955_v2 = vor.u32 4788187, %v3954_v39  ;;  %v4664_v31 = vmul.u32 %v4660_v13, %v4658_v23  ;;  %v4665_v17 = vshll.u32 %v4662_v48, 16  ;;  %v4667_v14 = vshll.u32 %v4663_v1, 16 }
 0x4cf   : > { %v4686_v18 = vmul.u32 %v4682_v51, %v4658_v23  ;;  %v4689_v62 = vshll.u32 %v4685_v10, 16  ;;  %vm4691_vm0 = vc.u32 %v4683_v20, %v4687_v19  ;;  %v4693_v46 = vadd.s32 %v4687_v19, %v4683_v20 }
 0x4d0   : > { %v3956_v24 = vand.u32 2147483647, %v3955_v2  ;;  %vm4669_vm15 = vc.u32 %v4661_v25, %v4665_v17  ;;  %v4671_v42 = vadd.s32 %v4665_v17, %v4661_v25  ;;  %v4666_v26 = vshrl.u32 %v4662_v48, 16 }
 0x4d1   : > { %v4670_v50 = vsel %vm4669_vm15, 1, %v9432_v63  ;;  %v4692_v35 = vsel %vm4691_vm0, 1, %v9432_v63  ;;  %vm4695_vm2 = vc.u32 %v4693_v46, %v4689_v62  ;;  %v4688_v36 = vshrl.u32 %v4684_v3, 16 }
 0x4d2   : > { %v3959_v61 = vmul.f32 %v3958_v52, %v3956_v24  ;;  %v4672_v41 = vadd.s32 %v4670_v50, %v4664_v31  ;;  %vm4673_vm1 = vc.u32 %v4671_v42, %v4667_v14  ;;  %v4694_v0 = vadd.s32 %v4692_v35, %v4686_v18  ;;  %v614_v14 = vpop.permute.xlu1 %613 }
 0x4d3   : > { %v4674_v28 = vsel %vm4673_vm1, 1, %v9432_v63  ;;  %v4696_v23 = vsel %vm4695_vm2, 1, %v9432_v63  ;;  %v881_v44 = vmul.f32 %v5435_v27, %v8936_v21  ;;  %v9028_v13 = vmul.f32 %v5435_v27, %v4938_v57 }
 0x4d4   : > { %v3960_v40 = vxor.u32 2147483648, %v3959_v61  ;;  %v4676_v51 = vadd.s32 %v4674_v28, %v4672_v41  ;;  %v4698_v38 = vadd.s32 %v4696_v23, %v4694_v0  ;;  %v4646_v60 = vsel %vm4642_vm10, %v8962_v47, %v4645_v9 }
 0x4d5   : > { %v4668_v39 = vshrl.u32 %v4663_v1, 16  ;;  %v4690_v48 = vshrl.u32 %v4685_v10, 16  ;;  %v9039_v21 = vmul.f32 %v8854_v11, %v881_v44  ;;  %v4647_v57 = vsel %vm4641_vm11, %v4644_v59, %v4646_v60  ;;  %v5473_v60 = vld [vmem:[%s9373_s1 + $0x2] ss:$0 sm:$0xff] }
 0x4d6   : > { %v3961_v7 = vsel %vm3840_vm13, %v3960_v40, %v3959_v61  ;;  %v4677_v2 = vadd.s32 %v4676_v51, %v4666_v26  ;;  %v4699_v20 = vadd.s32 %v4698_v38, %v4688_v36  ;;  %v9045_v19 = vadd.s32 %v4693_v46, %v4689_v62  ;;  %v9521_v26 = vld [vmem:[#allocation5_spill] sm:$0xff] }
 0x4d7   : > { %v3964_v3 = vsel %vm9013_vm14, %v8778_v30, %v3961_v7  ;;  %v3963_v1 = vsel %vm3840_vm13, %v3962_v45, %v8928_v12  ;;  %v4303_v52 = vand.u32 2139095040, %v9039_v21  ;;  %v724_v25 = vmul.f32 %v8677_v43, %v6621_v5 }
 0x4d8   : > { %v3966_v32 = vmul.f32 %v3964_v3, %v3964_v3  ;;  %v9043_v27 = vadd.s32 %v4677_v2, %v4668_v39  ;;  %v4700_v47 = vadd.s32 %v4699_v20, %v4690_v48  ;;  %v4701_v17 = vmul.u32 %v8919_v33, %v4647_v57 }
 0x4d9   : > { %v4304_v24 = vshrl.u32 %v4303_v52, 23  ;;  %v3965_v12 = vsel %vm9013_vm14, 0, %v3963_v1  ;;  %v4988_v45 = vmul.f32 %v8659_v8, %v8704_v54  ;;  %v4300_v62 = vand.u32 2147483647, %v9039_v21  ;;  %v5472_v8 = vld [vmem:[%s9373_s1 + $0x5] ss:$0 sm:$0xff] }
 0x4da   : > { %v3967_v10 = vmul.f32 -0.001358992, %v3966_v32  ;;  %v3974_v9 = vmul.f32 -0.00019511016, %v3966_v32  ;;  %vm4703_vm3 = vc.u32 %v9043_v27, %v9045_v19  ;;  %v4704_v16 = vadd.s32 1, %v4700_v47 }
 0x4db   : > { %v5255_v61 = vadd.s32 4294967169, %v4304_v24  ;;  %v352_v50 = vmul.f32 %v8652_v34, %v9521_v26  ;;  %v696_v33 = vmul.f32 %v8670_v29, %v9521_v26  ;;  %v484_v35 = vmul.f32 %v5471_v55, %v6621_v5 }
 0x4dc   : > { %v3968_v59 = vadd.f32 0.041655596, %v3967_v10  ;;  %v3975_v31 = vadd.f32 0.008332121, %v3974_v9  ;;  %v4705_v18 = vsel %vm4703_vm3, %v4704_v16, %v4700_v47  ;;  %v778_v54 = vmul.f32 %v5472_v8, %v614_v14 }
 0x4dd   : > { %v4706_v46 = vadd.s32 %v4705_v18, %v4701_v17  ;;  %v4310_v28 = vadd.s32 1, %v5255_v61  ;;  %v750_v36 = vadd.f32 %v724_v25, %v696_v33  ;;  %v3982_v34 = vand.u32 3, %v3965_v12 }
 0x4de   : > { %v3969_v43 = vmul.f32 %v3968_v59, %v3966_v32  ;;  %v3976_v42 = vmul.f32 %v3975_v31, %v3966_v32  ;;  %v5033_v23 = vmul.f32 1.442695, %v4988_v45  ;;  %v4307_v29 = vand.u32 8388607, %v4300_v62 }
 0x4df   : > { %v4707_v40 = vadd.s32 536870912, %v4706_v46  ;;  %vm4311_vm4 = vcmp.gt.s32.totalorder %v4310_v28, 0  ;;  %v510_v5 = vadd.f32 %v484_v35, %v352_v50  ;;  %v642_v39 = vmul.f32 %v5473_v60, %v614_v14 }
 0x4e0   : > { %v3970_v41 = vadd.f32 -0.4999988, %v3969_v43  ;;  %v3977_v0 = vadd.f32 -0.16666654, %v3976_v42  ;;  %v4312_v7 = vsel %vm4311_vm4, %v4310_v28, 0  ;;  %v9080_v57 = vadd.f32 %v778_v54, %v750_v36 }
 0x4e1   : > { %v9074_v44 = vshrl.u32 %v4707_v40, 30  ;;  %vm3981_vm5 = vweird.f32 %v8778_v30  ;;  %5436 = vpow2.f32 %v5033_v23  ;;  %v4314_v47 = vand.u32 31, %v4312_v7 }
 0x4e2   : > { %v3971_v51 = vmul.f32 %v3970_v41, %v3966_v32  ;;  %v3978_v38 = vmul.f32 %v3977_v0, %v3966_v32  ;;  %v4308_v32 = vor.u32 8388608, %v4307_v29  ;;  %vm3983_vm6 = vcmp.lt.s32.totalorder %v3982_v34, 2 }
 0x4e3   : > { %v4709_v20 = vshll.u32 %v9074_v44, 30  ;;  %vm3984_vm7 = vcmp.eq.s32.totalorder %v3982_v34, 0  ;;  %vm3987_vm8 = vcmp.eq.s32.totalorder %v3982_v34, 2  ;;  %v4315_v52 = vsub.s32 32, %v4314_v47 }
 0x4e4   : > { %v3972_v48 = vadd.f32 1.0, %v3971_v51  ;;  %v3979_v2 = vadd.f32 1.0, %v3978_v38  ;;  %v9083_v25 = vadd.f32 %v642_v39, %v510_v5  ;;  %v832_v31 = vadd.f32 1.000001, %v9080_v57 }
 0x4e5   : > { %v4710_v9 = vsub.s32 %v4706_v46, %v4709_v20  ;;  %v4702_v17 = vadd.s32 %v9045_v19, %v9043_v27  ;;  %v4318_v24 = vshrl.u32 %v9433_v56, %v4315_v52  ;;  %v9090_v14 = vshll.u32 %v4308_v32, 8 }
 0x4e6   : > { %v3980_v1 = vmul.f32 %v3979_v2, %v3964_v3  ;;  %v3988_v10 = vxor.u32 2147483648, %v3972_v48  ;;  %v4321_v3 = vshrl.u32 %v9434_v6, %v4315_v52  ;;  %v4317_v43 = vshll.u32 %v9431_v37, %v4314_v47 }
 0x4e7   : > { %vm4711_vm9 = vcmp.lt.s32.totalorder %v4710_v9, 0  ;;  %v4712_v59 = vsub.s32 0, %v4710_v9  ;;  %v5437_v42 = vpop.eup %5436  ;;  %v4320_v26 = vshll.u32 %v9433_v56, %v4314_v47  ;;  %v4324_v27 = vshrl.u32 %v9435_v49, %v4315_v52 }
 0x4e8   : > { %v3985_v16 = vxor.u32 2147483648, %v3980_v1  ;;  %v3989_v45 = vsel %vm3987_vm8, %v3988_v10, %v3980_v1  ;;  %v9098_v50 = vshrl.u32 %v4312_v7, 5  ;;  %v4323_v33 = vshll.u32 %v9434_v6, %v4314_v47 }
 0x4e9   : > { %v4713_v18 = vsel %vm4711_vm9, %v4712_v59, %v4710_v9  ;;  %5438 = vrcp.f32 %v832_v31  ;;  %v4319_v8 = vor.u32 %v4318_v24, %v4317_v43  ;;  %v9101_v54 = vor.u32 %v4321_v3, %v4320_v26 }
 0x4ea   : > { %v3986_v12 = vsel %vm3984_vm7, %v3972_v48, %v3985_v16  ;;  %v4714_v61 = vclz %v4713_v18  ;;  %v4326_v41 = vshll.u32 %v9435_v49, %v4314_v47  ;;  %v4327_v0 = vshrl.u32 %v9436_v15, %v4315_v52 }
 0x4eb   : > { %v3990_v46 = vsel %vm3983_vm6, %v3986_v12, %v3989_v45  ;;  %v4329_v40 = vshll.u32 %v9436_v15, %v4314_v47  ;;  %v4330_v28 = vshrl.u32 %v9437_v58, %v4315_v52  ;;  %v4325_v30 = vor.u32 %v4324_v27, %v4323_v33 }
 0x4ec   : > { %v3991_v19 = vsel %vm3981_vm5, nan, %v3990_v46  ;;  %v5262_v35 = vadd.s32 4294967294, %v4714_v61  ;;  %v4349_v36 = vand.u32 65535, %v9090_v14  ;;  %v4941_v34 = vsub.f32 1.0, %v9080_v57 }
 0x4ed   : > { %v5066_v55 = vmul.f32 %v5437_v42, %v3991_v19  ;;  %v4328_v29 = vor.u32 %v4327_v0, %v4326_v41  ;;  %v4331_v51 = vor.u32 %v4330_v28, %v4329_v40  ;;  %vm4332_vm11 = vcmp.lt.s32.totalorder %v9098_v50, 1 }
 0x4ee   : > { %vm5263_vm10 = vcmp.lt.s32.totalorder %v5262_v35, 0  ;;  %vm4333_vm12 = vcmp.lt.s32.totalorder %v9098_v50, 2  ;;  %vm4335_vm13 = vcmp.lt.s32.totalorder %v9098_v50, 4  ;;  %vm4334_vm14 = vcmp.lt.s32.totalorder %v9098_v50, 3 }
 0x4ef   : > { %5092 = vst [vmem:[%s6423_s27 + $0x98] sm:$0xff] %v5066_v55  ;;  %v4717_v23 = vsel %vm5263_vm10, 0, %v5262_v35  ;;  %v5439_v7 = vpop.eup %5438  ;;  %v4340_v39 = vsel %vm4332_vm11, %v4319_v8, %v9101_v54  ;;  %v4341_v48 = vsel %vm4335_vm13, %v4328_v29, 920167782  ;;  %v4344_v32 = vsel %vm4332_vm11, %v9101_v54, %v4325_v30 }
 0x4f0   : > { %v4718_v38 = vsub.s32 32, %v4717_v23  ;;  %v4722_v5 = vsub.s32 4294967266, %v4717_v23  ;;  %v4719_v60 = vshll.u32 %v4710_v9, %v4717_v23  ;;  %v4342_v57 = vsel %vm4334_vm14, %v4325_v30, %v4341_v48 }
 0x4f1   : > { %v4316_v47 = vshrl.u32 %v9431_v37, %v4315_v52  ;;  %v4343_v1 = vsel %vm4333_vm12, %v4340_v39, %v4342_v57  ;;  %v4345_v10 = vsel %vm4335_vm13, %v4331_v51, 1326507024  ;;  %v4350_v9 = vshrl.u32 %v9090_v14, 16 }
 0x4f2   : > { %v4720_v2 = vshrl.u32 %v4702_v17, %v4718_v38  ;;  %v4723_v20 = vadd.s32 127, %v4722_v5  ;;  %v4346_v31 = vsel %vm4334_vm14, %v4328_v29, %v4345_v10  ;;  %v4373_v17 = vand.u32 65535, %v4343_v1 }
 0x4f3   : > { %vm4610_vm15 = vcmp.lt.s32.totalorder %v8857_v22, 0  ;;  %v4347_v24 = vsel %vm4333_vm12, %v4344_v32, %v4346_v31  ;;  %v4374_v52 = vshrl.u32 %v4343_v1, 16  ;;  %v884_v3 = vmul.f32 %v5439_v7, %v9083_v25 }
 0x4f4   : > { %v4721_v16 = vor.u32 %v4720_v2, %v4719_v60  ;;  %v4724_v59 = vshll.u32 %v4723_v20, 23  ;;  %v9136_v12 = vmul.f32 %v5439_v7, %v4941_v34  ;;  %vm9140_vm0 = vcmp.le.f32.partialorder %v4608_v53, 0.7853982 }
 0x4f5   : > { %v4732_v43 = vsub.s32 4, %v9074_v44  ;;  %v4351_v42 = vand.u32 65535, %v4347_v24  ;;  %v4352_v46 = vshrl.u32 %v4347_v24, 16  ;;  %v4336_v61 = vsel %vm4332_vm11, %v4316_v47, %v4319_v8 }
 0x4f6   : > { %v4725_v18 = vor.u32 4788187, %v4724_v59  ;;  %v4337_v26 = vsel %vm4335_vm13, %v4325_v30, 2102212464  ;;  %v4376_v25 = vmul.u32 %v4374_v52, %v4349_v36  ;;  %v4377_v27 = vmul.u32 %v4373_v17, %v4350_v9 }
 0x4f7   : > { %v4728_v33 = vcvt.s32.f32 %v4721_v16  ;;  %v4354_v55 = vmul.u32 %v4352_v46, %v4349_v36  ;;  %v4355_v53 = vmul.u32 %v4351_v42, %v4350_v9  ;;  %v4375_v35 = vmul.u32 %v4373_v17, %v4349_v36 }
 0x4f8   : > { %v4726_v19 = vand.u32 2147483647, %v4725_v18  ;;  %v4378_v41 = vmul.u32 %v4374_v52, %v4350_v9  ;;  %v4379_v0 = vshll.u32 %v4376_v25, 16  ;;  %v9150_v40 = vmul.f32 %v8854_v11, %v884_v3 }
 0x4f9   : > { %v4353_v34 = vmul.u32 %v4351_v42, %v4349_v36  ;;  %v4356_v23 = vmul.u32 %v4352_v46, %v4350_v9  ;;  %v4357_v29 = vshll.u32 %v4354_v55, 16  ;;  %v4359_v8 = vshll.u32 %v4355_v53, 16 }
 0x4fa   : > { %v4729_v28 = vmul.f32 %v4728_v33, %v4726_v19  ;;  %v4381_v51 = vshll.u32 %v4377_v27, 16  ;;  %vm4383_vm1 = vc.u32 %v4375_v35, %v4379_v0  ;;  %v4385_v30 = vadd.s32 %v4379_v0, %v4375_v35 }
 0x4fb   : > { %vm4361_vm2 = vc.u32 %v4353_v34, %v4357_v29  ;;  %v4363_v5 = vadd.s32 %v4357_v29, %v4353_v34  ;;  %v4384_v7 = vsel %vm4383_vm1, 1, %v9432_v63  ;;  %v4338_v60 = vsel %vm4334_vm14, %v9101_v54, %v4337_v26 }
 0x4fc   : > { %v4730_v38 = vxor.u32 2147483648, %v4729_v28  ;;  %v4362_v11 = vsel %vm4361_vm2, 1, %v9432_v63  ;;  %v4386_v39 = vadd.s32 %v4384_v7, %v4378_v41  ;;  %vm4387_vm3 = vc.u32 %v4385_v30, %v4381_v51 }
 0x4fd   : > { %v4364_v48 = vadd.s32 %v4362_v11, %v4356_v23  ;;  %vm4365_vm4 = vc.u32 %v4363_v5, %v4359_v8  ;;  %v4388_v2 = vsel %vm4387_vm3, 1, %v9432_v63  ;;  %v4380_v32 = vshrl.u32 %v4376_v25, 16 }
 0x4fe   : > { %v4731_v36 = vsel %vm4610_vm15, %v4730_v38, %v4729_v28  ;;  %v4366_v57 = vsel %vm4365_vm4, 1, %v9432_v63  ;;  %v4390_v47 = vadd.s32 %v4388_v2, %v4386_v39  ;;  %v4358_v1 = vshrl.u32 %v4354_v55, 16 }
 0x4ff   : > { %v4734_v20 = vsel %vm9140_vm0, %v8857_v22, %v4731_v36  ;;  %v4368_v10 = vadd.s32 %v4366_v57, %v4364_v48  ;;  %v4765_v9 = vand.u32 2139095040, %v9150_v40  ;;  %v4733_v16 = vsel %vm4610_vm15, %v4732_v43, %v9074_v44  ;;  %v9179_v43 = vld [vmem:[%s9373_s1 + $0x7] ss:$0 sm:$0xff] }
 0x500   : > { %v4736_v54 = vmul.f32 %v4734_v20, %v4734_v20  ;;  %v4360_v59 = vshrl.u32 %v4355_v53, 16  ;;  %v4382_v31 = vshrl.u32 %v4377_v27, 16  ;;  %v4391_v17 = vadd.s32 %v4390_v47, %v4380_v32 }
 0x501   : > { %v4369_v3 = vadd.s32 %v4368_v10, %v4358_v1  ;;  %v4766_v18 = vshrl.u32 %v4765_v9, 23  ;;  %v4339_v42 = vsel %vm4333_vm12, %v4336_v61, %v4338_v60  ;;  %v9170_v46 = vadd.s32 %v4385_v30, %v4381_v51 }
 0x502   : > { %v4737_v24 = vmul.f32 -0.001358992, %v4736_v54  ;;  %v4744_v52 = vmul.f32 -0.00019511016, %v4736_v54  ;;  %v4392_v26 = vadd.s32 %v4391_v17, %v4382_v31  ;;  %v4735_v44 = vsel %vm9140_vm0, 0, %v4733_v16 }
 0x503   : > { %v9172_v33 = vadd.s32 %v4369_v3, %v4360_v59  ;;  %v5264_v55 = vadd.s32 4294967169, %v4766_v18  ;;  %v4993_v50 = vmul.f32 %v9179_v43, %v8894_v4  ;;  %v4393_v35 = vmul.u32 %v9090_v14, %v4339_v42 }
 0x504   : > { %v4738_v25 = vadd.f32 0.041655596, %v4737_v24  ;;  %v4745_v19 = vadd.f32 0.008332121, %v4744_v52  ;;  %v4396_v61 = vadd.s32 1, %v4392_v26  ;;  %v4752_v29 = vand.u32 3, %v4735_v44 }
 0x505   : > { %vm4395_vm5 = vc.u32 %v9172_v33, %v9170_v46  ;;  %v4762_v45 = vand.u32 2147483647, %v9150_v40  ;;  %v4772_v0 = vadd.s32 1, %v5264_v55  ;;  %v5043_v8 = vmul.f32 1.442695, %v4993_v50 }
 0x506   : > { %v4739_v27 = vmul.f32 %v4738_v25, %v4736_v54  ;;  %v4746_v53 = vmul.f32 %v4745_v19, %v4736_v54  ;;  %v4397_v41 = vsel %vm4395_vm5, %v4396_v61, %v4392_v26  ;;  %vm4751_vm7 = vweird.f32 %v8857_v22 }
 0x507   : > { %v4398_v23 = vadd.s32 %v4397_v41, %v4393_v35  ;;  %vm4773_vm6 = vcmp.gt.s32.totalorder %v4772_v0, 0  ;;  %v4769_v14 = vand.u32 8388607, %v4762_v45  ;;  %vm4753_vm8 = vcmp.lt.s32.totalorder %v4752_v29, 2 }
 0x508   : > { %v4740_v28 = vadd.f32 -0.4999988, %v4739_v27  ;;  %v4747_v34 = vadd.f32 -0.16666654, %v4746_v53  ;;  %v4774_v38 = vsel %vm4773_vm6, %v4772_v0, 0  ;;  %5440 = vpow2.f32 %v5043_v8 }
 0x509   : > { %v4399_v30 = vadd.s32 536870912, %v4398_v23  ;;  %v4776_v5 = vand.u32 31, %v4774_v38  ;;  %vm4754_vm9 = vcmp.eq.s32.totalorder %v4752_v29, 0  ;;  %vm4757_vm10 = vcmp.eq.s32.totalorder %v4752_v29, 2 }
 0x50a   : > { %v4741_v51 = vmul.f32 %v4740_v28, %v4736_v54  ;;  %v4748_v4 = vmul.f32 %v4747_v34, %v4736_v54  ;;  %v4770_v57 = vor.u32 8388608, %v4769_v14  ;;  %v9199_v10 = vshrl.u32 %v4774_v38, 5 }
 0x50b   : > { %v9189_v11 = vshrl.u32 %v4399_v30, 30  ;;  %v9192_v39 = vsub.s32 32, %v4776_v5  ;;  %v4779_v9 = vshll.u32 %v9431_v37, %v4776_v5  ;;  %v4785_v59 = vshll.u32 %v9434_v6, %v4776_v5 }
 0x50c   : > { %v4742_v7 = vadd.f32 1.0, %v4741_v51  ;;  %v4749_v60 = vadd.f32 1.0, %v4748_v4  ;;  %v4788_v26 = vshll.u32 %v9435_v49, %v4776_v5  ;;  %v4791_v61 = vshll.u32 %v9436_v15, %v4776_v5 }
 0x50d   : > { %v4401_v2 = vshll.u32 %v9189_v11, 30  ;;  %v4780_v32 = vshrl.u32 %v9433_v56, %v9192_v39  ;;  %v4783_v47 = vshrl.u32 %v9434_v6, %v9192_v39  ;;  %v4786_v31 = vshrl.u32 %v9435_v49, %v9192_v39 }
 0x50e   : > { %v4750_v36 = vmul.f32 %v4749_v60, %v4734_v20  ;;  %v4758_v48 = vxor.u32 2147483648, %v4742_v7  ;;  %v4782_v20 = vshll.u32 %v9433_v56, %v4776_v5  ;;  %v5441_v3 = vpop.eup %5440  ;;  %v4789_v56 = vshrl.u32 %v9436_v15, %v9192_v39 }
 0x50f   : > { %v4402_v1 = vsub.s32 %v4398_v23, %v4401_v2  ;;  %v9206_v52 = vor.u32 %v4780_v32, %v4779_v9  ;;  %v9216_v44 = vor.u32 %v4786_v31, %v4785_v59  ;;  %v4792_v27 = vshrl.u32 %v9437_v58, %v9192_v39 }
 0x510   : > { %v4755_v54 = vxor.u32 2147483648, %v4750_v36  ;;  %v4759_v16 = vsel %vm4757_vm10, %v4758_v48, %v4750_v36  ;;  %v9209_v42 = vor.u32 %v4783_v47, %v4782_v20  ;;  %v4790_v50 = vor.u32 %v4789_v56, %v4788_v26 }
 0x511   : > { %vm4403_vm11 = vcmp.lt.s32.totalorder %v4402_v1, 0  ;;  %v4404_v24 = vsub.s32 0, %v4402_v1  ;;  %vm4794_vm12 = vcmp.lt.s32.totalorder %v9199_v10, 1  ;;  %vm4797_vm13 = vcmp.lt.s32.totalorder %v9199_v10, 4 }
 0x512   : > { %v4756_v17 = vsel %vm4754_vm9, %v4742_v7, %v4755_v54  ;;  %v4802_v22 = vsel %vm4794_vm12, %v9206_v52, %v9209_v42  ;;  %v9228_v53 = vshll.u32 %v4770_v57, 8  ;;  %v4793_v35 = vor.u32 %v4792_v27, %v4791_v61 }
 0x513   : > { %v4760_v18 = vsel %vm4753_vm8, %v4756_v17, %v4759_v16  ;;  %v4405_v25 = vsel %vm4403_vm11, %v4404_v24, %v4402_v1  ;;  %vm4796_vm14 = vcmp.lt.s32.totalorder %v9199_v10, 3  ;;  %v4803_v15 = vsel %vm4797_vm13, %v4790_v50, 920167782 }
 0x514   : > { %v4761_v6 = vsel %vm4751_vm7, nan, %v4760_v18  ;;  %v4406_v55 = vclz %v4405_v25  ;;  %vm4795_vm0 = vcmp.lt.s32.totalorder %v9199_v10, 2  ;;  %v4804_v58 = vsel %vm4796_vm14, %v9216_v44, %v4803_v15 }
 0x515   : > { %v5071_v19 = vmul.f32 %v5441_v3, %v4761_v6  ;;  %v4806_v41 = vsel %vm4794_vm12, %v9209_v42, %v9216_v44  ;;  %v4394_v0 = vadd.s32 %v9170_v46, %v9172_v33  ;;  %v4805_v34 = vsel %vm4795_vm0, %v4802_v22, %v4804_v58 }
 0x516   : > { %v5256_v49 = vadd.s32 4294967294, %v4406_v55  ;;  %v4807_v23 = vsel %vm4797_vm13, %v4793_v35, 1326507024  ;;  %v4811_v4 = vand.u32 65535, %v9228_v53  ;;  %v4835_v14 = vand.u32 65535, %v4805_v34 }
 0x517   : > { %5097 = vst [vmem:[%s6423_s27 + $0xc0] sm:$0xff] %v5071_v19  ;;  %v4808_v51 = vsel %vm4796_vm14, %v4790_v50, %v4807_v23  ;;  %v4836_v46 = vshrl.u32 %v4805_v34, 16  ;;  %v4812_v36 = vshrl.u32 %v9228_v53, 16  ;;  %vm4302_vm1 = vcmp.lt.s32.totalorder %v9039_v21, 0 }
 0x518   : > { %vm5257_vm15 = vcmp.lt.s32.totalorder %v5256_v49, 0  ;;  %v4809_v38 = vsel %vm4795_vm0, %v4806_v41, %v4808_v51  ;;  %v4837_v59 = vmul.u32 %v4835_v14, %v4811_v4  ;;  %v4778_v27 = vshrl.u32 %v9431_v37, %v9192_v39 }
 0x519   : > { %v4409_v28 = vsel %vm5257_vm15, 0, %v5256_v49  ;;  %v4813_v7 = vand.u32 65535, %v4809_v38  ;;  %v4814_v60 = vshrl.u32 %v4809_v38, 16  ;;  %v4838_v48 = vmul.u32 %v4836_v46, %v4811_v4 }
 0x51a   : > { %v4410_v29 = vsub.s32 32, %v4409_v28  ;;  %v4414_v8 = vsub.s32 4294967266, %v4409_v28  ;;  %v4411_v30 = vshll.u32 %v4402_v1, %v4409_v28  ;;  %v4839_v54 = vmul.u32 %v4835_v14, %v4812_v36 }
 0x51b   : > { %v4816_v32 = vmul.u32 %v4814_v60, %v4811_v4  ;;  %v4817_v47 = vmul.u32 %v4813_v7, %v4812_v36  ;;  %v4841_v1 = vshll.u32 %v4838_v48, 16  ;;  %v4815_v16 = vmul.u32 %v4813_v7, %v4811_v4 }
 0x51c   : > { %v4412_v33 = vshrl.u32 %v4394_v0, %v4410_v29  ;;  %v4415_v5 = vadd.s32 127, %v4414_v8  ;;  %v4818_v17 = vmul.u32 %v4814_v60, %v4812_v36  ;;  %v4840_v3 = vmul.u32 %v4836_v46, %v4812_v36 }
 0x51d   : > { %v4819_v20 = vshll.u32 %v4816_v32, 16  ;;  %v4821_v24 = vshll.u32 %v4817_v47, 16  ;;  %vm4845_vm3 = vc.u32 %v4837_v59, %v4841_v1  ;;  %v4843_v6 = vshll.u32 %v4839_v54, 16 }
 0x51e   : > { %v4413_v2 = vor.u32 %v4412_v33, %v4411_v30  ;;  %v4416_v57 = vshll.u32 %v4415_v5, 23  ;;  %v4846_v25 = vsel %vm4845_vm3, 1, %v9432_v63  ;;  %v4847_v19 = vadd.s32 %v4841_v1, %v4837_v59 }
 0x51f   : > { %vm4823_vm2 = vc.u32 %v4815_v16, %v4819_v20  ;;  %v4825_v26 = vadd.s32 %v4819_v20, %v4815_v16  ;;  %v4848_v61 = vadd.s32 %v4846_v25, %v4840_v3  ;;  %v4799_v49 = vsel %vm4797_vm13, %v9216_v44, 2102212464 }
 0x520   : > { %v4417_v9 = vor.u32 4788187, %v4416_v57  ;;  %v4420_v31 = vcvt.s32.f32 %v4413_v2  ;;  %v4824_v56 = vsel %vm4823_vm2, 1, %v9432_v63  ;;  %vm4849_vm5 = vc.u32 %v4847_v19, %v4843_v6 }
 0x521   : > { %v4826_v50 = vadd.s32 %v4824_v56, %v4818_v17  ;;  %vm4827_vm4 = vc.u32 %v4825_v26, %v4821_v24  ;;  %v4820_v15 = vshrl.u32 %v4816_v32, 16  ;;  %v4850_v41 = vsel %vm4849_vm5, 1, %v9432_v63 }
 0x522   : > { %v4418_v18 = vand.u32 2147483647, %v4417_v9  ;;  %v4828_v22 = vsel %vm4827_vm4, 1, %v9432_v63  ;;  %vm9265_vm6 = vcmp.le.f32.partialorder %v4300_v62, 0.7853982  ;;  %v4798_v37 = vsel %vm4794_vm12, %v4778_v27, %v9206_v52 }
 0x523   : > { %v4830_v58 = vadd.s32 %v4828_v22, %v4826_v50  ;;  %v4842_v39 = vshrl.u32 %v4838_v48, 16  ;;  %v4852_v44 = vadd.s32 %v4850_v41, %v4848_v61  ;;  %v4800_v34 = vsel %vm4796_vm14, %v9209_v42, %v4799_v49 }
 0x524   : > { %v4421_v55 = vmul.f32 %v4420_v31, %v4418_v18  ;;  %v4822_v63 = vshrl.u32 %v4817_v47, 16  ;;  %v4844_v29 = vshrl.u32 %v4839_v54, 16  ;;  %v4851_v52 = vadd.s32 %v4847_v19, %v4843_v6 }
 0x525   : > { %v4831_v23 = vadd.s32 %v4830_v58, %v4820_v15  ;;  %v4853_v8 = vadd.s32 %v4852_v44, %v4842_v39  ;;  %v4801_v30 = vsel %vm4795_vm0, %v4798_v37, %v4800_v34  ;;  %v4424_v42 = vsub.s32 4, %v9189_v11 }
 0x526   : > { %v4422_v35 = vxor.u32 2147483648, %v4421_v55  ;;  %v4855_v60 = vmul.u32 %v9228_v53, %v4801_v30  ;;  %v4991_v36 = vmul.f32 %v9179_v43, %v9028_v13  ;;  %vm4443_vm12 = vweird.f32 %v9039_v21 }
 0x527   : > { %v4832_v4 = vadd.s32 %v4831_v23, %v4822_v63  ;;  %v4854_v38 = vadd.s32 %v4853_v8, %v4844_v29  ;;  %v4425_v10 = vsel %vm4302_vm1, %v4424_v42, %v9189_v11  ;;  %vm4764_vm14 = vcmp.lt.s32.totalorder %v9150_v40, 0 }
 0x528   : > { %v4423_v28 = vsel %vm4302_vm1, %v4422_v35, %v4421_v55  ;;  %v5039_v9 = vmul.f32 1.442695, %v4991_v36  ;;  %v4427_v16 = vsel %vm9265_vm6, 0, %v4425_v10  ;;  %vm9296_vm15 = vcmp.le.f32.partialorder %v4762_v45, 0.7853982 }
 0x529   : > { %v4426_v62 = vsel %vm9265_vm6, %v9039_v21, %v4423_v28  ;;  %vm4857_vm7 = vc.u32 %v4832_v4, %v4851_v52  ;;  %v4858_v33 = vadd.s32 1, %v4854_v38  ;;  %v4444_v24 = vand.u32 3, %v4427_v16 }
 0x52a   : > { %v4428_v51 = vmul.f32 %v4426_v62, %v4426_v62  ;;  %5442 = vpow2.f32 %v5039_v9  ;;  %v4856_v15 = vadd.s32 %v4851_v52, %v4832_v4  ;;  %vm4905_vm3 = vweird.f32 %v9150_v40 }
 0x52b   : > { %v4859_v48 = vsel %vm4857_vm7, %v4858_v33, %v4854_v38  ;;  %vm4446_vm9 = vcmp.eq.s32.totalorder %v4444_v24, 0  ;;  %vm4449_vm10 = vcmp.eq.s32.totalorder %v4444_v24, 2  ;;  %vm4445_vm11 = vcmp.lt.s32.totalorder %v4444_v24, 2 }
 0x52c   : > { %v4429_v14 = vmul.f32 -0.001358992, %v4428_v51  ;;  %v4436_v46 = vmul.f32 -0.00019511016, %v4428_v51  ;;  %v4860_v32 = vadd.s32 %v4859_v48, %v4855_v60 }
 0x52e   : > { %v4430_v5 = vadd.f32 0.041655596, %v4429_v14  ;;  %v4437_v7 = vadd.f32 0.008332121, %v4436_v46  ;;  %v4861_v1 = vadd.s32 536870912, %v4860_v32 }
 0x530   : > { %v4431_v2 = vmul.f32 %v4430_v5, %v4428_v51  ;;  %v4438_v57 = vmul.f32 %v4437_v7, %v4428_v51  ;;  %v4862_v59 = vshrl.u32 %v4861_v1, 30  ;;  %v5443_v61 = vpop.eup %5442  ;;  %v4994_v5 = vmul.f32 %v9179_v43, %v9136_v12 }
 0x532   : > { %v4432_v47 = vadd.f32 -0.4999988, %v4431_v2  ;;  %v4439_v54 = vadd.f32 -0.16666654, %v4438_v57  ;;  %v4863_v17 = vshll.u32 %v4862_v59, 30  ;;  %v4886_v38 = vsub.s32 4, %v4862_v59 }
 0x533   : > { %v5045_v57 = vmul.f32 1.442695, %v4994_v5 }
 0x534   : > { %v4433_v20 = vmul.f32 %v4432_v47, %v4428_v51  ;;  %v4440_v53 = vmul.f32 %v4439_v54, %v4428_v51  ;;  %v4864_v26 = vsub.s32 %v4860_v32, %v4863_v17  ;;  %v4887_v45 = vsel %vm4764_vm14, %v4886_v38, %v4862_v59 }
 0x535   : > { %v4889_v36 = vsel %vm9296_vm15, 0, %v4887_v45  ;;  %5444 = vpow2.f32 %v5045_v57 }
 0x536   : > { %v4434_v31 = vadd.f32 1.0, %v4433_v20  ;;  %v4441_v13 = vadd.f32 1.0, %v4440_v53  ;;  %vm4865_vm8 = vcmp.lt.s32.totalorder %v4864_v26, 0  ;;  %v4866_v11 = vsub.s32 0, %v4864_v26 }
 0x537   : > { %v4906_v47 = vand.u32 3, %v4889_v36 }
 0x538   : > { %v4442_v3 = vmul.f32 %v4441_v13, %v4426_v62  ;;  %v4450_v18 = vxor.u32 2147483648, %v4434_v31  ;;  %v4867_v19 = vsel %vm4865_vm8, %v4866_v11, %v4864_v26 }
 0x539   : > { %v4868_v50 = vclz %v4867_v19  ;;  %vm4908_vm0 = vcmp.eq.s32.totalorder %v4906_v47, 0  ;;  %vm4911_vm1 = vcmp.eq.s32.totalorder %v4906_v47, 2  ;;  %vm4907_vm2 = vcmp.lt.s32.totalorder %v4906_v47, 2 }
 0x53a   : > { %v4447_v56 = vxor.u32 2147483648, %v4442_v3  ;;  %v4451_v25 = vsel %vm4449_vm10, %v4450_v18, %v4442_v3 }
 0x53b   : > { %v5265_v22 = vadd.s32 4294967294, %v4868_v50  ;;  %v5445_v20 = vpop.eup %5444 }
 0x53c   : > { %v4448_v6 = vsel %vm4446_vm9, %v4434_v31, %v4447_v56 }
 0x53d   : > { %v4452_v55 = vsel %vm4445_vm11, %v4448_v6, %v4451_v25  ;;  %vm5266_vm13 = vcmp.lt.s32.totalorder %v5265_v22, 0 }
 0x53e   : > { %v4453_v27 = vsel %vm4443_vm12, nan, %v4452_v55  ;;  %v4871_v35 = vsel %vm5266_vm13, 0, %v5265_v22 }
 0x53f   : > { %v5069_v49 = vmul.f32 %v5443_v61, %v4453_v27  ;;  %v4872_v58 = vsub.s32 32, %v4871_v35  ;;  %v4876_v41 = vsub.s32 4294967266, %v4871_v35  ;;  %v4873_v0 = vshll.u32 %v4864_v26, %v4871_v35 }
 0x541   : > { %5095 = vst [vmem:[%s6423_s27 + $0xb0] sm:$0xff] %v5069_v49  ;;  %v4874_v37 = vshrl.u32 %v4856_v15, %v4872_v58  ;;  %v4877_v39 = vadd.s32 127, %v4876_v41 }
 0x543   : > { %v4875_v44 = vor.u32 %v4874_v37, %v4873_v0  ;;  %v4878_v28 = vshll.u32 %v4877_v39, 23 }
 0x545   : > { %v4879_v34 = vor.u32 4788187, %v4878_v28  ;;  %v4882_v21 = vcvt.s32.f32 %v4875_v44 }
 0x547   : > { %v4880_v63 = vand.u32 2147483647, %v4879_v34 }
 0x549   : > { %v4883_v23 = vmul.f32 %v4882_v21, %v4880_v63 }
 0x54b   : > { %v4884_v62 = vxor.u32 2147483648, %v4883_v23 }
 0x54d   : > { %v4885_v8 = vsel %vm4764_vm14, %v4884_v62, %v4883_v23 }
 0x54e   : > { %v4888_v51 = vsel %vm9296_vm15, %v9150_v40, %v4885_v8 }
 0x54f   : > { %v4890_v4 = vmul.f32 %v4888_v51, %v4888_v51 }
 0x551   : > { %v4891_v52 = vmul.f32 -0.001358992, %v4890_v4  ;;  %v4898_v30 = vmul.f32 -0.00019511016, %v4890_v4 }
 0x553   : > { %v4892_v14 = vadd.f32 0.041655596, %v4891_v52  ;;  %v4899_v46 = vadd.f32 0.008332121, %v4898_v30 }
 0x555   : > { %v4893_v42 = vmul.f32 %v4892_v14, %v4890_v4  ;;  %v4900_v33 = vmul.f32 %v4899_v46, %v4890_v4 }
 0x557   : > { %v4894_v7 = vadd.f32 -0.4999988, %v4893_v42  ;;  %v4901_v60 = vadd.f32 -0.16666654, %v4900_v33 }
 0x559   : > { %v4895_v48 = vmul.f32 %v4894_v7, %v4890_v4  ;;  %v4902_v2 = vmul.f32 %v4901_v60, %v4890_v4 }
 0x55b   : > { %v4896_v32 = vadd.f32 1.0, %v4895_v48  ;;  %v4903_v10 = vadd.f32 1.0, %v4902_v2 }
 0x55d   : > { %v4904_v54 = vmul.f32 %v4903_v10, %v4888_v51  ;;  %v4912_v1 = vxor.u32 2147483648, %v4896_v32 }
 0x55f   : > { %v4909_v9 = vxor.u32 2147483648, %v4904_v54  ;;  %v4913_v43 = vsel %vm4911_vm1, %v4912_v1, %v4904_v54 }
 0x561   : > { %v4910_v12 = vsel %vm4908_vm0, %v4896_v32, %v4909_v9 }
 0x562   : > { %v4914_v16 = vsel %vm4907_vm2, %v4910_v12, %v4913_v43  ;;  %5106 = sbr.rel (!%p5615_p5) target bundleno = 1414 (0x586), region = 32 }
 0x563   : > { %v4915_v53 = vsel %vm4905_vm3, nan, %v4914_v16 }
 0x564   : > { %v5072_v59 = vmul.f32 %v5445_v20, %v4915_v53 }
 0x566   : > { %5098 = vst [vmem:[%s6423_s27 + $0xc8] sm:$0xff] %v5072_v59 }
 0x567   : > { %s9534_s22 = smov (!%p5109_p11, %s5108_s22), 26 }
 0x568   : > { %s5267_s23 = sshll.u32 %s9534_s22, 3 }
 0x569   : > { %s5112_s24 = ssub.s32 208, %s5267_s23 }
 0x56a   : > { %s5113_s25 = sshll.u32 %s5112_s24, 4 }
 0x56b   : > { %5114 = vsyncadd %s9311_s17, %s5113_s25  ;;  %p9320_p12 = scmp.ne.s32.totalorder %s5267_s23, 0  ;;  %s5274_s19 = smul.u32 208, %s5598_s13 }
 0x56c   : > { %s5119_s26 = sshll.u32 %s6423_s27, 4  ;;  %s5271_s21 = sshll.u32 %s9534_s22, 7  ;;  %s9330_s26 = int_to_ptr.vmem [resolvable:$true] %s5119_s26 }
 0x56d   : > { %s5117_s30 = scalar_lea.hbm %s9374_s2, %s5274_s19  ;;  %s5475_s4 = sshra.s32 %s9330_s26, 4  ;;  %s5476_s4 = int_to_ptr.vmem [resolvable:$true] %s5475_s4 }
 0x56e   : > { %s5121_s3 = sshll.u32 %s5117_s30, 4  ;;  %s5477_s5 = sshrl.u32 %s5271_s21, 4  ;;  %s9332_s3 = int_to_ptr.hbm [resolvable:$true] %s5121_s3 }
 0x56f   : > { %s5482_s6 = scalar_lea.vmem %s5476_s4, %s5477_s5  ;;  %s5559_s13 = smov [#allocation2]  }
 0x570   : > { %p5483_p13 = scmp.ne.s32.totalorder %s5476_s4, %s5482_s6  ;;  %s5486_s27 = scalar_lea.vmem %s5559_s13, 416 }
 0x571   : > { %p5488_p2 = scmp.lt.s32.totalorder %s5486_s27, %s5482_s6 }
 0x572   : > { %p5484_p0 = pnand %p5483_p13, %p9320_p12 }
 0x574   : > { %p5485_p1 = pneg %p5484_p0 }
 0x576   : > { %p5490_p3 = pnand %p5488_p2, %p5485_p1 }
 0x578   : > { %5493 = shalt.err (!%p5490_p3)
}
 0x579   : > { %s5494_s8 = sshra.s32 %s9332_s3, 4  ;;  %s5505_s24 = scalar_lea.hbm %s9374_s2, 408  ;;  %s5495_s8 = int_to_ptr.hbm [resolvable:$true] %s5494_s8 }
 0x57a   : > { %s5501_s14 = scalar_lea.hbm %s5495_s8, %s5477_s5  ;;  %p5506_p8 = scmp.lt.s32.totalorder %s5495_s8, %s9374_s2 }
 0x57b   : > { %p5502_p4 = scmp.ne.s32.totalorder %s5495_s8, %s5501_s14  ;;  %p5507_p9 = scmp.lt.s32.totalorder %s5505_s24, %s5501_s14 }
 0x57d   : > { %p5503_p5 = pnand %p5502_p4, %p9320_p12  ;;  %p5508_p10 = por %p5507_p9, %p5506_p8 }
 0x57f   : > { %p5504_p7 = pneg %p5503_p5 }
 0x581   : > { %p5509_p11 = pnand %p5508_p10, %p5504_p7 }
 0x583   : > { %5512 = shalt.err (!%p5509_p11)
}
 0x584   : > { %s5560_s28 = smov 128   ;;  %s5561_s29 = smov 8  }
 0x585   : > { %5127 = dma.vmem_to_hbm [thread:$0]  (%p9320_p12), %s9330_s26, %s5271_s21, %s9332_s3, %s9311_s17, %s5560_s28, %s5560_s28, %s5561_s29  }
 0x586 PF: > { %p5281_p13 = scmp.ge.s32.totalorder %s5548_s12, 2  ;;  %s5136_s30 = sand.u32 1, %s5536_s9  }
 0x587   : > { %s5137_s4 = scalar_lea.sflag [#allocation3], %s5136_s30 }
 0x588   : > { %p5278_p0 = pnand %p5281_p13, %p5619_p6 }
 0x58a   : > { %p5279_p1 = pneg %p5278_p0 }
 0x58c   : > { %5531 = dma.done.wait (%p5279_p1), %s5137_s4, 3328  }
 0x58d   : > { %5533 = vsyncadd (%p5279_p1), %s5137_s4, 4294963968  ;;  %p12_p2 = scmp.ge.s32.totalorder %s5602_s15, 4   ;;  %s9529_s9 = smov %s5540_s10 }
 0x58e   : > { %s9530_s10 = smov %s5544_s11  ;;  %s9531_s11 = smov %s5613_s18 }
 0x58f   : > { %s9532_s12 = smov %s5602_s15  ;;  %14 = sbr.rel (!%p12_p2) target bundleno = 3 (0x3), region = 63 }
 0x594   :  { %5143 = vsyncpa [#allocation3], 1 }
 0x595   :  { %5145 = vsyncpa [#allocation3 + $0x1], 1 }

</bundles_post_ra>
